<compile_context>
chip_gen: v7x
topology: tpu7x:2x2x1
jax: 0.10.0
libtpu: 0.0.40
codegen_flags: <defaults>
</compile_context>

<pallas_src>
import functools

import jax
import jax.numpy as jnp
from jax.experimental import pallas as pl
from jax.experimental.pallas import tpu as pltpu


VMEM_LIMIT = 48 * 1024 * 1024          # fits v5e/v6e (128 MiB) and v7x (64 MiB physical) VMEM

GROWTH = 32
BLOCK_CONFIG = (6, 12, 32, 32)
NUM_INIT_FEATURES = 64
BN_SIZE = 4
CONV1_OUT = BN_SIZE * GROWTH           # 128
CONV2_COLS = 9 * GROWTH                # 288 (all 9 taps along output lanes)
CONV0_PAD = 128                        # conv0 channels padded 64 -> 128 for lane-dense stores


# ----------------------------------------------------------------------------
# Pallas kernels
# ----------------------------------------------------------------------------

def _dense_block_kernel(x_ref, s1_ref, b1_ref, w1_ref, s2_ref, b2_ref, w2_ref,
                        o_ref, *, width, hw_img, c0):
    """One whole DenseNet block, fused.  Grid = (image_groups, num_layers).

    x_ref / o_ref : (1, R, C_total) bf16 channel buffer, R = images_per_step * hw_img.
    The output block index only depends on the image-group axis, so the buffer stays
    VMEM-resident across every layer of the block; per-layer weights are streamed along
    the layer grid axis:
      s1/b1 : (1, 1, C_total) f32  (zero beyond c_in -> padded channels stay exactly 0)
      w1    : (1, C_total, 128) bf16 (zero rows beyond c_in)
      s2/b2 : (1, 1, 128) f32
      w2    : (1, 128, 288) bf16 lane-dense; columns [32*t, 32*t+32) = 3x3 tap t
    Layer l adds 32 new channels at lanes [c0 + 32*l, c0 + 32*l + 32).
    """
    l = pl.program_id(1)

    @pl.when(l == 0)
    def _init():
        o_ref[...] = x_ref[...]

    feat = o_ref[0]                                     # (R, C_total) bf16
    r, c_total = feat.shape

    # norm1 + relu1 (padded channels have scale = shift = 0 -> stay exactly 0)
    a = jnp.maximum(feat.astype(jnp.float32) * s1_ref[0] + b1_ref[0],
                    0.0).astype(jnp.bfloat16)
    # conv1 (1x1) on the MXU: bf16 operands, f32 accumulation
    y = jnp.dot(a, w1_ref[0], preferred_element_type=jnp.float32)      # (R, 128) f32
    # norm2 + relu2
    z = jnp.maximum(y * s2_ref[0] + b2_ref[0], 0.0).astype(jnp.bfloat16)

    # conv2 (3x3, pad 1): ONE lane-dense (R,128)x(128,288) matmul for all 9 taps, then
    # 9 roll-shifted, masked 32-lane accumulations (rolls run on the XLU slot).
    t = jnp.dot(z, w2_ref[0], preferred_element_type=jnp.float32)      # (R, 288) f32

    row = jax.lax.broadcasted_iota(jnp.int32, (r, 1), 0)
    col = row % width                                   # x position within an image row
    pos = row % hw_img                                  # pixel index within its image
    not_left = col != 0
    not_right = col != (width - 1)
    not_top = pos >= width
    not_bot = pos < (hw_img - width)

    acc = jnp.zeros((r, GROWTH), jnp.float32)
    tap = 0
    for dy in (-1, 0, 1):
        for dx in (-1, 0, 1):
            s = dy * width + dx
            tcol = t[:, tap * GROWTH:(tap + 1) * GROWTH]      # (R, 32)
            if s != 0:
                tcol = pltpu.roll(tcol, (-s) % r, axis=0)     # tcol'[i] = t_tap[i + s]
            valid = None
            if dy == -1:
                valid = not_top
            elif dy == 1:
                valid = not_bot
            if dx == -1:
                valid = not_left if valid is None else jnp.logical_and(valid, not_left)
            elif dx == 1:
                valid = not_right if valid is None else jnp.logical_and(valid, not_right)
            if valid is not None:                       # kills image-edge and cross-image wraps
                tcol = jnp.where(valid, tcol, 0.0)
            acc = acc + tcol
            tap += 1

    # Scatter the 32 new channels into lanes [c_in, c_in+32) via a one-hot placement matmul
    # (no dynamic lane slicing).  All other lanes of `placed` are zero and lanes >= c_in of
    # the buffer are zero, so the bf16 add is exact and reproduces torch.cat([x, new], 1).
    c_in = c0 + GROWTH * l
    rr = jax.lax.broadcasted_iota(jnp.int32, (GROWTH, c_total), 0)
    cc = jax.lax.broadcasted_iota(jnp.int32, (GROWTH, c_total), 1)
    place = (cc == rr + c_in).astype(jnp.bfloat16)              # (32, C_total) one-hot
    placed = jnp.dot(acc.astype(jnp.bfloat16), place,
                     preferred_element_type=jnp.bfloat16)       # (R, C_total) bf16
    o_ref[0] = o_ref[0] + placed


def _matmul_bn_relu_kernel(a_ref, w_ref, s_ref, b_ref, o_ref):
    # conv0: im2col-tile matmul with fused BatchNorm(eval) + ReLU epilogue (128-lane output)
    y = jnp.dot(a_ref[...], w_ref[...], preferred_element_type=jnp.float32)
    o_ref[...] = jnp.maximum(y * s_ref[...] + b_ref[...], 0.0).astype(o_ref.dtype)


def _bn_relu_matmul_kernel(x_ref, s_ref, b_ref, w_ref, o_ref):
    # transition: BatchNorm(eval) + ReLU + 1x1 conv (full weight resident in VMEM)
    a = jnp.maximum(x_ref[0].astype(jnp.float32) * s_ref[...] + b_ref[...], 0.0)
    o_ref[0] = jnp.dot(a.astype(jnp.bfloat16), w_ref[...],
                       preferred_element_type=jnp.float32).astype(o_ref.dtype)


def _bn_relu_kernel(x_ref, s_ref, b_ref, o_ref):
    o_ref[...] = jnp.maximum(
        x_ref[...].astype(jnp.float32) * s_ref[...] + b_ref[...], 0.0)


def _linear_bias_kernel(x_ref, w_ref, b_ref, o_ref):
    # res_final: bf16 weights, f32 accumulation + bias epilogue
    o_ref[...] = (jnp.dot(x_ref[...].astype(jnp.bfloat16), w_ref[...],
                          preferred_element_type=jnp.float32)
                  + b_ref[...]).astype(o_ref.dtype)


def _mlp_head_kernel(x_ref, w1_ref, b1_ref, w2_ref, b2_ref, o_ref):
    # bert_l1 -> relu -> bert_l2 fused (bf16 weights, f32 bias/epilogue)
    h = jnp.dot(x_ref[...].astype(jnp.bfloat16), w1_ref[...],
                preferred_element_type=jnp.float32) + b1_ref[...]
    h = jnp.maximum(h, 0.0).astype(jnp.bfloat16)
    o_ref[...] = (jnp.dot(h, w2_ref[...], preferred_element_type=jnp.float32)
                  + b2_ref[...]).astype(o_ref.dtype)


def _masked_mean_kernel(emb_ref, mask_ref, o_ref):
    emb = emb_ref[...]                                   # (S, H)
    m = mask_ref[...]                                    # (S, 1)
    s = jnp.sum(emb * m, axis=0, keepdims=True)          # (1, H)
    denom = jnp.maximum(jnp.sum(m, axis=0, keepdims=True), 1e-9)
    o_ref[...] = s / denom


# ----------------------------------------------------------------------------
# Pallas wrappers
# ----------------------------------------------------------------------------

@functools.partial(jax.jit,
                   static_argnames=("width", "hw_img", "images_per_step", "c0"))
def dense_block_call(feat, s1, b1, w1, s2, b2, w2, *, width, hw_img,
                     images_per_step, c0):
    n, hw, c_total = feat.shape
    g = n // images_per_step
    r = images_per_step * hw
    num_layers = w1.shape[0]
    kernel = functools.partial(_dense_block_kernel, width=width,
                               hw_img=hw_img, c0=c0)
    out = pl.pallas_call(
        kernel,
        out_shape=jax.ShapeDtypeStruct((g, r, c_total), jnp.bfloat16),
        grid=(g, num_layers),
        in_specs=[
            pl.BlockSpec((1, r, c_total), lambda i, l: (i, 0, 0)),        # feature buffer
            pl.BlockSpec((1, 1, c_total), lambda i, l: (l, 0, 0)),        # s1 (per layer)
            pl.BlockSpec((1, 1, c_total), lambda i, l: (l, 0, 0)),        # b1
            pl.BlockSpec((1, c_total, CONV1_OUT), lambda i, l: (l, 0, 0)),  # w1
            pl.BlockSpec((1, 1, CONV1_OUT), lambda i, l: (l, 0, 0)),      # s2
            pl.BlockSpec((1, 1, CONV1_OUT), lambda i, l: (l, 0, 0)),      # b2
            pl.BlockSpec((1, CONV1_OUT, CONV2_COLS), lambda i, l: (l, 0, 0)),  # w2
        ],
        out_specs=pl.BlockSpec((1, r, c_total), lambda i, l: (i, 0, 0)),
        compiler_params=pltpu.CompilerParams(
            dimension_semantics=("parallel", "arbitrary"),
            vmem_limit_bytes=VMEM_LIMIT),
    )(feat.reshape(g, r, c_total), s1, b1, w1, s2, b2, w2)
    return out.reshape(n, hw, c_total)


@functools.partial(jax.jit, static_argnames=("tm",))
def conv0_bn_relu(a, w, s, b, tm=4096):
    m, k = a.shape
    n_out = w.shape[1]
    if m % tm != 0:
        tm = m
    return pl.pallas_call(
        _matmul_bn_relu_kernel,
        out_shape=jax.ShapeDtypeStruct((m, n_out), jnp.bfloat16),
        grid=(m // tm,),
        in_specs=[pl.BlockSpec((tm, k), lambda i: (i, 0)),
                  pl.BlockSpec((k, n_out), lambda i: (0, 0)),
                  pl.BlockSpec((1, n_out), lambda i: (0, 0)),
                  pl.BlockSpec((1, n_out), lambda i: (0, 0))],
        out_specs=pl.BlockSpec((tm, n_out), lambda i: (i, 0)),
        compiler_params=pltpu.CompilerParams(
            dimension_semantics=("parallel",),
            vmem_limit_bytes=VMEM_LIMIT),
    )(a, w, s, b)


@jax.jit
def transition_conv(feat, s, b, w):
    n, hw, c = feat.shape
    co = w.shape[1]
    return pl.pallas_call(
        _bn_relu_matmul_kernel,
        out_shape=jax.ShapeDtypeStruct((n, hw, co), jnp.bfloat16),
        grid=(n,),
        in_specs=[pl.BlockSpec((1, hw, c), lambda i: (i, 0, 0)),
                  pl.BlockSpec((1, c), lambda i: (0, 0)),
                  pl.BlockSpec((1, c), lambda i: (0, 0)),
                  pl.BlockSpec((c, co), lambda i: (0, 0))],
        out_specs=pl.BlockSpec((1, hw, co), lambda i: (i, 0, 0)),
        compiler_params=pltpu.CompilerParams(
            dimension_semantics=("parallel",),
            vmem_limit_bytes=VMEM_LIMIT),
    )(feat, s, b, w)


@jax.jit
def bn_relu(x2d, s, b):
    m, c = x2d.shape
    return pl.pallas_call(
        _bn_relu_kernel,
        out_shape=jax.ShapeDtypeStruct((m, c), jnp.float32),
        grid=(1,),
        in_specs=[pl.BlockSpec((m, c), lambda i: (0, 0)),
                  pl.BlockSpec((1, c), lambda i: (0, 0)),
                  pl.BlockSpec((1, c), lambda i: (0, 0))],
        out_specs=pl.BlockSpec((m, c), lambda i: (0, 0)),
        compiler_params=pltpu.CompilerParams(vmem_limit_bytes=VMEM_LIMIT),
    )(x2d, s, b)


@jax.jit
def linear_bias(x, w, b):
    m, k = x.shape
    n_out = w.shape[1]
    return pl.pallas_call(
        _linear_bias_kernel,
        out_shape=jax.ShapeDtypeStruct((m, n_out), jnp.float32),
        grid=(1,),
        in_specs=[pl.BlockSpec((m, k), lambda i: (0, 0)),
                  pl.BlockSpec((k, n_out), lambda i: (0, 0)),
                  pl.BlockSpec((1, n_out), lambda i: (0, 0))],
        out_specs=pl.BlockSpec((m, n_out), lambda i: (0, 0)),
        compiler_params=pltpu.CompilerParams(vmem_limit_bytes=VMEM_LIMIT),
    )(x, w, b.reshape(1, n_out))


@jax.jit
def mlp_head(x, w1, b1, w2, b2):
    m, k = x.shape
    h = w1.shape[1]
    n_out = w2.shape[1]
    return pl.pallas_call(
        _mlp_head_kernel,
        out_shape=jax.ShapeDtypeStruct((m, n_out), jnp.float32),
        grid=(1,),
        in_specs=[pl.BlockSpec((m, k), lambda i: (0, 0)),
                  pl.BlockSpec((k, h), lambda i: (0, 0)),
                  pl.BlockSpec((1, h), lambda i: (0, 0)),
                  pl.BlockSpec((h, n_out), lambda i: (0, 0)),
                  pl.BlockSpec((1, n_out), lambda i: (0, 0))],
        out_specs=pl.BlockSpec((m, n_out), lambda i: (0, 0)),
        compiler_params=pltpu.CompilerParams(vmem_limit_bytes=VMEM_LIMIT),
    )(x, w1, b1.reshape(1, h), w2, b2.reshape(1, n_out))


@jax.jit
def masked_mean(token_embeddings, attention_mask):
    b, s, h = token_embeddings.shape
    mask3 = attention_mask.astype(jnp.float32).reshape(b, s, 1)
    return pl.pallas_call(
        _masked_mean_kernel,
        out_shape=jax.ShapeDtypeStruct((b, h), jnp.float32),
        grid=(b,),
        in_specs=[pl.BlockSpec((None, s, h), lambda i: (i, 0, 0)),
                  pl.BlockSpec((None, s, 1), lambda i: (i, 0, 0))],
        out_specs=pl.BlockSpec((1, h), lambda i: (i, 0)),
        compiler_params=pltpu.CompilerParams(
            dimension_semantics=("parallel",)),
    )(token_embeddings.astype(jnp.float32), mask3)


# ----------------------------------------------------------------------------
# Glue: im2col (conv0 only), parameter construction
# ----------------------------------------------------------------------------

def im2col(x, k, stride, pad):
    """x: (N,H,W,C) -> (N,Ho,Wo,k*k*C), column order (dy, dx, C)."""
    n, h, w, c = x.shape
    xp = jnp.pad(x, ((0, 0), (pad, pad), (pad, pad), (0, 0)))
    ho = (h + 2 * pad - k) // stride + 1
    wo = (w + 2 * pad - k) // stride + 1
    cols = []
    for dy in range(k):
        for dx in range(k):
            cols.append(xp[:, dy:dy + stride * ho:stride, dx:dx + stride * wo:stride, :])
    return jnp.concatenate(cols, axis=-1)


def conv_w(key, cin, cout, k):
    # kaiming_normal_ (fan_in, gain=sqrt(2)), stored as (k*k*cin, cout) to match im2col order.
    fan_in = cin * k * k
    std = (2.0 / fan_in) ** 0.5
    w = std * jax.random.normal(key, (k, k, cin, cout), dtype=jnp.float32)
    return w.reshape(k * k * cin, cout)


def bn_sc(c, eps=1e-5):
    # BatchNorm2d eval: scale = w/sqrt(var+eps), shift = b - mean*scale (init: w=1,b=0,mean=0,var=1)
    weight = jnp.ones((c,), jnp.float32)
    bias = jnp.zeros((c,), jnp.float32)
    rmean = jnp.zeros((c,), jnp.float32)
    rvar = jnp.ones((c,), jnp.float32)
    scale = weight / jnp.sqrt(rvar + eps)
    shift = bias - rmean * scale
    return scale, shift


def lin(key, fin, fout):
    bound = 1.0 / (fin ** 0.5)
    w = jax.random.uniform(key, (fin, fout), jnp.float32, -bound, bound)
    b = jnp.zeros((fout,), jnp.float32)  # m.bias.data.zero_()
    return w, b


def _pad_rows(w, total):
    return w if w.shape[0] == total else jnp.pad(w, ((0, total - w.shape[0]), (0, 0)))


def _pad_vec(v, total):
    return v if v.shape[0] == total else jnp.pad(v, (0, total - v.shape[0]))


def build_params(key, out_dim):
    cnt = [0]

    def nk():
        cnt[0] += 1
        return jax.random.fold_in(key, cnt[0])

    params = {}
    # conv0 output channels padded 64 -> 128 (zero scale/shift + zero weight columns, so the
    # extra channels are exactly zero and flow straight into block1's zero-padded buffer).
    w0 = conv_w(nk(), 3, NUM_INIT_FEATURES, 7)
    params["conv0_w"] = jnp.pad(
        w0, ((0, 0), (0, CONV0_PAD - NUM_INIT_FEATURES))).astype(jnp.bfloat16)
    s0, b0 = bn_sc(NUM_INIT_FEATURES)
    params["norm0"] = (_pad_vec(s0, CONV0_PAD).reshape(1, CONV0_PAD),
                       _pad_vec(b0, CONV0_PAD).reshape(1, CONV0_PAD))

    blocks = []
    nf = NUM_INIT_FEATURES
    for i, nl in enumerate(BLOCK_CONFIG):
        c_total = nf + nl * GROWTH
        s1l, b1l, w1l, s2l, b2l, w2l = [], [], [], [], [], []
        for l in range(nl):
            cin = nf + l * GROWTH
            s1, b1 = bn_sc(cin)
            w1 = conv_w(nk(), cin, CONV1_OUT, 1)
            s2, b2 = bn_sc(CONV1_OUT)
            w2 = conv_w(nk(), CONV1_OUT, GROWTH, 3)                 # (9*128, 32)
            s1l.append(_pad_vec(s1, c_total))
            b1l.append(_pad_vec(b1, c_total))
            w1l.append(_pad_rows(w1, c_total))
            s2l.append(s2)
            b2l.append(b2)
            # lane-dense conv2 weight: (128, 9*32) with columns [32*t, 32*t+32) = tap t
            w2l.append(w2.reshape(9, CONV1_OUT, GROWTH)
                         .transpose(1, 0, 2).reshape(CONV1_OUT, CONV2_COLS))
        block = dict(
            c0=nf, c_total=c_total,
            s1=jnp.stack(s1l).reshape(nl, 1, c_total),
            b1=jnp.stack(b1l).reshape(nl, 1, c_total),
            w1=jnp.stack(w1l).astype(jnp.bfloat16),
            s2=jnp.stack(s2l).reshape(nl, 1, CONV1_OUT),
            b2=jnp.stack(b2l).reshape(nl, 1, CONV1_OUT),
            w2=jnp.stack(w2l).astype(jnp.bfloat16),
        )
        nf = c_total
        trans = None
        if i != len(BLOCK_CONFIG) - 1:
            st, bt = bn_sc(nf)
            trans = dict(s=st.reshape(1, -1), b=bt.reshape(1, -1),
                         w=conv_w(nk(), nf, nf // 2, 1).astype(jnp.bfloat16))
            nf = nf // 2
        block["trans"] = trans
        blocks.append(block)
    params["blocks"] = blocks

    s5, b5 = bn_sc(nf)                                 # nf == 1664
    params["norm5"] = (s5.reshape(1, -1), b5.reshape(1, -1))

    # res_final: Linear(6656, out_dim). Rows are permuted from the PyTorch NCHW flatten
    # order (c, h, w) to the NHWC flatten order (h, w, c) used by this implementation.
    w_rf, b_rf = lin(nk(), 6656, out_dim)
    w_rf = w_rf.reshape(1664, 2, 2, out_dim).transpose(1, 2, 0, 3).reshape(6656, out_dim)
    params["res_final"] = (w_rf.astype(jnp.bfloat16), b_rf)

    w1, b1 = lin(nk(), 768, 768)
    params["bert_l1"] = (w1.astype(jnp.bfloat16), b1)
    w2, b2 = lin(nk(), 768, out_dim)
    params["bert_l2"] = (w2.astype(jnp.bfloat16), b2)
    return params


# ----------------------------------------------------------------------------
# Forward pass
# ----------------------------------------------------------------------------

def image_encoder(params, xis_nchw):
    n = xis_nchw.shape[0]
    x = jnp.transpose(xis_nchw, (0, 2, 3, 1)).astype(jnp.bfloat16)    # NCHW -> NHWC, bf16

    # conv0 (7x7 / s2 / p3, bias=False) + norm0 + relu0 (fused epilogue, 128-lane output)
    cols = im2col(x, 7, 2, 3)                                         # (N,128,128,147)
    ho, wo = cols.shape[1], cols.shape[2]
    s0, b0 = params["norm0"]
    y = conv0_bn_relu(cols.reshape(n * ho * wo, -1), params["conv0_w"], s0, b0)
    y = y.reshape(n, ho, wo, CONV0_PAD)                               # channels 64..127 == 0

    # pool0: MaxPool2d(3, stride=2, padding=1) -- post-ReLU values are >= 0 so init 0 is exact
    y = jax.lax.reduce_window(y, jnp.array(0, dtype=y.dtype), jax.lax.max,
                              (1, 3, 3, 1), (1, 2, 2, 1),
                              [(0, 0), (1, 1), (1, 1), (0, 0)])
    h, w = y.shape[1], y.shape[2]
    feat = y.reshape(n, h * w, CONV0_PAD)

    for bi, blk in enumerate(params["blocks"]):
        c_total = blk["c_total"]
        # preallocate the block's full channel buffer (zero padded); the fused block kernel
        # keeps it VMEM-resident across all layers and writes each layer's 32 new channels
        # into their slot -> one HBM read + one HBM write of the features per block.
        feat = jnp.pad(feat, ((0, 0), (0, 0), (0, c_total - feat.shape[-1])))
        # blocks 3 & 4 (small HW) batch all images per grid step so their large stacked
        # weights are streamed from HBM exactly once; blocks 1 & 2 keep a per-image
        # 'parallel' grid axis (megacore-friendly, bounded VMEM at HW=4096).
        ips = 1 if bi < 2 else n
        feat = dense_block_call(feat, blk["s1"], blk["b1"], blk["w1"],
                                blk["s2"], blk["b2"], blk["w2"],
                                width=w, hw_img=h * w,
                                images_per_step=ips, c0=blk["c0"])
        if blk["trans"] is not None:
            tr = blk["trans"]
            feat = transition_conv(feat, tr["s"], tr["b"], tr["w"])
            co = feat.shape[-1]
            # AvgPool2d(kernel_size=2, stride=2) (tiny XLA glue, f32 accumulation)
            feat = feat.reshape(n, h // 2, 2, w // 2, 2, co).astype(jnp.float32)
            feat = feat.mean(axis=(2, 4)).astype(jnp.bfloat16)
            h, w = h // 2, w // 2
            feat = feat.reshape(n, h * w, co)

    # norm5 then F.relu(features)
    s5, b5 = params["norm5"]
    c = feat.shape[-1]
    out = bn_relu(feat.reshape(n * h * w, c), s5, b5)                 # (N*HW, 1664) f32
    out = out.reshape(n, h, w, c)

    # F.avg_pool2d(out, kernel_size=7, stride=1)
    out = jax.lax.reduce_window(out, 0.0, jax.lax.add,
                                (1, 7, 7, 1), (1, 1, 1, 1), "VALID") / 49.0
    out = out.reshape(n, -1)                                          # (N, 6656), NHWC flatten

    w_rf, b_rf = params["res_final"]
    return linear_bias(out, w_rf, b_rf)                               # zis, float32


def text_encoder(params, token_embeddings, attention_mask):
    # TODO(synk): `token_embeddings` substitutes bert_model(**encoded_inputs)[0] (last_hidden_state).
    pooled = masked_mean(token_embeddings, attention_mask)
    pooled = pooled.astype(jnp.float16).astype(jnp.float32)           # .half() rounding

    w1, b1 = params["bert_l1"]
    w2, b2 = params["bert_l2"]
    out = mlp_head(pooled, w1, b1, w2, b2)                            # bert_l1 -> relu -> bert_l2
    return out.astype(jnp.float16)                                    # zls, float16


def model_clr_forward(params, xis, token_embeddings, attention_mask):
    zis = image_encoder(params, xis)
    zls = text_encoder(params, token_embeddings, attention_mask)
    return zis, zls


# ----------------------------------------------------------------------------
# Main
# ----------------------------------------------------------------------------

if __name__ == "__main__":
    key = jax.random.PRNGKey(0)
    out_dim = 128
    params = build_params(key, out_dim)

    B, S = 2, 8
    kx = jax.random.fold_in(key, 10_001)
    kt = jax.random.fold_in(key, 10_002)
    # xis spatial 256 is implied by res_final.in_features == 6656 (== 1664 * 2 * 2).
    xis = jax.random.normal(kx, (B, 3, 256, 256), jnp.float32)        # NCHW like PyTorch
    token_embeddings = jax.random.normal(kt, (B, S, 768), jnp.float32)
    attention_mask = (jnp.arange(S)[None, :] < jnp.array([[S], [5]])).astype(jnp.int32)

    zis, zls = model_clr_forward(params, xis, token_embeddings, attention_mask)
    jax.block_until_ready((zis, zls))

    assert zis.shape == (B, out_dim) and zis.dtype == jnp.float32
    assert zls.shape == (B, out_dim) and zls.dtype == jnp.float16
    print("KERNEL_OK")
</pallas_src>

<mosaic_0001>
module attributes {stable_mosaic.version = 11 : i64} {
  func.func @_matmul_bn_relu_kernel(%arg0: i32, %arg1: memref<4096x147xbf16, #tpu.memory_space<vmem>>, %arg2: memref<147x128xbf16, #tpu.memory_space<vmem>>, %arg3: memref<1x128xf32, #tpu.memory_space<vmem>>, %arg4: memref<1x128xf32, #tpu.memory_space<vmem>>, %arg5: memref<4096x128xbf16, #tpu.memory_space<vmem>>) attributes {dimension_semantics = [#tpu.dimension_semantics<parallel>], iteration_bounds = array<i64: 8>, scalar_prefetch = 0 : i64, scratch_operands = 0 : i64, tpu.core_type = #tpu.core_type<tc>, window_params = [{transform_indices = @transform_0, window_bounds = array<i64: 4096, 147>}, {pipeline_mode = #tpu.pipeline_mode<synchronous>, transform_indices = @transform_1, window_bounds = array<i64: 147, 128>}, {pipeline_mode = #tpu.pipeline_mode<synchronous>, transform_indices = @transform_2, window_bounds = array<i64: 1, 128>}, {pipeline_mode = #tpu.pipeline_mode<synchronous>, transform_indices = @transform_3, window_bounds = array<i64: 1, 128>}, {transform_indices = @transform_4, window_bounds = array<i64: 4096, 128>}]} {
    %c0 = arith.constant 0 : index
    %c0_0 = arith.constant 0 : index
    %0 = vector.load %arg1[%c0, %c0_0] : memref<4096x147xbf16, #tpu.memory_space<vmem>>, vector<4096x147xbf16>
    %c0_1 = arith.constant 0 : index
    %c0_2 = arith.constant 0 : index
    %1 = vector.load %arg2[%c0_1, %c0_2] : memref<147x128xbf16, #tpu.memory_space<vmem>>, vector<147x128xbf16>
    %cst = arith.constant dense<0.000000e+00> : vector<4096x128xf32>
    %2 = tpu.matmul %0, %1, %cst {dimension_numbers = #tpu.dot_dimension_numbers<[1], [0], [0], [1], [0, 0, 1, 1], [], []>} : vector<4096x147xbf16>, vector<147x128xbf16>, vector<4096x128xf32> -> vector<4096x128xf32>
    %c0_3 = arith.constant 0 : index
    %c0_4 = arith.constant 0 : index
    %3 = vector.load %arg3[%c0_3, %c0_4] : memref<1x128xf32, #tpu.memory_space<vmem>>, vector<1x128xf32>
    %4 = vector.broadcast %3 : vector<1x128xf32> to vector<4096x128xf32>
    %5 = arith.mulf %2, %4 : vector<4096x128xf32>
    %c0_5 = arith.constant 0 : index
    %c0_6 = arith.constant 0 : index
    %6 = vector.load %arg4[%c0_5, %c0_6] : memref<1x128xf32, #tpu.memory_space<vmem>>, vector<1x128xf32>
    %7 = vector.broadcast %6 : vector<1x128xf32> to vector<4096x128xf32>
    %8 = arith.addf %5, %7 : vector<4096x128xf32>
    %cst_7 = arith.constant 0.000000e+00 : f32
    %9 = vector.broadcast %cst_7 : f32 to vector<4096x128xf32>
    %10 = arith.maximumf %8, %9 : vector<4096x128xf32>
    %11 = arith.truncf %10 : vector<4096x128xf32> to vector<4096x128xbf16>
    %c0_8 = arith.constant 0 : index
    %c0_9 = arith.constant 0 : index
    %12 = vector.load %arg5[%c0_8, %c0_9] : memref<4096x128xbf16, #tpu.memory_space<vmem>>, vector<4096x128xbf16>
    tpu.vector_store %arg5[%c0_8, %c0_9], %11 {strides = array<i32>} : memref<4096x128xbf16, #tpu.memory_space<vmem>>, vector<4096x128xbf16>,
    return
  }
  func.func @transform_0(%arg0: i32) -> (i32, i32) {
    %c0_i32 = arith.constant 0 : i32
    %c0_i32_0 = arith.constant 0 : i32
    return %arg0, %c0_i32 : i32, i32
  }
  func.func @transform_1(%arg0: i32) -> (i32, i32) {
    %c0_i32 = arith.constant 0 : i32
    %c0_i32_0 = arith.constant 0 : i32
    %c0_i32_1 = arith.constant 0 : i32
    return %c0_i32, %c0_i32_0 : i32, i32
  }
  func.func @transform_2(%arg0: i32) -> (i32, i32) {
    %c0_i32 = arith.constant 0 : i32
    %c0_i32_0 = arith.constant 0 : i32
    %c0_i32_1 = arith.constant 0 : i32
    return %c0_i32, %c0_i32_0 : i32, i32
  }
  func.func @transform_3(%arg0: i32) -> (i32, i32) {
    %c0_i32 = arith.constant 0 : i32
    %c0_i32_0 = arith.constant 0 : i32
    %c0_i32_1 = arith.constant 0 : i32
    return %c0_i32, %c0_i32_0 : i32, i32
  }
  func.func @transform_4(%arg0: i32) -> (i32, i32) {
    %c0_i32 = arith.constant 0 : i32
    %c0_i32_0 = arith.constant 0 : i32
    return %arg0, %c0_i32 : i32, i32
  }
}

</mosaic_0001>

<bundles_post_ra>
// kernel: conv0_bn_relu.1
= control target key start
LH: loop header
LB: loop body
LE: loop exit
PB: predicated region body
PF: predicated region fallthrough
CT: control target
= control target key end

     0   :  { %9 = vsyncpa [#allocation3], 0  ;;  %s16952_s0 = inlined_call_operand.vmem [shape: bf16[32768,147], index: 0, kind: input, shape index: {}]   ;;  %s16953_s1 = inlined_call_operand.hbm [shape: bf16[147,128], index: 1, kind: input, shape index: {}]   ;;  %s16954_s2 = inlined_call_operand.hbm [shape: f32[1,128], index: 2, kind: input, shape index: {}]   ;;  %s16955_s3 = inlined_call_operand.hbm [shape: f32[1,128], index: 3, kind: input, shape index: {}]   ;;  %s16956_s4 = inlined_call_operand.hbm [shape: bf16[32768,128], index: 4, kind: output, shape index: {}]  }
   0x1   :  { %10 = vsyncpa [#allocation6], 0 }
   0x2   :  { %11 = vsyncpa [#allocation4], 0 }
   0x3   :  { %13 = vsyncpa [#allocation4 + $0x1], 0  ;;  %s14648_s15 = smov 0   ;;  %s14650_s16 = smov 0  }
   0x4   :  { %s14652_s17 = smov 0   ;;  %s14654_s18 = smov 0  }
   0x5 LB: > { %s14669_s19 = sadd.s32 4294967295, %s14611_s18   ;;  %s10209_s20 = sadd.s32 4294967294, %s14611_s18   ;;  %s14611_s18 = sphi %s14654_s18, %s16975_s18   ;;  %s14607_s17 = sphi %s14652_s17, %s16974_s17   ;;  %s14603_s16 = sphi %s14650_s16, %s16973_s16   ;;  %s14599_s15 = sphi %s14648_s15, %s16972_s15  }
   0x6   : > { %s14673_s21 = sadd.s32 1, %s14611_s18   ;;  %s115_s22 = sadd.s32 1, %s14607_s17 }
   0x7   : > { %s112_s23 = ssub.s32 %s14611_s18, %s14673_s21  ;;  %p125_p0 = scmp.ne.s32.totalorder %s14607_s17, %s14603_s16 }
   0x8   : > { %p113_p1 = scmp.eq.s32.totalorder %s112_s23, 0  ;;  %p126_p2 = scmp.eq.s32.totalorder %s14669_s19, 7 }
   0x9   : > { %p131_p3 = scmp.ne.s32.totalorder %s14603_s16, %s14599_s15  ;;  %p132_p4 = scmp.eq.s32.totalorder %s10209_s20, 7 }
   0xa   : > { %s14684_s24 = scalar_select %p113_p1, %s14607_s17, %s115_s22  }
   0xb   : > { %p14686_p5 = por %p126_p2, %p125_p0  ;;  %p14690_p6 = por %p132_p4, %p131_p3 }
   0xc   : > { %p10210_p7 = scmp.ge.s32.totalorder %s14611_s18, 1  ;;  %p139_p8 = scmp.lt.s32.totalorder %s14611_s18, 9 }
   0xd   : > { %s16960_s25 = scalar_select %p14686_p5, 1, 0 }
   0xe   : > { %s16961_s26 = scalar_select %p14690_p6, 1, 0 }
   0xf   : > { %p16957_p9 = scmp.eq.s32.totalorder %s14669_s19, 0  ;;  %p14697_p10 = pnand %p10210_p7, %p139_p8 }
  0x10   : > { %s14613_s28 = smov [#allocation5]   ;;  %s14614_s30 = smov [#allocation2]  }
  0x11   : > { %s16962_s27 = scalar_select %p14697_p10, 1, 0 }
  0x12   : > { %s165_s29 = sshll.u32 %s14613_s28, 4  ;;  %p13603_p11 = pneg %p14697_p10  ;;  %s166_s29 = int_to_ptr.vmem [resolvable:$true] %s165_s29 }
  0x13   : > { %s151_s5 = sshll.u32 %s14614_s30, 4  ;;  %s14615_s7 = smov [#allocation7]   ;;  %s14709_s5 = int_to_ptr.vmem [resolvable:$true] %s151_s5 }
  0x14   : > { %p14705_p12 = pnand %p16957_p9, %p13603_p11  ;;  %s14711_s8 = sshll.u32 %s14615_s7, 4  ;;  %s177_s8 = int_to_ptr.vmem [resolvable:$true] %s14711_s8 }
  0x15   : > { %s14457_s11 = scalar_lea.hbm %s16954_s2, 16 }
  0x16   : > { %p14458_p13 = scmp.ne.s32.totalorder %s16954_s2, %s14457_s11  ;;  %p14721_p0 = pneg %p14705_p12 }
  0x17   : > { %p14464_p3 = scmp.lt.u32.totalorder %s14457_s11, %s16954_s2 }
  0x18   : > { %p14460_p1 = pnand %p14721_p0, %p14458_p13 }
  0x1a   : > { %p14461_p2 = pneg %p14460_p1 }
  0x1c   : > { %p14466_p4 = pnand %p14464_p3, %p14461_p2 }
  0x1e   : > { %14469 = shalt.err (!%p14466_p4)
}
  0x1f   : > { %s14470_s23 = scalar_lea.vmem %s166_s29, 16  ;;  %s14477_s28 = scalar_lea.vmem %s166_s29, 32 }
  0x20   : > { %p14471_p7 = scmp.ne.s32.totalorder %s166_s29, %s14470_s23  ;;  %p14478_p9 = scmp.lt.s32.totalorder %s166_s29, %s166_s29 }
  0x21   : > { %p14479_p6 = scmp.lt.s32.totalorder %s14477_s28, %s14470_s23 }
  0x22   : > { %p14473_p8 = pnand %p14471_p7, %p14721_p0 }
  0x23   : > { %p14480_p5 = por %p14479_p6, %p14478_p9 }
  0x24   : > { %p14474_p11 = pneg %p14473_p8 }
  0x26   : > { %p14481_p10 = pnand %p14480_p5, %p14474_p11 }
  0x28   : > { %14484 = shalt.err (!%p14481_p10)
}
  0x29   : > { %13609 = dma.hbm_to_vmem [thread:$0]  (!%p14705_p12), %s16954_s2, 16, %s166_s29, [#allocation6]  }
  0x2a   : > { %s14485_s11 = scalar_lea.hbm %s16953_s1, 1216 }
  0x2b   : > { %p14486_p13 = scmp.ne.s32.totalorder %s16953_s1, %s14485_s11  ;;  %p14492_p5 = scmp.lt.u32.totalorder %s14485_s11, %s16953_s1 }
  0x2d   : > { %p14488_p1 = pnand %p14486_p13, %p14721_p0 }
  0x2f   : > { %p14489_p6 = pneg %p14488_p1 }
  0x31   : > { %p14494_p9 = pnand %p14492_p5, %p14489_p6 }
  0x33   : > { %14497 = shalt.err (!%p14494_p9)
}
  0x34   : > { %s14498_s29 = scalar_lea.vmem %s14709_s5, 1216  ;;  %p14506_p4 = scmp.lt.s32.totalorder %s14709_s5, %s14709_s5 }
  0x35   : > { %p14499_p10 = scmp.ne.s32.totalorder %s14709_s5, %s14498_s29  ;;  %p14507_p7 = scmp.lt.s32.totalorder %s14498_s29, %s14498_s29 }
  0x37   : > { %p14501_p2 = pnand %p14499_p10, %p14721_p0  ;;  %p14508_p8 = por %p14507_p7, %p14506_p4 }
  0x39   : > { %p14502_p3 = pneg %p14501_p2 }
  0x3b   : > { %p14509_p11 = pnand %p14508_p8, %p14502_p3 }
  0x3d   : > { %14512 = shalt.err (!%p14509_p11)
}
  0x3e   : > { %s14616_s23 = smov 64   ;;  %s14617_s28 = smov 4  }
  0x3f   : > { %13606 = dma.hbm_to_vmem [thread:$0]  (!%p14705_p12), %s16953_s1, 1216, %s14709_s5, [#allocation3], %s14616_s23, %s14616_s23, %s14617_s28  }
  0x40   : > { %s14513_s11 = scalar_lea.hbm %s16955_s3, 16 }
  0x41   : > { %p14514_p13 = scmp.ne.s32.totalorder %s16955_s3, %s14513_s11  ;;  %p14520_p5 = scmp.lt.u32.totalorder %s14513_s11, %s16955_s3 }
  0x43   : > { %p14516_p1 = pnand %p14514_p13, %p14721_p0 }
  0x45   : > { %p14517_p6 = pneg %p14516_p1 }
  0x47   : > { %p14522_p9 = pnand %p14520_p5, %p14517_p6 }
  0x49   : > { %14525 = shalt.err (!%p14522_p9)
}
  0x4a   : > { %s14526_s29 = scalar_lea.vmem %s177_s8, 16  ;;  %s14533_s5 = scalar_lea.vmem %s177_s8, 32 }
  0x4b   : > { %p14527_p10 = scmp.ne.s32.totalorder %s177_s8, %s14526_s29  ;;  %p14534_p4 = scmp.lt.s32.totalorder %s177_s8, %s177_s8 }
  0x4c   : > { %p14535_p7 = scmp.lt.s32.totalorder %s14533_s5, %s14526_s29 }
  0x4d   : > { %p14529_p2 = pnand %p14527_p10, %p14721_p0 }
  0x4e   : > { %p14536_p8 = por %p14535_p7, %p14534_p4 }
  0x4f   : > { %p14530_p3 = pneg %p14529_p2 }
  0x51   : > { %p14537_p11 = pnand %p14536_p8, %p14530_p3 }
  0x53   : > { %14540 = shalt.err (!%p14537_p11)
}
  0x54   : > { %13612 = dma.hbm_to_vmem [thread:$0]  (!%p14705_p12), %s16955_s3, 16, %s177_s8, [#allocation6]  }
  0x55   : > { %p16965_p13 = scmp.ne.s32.totalorder %s16962_s27, 0 }
  0x56   : > { %p16966_p1 = scmp.eq.s32.totalorder (!%p16965_p13), %s14669_s19, 0 }
  0x57   : > { %199 = sbr.rel (%p16965_p13) target bundleno = 1394 (0x572), region = 36 }
  0x5e   : > { %14586 = dma.done.wait (%p16966_p1), [#allocation3], 1216   ;;  %p16967_p0 = pmov %p16966_p1 }
  0x60   : > { %14588 = vsyncadd (%p16967_p0), [#allocation3], 4294966080  ;;  %p16968_p6 = pmov %p16967_p0 }
  0x61   : > { %p16969_p5 = pmov %p16967_p0 }
  0x62   : > { %14590 = dma.done.wait (%p16968_p6), [#allocation6], 32  }
  0x63   : > { %14592 = vsyncadd (%p16969_p5), [#allocation6], 4294967264  ;;  %v14618_v0 = vmov 0   ;;  %s10220_s27 = sshll.u32 %s14669_s19, 9  ;;  %v13665_v1 = vld [vmem:[#allocation2] sm:$0xff]   ;;  %v13666_v2 = vld [vmem:[#allocation2 + $0x8] sm:$0xff]  }
  0x64   : > { %3911 = vmatprep.subr.bf16.mxu0 %v14618_v0  ;;  %13569 = vmatprep.subr.bf16.mxu1 %v14618_v0  ;;  %p235_p12 = scmp.lt.s32.totalorder %s10220_s27, 4095  ;;  %v13667_v3 = vld [vmem:[#allocation2 + $0x10] sm:$0xff]   ;;  %vm3135_vm0 = vcmask 154624   ;;  %v13668_v4 = vld [vmem:[#allocation2 + $0x18] sm:$0xff]   ;;  %v13669_v7 = vld [vmem:[#allocation2 + $0x20] sm:$0xff]   ;;  %vm3904_vm1 = vcmask 1040384  }
  0x65   : > { %3912 = vmatpush1.bf16.msra.mxu0 %v13665_v1  ;;  %13579 = vmatpush1.bf16.msra.mxu1 %v13665_v1  ;;  %v13670_v8 = vld [vmem:[#allocation2 + $0x28] sm:$0xff]   ;;  %v13671_v9 = vld [vmem:[#allocation2 + $0x30] sm:$0xff]   ;;  %v13672_v10 = vld [vmem:[#allocation2 + $0x38] sm:$0xff]   ;;  %vm3905_vm2 = vcmask 1041408   ;;  %v14619_v11 = vmov 65535   ;;  %s231_s7 = sand.u32 1, %s14603_s16  }
  0x66   : > { %s16977_s27 = smov (!%p235_p12, %s10220_s27), 4095  ;;  %3913 = vmatprep.subr.bf16.mxu0 %v14618_v0  ;;  %13570 = vmatprep.subr.bf16.mxu1 %v14618_v0  ;;  %v3906_v12 = vsel %vm3904_vm1, 4294967295, %v14619_v11  ;;  %v13673_v13 = vld [vmem:[#allocation2 + $0x40] sm:$0xff]   ;;  %v13674_v14 = vld [vmem:[#allocation2 + $0x48] ss:$0 sps:$4 sm:$0x33]  }
  0x67   : > { %s11520_s6 = sshll.u32 %s16977_s27, 3  ;;  %v3907_v15 = vsel %vm3905_vm2, %v3906_v12, 0  ;;  %s10219_s9 = sshll.u32 %s231_s7, 11 }
  0x68   : > { %s14799_s30 = scalar_lea.vmem %s16952_s0, %s11520_s6  ;;  %v3909_v16 = vand.u32 %v13674_v14, %v3907_v15  ;;  %s15008_s10 = scalar_lea.vmem [#allocation8], %s10219_s9 }
  0x69   : > { %3914 = vmatpush1.bf16.msra.mxu0 %v13666_v2  ;;  %13580 = vmatpush1.bf16.msra.mxu1 %v13666_v2  ;;  %v13677_v5 = vld [vmem:[%s14799_s30 + $0x4] ss:$8 sps:$4 sm:$0xff]   ;;  %v13675_v17 = vld [vmem:[%s14799_s30] ss:$8 sps:$4 sm:$0xff]   ;;  %v13681_v19 = vld [vmem:[%s14799_s30 + $0x14] ss:$8 sps:$4 sm:$0xff]  }
  0x6a   : > { %3915 = vmatprep.subr.bf16.mxu0 %v14618_v0  ;;  %13571 = vmatprep.subr.bf16.mxu1 %v14618_v0  ;;  %v13680_v6 = vld [vmem:[%s14799_s30 + $0x804] ss:$8 sps:$4 sm:$0xff]   ;;  %v13678_v18 = vld [vmem:[%s14799_s30 + $0x800] ss:$8 sps:$4 sm:$0xff]   ;;  %v13683_v20 = vld [vmem:[%s14799_s30 + $0x814] ss:$8 sps:$4 sm:$0xff]  }
  0x6b   : > { %10745 = vmatprep.mubr.msk.bf16.mxu0 %vm3135_vm0, %v13677_v5  ;;  %10873 = vmatprep.mubr.msk.bf16.mxu1 %vm3135_vm0, %v13680_v6  ;;  %v13685_v21 = vld [vmem:[%s14799_s30 + $0x10] ss:$8 sps:$4 sm:$0xff]   ;;  %v13687_v23 = vld [vmem:[%s14799_s30 + $0x24] ss:$8 sps:$4 sm:$0xff]   ;;  %v13691_v25 = vld [vmem:[%s14799_s30 + $0x20] ss:$8 sps:$4 sm:$0xff]  }
  0x6c   : > { %v13686_v22 = vld [vmem:[%s14799_s30 + $0x810] ss:$8 sps:$4 sm:$0xff]   ;;  %v13689_v24 = vld [vmem:[%s14799_s30 + $0x824] ss:$8 sps:$4 sm:$0xff]   ;;  %v13692_v26 = vld [vmem:[%s14799_s30 + $0x820] ss:$8 sps:$4 sm:$0xff]  }
  0x6d   : > { %3916 = vmatpush1.bf16.msra.mxu0 %v13667_v3  ;;  %13581 = vmatpush1.bf16.msra.mxu1 %v13667_v3  ;;  %v13693_v27 = vld [vmem:[%s14799_s30 + $0x34] ss:$8 sps:$4 sm:$0xff]   ;;  %v13697_v29 = vld [vmem:[%s14799_s30 + $0x30] ss:$8 sps:$4 sm:$0xff]   ;;  %v13699_v31 = vld [vmem:[%s14799_s30 + $0x44] ss:$8 sps:$4 sm:$0xff]  }
  0x6e   : > { %3917 = vmatprep.subr.bf16.mxu0 %v14618_v0  ;;  %13572 = vmatprep.subr.bf16.mxu1 %v14618_v0  ;;  %v13695_v28 = vld [vmem:[%s14799_s30 + $0x834] ss:$8 sps:$4 sm:$0xff]   ;;  %v13698_v30 = vld [vmem:[%s14799_s30 + $0x830] ss:$8 sps:$4 sm:$0xff]   ;;  %v13701_v32 = vld [vmem:[%s14799_s30 + $0x844] ss:$8 sps:$4 sm:$0xff]  }
  0x6f   : > { %v13703_v33 = vld [vmem:[%s14799_s30 + $0x40] ss:$8 sps:$4 sm:$0xff]   ;;  %v13705_v35 = vld [vmem:[%s14799_s30 + $0x54] ss:$8 sps:$4 sm:$0xff]   ;;  %v13709_v37 = vld [vmem:[%s14799_s30 + $0x50] ss:$8 sps:$4 sm:$0xff]  }
  0x70   : > { %v13704_v34 = vld [vmem:[%s14799_s30 + $0x840] ss:$8 sps:$4 sm:$0xff]   ;;  %v13707_v36 = vld [vmem:[%s14799_s30 + $0x854] ss:$8 sps:$4 sm:$0xff]   ;;  %v13710_v38 = vld [vmem:[%s14799_s30 + $0x850] ss:$8 sps:$4 sm:$0xff]  }
  0x71   : > { %3918 = vmatpush1.bf16.msra.mxu0 %v13668_v4  ;;  %13582 = vmatpush1.bf16.msra.mxu1 %v13668_v4  ;;  %v13711_v39 = vld [vmem:[%s14799_s30 + $0x64] ss:$8 sps:$4 sm:$0xff]   ;;  %v13715_v41 = vld [vmem:[%s14799_s30 + $0x60] ss:$8 sps:$4 sm:$0xff]   ;;  %v13717_v43 = vld [vmem:[%s14799_s30 + $0x74] ss:$8 sps:$4 sm:$0xff]  }
  0x72   : > { %3919 = vmatprep.subr.bf16.mxu0 %v14618_v0  ;;  %13573 = vmatprep.subr.bf16.mxu1 %v14618_v0  ;;  %v13713_v40 = vld [vmem:[%s14799_s30 + $0x864] ss:$8 sps:$4 sm:$0xff]   ;;  %v13716_v42 = vld [vmem:[%s14799_s30 + $0x860] ss:$8 sps:$4 sm:$0xff]   ;;  %v13719_v44 = vld [vmem:[%s14799_s30 + $0x874] ss:$8 sps:$4 sm:$0xff]  }
  0x73   : > { %v13721_v45 = vld [vmem:[%s14799_s30 + $0x70] ss:$8 sps:$4 sm:$0xff]   ;;  %v13723_v47 = vld [vmem:[%s14799_s30 + $0x84] ss:$8 sps:$4 sm:$0xff]   ;;  %v13727_v49 = vld [vmem:[%s14799_s30 + $0x80] ss:$8 sps:$4 sm:$0xff]  }
  0x74   : > { %v13722_v46 = vld [vmem:[%s14799_s30 + $0x870] ss:$8 sps:$4 sm:$0xff]   ;;  %v13725_v48 = vld [vmem:[%s14799_s30 + $0x884] ss:$8 sps:$4 sm:$0xff]   ;;  %v13728_v50 = vld [vmem:[%s14799_s30 + $0x880] ss:$8 sps:$4 sm:$0xff]  }
  0x75   : > { %3920 = vmatpush1.bf16.msra.mxu0 %v13669_v7  ;;  %13583 = vmatpush1.bf16.msra.mxu1 %v13669_v7  ;;  %v13729_v51 = vld [vmem:[%s14799_s30 + $0x94] ss:$8 sps:$4 sm:$0xff]   ;;  %v13733_v53 = vld [vmem:[%s14799_s30 + $0x90] ss:$8 sps:$4 sm:$0xff]   ;;  %v13735_v55 = vld [vmem:[%s14799_s30 + $0xa4] ss:$8 sps:$4 sm:$0xff]  }
  0x76   : > { %3921 = vmatprep.subr.bf16.mxu0 %v14618_v0  ;;  %13574 = vmatprep.subr.bf16.mxu1 %v14618_v0  ;;  %v13731_v52 = vld [vmem:[%s14799_s30 + $0x894] ss:$8 sps:$4 sm:$0xff]   ;;  %v13734_v54 = vld [vmem:[%s14799_s30 + $0x890] ss:$8 sps:$4 sm:$0xff]   ;;  %v13737_v56 = vld [vmem:[%s14799_s30 + $0x8a4] ss:$8 sps:$4 sm:$0xff]  }
  0x77   : > { %v13739_v57 = vld [vmem:[%s14799_s30 + $0xa0] ss:$8 sps:$4 sm:$0xff]   ;;  %v13741_v59 = vld [vmem:[%s14799_s30 + $0xb4] ss:$8 sps:$4 sm:$0xff]   ;;  %v13745_v61 = vld [vmem:[%s14799_s30 + $0xb0] ss:$8 sps:$4 sm:$0xff]  }
  0x78   : > { %v13740_v58 = vld [vmem:[%s14799_s30 + $0x8a0] ss:$8 sps:$4 sm:$0xff]   ;;  %v13743_v60 = vld [vmem:[%s14799_s30 + $0x8b4] ss:$8 sps:$4 sm:$0xff]   ;;  %v13746_v62 = vld [vmem:[%s14799_s30 + $0x8b0] ss:$8 sps:$4 sm:$0xff]  }
  0x79   : > { %3922 = vmatpush1.bf16.msra.mxu0 %v13670_v8  ;;  %13584 = vmatpush1.bf16.msra.mxu1 %v13670_v8  ;;  %v13747_v63 = vld [vmem:[%s14799_s30 + $0xc4] ss:$8 sps:$4 sm:$0xff]   ;;  %v13751_v1 = vld [vmem:[%s14799_s30 + $0xc0] ss:$8 sps:$4 sm:$0xff]   ;;  %v13753_v3 = vld [vmem:[%s14799_s30 + $0xd4] ss:$8 sps:$4 sm:$0xff]  }
  0x7a   : > { %3923 = vmatprep.subr.bf16.mxu0 %v14618_v0  ;;  %13575 = vmatprep.subr.bf16.mxu1 %v14618_v0  ;;  %v13752_v2 = vld [vmem:[%s14799_s30 + $0x8c0] ss:$8 sps:$4 sm:$0xff]   ;;  %v13755_v4 = vld [vmem:[%s14799_s30 + $0x8d4] ss:$8 sps:$4 sm:$0xff]   ;;  %v13757_v5 = vld [vmem:[%s14799_s30 + $0xd0] ss:$8 sps:$4 sm:$0xff]  }
  0x7b   : > { %v13758_v6 = vld [vmem:[%s14799_s30 + $0x8d0] ss:$8 sps:$4 sm:$0xff]   ;;  %v13759_v7 = vld [vmem:[%s14799_s30 + $0xe4] ss:$8 sps:$4 sm:$0xff]   ;;  %v13765_v11 = vld [vmem:[%s14799_s30 + $0xf4] ss:$8 sps:$4 sm:$0xff]  }
  0x7c   : > { %v13761_v8 = vld [vmem:[%s14799_s30 + $0x8e4] ss:$8 sps:$4 sm:$0xff]   ;;  %v13767_v12 = vld [vmem:[%s14799_s30 + $0x8f4] ss:$8 sps:$4 sm:$0xff]   ;;  %v13770_v14 = vld [vmem:[%s14799_s30 + $0x8f0] ss:$8 sps:$4 sm:$0xff]  }
  0x7d   : > { %3924 = vmatpush1.bf16.msra.mxu0 %v13671_v9  ;;  %13585 = vmatpush1.bf16.msra.mxu1 %v13671_v9  ;;  %v13763_v9 = vld [vmem:[%s14799_s30 + $0xe0] ss:$8 sps:$4 sm:$0xff]   ;;  %v13771_v15 = vld [vmem:[%s14799_s30 + $0x104] ss:$8 sps:$4 sm:$0xff]   ;;  %s12033_s11 = sshll.u32 %s14669_s19, 15  ;;  %s10116_s12 = sshll.u32 %s15008_s10, 4  ;;  %s16905_s12 = int_to_ptr.vmem [resolvable:$true] %s10116_s12 }
  0x7e   : > { %3925 = vmatprep.subr.bf16.mxu0 %v14618_v0  ;;  %13576 = vmatprep.subr.bf16.mxu1 %v14618_v0  ;;  %s16903_s22 = scalar_lea.hbm %s16956_s4, %s12033_s11  ;;  %s16911_s19 = scalar_lea.sflag [#allocation4], %s231_s7 }
  0x7f   : > { %s14541_s29 = scalar_lea.vmem %s16905_s12, 32768  ;;  %p16970_p10 = scmp.ne.s32.totalorder %s16960_s25, 0 }
  0x80   : > { %p14542_p9 = scmp.ne.s32.totalorder %s16905_s12, %s14541_s29  ;;  %s14620_s5 = smov [#allocation8]  }
  0x81   : > { %3926 = vmatpush1.bf16.msra.mxu0 %v13672_v10  ;;  %13586 = vmatpush1.bf16.msra.mxu1 %v13672_v10  ;;  %v13764_v10 = vld [vmem:[%s14799_s30 + $0x8e0] ss:$8 sps:$4 sm:$0xff]   ;;  %s14545_s23 = sshll.u32 %s14620_s5, 4  ;;  %s14546_s23 = int_to_ptr.vmem [resolvable:$false] %s14545_s23 }
  0x82   : > { %3927 = vmatprep.subr.bf16.mxu0 %v14618_v0  ;;  %13577 = vmatprep.subr.bf16.mxu1 %v14618_v0  ;;  %p14543_p2 = pnand %p14542_p9, %p16970_p10  ;;  %s14547_s28 = scalar_lea.vmem %s14546_s23, 65536 }
  0x83   : > { %p14548_p4 = scmp.lt.s32.totalorder %s16905_s12, %s14546_s23  ;;  %p14549_p7 = scmp.lt.s32.totalorder %s14547_s28, %s14541_s29 }
  0x84   : > { %p14544_p3 = pneg %p14543_p2 }
  0x85   : > { %3928 = vmatpush1.bf16.msra.mxu0 %v13673_v13  ;;  %13587 = vmatpush1.bf16.msra.mxu1 %v13673_v13  ;;  %v13769_v13 = vld [vmem:[%s14799_s30 + $0xf0] ss:$8 sps:$4 sm:$0xff]   ;;  %p14550_p8 = por %p14549_p7, %p14548_p4 }
  0x86   : > { %3929 = vmatprep.subr.bf16.mxu0 %v14618_v0  ;;  %13578 = vmatprep.subr.bf16.mxu1 %v14618_v0  ;;  %v13749_v0 = vld [vmem:[%s14799_s30 + $0x8c4] ss:$8 sps:$4 sm:$0xff]  }
  0x87   : > { %p14551_p11 = pnand %p14550_p8, %p14544_p3 }
  0x89   : > { %3930 = vmatpush1.bf16.msra.mxu0 %v3909_v16  ;;  %13588 = vmatpush1.bf16.msra.mxu1 %v3909_v16  ;;  %v13773_v16 = vld [vmem:[%s14799_s30 + $0x904] ss:$8 sps:$4 sm:$0xff]  }
  0x8c   : > { %3944 = vmatmul.mubr.bf16.vlgmr.msra.gmra.mrb[0].mxu0 %v13675_v17  ;;  %4968 = vmatmul.mubr.bf16.vlgmr.msra.gmra.mrb[0].mxu1 %v13678_v18  ;;  %v13775_v17 = vld [vmem:[%s14799_s30 + $0x100] ss:$8 sps:$4 sm:$0xff]  }
  0x8d   : > { %10746 = vmatprep.mubr.msk.bf16.mxu0 %vm3135_vm0, %v13681_v19  ;;  %10874 = vmatprep.mubr.msk.bf16.mxu1 %vm3135_vm0, %v13683_v20  ;;  %v13776_v18 = vld [vmem:[%s14799_s30 + $0x900] ss:$8 sps:$4 sm:$0xff]   ;;  %v13777_v19 = vld [vmem:[%s14799_s30 + $0x114] ss:$8 sps:$4 sm:$0xff]  }
  0x8e   : > { %v13779_v20 = vld [vmem:[%s14799_s30 + $0x914] ss:$8 sps:$4 sm:$0xff]  }
  0x94   : > { %3952 = vmatmul.mubr.bf16.gmra.mrb[4].mxu0 %v13685_v21  ;;  %4976 = vmatmul.mubr.bf16.gmra.mrb[4].mxu1 %v13686_v22  ;;  %v13781_v21 = vld [vmem:[%s14799_s30 + $0x110] ss:$8 sps:$4 sm:$0xff]  }
  0x95   : > { %10747 = vmatprep.mubr.msk.bf16.mxu0 %vm3135_vm0, %v13687_v23  ;;  %10875 = vmatprep.mubr.msk.bf16.mxu1 %vm3135_vm0, %v13689_v24  ;;  %v13782_v22 = vld [vmem:[%s14799_s30 + $0x910] ss:$8 sps:$4 sm:$0xff]   ;;  %v13783_v23 = vld [vmem:[%s14799_s30 + $0x124] ss:$8 sps:$4 sm:$0xff]  }
  0x96   : > { %v13785_v24 = vld [vmem:[%s14799_s30 + $0x924] ss:$8 sps:$4 sm:$0xff]  }
  0x9c   : > { %3960 = vmatmul.mubr.bf16.gmra.mrb[8].mxu0 %v13691_v25  ;;  %4984 = vmatmul.mubr.bf16.gmra.mrb[8].mxu1 %v13692_v26  ;;  %v13787_v25 = vld [vmem:[%s14799_s30 + $0x120] ss:$8 sps:$4 sm:$0xff]  }
  0x9d   : > { %10748 = vmatprep.mubr.msk.bf16.mxu0 %vm3135_vm0, %v13693_v27  ;;  %10876 = vmatprep.mubr.msk.bf16.mxu1 %vm3135_vm0, %v13695_v28  ;;  %v13788_v26 = vld [vmem:[%s14799_s30 + $0x920] ss:$8 sps:$4 sm:$0xff]   ;;  %v13789_v27 = vld [vmem:[%s14799_s30 + $0x134] ss:$8 sps:$4 sm:$0xff]  }
  0x9e   : > { %v13791_v28 = vld [vmem:[%s14799_s30 + $0x934] ss:$8 sps:$4 sm:$0xff]  }
  0xa4   : > { %3968 = vmatmul.mubr.bf16.gmra.mrb[12].mxu0 %v13697_v29  ;;  %4992 = vmatmul.mubr.bf16.gmra.mrb[12].mxu1 %v13698_v30  ;;  %v13793_v29 = vld [vmem:[%s14799_s30 + $0x130] ss:$8 sps:$4 sm:$0xff]  }
  0xa5   : > { %10749 = vmatprep.mubr.msk.bf16.mxu0 %vm3135_vm0, %v13699_v31  ;;  %10877 = vmatprep.mubr.msk.bf16.mxu1 %vm3135_vm0, %v13701_v32  ;;  %v13794_v30 = vld [vmem:[%s14799_s30 + $0x930] ss:$8 sps:$4 sm:$0xff]   ;;  %v13795_v31 = vld [vmem:[%s14799_s30 + $0x144] ss:$8 sps:$4 sm:$0xff]  }
  0xa6   : > { %v13797_v32 = vld [vmem:[%s14799_s30 + $0x944] ss:$8 sps:$4 sm:$0xff]  }
  0xac   : > { %3976 = vmatmul.mubr.bf16.gmra.mrb[16].mxu0 %v13703_v33  ;;  %5000 = vmatmul.mubr.bf16.gmra.mrb[16].mxu1 %v13704_v34  ;;  %v13799_v33 = vld [vmem:[%s14799_s30 + $0x140] ss:$8 sps:$4 sm:$0xff]  }
  0xad   : > { %10750 = vmatprep.mubr.msk.bf16.mxu0 %vm3135_vm0, %v13705_v35  ;;  %10878 = vmatprep.mubr.msk.bf16.mxu1 %vm3135_vm0, %v13707_v36  ;;  %v13800_v34 = vld [vmem:[%s14799_s30 + $0x940] ss:$8 sps:$4 sm:$0xff]   ;;  %v13801_v35 = vld [vmem:[%s14799_s30 + $0x154] ss:$8 sps:$4 sm:$0xff]  }
  0xae   : > { %v13803_v36 = vld [vmem:[%s14799_s30 + $0x954] ss:$8 sps:$4 sm:$0xff]  }
  0xb4   : > { %3984 = vmatmul.mubr.bf16.gmra.mrb[20].mxu0 %v13709_v37  ;;  %5008 = vmatmul.mubr.bf16.gmra.mrb[20].mxu1 %v13710_v38  ;;  %v13805_v37 = vld [vmem:[%s14799_s30 + $0x150] ss:$8 sps:$4 sm:$0xff]  }
  0xb5   : > { %10751 = vmatprep.mubr.msk.bf16.mxu0 %vm3135_vm0, %v13711_v39  ;;  %10879 = vmatprep.mubr.msk.bf16.mxu1 %vm3135_vm0, %v13713_v40  ;;  %v13806_v38 = vld [vmem:[%s14799_s30 + $0x950] ss:$8 sps:$4 sm:$0xff]   ;;  %v13807_v39 = vld [vmem:[%s14799_s30 + $0x164] ss:$8 sps:$4 sm:$0xff]  }
  0xb6   : > { %v13809_v40 = vld [vmem:[%s14799_s30 + $0x964] ss:$8 sps:$4 sm:$0xff]  }
  0xbc   : > { %3992 = vmatmul.mubr.bf16.gmra.mrb[24].mxu0 %v13715_v41  ;;  %5016 = vmatmul.mubr.bf16.gmra.mrb[24].mxu1 %v13716_v42  ;;  %v13811_v41 = vld [vmem:[%s14799_s30 + $0x160] ss:$8 sps:$4 sm:$0xff]  }
  0xbd   : > { %10752 = vmatprep.mubr.msk.bf16.mxu0 %vm3135_vm0, %v13717_v43  ;;  %10880 = vmatprep.mubr.msk.bf16.mxu1 %vm3135_vm0, %v13719_v44  ;;  %v13812_v42 = vld [vmem:[%s14799_s30 + $0x960] ss:$8 sps:$4 sm:$0xff]   ;;  %v13813_v43 = vld [vmem:[%s14799_s30 + $0x174] ss:$8 sps:$4 sm:$0xff]  }
  0xbe   : > { %v13815_v44 = vld [vmem:[%s14799_s30 + $0x974] ss:$8 sps:$4 sm:$0xff]  }
  0xc4   : > { %4000 = vmatmul.mubr.bf16.gmra.mrb[28].mxu0 %v13721_v45  ;;  %5024 = vmatmul.mubr.bf16.gmra.mrb[28].mxu1 %v13722_v46  ;;  %v13817_v45 = vld [vmem:[%s14799_s30 + $0x170] ss:$8 sps:$4 sm:$0xff]  }
  0xc5   : > { %10753 = vmatprep.mubr.msk.bf16.mxu0 %vm3135_vm0, %v13723_v47  ;;  %10881 = vmatprep.mubr.msk.bf16.mxu1 %vm3135_vm0, %v13725_v48  ;;  %v13818_v46 = vld [vmem:[%s14799_s30 + $0x970] ss:$8 sps:$4 sm:$0xff]   ;;  %v13819_v47 = vld [vmem:[%s14799_s30 + $0x184] ss:$8 sps:$4 sm:$0xff]  }
  0xc6   : > { %v13821_v48 = vld [vmem:[%s14799_s30 + $0x984] ss:$8 sps:$4 sm:$0xff]  }
  0xcc   : > { %4008 = vmatmul.mubr.bf16.gmra.mrb[32].mxu0 %v13727_v49  ;;  %5032 = vmatmul.mubr.bf16.gmra.mrb[32].mxu1 %v13728_v50  ;;  %v13823_v49 = vld [vmem:[%s14799_s30 + $0x180] ss:$8 sps:$4 sm:$0xff]  }
  0xcd   : > { %10754 = vmatprep.mubr.msk.bf16.mxu0 %vm3135_vm0, %v13729_v51  ;;  %10882 = vmatprep.mubr.msk.bf16.mxu1 %vm3135_vm0, %v13731_v52  ;;  %v13824_v50 = vld [vmem:[%s14799_s30 + $0x980] ss:$8 sps:$4 sm:$0xff]   ;;  %v13825_v51 = vld [vmem:[%s14799_s30 + $0x194] ss:$8 sps:$4 sm:$0xff]  }
  0xce   : > { %v13827_v52 = vld [vmem:[%s14799_s30 + $0x994] ss:$8 sps:$4 sm:$0xff]  }
  0xd4   : > { %4016 = vmatmul.mubr.bf16.gmra.mrb[36].mxu0 %v13733_v53  ;;  %5040 = vmatmul.mubr.bf16.gmra.mrb[36].mxu1 %v13734_v54  ;;  %v13829_v53 = vld [vmem:[%s14799_s30 + $0x190] ss:$8 sps:$4 sm:$0xff]  }
  0xd5   : > { %10755 = vmatprep.mubr.msk.bf16.mxu0 %vm3135_vm0, %v13735_v55  ;;  %10883 = vmatprep.mubr.msk.bf16.mxu1 %vm3135_vm0, %v13737_v56  ;;  %v13830_v54 = vld [vmem:[%s14799_s30 + $0x990] ss:$8 sps:$4 sm:$0xff]   ;;  %v13831_v55 = vld [vmem:[%s14799_s30 + $0x1a4] ss:$8 sps:$4 sm:$0xff]  }
  0xd6   : > { %v13833_v56 = vld [vmem:[%s14799_s30 + $0x9a4] ss:$8 sps:$4 sm:$0xff]  }
  0xdc   : > { %4024 = vmatmul.mubr.bf16.gmra.mrb[40].mxu0 %v13739_v57  ;;  %5048 = vmatmul.mubr.bf16.gmra.mrb[40].mxu1 %v13740_v58  ;;  %v13835_v57 = vld [vmem:[%s14799_s30 + $0x1a0] ss:$8 sps:$4 sm:$0xff]  }
  0xdd   : > { %10756 = vmatprep.mubr.msk.bf16.mxu0 %vm3135_vm0, %v13741_v59  ;;  %10884 = vmatprep.mubr.msk.bf16.mxu1 %vm3135_vm0, %v13743_v60  ;;  %v13836_v58 = vld [vmem:[%s14799_s30 + $0x9a0] ss:$8 sps:$4 sm:$0xff]   ;;  %v13837_v59 = vld [vmem:[%s14799_s30 + $0x1b4] ss:$8 sps:$4 sm:$0xff]  }
  0xde   : > { %v13839_v60 = vld [vmem:[%s14799_s30 + $0x9b4] ss:$8 sps:$4 sm:$0xff]  }
  0xe4   : > { %4032 = vmatmul.mubr.bf16.gmra.mrb[44].mxu0 %v13745_v61  ;;  %5056 = vmatmul.mubr.bf16.gmra.mrb[44].mxu1 %v13746_v62  ;;  %v14979_v61 = vld [vmem:[#allocation5] ss:$0 sm:$0xff] }
  0xe5   : > { %10757 = vmatprep.mubr.msk.bf16.mxu0 %vm3135_vm0, %v13747_v63  ;;  %10885 = vmatprep.mubr.msk.bf16.mxu1 %vm3135_vm0, %v13749_v0  ;;  %v14983_v63 = vld [vmem:[#allocation7] ss:$0 sm:$0xff] }
  0xec   : > { %4040 = vmatmul.mubr.bf16.gmra.mrb[48].mxu0 %v13751_v1  ;;  %5064 = vmatmul.mubr.bf16.gmra.mrb[48].mxu1 %v13752_v2  ;;  %v13841_v1 = vld [vmem:[%s14799_s30 + $0x1b0] ss:$8 sps:$4 sm:$0xff]  }
  0xed   : > { %10758 = vmatprep.mubr.msk.bf16.mxu0 %vm3135_vm0, %v13753_v3  ;;  %10886 = vmatprep.mubr.msk.bf16.mxu1 %vm3135_vm0, %v13755_v4 }
  0xf4   : > { %4048 = vmatmul.mubr.bf16.gmra.mrb[52].mxu0 %v13757_v5  ;;  %5072 = vmatmul.mubr.bf16.gmra.mrb[52].mxu1 %v13758_v6  ;;  %v13842_v6 = vld [vmem:[%s14799_s30 + $0x9b0] ss:$8 sps:$4 sm:$0xff]  }
  0xf5   : > { %10759 = vmatprep.mubr.msk.bf16.mxu0 %vm3135_vm0, %v13759_v7  ;;  %10887 = vmatprep.mubr.msk.bf16.mxu1 %vm3135_vm0, %v13761_v8 }
  0xfc   : > { %4056 = vmatmul.mubr.bf16.gmra.mrb[56].mxu0 %v13763_v9  ;;  %5080 = vmatmul.mubr.bf16.gmra.mrb[56].mxu1 %v13764_v10  ;;  %v13843_v9 = vld [vmem:[%s14799_s30 + $0x1c4] ss:$8 sps:$4 sm:$0xff]  }
  0xfd   : > { %10760 = vmatprep.mubr.msk.bf16.mxu0 %vm3135_vm0, %v13765_v11  ;;  %10888 = vmatprep.mubr.msk.bf16.mxu1 %vm3135_vm0, %v13767_v12  ;;  %v13845_v10 = vld [vmem:[%s14799_s30 + $0x9c4] ss:$8 sps:$4 sm:$0xff]  }
 0x104   : > { %4064 = vmatmul.mubr.bf16.gmra.mrb[60].mxu0 %v13769_v13  ;;  %5088 = vmatmul.mubr.bf16.gmra.mrb[60].mxu1 %v13770_v14 }
 0x105   : > { %10761 = vmatprep.mubr.msk.bf16.mxu0 %vm3135_vm0, %v13771_v15  ;;  %10889 = vmatprep.mubr.msk.bf16.mxu1 %vm3135_vm0, %v13773_v16 }
 0x10c   : > { %4072 = vmatmul.mubr.bf16.gmra.mrb[64].mxu0 %v13775_v17  ;;  %5096 = vmatmul.mubr.bf16.gmra.mrb[64].mxu1 %v13776_v18 }
 0x10d   : > { %10762 = vmatprep.mubr.msk.bf16.mxu0 %vm3135_vm0, %v13777_v19  ;;  %10890 = vmatprep.mubr.msk.bf16.mxu1 %vm3135_vm0, %v13779_v20 }
 0x114   : > { %4080 = vmatmul.mubr.bf16.gmra.mrb[68].mxu0 %v13781_v21  ;;  %5104 = vmatmul.mubr.bf16.gmra.mrb[68].mxu1 %v13782_v22 }
 0x115   : > { %10763 = vmatprep.mubr.msk.bf16.mxu0 %vm3135_vm0, %v13783_v23  ;;  %10891 = vmatprep.mubr.msk.bf16.mxu1 %vm3135_vm0, %v13785_v24 }
 0x11c   : > { %4088 = vmatmul.mubr.bf16.gmra.mrb[72].mxu0 %v13787_v25  ;;  %5112 = vmatmul.mubr.bf16.gmra.mrb[72].mxu1 %v13788_v26 }
 0x11d   : > { %10764 = vmatprep.mubr.msk.bf16.mxu0 %vm3135_vm0, %v13789_v27  ;;  %10892 = vmatprep.mubr.msk.bf16.mxu1 %vm3135_vm0, %v13791_v28 }
 0x124   : > { %4096 = vmatmul.mubr.bf16.gmra.mrb[76].mxu0 %v13793_v29  ;;  %5120 = vmatmul.mubr.bf16.gmra.mrb[76].mxu1 %v13794_v30 }
 0x125   : > { %10765 = vmatprep.mubr.msk.bf16.mxu0 %vm3135_vm0, %v13795_v31  ;;  %10893 = vmatprep.mubr.msk.bf16.mxu1 %vm3135_vm0, %v13797_v32  ;;  %v13847_v31 = vld [vmem:[%s14799_s30 + $0x1c0] ss:$8 sps:$4 sm:$0xff]  }
 0x126   : > { %v13848_v32 = vld [vmem:[%s14799_s30 + $0x9c0] ss:$8 sps:$4 sm:$0xff]  }
 0x12c   : > { %4104 = vmatmul.mubr.bf16.gmra.mrb[80].mxu0 %v13799_v33  ;;  %5128 = vmatmul.mubr.bf16.gmra.mrb[80].mxu1 %v13800_v34 }
 0x12d   : > { %10766 = vmatprep.mubr.msk.bf16.mxu0 %vm3135_vm0, %v13801_v35  ;;  %10894 = vmatprep.mubr.msk.bf16.mxu1 %vm3135_vm0, %v13803_v36  ;;  %v13849_v35 = vld [vmem:[%s14799_s30 + $0x1d4] ss:$8 sps:$4 sm:$0xff]  }
 0x12e   : > { %v13851_v36 = vld [vmem:[%s14799_s30 + $0x9d4] ss:$8 sps:$4 sm:$0xff]  }
 0x134   : > { %4112 = vmatmul.mubr.bf16.gmra.mrb[84].mxu0 %v13805_v37  ;;  %5136 = vmatmul.mubr.bf16.gmra.mrb[84].mxu1 %v13806_v38 }
 0x135   : > { %10767 = vmatprep.mubr.msk.bf16.mxu0 %vm3135_vm0, %v13807_v39  ;;  %10895 = vmatprep.mubr.msk.bf16.mxu1 %vm3135_vm0, %v13809_v40 }
 0x13c   : > { %4120 = vmatmul.mubr.bf16.gmra.mrb[88].mxu0 %v13811_v41  ;;  %5144 = vmatmul.mubr.bf16.gmra.mrb[88].mxu1 %v13812_v42 }
 0x13d   : > { %10768 = vmatprep.mubr.msk.bf16.mxu0 %vm3135_vm0, %v13813_v43  ;;  %10896 = vmatprep.mubr.msk.bf16.mxu1 %vm3135_vm0, %v13815_v44 }
 0x144   : > { %4128 = vmatmul.mubr.bf16.gmra.mrb[92].mxu0 %v13817_v45  ;;  %5152 = vmatmul.mubr.bf16.gmra.mrb[92].mxu1 %v13818_v46 }
 0x145   : > { %10769 = vmatprep.mubr.msk.bf16.mxu0 %vm3135_vm0, %v13819_v47  ;;  %10897 = vmatprep.mubr.msk.bf16.mxu1 %vm3135_vm0, %v13821_v48 }
 0x14c   : > { %4136 = vmatmul.mubr.bf16.gmra.mrb[96].mxu0 %v13823_v49  ;;  %5160 = vmatmul.mubr.bf16.gmra.mrb[96].mxu1 %v13824_v50 }
 0x14d   : > { %10770 = vmatprep.mubr.msk.bf16.mxu0 %vm3135_vm0, %v13825_v51  ;;  %10898 = vmatprep.mubr.msk.bf16.mxu1 %vm3135_vm0, %v13827_v52 }
 0x154   : > { %4144 = vmatmul.mubr.bf16.gmra.mrb[100].mxu0 %v13829_v53  ;;  %5168 = vmatmul.mubr.bf16.gmra.mrb[100].mxu1 %v13830_v54 }
 0x155   : > { %10771 = vmatprep.mubr.msk.bf16.mxu0 %vm3135_vm0, %v13831_v55  ;;  %10899 = vmatprep.mubr.msk.bf16.mxu1 %vm3135_vm0, %v13833_v56 }
 0x15c   : > { %4152 = vmatmul.mubr.bf16.gmra.mrb[104].mxu0 %v13835_v57  ;;  %5176 = vmatmul.mubr.bf16.gmra.mrb[104].mxu1 %v13836_v58  ;;  %v13853_v57 = vld [vmem:[%s14799_s30 + $0x1d0] ss:$8 sps:$4 sm:$0xff]  }
 0x15d   : > { %10772 = vmatprep.mubr.msk.bf16.mxu0 %vm3135_vm0, %v13837_v59  ;;  %10900 = vmatprep.mubr.msk.bf16.mxu1 %vm3135_vm0, %v13839_v60  ;;  %v13854_v58 = vld [vmem:[%s14799_s30 + $0x9d0] ss:$8 sps:$4 sm:$0xff]  }
 0x15f   : > { %v3945_v62 = vpop.f32.mrb[0].mxu0  ;;  %v4969_v0 = vpop.f32.mrb[0].mxu1 }
 0x160   : > { %v5999_v2 = vmul.f32 %v14979_v61, %v3945_v62  ;;  %v6255_v3 = vmul.f32 %v14979_v61, %v4969_v0  ;;  %v3947_v4 = vpop.f32.mrb[1].mxu0  ;;  %v4971_v5 = vpop.f32.mrb[1].mxu1  ;;  %v13855_v62 = vld [vmem:[%s14799_s30 + $0x1e4] ss:$8 sps:$4 sm:$0xff]  }
 0x161   : > { %v3948_v7 = vpop.f32.mrb[2].mxu0  ;;  %v4972_v8 = vpop.f32.mrb[2].mxu1  ;;  %v13857_v0 = vld [vmem:[%s14799_s30 + $0x9e4] ss:$8 sps:$4 sm:$0xff]  }
 0x162   : > { %v6518_v11 = vadd.f32 %v14983_v63, %v5999_v2  ;;  %v6774_v12 = vadd.f32 %v14983_v63, %v6255_v3  ;;  %v6000_v13 = vmul.f32 %v14979_v61, %v3948_v7  ;;  %v6256_v14 = vmul.f32 %v14979_v61, %v4972_v8  ;;  %v3950_v15 = vpop.f32.mrb[3].mxu0  ;;  %v4974_v16 = vpop.f32.mrb[3].mxu1 }
 0x164   : > { %v6519_v17 = vadd.f32 %v14983_v63, %v6000_v13  ;;  %v6775_v18 = vadd.f32 %v14983_v63, %v6256_v14  ;;  %4160 = vmatmul.mubr.bf16.gmra.mrb[108].mxu0 %v13841_v1  ;;  %5184 = vmatmul.mubr.bf16.gmra.mrb[108].mxu1 %v13842_v6  ;;  %v7030_v19 = vmax.f32 %v6518_v11, 0.0  ;;  %v7286_v20 = vmax.f32 %v6774_v12, 0.0 }
 0x165   : > { %10773 = vmatprep.mubr.msk.bf16.mxu0 %vm3135_vm0, %v13843_v9  ;;  %10901 = vmatprep.mubr.msk.bf16.mxu1 %vm3135_vm0, %v13845_v10 }
 0x166   : > { %v7031_v21 = vmax.f32 %v6519_v17, 0.0  ;;  %v7287_v22 = vmax.f32 %v6775_v18, 0.0 }
 0x167   : > { %v3953_v23 = vpop.f32.mrb[4].mxu0  ;;  %v4977_v24 = vpop.f32.mrb[4].mxu1 }
 0x168   : > { %v12037_v25 = vpack.c.bf16 %v7031_v21, %v7030_v19  ;;  %v12677_v26 = vpack.c.bf16 %v7287_v22, %v7286_v20  ;;  %v6001_v27 = vmul.f32 %v14979_v61, %v3953_v23  ;;  %v6257_v28 = vmul.f32 %v14979_v61, %v4977_v24  ;;  %v3955_v29 = vpop.f32.mrb[5].mxu0  ;;  %v4979_v30 = vpop.f32.mrb[5].mxu1  ;;  %v13859_v21 = vld [vmem:[%s14799_s30 + $0x1e0] ss:$8 sps:$4 sm:$0xff]  }
 0x169   : > { %v3956_v33 = vpop.f32.mrb[6].mxu0  ;;  %v4980_v34 = vpop.f32.mrb[6].mxu1  ;;  %v13860_v22 = vld [vmem:[%s14799_s30 + $0x9e0] ss:$8 sps:$4 sm:$0xff]  }
 0x16a   : > { %12038 = vst [vmem:[%s15008_s10] sm:$0xff] %v12037_v25   ;;  %13441 = vst [vmem:[%s15008_s10 + $0x400] sm:$0xff] %v12677_v26   ;;  %v6520_v37 = vadd.f32 %v14983_v63, %v6001_v27  ;;  %v6776_v38 = vadd.f32 %v14983_v63, %v6257_v28  ;;  %v6002_v39 = vmul.f32 %v14979_v61, %v3956_v33  ;;  %v3958_v41 = vpop.f32.mrb[7].mxu0  ;;  %v4982_v42 = vpop.f32.mrb[7].mxu1  ;;  %v13861_v25 = vld [vmem:[%s14799_s30 + $0x1f4] ss:$8 sps:$4 sm:$0xff]  }
 0x16b   : > { %v6258_v40 = vmul.f32 %v14979_v61, %v4980_v34  ;;  %v13863_v26 = vld [vmem:[%s14799_s30 + $0x9f4] ss:$8 sps:$4 sm:$0xff]  }
 0x16c   : > { %v6521_v43 = vadd.f32 %v14983_v63, %v6002_v39  ;;  %4168 = vmatmul.mubr.bf16.gmra.mrb[112].mxu0 %v13847_v31  ;;  %5192 = vmatmul.mubr.bf16.gmra.mrb[112].mxu1 %v13848_v32  ;;  %v7032_v45 = vmax.f32 %v6520_v37, 0.0  ;;  %v7288_v46 = vmax.f32 %v6776_v38, 0.0 }
 0x16d   : > { %v6777_v44 = vadd.f32 %v14983_v63, %v6258_v40  ;;  %10774 = vmatprep.mubr.msk.bf16.mxu0 %vm3135_vm0, %v13849_v35  ;;  %10902 = vmatprep.mubr.msk.bf16.mxu1 %vm3135_vm0, %v13851_v36 }
 0x16e   : > { %v7033_v47 = vmax.f32 %v6521_v43, 0.0 }
 0x16f   : > { %v7289_v48 = vmax.f32 %v6777_v44, 0.0  ;;  %v3961_v49 = vpop.f32.mrb[8].mxu0  ;;  %v4985_v50 = vpop.f32.mrb[8].mxu1 }
 0x170   : > { %v12042_v51 = vpack.c.bf16 %v7033_v47, %v7032_v45  ;;  %v6003_v53 = vmul.f32 %v14979_v61, %v3961_v49  ;;  %v6259_v54 = vmul.f32 %v14979_v61, %v4985_v50  ;;  %v3963_v55 = vpop.f32.mrb[9].mxu0  ;;  %v4987_v56 = vpop.f32.mrb[9].mxu1  ;;  %v13865_v47 = vld [vmem:[%s14799_s30 + $0x1f0] ss:$8 sps:$4 sm:$0xff]  }
 0x171   : > { %v12682_v52 = vpack.c.bf16 %v7289_v48, %v7288_v46  ;;  %v3964_v59 = vpop.f32.mrb[10].mxu0  ;;  %v4988_v60 = vpop.f32.mrb[10].mxu1  ;;  %v13866_v48 = vld [vmem:[%s14799_s30 + $0x9f0] ss:$8 sps:$4 sm:$0xff]  }
 0x172   : > { %13314 = vst [vmem:[%s15008_s10 + $0x8] sm:$0xff] %v12042_v51   ;;  %v6522_v1 = vadd.f32 %v14983_v63, %v6003_v53  ;;  %v6778_v2 = vadd.f32 %v14983_v63, %v6259_v54  ;;  %v6004_v3 = vmul.f32 %v14979_v61, %v3964_v59  ;;  %v6260_v4 = vmul.f32 %v14979_v61, %v4988_v60  ;;  %v3966_v5 = vpop.f32.mrb[11].mxu0  ;;  %v4990_v6 = vpop.f32.mrb[11].mxu1  ;;  %v13867_v51 = vld [vmem:[%s14799_s30 + $0x204] ss:$8 sps:$4 sm:$0xff]  }
 0x173   : > { %13442 = vst [vmem:[%s15008_s10 + $0x408] sm:$0xff] %v12682_v52   ;;  %v13869_v52 = vld [vmem:[%s14799_s30 + $0xa04] ss:$8 sps:$4 sm:$0xff]  }
 0x174   : > { %v6523_v7 = vadd.f32 %v14983_v63, %v6004_v3  ;;  %v6779_v8 = vadd.f32 %v14983_v63, %v6260_v4  ;;  %4176 = vmatmul.mubr.bf16.gmra.mrb[116].mxu0 %v13853_v57  ;;  %5200 = vmatmul.mubr.bf16.gmra.mrb[116].mxu1 %v13854_v58  ;;  %v7034_v9 = vmax.f32 %v6522_v1, 0.0  ;;  %v7290_v10 = vmax.f32 %v6778_v2, 0.0 }
 0x175   : > { %10775 = vmatprep.mubr.msk.bf16.mxu0 %vm3135_vm0, %v13855_v62  ;;  %10903 = vmatprep.mubr.msk.bf16.mxu1 %vm3135_vm0, %v13857_v0 }
 0x176   : > { %v7035_v11 = vmax.f32 %v6523_v7, 0.0  ;;  %v7291_v12 = vmax.f32 %v6779_v8, 0.0 }
 0x177   : > { %v3969_v13 = vpop.f32.mrb[12].mxu0  ;;  %v4993_v14 = vpop.f32.mrb[12].mxu1 }
 0x178   : > { %v12047_v15 = vpack.c.bf16 %v7035_v11, %v7034_v9  ;;  %v12687_v16 = vpack.c.bf16 %v7291_v12, %v7290_v10  ;;  %v6005_v17 = vmul.f32 %v14979_v61, %v3969_v13  ;;  %v6261_v18 = vmul.f32 %v14979_v61, %v4993_v14  ;;  %v3971_v19 = vpop.f32.mrb[13].mxu0  ;;  %v4995_v20 = vpop.f32.mrb[13].mxu1  ;;  %v13871_v11 = vld [vmem:[%s14799_s30 + $0x200] ss:$8 sps:$4 sm:$0xff]  }
 0x179   : > { %v3972_v23 = vpop.f32.mrb[14].mxu0  ;;  %v4996_v24 = vpop.f32.mrb[14].mxu1  ;;  %v13872_v12 = vld [vmem:[%s14799_s30 + $0xa00] ss:$8 sps:$4 sm:$0xff]  }
 0x17a   : > { %13315 = vst [vmem:[%s15008_s10 + $0x10] sm:$0xff] %v12047_v15   ;;  %13443 = vst [vmem:[%s15008_s10 + $0x410] sm:$0xff] %v12687_v16   ;;  %v6524_v27 = vadd.f32 %v14983_v63, %v6005_v17  ;;  %v6780_v28 = vadd.f32 %v14983_v63, %v6261_v18  ;;  %v6006_v29 = vmul.f32 %v14979_v61, %v3972_v23  ;;  %v3974_v31 = vpop.f32.mrb[15].mxu0  ;;  %v4998_v32 = vpop.f32.mrb[15].mxu1  ;;  %v13873_v15 = vld [vmem:[%s14799_s30 + $0x214] ss:$8 sps:$4 sm:$0xff]  }
 0x17b   : > { %v6262_v30 = vmul.f32 %v14979_v61, %v4996_v24  ;;  %v13875_v16 = vld [vmem:[%s14799_s30 + $0xa14] ss:$8 sps:$4 sm:$0xff]  }
 0x17c   : > { %v6525_v33 = vadd.f32 %v14983_v63, %v6006_v29  ;;  %4184 = vmatmul.mubr.bf16.gmra.mrb[120].mxu0 %v13859_v21  ;;  %5208 = vmatmul.mubr.bf16.gmra.mrb[120].mxu1 %v13860_v22  ;;  %v7036_v35 = vmax.f32 %v6524_v27, 0.0  ;;  %v7292_v36 = vmax.f32 %v6780_v28, 0.0 }
 0x17d   : > { %v6781_v34 = vadd.f32 %v14983_v63, %v6262_v30  ;;  %10776 = vmatprep.mubr.msk.bf16.mxu0 %vm3135_vm0, %v13861_v25  ;;  %10904 = vmatprep.mubr.msk.bf16.mxu1 %vm3135_vm0, %v13863_v26 }
 0x17e   : > { %v7037_v37 = vmax.f32 %v6525_v33, 0.0 }
 0x17f   : > { %v7293_v38 = vmax.f32 %v6781_v34, 0.0  ;;  %v3977_v39 = vpop.f32.mrb[16].mxu0  ;;  %v5001_v40 = vpop.f32.mrb[16].mxu1 }
 0x180   : > { %v12052_v41 = vpack.c.bf16 %v7037_v37, %v7036_v35  ;;  %v6007_v43 = vmul.f32 %v14979_v61, %v3977_v39  ;;  %v6263_v44 = vmul.f32 %v14979_v61, %v5001_v40  ;;  %v3979_v45 = vpop.f32.mrb[17].mxu0  ;;  %v5003_v46 = vpop.f32.mrb[17].mxu1  ;;  %v13877_v37 = vld [vmem:[%s14799_s30 + $0x210] ss:$8 sps:$4 sm:$0xff]  }
 0x181   : > { %v12692_v42 = vpack.c.bf16 %v7293_v38, %v7292_v36  ;;  %v3980_v49 = vpop.f32.mrb[18].mxu0  ;;  %v5004_v50 = vpop.f32.mrb[18].mxu1  ;;  %v13878_v38 = vld [vmem:[%s14799_s30 + $0xa10] ss:$8 sps:$4 sm:$0xff]  }
 0x182   : > { %13316 = vst [vmem:[%s15008_s10 + $0x18] sm:$0xff] %v12052_v41   ;;  %v6526_v53 = vadd.f32 %v14983_v63, %v6007_v43  ;;  %v6782_v54 = vadd.f32 %v14983_v63, %v6263_v44  ;;  %v6008_v55 = vmul.f32 %v14979_v61, %v3980_v49  ;;  %v6264_v56 = vmul.f32 %v14979_v61, %v5004_v50  ;;  %v3982_v57 = vpop.f32.mrb[19].mxu0  ;;  %v5006_v58 = vpop.f32.mrb[19].mxu1  ;;  %v13879_v41 = vld [vmem:[%s14799_s30 + $0x224] ss:$8 sps:$4 sm:$0xff]  }
 0x183   : > { %13444 = vst [vmem:[%s15008_s10 + $0x418] sm:$0xff] %v12692_v42   ;;  %v13881_v42 = vld [vmem:[%s14799_s30 + $0xa24] ss:$8 sps:$4 sm:$0xff]  }
 0x184   : > { %v6527_v59 = vadd.f32 %v14983_v63, %v6008_v55  ;;  %v6783_v60 = vadd.f32 %v14983_v63, %v6264_v56  ;;  %4192 = vmatmul.mubr.bf16.gmra.mrb[124].mxu0 %v13865_v47  ;;  %5216 = vmatmul.mubr.bf16.gmra.mrb[124].mxu1 %v13866_v48  ;;  %v7038_v62 = vmax.f32 %v6526_v53, 0.0  ;;  %v7294_v0 = vmax.f32 %v6782_v54, 0.0 }
 0x185   : > { %10777 = vmatprep.mubr.msk.bf16.mxu0 %vm3135_vm0, %v13867_v51  ;;  %10905 = vmatprep.mubr.msk.bf16.mxu1 %vm3135_vm0, %v13869_v52 }
 0x186   : > { %v7039_v1 = vmax.f32 %v6527_v59, 0.0  ;;  %v7295_v2 = vmax.f32 %v6783_v60, 0.0 }
 0x187   : > { %v3985_v3 = vpop.f32.mrb[20].mxu0  ;;  %v5009_v4 = vpop.f32.mrb[20].mxu1 }
 0x188   : > { %v12057_v5 = vpack.c.bf16 %v7039_v1, %v7038_v62  ;;  %v12697_v6 = vpack.c.bf16 %v7295_v2, %v7294_v0  ;;  %v6009_v7 = vmul.f32 %v14979_v61, %v3985_v3  ;;  %v6265_v8 = vmul.f32 %v14979_v61, %v5009_v4  ;;  %v3987_v9 = vpop.f32.mrb[21].mxu0  ;;  %v5011_v10 = vpop.f32.mrb[21].mxu1  ;;  %v13883_v1 = vld [vmem:[%s14799_s30 + $0x220] ss:$8 sps:$4 sm:$0xff]  }
 0x189   : > { %v3988_v13 = vpop.f32.mrb[22].mxu0  ;;  %v5012_v14 = vpop.f32.mrb[22].mxu1  ;;  %v13884_v2 = vld [vmem:[%s14799_s30 + $0xa20] ss:$8 sps:$4 sm:$0xff]  }
 0x18a   : > { %13317 = vst [vmem:[%s15008_s10 + $0x20] sm:$0xff] %v12057_v5   ;;  %13445 = vst [vmem:[%s15008_s10 + $0x420] sm:$0xff] %v12697_v6   ;;  %v6528_v17 = vadd.f32 %v14983_v63, %v6009_v7  ;;  %v6784_v18 = vadd.f32 %v14983_v63, %v6265_v8  ;;  %v6010_v19 = vmul.f32 %v14979_v61, %v3988_v13  ;;  %v3990_v21 = vpop.f32.mrb[23].mxu0  ;;  %v5014_v22 = vpop.f32.mrb[23].mxu1  ;;  %v13885_v5 = vld [vmem:[%s14799_s30 + $0x234] ss:$8 sps:$4 sm:$0xff]  }
 0x18b   : > { %v6266_v20 = vmul.f32 %v14979_v61, %v5012_v14  ;;  %v13887_v6 = vld [vmem:[%s14799_s30 + $0xa34] ss:$8 sps:$4 sm:$0xff]  }
 0x18c   : > { %v6529_v23 = vadd.f32 %v14983_v63, %v6010_v19  ;;  %4200 = vmatmul.mubr.bf16.gmra.mrb[128].mxu0 %v13871_v11  ;;  %5224 = vmatmul.mubr.bf16.gmra.mrb[128].mxu1 %v13872_v12  ;;  %v7040_v25 = vmax.f32 %v6528_v17, 0.0  ;;  %v7296_v26 = vmax.f32 %v6784_v18, 0.0 }
 0x18d   : > { %v6785_v24 = vadd.f32 %v14983_v63, %v6266_v20  ;;  %10778 = vmatprep.mubr.msk.bf16.mxu0 %vm3135_vm0, %v13873_v15  ;;  %10906 = vmatprep.mubr.msk.bf16.mxu1 %vm3135_vm0, %v13875_v16 }
 0x18e   : > { %v7041_v27 = vmax.f32 %v6529_v23, 0.0 }
 0x18f   : > { %v7297_v28 = vmax.f32 %v6785_v24, 0.0  ;;  %v3993_v29 = vpop.f32.mrb[24].mxu0  ;;  %v5017_v30 = vpop.f32.mrb[24].mxu1 }
 0x190   : > { %v12062_v31 = vpack.c.bf16 %v7041_v27, %v7040_v25  ;;  %v6011_v33 = vmul.f32 %v14979_v61, %v3993_v29  ;;  %v6267_v34 = vmul.f32 %v14979_v61, %v5017_v30  ;;  %v3995_v35 = vpop.f32.mrb[25].mxu0  ;;  %v5019_v36 = vpop.f32.mrb[25].mxu1  ;;  %v13889_v27 = vld [vmem:[%s14799_s30 + $0x230] ss:$8 sps:$4 sm:$0xff]  }
 0x191   : > { %v12702_v32 = vpack.c.bf16 %v7297_v28, %v7296_v26  ;;  %v3996_v39 = vpop.f32.mrb[26].mxu0  ;;  %v5020_v40 = vpop.f32.mrb[26].mxu1  ;;  %v13890_v28 = vld [vmem:[%s14799_s30 + $0xa30] ss:$8 sps:$4 sm:$0xff]  }
 0x192   : > { %13318 = vst [vmem:[%s15008_s10 + $0x28] sm:$0xff] %v12062_v31   ;;  %v6530_v43 = vadd.f32 %v14983_v63, %v6011_v33  ;;  %v6786_v44 = vadd.f32 %v14983_v63, %v6267_v34  ;;  %v6012_v45 = vmul.f32 %v14979_v61, %v3996_v39  ;;  %v6268_v46 = vmul.f32 %v14979_v61, %v5020_v40  ;;  %v3998_v47 = vpop.f32.mrb[27].mxu0  ;;  %v5022_v48 = vpop.f32.mrb[27].mxu1  ;;  %v13891_v31 = vld [vmem:[%s14799_s30 + $0x244] ss:$8 sps:$4 sm:$0xff]  }
 0x193   : > { %13446 = vst [vmem:[%s15008_s10 + $0x428] sm:$0xff] %v12702_v32   ;;  %v13893_v32 = vld [vmem:[%s14799_s30 + $0xa44] ss:$8 sps:$4 sm:$0xff]  }
 0x194   : > { %v6531_v49 = vadd.f32 %v14983_v63, %v6012_v45  ;;  %v6787_v50 = vadd.f32 %v14983_v63, %v6268_v46  ;;  %4208 = vmatmul.mubr.bf16.gmra.mrb[132].mxu0 %v13877_v37  ;;  %5232 = vmatmul.mubr.bf16.gmra.mrb[132].mxu1 %v13878_v38  ;;  %v7042_v51 = vmax.f32 %v6530_v43, 0.0  ;;  %v7298_v52 = vmax.f32 %v6786_v44, 0.0 }
 0x195   : > { %10779 = vmatprep.mubr.msk.bf16.mxu0 %vm3135_vm0, %v13879_v41  ;;  %10907 = vmatprep.mubr.msk.bf16.mxu1 %vm3135_vm0, %v13881_v42 }
 0x196   : > { %v7043_v53 = vmax.f32 %v6531_v49, 0.0  ;;  %v7299_v54 = vmax.f32 %v6787_v50, 0.0 }
 0x197   : > { %v4001_v55 = vpop.f32.mrb[28].mxu0  ;;  %v5025_v56 = vpop.f32.mrb[28].mxu1 }
 0x198   : > { %v12067_v57 = vpack.c.bf16 %v7043_v53, %v7042_v51  ;;  %v12707_v58 = vpack.c.bf16 %v7299_v54, %v7298_v52  ;;  %v6013_v59 = vmul.f32 %v14979_v61, %v4001_v55  ;;  %v6269_v60 = vmul.f32 %v14979_v61, %v5025_v56  ;;  %v4003_v62 = vpop.f32.mrb[29].mxu0  ;;  %v5027_v0 = vpop.f32.mrb[29].mxu1  ;;  %v13895_v53 = vld [vmem:[%s14799_s30 + $0x240] ss:$8 sps:$4 sm:$0xff]  }
 0x199   : > { %v4004_v3 = vpop.f32.mrb[30].mxu0  ;;  %v5028_v4 = vpop.f32.mrb[30].mxu1  ;;  %v13896_v54 = vld [vmem:[%s14799_s30 + $0xa40] ss:$8 sps:$4 sm:$0xff]  }
 0x19a   : > { %13319 = vst [vmem:[%s15008_s10 + $0x30] sm:$0xff] %v12067_v57   ;;  %13447 = vst [vmem:[%s15008_s10 + $0x430] sm:$0xff] %v12707_v58   ;;  %v6532_v7 = vadd.f32 %v14983_v63, %v6013_v59  ;;  %v6788_v8 = vadd.f32 %v14983_v63, %v6269_v60  ;;  %v6014_v9 = vmul.f32 %v14979_v61, %v4004_v3  ;;  %v4006_v11 = vpop.f32.mrb[31].mxu0  ;;  %v5030_v12 = vpop.f32.mrb[31].mxu1  ;;  %v13897_v57 = vld [vmem:[%s14799_s30 + $0x254] ss:$8 sps:$4 sm:$0xff]  }
 0x19b   : > { %v6270_v10 = vmul.f32 %v14979_v61, %v5028_v4  ;;  %v13899_v58 = vld [vmem:[%s14799_s30 + $0xa54] ss:$8 sps:$4 sm:$0xff]  }
 0x19c   : > { %v6533_v13 = vadd.f32 %v14983_v63, %v6014_v9  ;;  %4216 = vmatmul.mubr.bf16.gmra.mrb[136].mxu0 %v13883_v1  ;;  %5240 = vmatmul.mubr.bf16.gmra.mrb[136].mxu1 %v13884_v2  ;;  %v7044_v15 = vmax.f32 %v6532_v7, 0.0  ;;  %v7300_v16 = vmax.f32 %v6788_v8, 0.0 }
 0x19d   : > { %v6789_v14 = vadd.f32 %v14983_v63, %v6270_v10  ;;  %10780 = vmatprep.mubr.msk.bf16.mxu0 %vm3135_vm0, %v13885_v5  ;;  %10908 = vmatprep.mubr.msk.bf16.mxu1 %vm3135_vm0, %v13887_v6 }
 0x19e   : > { %v7045_v17 = vmax.f32 %v6533_v13, 0.0 }
 0x19f   : > { %v7301_v18 = vmax.f32 %v6789_v14, 0.0  ;;  %v4009_v19 = vpop.f32.mrb[32].mxu0  ;;  %v5033_v20 = vpop.f32.mrb[32].mxu1 }
 0x1a0   : > { %v12072_v21 = vpack.c.bf16 %v7045_v17, %v7044_v15  ;;  %v6015_v23 = vmul.f32 %v14979_v61, %v4009_v19  ;;  %v6271_v24 = vmul.f32 %v14979_v61, %v5033_v20  ;;  %v4011_v25 = vpop.f32.mrb[33].mxu0  ;;  %v5035_v26 = vpop.f32.mrb[33].mxu1  ;;  %v13901_v17 = vld [vmem:[%s14799_s30 + $0x250] ss:$8 sps:$4 sm:$0xff]  }
 0x1a1   : > { %v12712_v22 = vpack.c.bf16 %v7301_v18, %v7300_v16  ;;  %v4012_v29 = vpop.f32.mrb[34].mxu0  ;;  %v5036_v30 = vpop.f32.mrb[34].mxu1  ;;  %v13902_v18 = vld [vmem:[%s14799_s30 + $0xa50] ss:$8 sps:$4 sm:$0xff]  }
 0x1a2   : > { %13320 = vst [vmem:[%s15008_s10 + $0x38] sm:$0xff] %v12072_v21   ;;  %v6534_v33 = vadd.f32 %v14983_v63, %v6015_v23  ;;  %v6790_v34 = vadd.f32 %v14983_v63, %v6271_v24  ;;  %v6016_v35 = vmul.f32 %v14979_v61, %v4012_v29  ;;  %v6272_v36 = vmul.f32 %v14979_v61, %v5036_v30  ;;  %v4014_v37 = vpop.f32.mrb[35].mxu0  ;;  %v5038_v38 = vpop.f32.mrb[35].mxu1  ;;  %v13903_v21 = vld [vmem:[%s14799_s30 + $0x264] ss:$8 sps:$4 sm:$0xff]  }
 0x1a3   : > { %13448 = vst [vmem:[%s15008_s10 + $0x438] sm:$0xff] %v12712_v22   ;;  %v13905_v22 = vld [vmem:[%s14799_s30 + $0xa64] ss:$8 sps:$4 sm:$0xff]  }
 0x1a4   : > { %v6535_v39 = vadd.f32 %v14983_v63, %v6016_v35  ;;  %v6791_v40 = vadd.f32 %v14983_v63, %v6272_v36  ;;  %4224 = vmatmul.mubr.bf16.gmra.mrb[140].mxu0 %v13889_v27  ;;  %5248 = vmatmul.mubr.bf16.gmra.mrb[140].mxu1 %v13890_v28  ;;  %v7046_v41 = vmax.f32 %v6534_v33, 0.0  ;;  %v7302_v42 = vmax.f32 %v6790_v34, 0.0 }
 0x1a5   : > { %10781 = vmatprep.mubr.msk.bf16.mxu0 %vm3135_vm0, %v13891_v31  ;;  %10909 = vmatprep.mubr.msk.bf16.mxu1 %vm3135_vm0, %v13893_v32 }
 0x1a6   : > { %v7047_v43 = vmax.f32 %v6535_v39, 0.0  ;;  %v7303_v44 = vmax.f32 %v6791_v40, 0.0 }
 0x1a7   : > { %v4017_v45 = vpop.f32.mrb[36].mxu0  ;;  %v5041_v46 = vpop.f32.mrb[36].mxu1 }
 0x1a8   : > { %v12077_v47 = vpack.c.bf16 %v7047_v43, %v7046_v41  ;;  %v12717_v48 = vpack.c.bf16 %v7303_v44, %v7302_v42  ;;  %v6017_v49 = vmul.f32 %v14979_v61, %v4017_v45  ;;  %v6273_v50 = vmul.f32 %v14979_v61, %v5041_v46  ;;  %v4019_v51 = vpop.f32.mrb[37].mxu0  ;;  %v5043_v52 = vpop.f32.mrb[37].mxu1  ;;  %v13907_v43 = vld [vmem:[%s14799_s30 + $0x260] ss:$8 sps:$4 sm:$0xff]  }
 0x1a9   : > { %v4020_v55 = vpop.f32.mrb[38].mxu0  ;;  %v5044_v56 = vpop.f32.mrb[38].mxu1  ;;  %v13908_v44 = vld [vmem:[%s14799_s30 + $0xa60] ss:$8 sps:$4 sm:$0xff]  }
 0x1aa   : > { %13321 = vst [vmem:[%s15008_s10 + $0x40] sm:$0xff] %v12077_v47   ;;  %13449 = vst [vmem:[%s15008_s10 + $0x440] sm:$0xff] %v12717_v48   ;;  %v6536_v59 = vadd.f32 %v14983_v63, %v6017_v49  ;;  %v6792_v60 = vadd.f32 %v14983_v63, %v6273_v50  ;;  %v6018_v62 = vmul.f32 %v14979_v61, %v4020_v55  ;;  %v4022_v1 = vpop.f32.mrb[39].mxu0  ;;  %v5046_v2 = vpop.f32.mrb[39].mxu1  ;;  %v13909_v47 = vld [vmem:[%s14799_s30 + $0x274] ss:$8 sps:$4 sm:$0xff]  }
 0x1ab   : > { %v6274_v0 = vmul.f32 %v14979_v61, %v5044_v56  ;;  %v13911_v48 = vld [vmem:[%s14799_s30 + $0xa74] ss:$8 sps:$4 sm:$0xff]  }
 0x1ac   : > { %v6537_v3 = vadd.f32 %v14983_v63, %v6018_v62  ;;  %4232 = vmatmul.mubr.bf16.gmra.mrb[144].mxu0 %v13895_v53  ;;  %5256 = vmatmul.mubr.bf16.gmra.mrb[144].mxu1 %v13896_v54  ;;  %v7048_v5 = vmax.f32 %v6536_v59, 0.0  ;;  %v7304_v6 = vmax.f32 %v6792_v60, 0.0 }
 0x1ad   : > { %v6793_v4 = vadd.f32 %v14983_v63, %v6274_v0  ;;  %10782 = vmatprep.mubr.msk.bf16.mxu0 %vm3135_vm0, %v13897_v57  ;;  %10910 = vmatprep.mubr.msk.bf16.mxu1 %vm3135_vm0, %v13899_v58 }
 0x1ae   : > { %v7049_v7 = vmax.f32 %v6537_v3, 0.0 }
 0x1af   : > { %v7305_v8 = vmax.f32 %v6793_v4, 0.0  ;;  %v4025_v9 = vpop.f32.mrb[40].mxu0  ;;  %v5049_v10 = vpop.f32.mrb[40].mxu1 }
 0x1b0   : > { %v12082_v11 = vpack.c.bf16 %v7049_v7, %v7048_v5  ;;  %v6019_v13 = vmul.f32 %v14979_v61, %v4025_v9  ;;  %v6275_v14 = vmul.f32 %v14979_v61, %v5049_v10  ;;  %v4027_v15 = vpop.f32.mrb[41].mxu0  ;;  %v5051_v16 = vpop.f32.mrb[41].mxu1  ;;  %v13913_v7 = vld [vmem:[%s14799_s30 + $0x270] ss:$8 sps:$4 sm:$0xff]  }
 0x1b1   : > { %v12722_v12 = vpack.c.bf16 %v7305_v8, %v7304_v6  ;;  %v4028_v19 = vpop.f32.mrb[42].mxu0  ;;  %v5052_v20 = vpop.f32.mrb[42].mxu1  ;;  %v13914_v8 = vld [vmem:[%s14799_s30 + $0xa70] ss:$8 sps:$4 sm:$0xff]  }
 0x1b2   : > { %13322 = vst [vmem:[%s15008_s10 + $0x48] sm:$0xff] %v12082_v11   ;;  %v6538_v23 = vadd.f32 %v14983_v63, %v6019_v13  ;;  %v6794_v24 = vadd.f32 %v14983_v63, %v6275_v14  ;;  %v6020_v25 = vmul.f32 %v14979_v61, %v4028_v19  ;;  %v6276_v26 = vmul.f32 %v14979_v61, %v5052_v20  ;;  %v4030_v27 = vpop.f32.mrb[43].mxu0  ;;  %v5054_v28 = vpop.f32.mrb[43].mxu1  ;;  %v13915_v11 = vld [vmem:[%s14799_s30 + $0x284] ss:$8 sps:$4 sm:$0xff]  }
 0x1b3   : > { %13450 = vst [vmem:[%s15008_s10 + $0x448] sm:$0xff] %v12722_v12   ;;  %v13917_v12 = vld [vmem:[%s14799_s30 + $0xa84] ss:$8 sps:$4 sm:$0xff]  }
 0x1b4   : > { %v6539_v29 = vadd.f32 %v14983_v63, %v6020_v25  ;;  %v6795_v30 = vadd.f32 %v14983_v63, %v6276_v26  ;;  %4240 = vmatmul.mubr.bf16.gmra.mrb[148].mxu0 %v13901_v17  ;;  %5264 = vmatmul.mubr.bf16.gmra.mrb[148].mxu1 %v13902_v18  ;;  %v7050_v31 = vmax.f32 %v6538_v23, 0.0  ;;  %v7306_v32 = vmax.f32 %v6794_v24, 0.0 }
 0x1b5   : > { %10783 = vmatprep.mubr.msk.bf16.mxu0 %vm3135_vm0, %v13903_v21  ;;  %10911 = vmatprep.mubr.msk.bf16.mxu1 %vm3135_vm0, %v13905_v22 }
 0x1b6   : > { %v7051_v33 = vmax.f32 %v6539_v29, 0.0  ;;  %v7307_v34 = vmax.f32 %v6795_v30, 0.0 }
 0x1b7   : > { %v4033_v35 = vpop.f32.mrb[44].mxu0  ;;  %v5057_v36 = vpop.f32.mrb[44].mxu1 }
 0x1b8   : > { %v12087_v37 = vpack.c.bf16 %v7051_v33, %v7050_v31  ;;  %v12727_v38 = vpack.c.bf16 %v7307_v34, %v7306_v32  ;;  %v6021_v39 = vmul.f32 %v14979_v61, %v4033_v35  ;;  %v6277_v40 = vmul.f32 %v14979_v61, %v5057_v36  ;;  %v4035_v41 = vpop.f32.mrb[45].mxu0  ;;  %v5059_v42 = vpop.f32.mrb[45].mxu1  ;;  %v13919_v33 = vld [vmem:[%s14799_s30 + $0x280] ss:$8 sps:$4 sm:$0xff]  }
 0x1b9   : > { %v4036_v45 = vpop.f32.mrb[46].mxu0  ;;  %v5060_v46 = vpop.f32.mrb[46].mxu1  ;;  %v13920_v34 = vld [vmem:[%s14799_s30 + $0xa80] ss:$8 sps:$4 sm:$0xff]  }
 0x1ba   : > { %13323 = vst [vmem:[%s15008_s10 + $0x50] sm:$0xff] %v12087_v37   ;;  %13451 = vst [vmem:[%s15008_s10 + $0x450] sm:$0xff] %v12727_v38   ;;  %v6540_v49 = vadd.f32 %v14983_v63, %v6021_v39  ;;  %v6796_v50 = vadd.f32 %v14983_v63, %v6277_v40  ;;  %v6022_v51 = vmul.f32 %v14979_v61, %v4036_v45  ;;  %v4038_v53 = vpop.f32.mrb[47].mxu0  ;;  %v5062_v54 = vpop.f32.mrb[47].mxu1  ;;  %v13921_v37 = vld [vmem:[%s14799_s30 + $0x294] ss:$8 sps:$4 sm:$0xff]  }
 0x1bb   : > { %v6278_v52 = vmul.f32 %v14979_v61, %v5060_v46  ;;  %v13923_v38 = vld [vmem:[%s14799_s30 + $0xa94] ss:$8 sps:$4 sm:$0xff]  }
 0x1bc   : > { %v6541_v55 = vadd.f32 %v14983_v63, %v6022_v51  ;;  %4248 = vmatmul.mubr.bf16.gmra.mrb[152].mxu0 %v13907_v43  ;;  %5272 = vmatmul.mubr.bf16.gmra.mrb[152].mxu1 %v13908_v44  ;;  %v7052_v57 = vmax.f32 %v6540_v49, 0.0  ;;  %v7308_v58 = vmax.f32 %v6796_v50, 0.0 }
 0x1bd   : > { %v6797_v56 = vadd.f32 %v14983_v63, %v6278_v52  ;;  %10784 = vmatprep.mubr.msk.bf16.mxu0 %vm3135_vm0, %v13909_v47  ;;  %10912 = vmatprep.mubr.msk.bf16.mxu1 %vm3135_vm0, %v13911_v48 }
 0x1be   : > { %v7053_v59 = vmax.f32 %v6541_v55, 0.0 }
 0x1bf   : > { %v7309_v60 = vmax.f32 %v6797_v56, 0.0  ;;  %v4041_v62 = vpop.f32.mrb[48].mxu0  ;;  %v5065_v0 = vpop.f32.mrb[48].mxu1 }
 0x1c0   : > { %v12092_v1 = vpack.c.bf16 %v7053_v59, %v7052_v57  ;;  %v6023_v3 = vmul.f32 %v14979_v61, %v4041_v62  ;;  %v6279_v4 = vmul.f32 %v14979_v61, %v5065_v0  ;;  %v4043_v5 = vpop.f32.mrb[49].mxu0  ;;  %v5067_v6 = vpop.f32.mrb[49].mxu1  ;;  %v13925_v59 = vld [vmem:[%s14799_s30 + $0x290] ss:$8 sps:$4 sm:$0xff]  }
 0x1c1   : > { %v12732_v2 = vpack.c.bf16 %v7309_v60, %v7308_v58  ;;  %v4044_v9 = vpop.f32.mrb[50].mxu0  ;;  %v5068_v10 = vpop.f32.mrb[50].mxu1  ;;  %v13926_v60 = vld [vmem:[%s14799_s30 + $0xa90] ss:$8 sps:$4 sm:$0xff]  }
 0x1c2   : > { %13324 = vst [vmem:[%s15008_s10 + $0x58] sm:$0xff] %v12092_v1   ;;  %v6542_v13 = vadd.f32 %v14983_v63, %v6023_v3  ;;  %v6798_v14 = vadd.f32 %v14983_v63, %v6279_v4  ;;  %v6024_v15 = vmul.f32 %v14979_v61, %v4044_v9  ;;  %v6280_v16 = vmul.f32 %v14979_v61, %v5068_v10  ;;  %v4046_v17 = vpop.f32.mrb[51].mxu0  ;;  %v5070_v18 = vpop.f32.mrb[51].mxu1  ;;  %v13927_v1 = vld [vmem:[%s14799_s30 + $0x2a4] ss:$8 sps:$4 sm:$0xff]  }
 0x1c3   : > { %13452 = vst [vmem:[%s15008_s10 + $0x458] sm:$0xff] %v12732_v2   ;;  %v13929_v2 = vld [vmem:[%s14799_s30 + $0xaa4] ss:$8 sps:$4 sm:$0xff]  }
 0x1c4   : > { %v6543_v19 = vadd.f32 %v14983_v63, %v6024_v15  ;;  %v6799_v20 = vadd.f32 %v14983_v63, %v6280_v16  ;;  %4256 = vmatmul.mubr.bf16.gmra.mrb[156].mxu0 %v13913_v7  ;;  %5280 = vmatmul.mubr.bf16.gmra.mrb[156].mxu1 %v13914_v8  ;;  %v7054_v21 = vmax.f32 %v6542_v13, 0.0  ;;  %v7310_v22 = vmax.f32 %v6798_v14, 0.0 }
 0x1c5   : > { %10785 = vmatprep.mubr.msk.bf16.mxu0 %vm3135_vm0, %v13915_v11  ;;  %10913 = vmatprep.mubr.msk.bf16.mxu1 %vm3135_vm0, %v13917_v12 }
 0x1c6   : > { %v7055_v23 = vmax.f32 %v6543_v19, 0.0  ;;  %v7311_v24 = vmax.f32 %v6799_v20, 0.0 }
 0x1c7   : > { %v4049_v25 = vpop.f32.mrb[52].mxu0  ;;  %v5073_v26 = vpop.f32.mrb[52].mxu1 }
 0x1c8   : > { %v12097_v27 = vpack.c.bf16 %v7055_v23, %v7054_v21  ;;  %v12737_v28 = vpack.c.bf16 %v7311_v24, %v7310_v22  ;;  %v6025_v29 = vmul.f32 %v14979_v61, %v4049_v25  ;;  %v6281_v30 = vmul.f32 %v14979_v61, %v5073_v26  ;;  %v4051_v31 = vpop.f32.mrb[53].mxu0  ;;  %v5075_v32 = vpop.f32.mrb[53].mxu1  ;;  %v13931_v23 = vld [vmem:[%s14799_s30 + $0x2a0] ss:$8 sps:$4 sm:$0xff]  }
 0x1c9   : > { %v4052_v35 = vpop.f32.mrb[54].mxu0  ;;  %v5076_v36 = vpop.f32.mrb[54].mxu1  ;;  %v13932_v24 = vld [vmem:[%s14799_s30 + $0xaa0] ss:$8 sps:$4 sm:$0xff]  }
 0x1ca   : > { %13325 = vst [vmem:[%s15008_s10 + $0x60] sm:$0xff] %v12097_v27   ;;  %13453 = vst [vmem:[%s15008_s10 + $0x460] sm:$0xff] %v12737_v28   ;;  %v6544_v39 = vadd.f32 %v14983_v63, %v6025_v29  ;;  %v6800_v40 = vadd.f32 %v14983_v63, %v6281_v30  ;;  %v6026_v41 = vmul.f32 %v14979_v61, %v4052_v35  ;;  %v4054_v43 = vpop.f32.mrb[55].mxu0  ;;  %v5078_v44 = vpop.f32.mrb[55].mxu1  ;;  %v13933_v27 = vld [vmem:[%s14799_s30 + $0x2b4] ss:$8 sps:$4 sm:$0xff]  }
 0x1cb   : > { %v6282_v42 = vmul.f32 %v14979_v61, %v5076_v36  ;;  %v13935_v28 = vld [vmem:[%s14799_s30 + $0xab4] ss:$8 sps:$4 sm:$0xff]   ;;  %v15244_v43 = vld [vmem:[#allocation5] ss:$0 sm:$0xff] }
 0x1cc   : > { %v6545_v45 = vadd.f32 %v14983_v63, %v6026_v41  ;;  %4264 = vmatmul.mubr.bf16.gmra.mrb[160].mxu0 %v13919_v33  ;;  %5288 = vmatmul.mubr.bf16.gmra.mrb[160].mxu1 %v13920_v34  ;;  %v7056_v47 = vmax.f32 %v6544_v39, 0.0  ;;  %v7312_v48 = vmax.f32 %v6800_v40, 0.0 }
 0x1cd   : > { %v6801_v46 = vadd.f32 %v14983_v63, %v6282_v42  ;;  %10786 = vmatprep.mubr.msk.bf16.mxu0 %vm3135_vm0, %v13921_v37  ;;  %10914 = vmatprep.mubr.msk.bf16.mxu1 %vm3135_vm0, %v13923_v38 }
 0x1ce   : > { %v7057_v49 = vmax.f32 %v6545_v45, 0.0 }
 0x1cf   : > { %v7313_v50 = vmax.f32 %v6801_v46, 0.0  ;;  %v4057_v51 = vpop.f32.mrb[56].mxu0  ;;  %v5081_v52 = vpop.f32.mrb[56].mxu1 }
 0x1d0   : > { %v12102_v53 = vpack.c.bf16 %v7057_v49, %v7056_v47  ;;  %v6027_v55 = vmul.f32 %v14979_v61, %v4057_v51  ;;  %v6283_v56 = vmul.f32 %v14979_v61, %v5081_v52  ;;  %v4059_v57 = vpop.f32.mrb[57].mxu0  ;;  %v5083_v58 = vpop.f32.mrb[57].mxu1  ;;  %v13938_v49 = vld [vmem:[%s14799_s30 + $0xab0] ss:$8 sps:$4 sm:$0xff]   ;;  %v13939_v52 = vld [vmem:[%s14799_s30 + $0x2c4] ss:$8 sps:$4 sm:$0xff]  }
 0x1d1   : > { %v12742_v54 = vpack.c.bf16 %v7313_v50, %v7312_v48  ;;  %v4060_v62 = vpop.f32.mrb[58].mxu0  ;;  %v5084_v0 = vpop.f32.mrb[58].mxu1  ;;  %v13937_v48 = vld [vmem:[%s14799_s30 + $0x2b0] ss:$8 sps:$4 sm:$0xff]  }
 0x1d2   : > { %13326 = vst [vmem:[%s15008_s10 + $0x68] sm:$0xff] %v12102_v53   ;;  %v6546_v3 = vadd.f32 %v14983_v63, %v6027_v55  ;;  %v6802_v4 = vadd.f32 %v14983_v63, %v6283_v56  ;;  %v6028_v5 = vmul.f32 %v14979_v61, %v4060_v62  ;;  %v6284_v6 = vmul.f32 %v14979_v61, %v5084_v0  ;;  %v4062_v7 = vpop.f32.mrb[59].mxu0  ;;  %v5086_v8 = vpop.f32.mrb[59].mxu1  ;;  %v13941_v53 = vld [vmem:[%s14799_s30 + $0xac4] ss:$8 sps:$4 sm:$0xff]  }
 0x1d3   : > { %13454 = vst [vmem:[%s15008_s10 + $0x468] sm:$0xff] %v12742_v54   ;;  %v15254_v54 = vld [vmem:[#allocation7] ss:$0 sm:$0xff] }
 0x1d4   : > { %v6547_v9 = vadd.f32 %v14983_v63, %v6028_v5  ;;  %v6803_v10 = vadd.f32 %v14983_v63, %v6284_v6  ;;  %4272 = vmatmul.mubr.bf16.gmra.mrb[164].mxu0 %v13925_v59  ;;  %5296 = vmatmul.mubr.bf16.gmra.mrb[164].mxu1 %v13926_v60  ;;  %v7058_v11 = vmax.f32 %v6546_v3, 0.0  ;;  %v7314_v12 = vmax.f32 %v6802_v4, 0.0 }
 0x1d5   : > { %10787 = vmatprep.mubr.msk.bf16.mxu0 %vm3135_vm0, %v13927_v1  ;;  %10915 = vmatprep.mubr.msk.bf16.mxu1 %vm3135_vm0, %v13929_v2 }
 0x1d6   : > { %v7059_v13 = vmax.f32 %v6547_v9, 0.0  ;;  %v7315_v14 = vmax.f32 %v6803_v10, 0.0 }
 0x1d7   : > { %v4065_v15 = vpop.f32.mrb[60].mxu0  ;;  %v5089_v16 = vpop.f32.mrb[60].mxu1 }
 0x1d8   : > { %v12107_v17 = vpack.c.bf16 %v7059_v13, %v7058_v11  ;;  %v12747_v18 = vpack.c.bf16 %v7315_v14, %v7314_v12  ;;  %v6029_v19 = vmul.f32 %v14979_v61, %v4065_v15  ;;  %v6285_v20 = vmul.f32 %v14979_v61, %v5089_v16  ;;  %v4067_v21 = vpop.f32.mrb[61].mxu0  ;;  %v5091_v22 = vpop.f32.mrb[61].mxu1  ;;  %v13943_v13 = vld [vmem:[%s14799_s30 + $0x2c0] ss:$8 sps:$4 sm:$0xff]  }
 0x1d9   : > { %v4068_v25 = vpop.f32.mrb[62].mxu0  ;;  %v5092_v26 = vpop.f32.mrb[62].mxu1  ;;  %v13944_v14 = vld [vmem:[%s14799_s30 + $0xac0] ss:$8 sps:$4 sm:$0xff]  }
 0x1da   : > { %13327 = vst [vmem:[%s15008_s10 + $0x70] sm:$0xff] %v12107_v17   ;;  %13455 = vst [vmem:[%s15008_s10 + $0x470] sm:$0xff] %v12747_v18   ;;  %v6548_v29 = vadd.f32 %v14983_v63, %v6029_v19  ;;  %v6804_v30 = vadd.f32 %v14983_v63, %v6285_v20  ;;  %v6030_v31 = vmul.f32 %v14979_v61, %v4068_v25  ;;  %v4070_v33 = vpop.f32.mrb[63].mxu0  ;;  %v5094_v34 = vpop.f32.mrb[63].mxu1  ;;  %v13945_v17 = vld [vmem:[%s14799_s30 + $0x2d4] ss:$8 sps:$4 sm:$0xff]  }
 0x1db   : > { %v6286_v32 = vmul.f32 %v14979_v61, %v5092_v26  ;;  %v13947_v18 = vld [vmem:[%s14799_s30 + $0xad4] ss:$8 sps:$4 sm:$0xff]  }
 0x1dc   : > { %v6549_v35 = vadd.f32 %v14983_v63, %v6030_v31  ;;  %4280 = vmatmul.mubr.bf16.gmra.mrb[168].mxu0 %v13931_v23  ;;  %5304 = vmatmul.mubr.bf16.gmra.mrb[168].mxu1 %v13932_v24  ;;  %v7060_v37 = vmax.f32 %v6548_v29, 0.0  ;;  %v7316_v38 = vmax.f32 %v6804_v30, 0.0 }
 0x1dd   : > { %v6805_v36 = vadd.f32 %v14983_v63, %v6286_v32  ;;  %10788 = vmatprep.mubr.msk.bf16.mxu0 %vm3135_vm0, %v13933_v27  ;;  %10916 = vmatprep.mubr.msk.bf16.mxu1 %vm3135_vm0, %v13935_v28 }
 0x1de   : > { %v7061_v39 = vmax.f32 %v6549_v35, 0.0 }
 0x1df   : > { %v7317_v61 = vmax.f32 %v6805_v36, 0.0  ;;  %v4073_v40 = vpop.f32.mrb[64].mxu0  ;;  %v5097_v41 = vpop.f32.mrb[64].mxu1 }
 0x1e0   : > { %v12112_v42 = vpack.c.bf16 %v7061_v39, %v7060_v37  ;;  %v6031_v44 = vmul.f32 %v15244_v43, %v4073_v40  ;;  %v6287_v45 = vmul.f32 %v15244_v43, %v5097_v41  ;;  %v4075_v46 = vpop.f32.mrb[65].mxu0  ;;  %v5099_v47 = vpop.f32.mrb[65].mxu1  ;;  %v13949_v39 = vld [vmem:[%s14799_s30 + $0x2d0] ss:$8 sps:$4 sm:$0xff]  }
 0x1e1   : > { %v12752_v63 = vpack.c.bf16 %v7317_v61, %v7316_v38  ;;  %v4076_v50 = vpop.f32.mrb[66].mxu0  ;;  %v5100_v51 = vpop.f32.mrb[66].mxu1  ;;  %v13950_v61 = vld [vmem:[%s14799_s30 + $0xad0] ss:$8 sps:$4 sm:$0xff]  }
 0x1e2   : > { %13328 = vst [vmem:[%s15008_s10 + $0x78] sm:$0xff] %v12112_v42   ;;  %v6550_v55 = vadd.f32 %v15254_v54, %v6031_v44  ;;  %v6806_v56 = vadd.f32 %v15254_v54, %v6287_v45  ;;  %v6032_v57 = vmul.f32 %v15244_v43, %v4076_v50  ;;  %v6288_v58 = vmul.f32 %v15244_v43, %v5100_v51  ;;  %v4078_v59 = vpop.f32.mrb[67].mxu0  ;;  %v5102_v60 = vpop.f32.mrb[67].mxu1  ;;  %v13951_v42 = vld [vmem:[%s14799_s30 + $0x2e4] ss:$8 sps:$4 sm:$0xff]  }
 0x1e3   : > { %13456 = vst [vmem:[%s15008_s10 + $0x478] sm:$0xff] %v12752_v63   ;;  %v13953_v63 = vld [vmem:[%s14799_s30 + $0xae4] ss:$8 sps:$4 sm:$0xff]  }
 0x1e4   : > { %v6551_v62 = vadd.f32 %v15254_v54, %v6032_v57  ;;  %v6807_v0 = vadd.f32 %v15254_v54, %v6288_v58  ;;  %4288 = vmatmul.mubr.bf16.gmra.mrb[172].mxu0 %v13937_v48  ;;  %5312 = vmatmul.mubr.bf16.gmra.mrb[172].mxu1 %v13938_v49  ;;  %v7062_v1 = vmax.f32 %v6550_v55, 0.0  ;;  %v7318_v2 = vmax.f32 %v6806_v56, 0.0 }
 0x1e5   : > { %10789 = vmatprep.mubr.msk.bf16.mxu0 %vm3135_vm0, %v13939_v52  ;;  %10917 = vmatprep.mubr.msk.bf16.mxu1 %vm3135_vm0, %v13941_v53 }
 0x1e6   : > { %v7063_v3 = vmax.f32 %v6551_v62, 0.0  ;;  %v7319_v4 = vmax.f32 %v6807_v0, 0.0 }
 0x1e7   : > { %v4081_v5 = vpop.f32.mrb[68].mxu0  ;;  %v5105_v6 = vpop.f32.mrb[68].mxu1 }
 0x1e8   : > { %v12117_v7 = vpack.c.bf16 %v7063_v3, %v7062_v1  ;;  %v12757_v8 = vpack.c.bf16 %v7319_v4, %v7318_v2  ;;  %v6033_v9 = vmul.f32 %v15244_v43, %v4081_v5  ;;  %v6289_v10 = vmul.f32 %v15244_v43, %v5105_v6  ;;  %v4083_v11 = vpop.f32.mrb[69].mxu0  ;;  %v5107_v12 = vpop.f32.mrb[69].mxu1  ;;  %v13955_v3 = vld [vmem:[%s14799_s30 + $0x2e0] ss:$8 sps:$4 sm:$0xff]  }
 0x1e9   : > { %v4084_v15 = vpop.f32.mrb[70].mxu0  ;;  %v5108_v16 = vpop.f32.mrb[70].mxu1  ;;  %v13956_v4 = vld [vmem:[%s14799_s30 + $0xae0] ss:$8 sps:$4 sm:$0xff]  }
 0x1ea   : > { %13329 = vst [vmem:[%s15008_s10 + $0x80] sm:$0xff] %v12117_v7   ;;  %13457 = vst [vmem:[%s15008_s10 + $0x480] sm:$0xff] %v12757_v8   ;;  %v6552_v19 = vadd.f32 %v15254_v54, %v6033_v9  ;;  %v6808_v20 = vadd.f32 %v15254_v54, %v6289_v10  ;;  %v6034_v21 = vmul.f32 %v15244_v43, %v4084_v15  ;;  %v4086_v23 = vpop.f32.mrb[71].mxu0  ;;  %v5110_v24 = vpop.f32.mrb[71].mxu1  ;;  %v13957_v7 = vld [vmem:[%s14799_s30 + $0x2f4] ss:$8 sps:$4 sm:$0xff]  }
 0x1eb   : > { %v6290_v22 = vmul.f32 %v15244_v43, %v5108_v16  ;;  %v13959_v8 = vld [vmem:[%s14799_s30 + $0xaf4] ss:$8 sps:$4 sm:$0xff]  }
 0x1ec   : > { %v6553_v25 = vadd.f32 %v15254_v54, %v6034_v21  ;;  %4296 = vmatmul.mubr.bf16.gmra.mrb[176].mxu0 %v13943_v13  ;;  %5320 = vmatmul.mubr.bf16.gmra.mrb[176].mxu1 %v13944_v14  ;;  %v7064_v27 = vmax.f32 %v6552_v19, 0.0  ;;  %v7320_v28 = vmax.f32 %v6808_v20, 0.0 }
 0x1ed   : > { %v6809_v26 = vadd.f32 %v15254_v54, %v6290_v22  ;;  %10790 = vmatprep.mubr.msk.bf16.mxu0 %vm3135_vm0, %v13945_v17  ;;  %10918 = vmatprep.mubr.msk.bf16.mxu1 %vm3135_vm0, %v13947_v18 }
 0x1ee   : > { %v7065_v29 = vmax.f32 %v6553_v25, 0.0 }
 0x1ef   : > { %v7321_v30 = vmax.f32 %v6809_v26, 0.0  ;;  %v4089_v31 = vpop.f32.mrb[72].mxu0  ;;  %v5113_v32 = vpop.f32.mrb[72].mxu1 }
 0x1f0   : > { %v12122_v33 = vpack.c.bf16 %v7065_v29, %v7064_v27  ;;  %v6035_v35 = vmul.f32 %v15244_v43, %v4089_v31  ;;  %v6291_v36 = vmul.f32 %v15244_v43, %v5113_v32  ;;  %v4091_v37 = vpop.f32.mrb[73].mxu0  ;;  %v5115_v38 = vpop.f32.mrb[73].mxu1  ;;  %v13961_v29 = vld [vmem:[%s14799_s30 + $0x2f0] ss:$8 sps:$4 sm:$0xff]  }
 0x1f1   : > { %v12762_v34 = vpack.c.bf16 %v7321_v30, %v7320_v28  ;;  %v4092_v40 = vpop.f32.mrb[74].mxu0  ;;  %v5116_v41 = vpop.f32.mrb[74].mxu1  ;;  %v13962_v30 = vld [vmem:[%s14799_s30 + $0xaf0] ss:$8 sps:$4 sm:$0xff]  }
 0x1f2   : > { %13330 = vst [vmem:[%s15008_s10 + $0x88] sm:$0xff] %v12122_v33   ;;  %v6554_v44 = vadd.f32 %v15254_v54, %v6035_v35  ;;  %v6810_v45 = vadd.f32 %v15254_v54, %v6291_v36  ;;  %v6036_v46 = vmul.f32 %v15244_v43, %v4092_v40  ;;  %v6292_v47 = vmul.f32 %v15244_v43, %v5116_v41  ;;  %v4094_v48 = vpop.f32.mrb[75].mxu0  ;;  %v5118_v49 = vpop.f32.mrb[75].mxu1  ;;  %v13963_v33 = vld [vmem:[%s14799_s30 + $0x304] ss:$8 sps:$4 sm:$0xff]  }
 0x1f3   : > { %13458 = vst [vmem:[%s15008_s10 + $0x488] sm:$0xff] %v12762_v34   ;;  %v13965_v34 = vld [vmem:[%s14799_s30 + $0xb04] ss:$8 sps:$4 sm:$0xff]  }
 0x1f4   : > { %v6555_v50 = vadd.f32 %v15254_v54, %v6036_v46  ;;  %v6811_v51 = vadd.f32 %v15254_v54, %v6292_v47  ;;  %4304 = vmatmul.mubr.bf16.gmra.mrb[180].mxu0 %v13949_v39  ;;  %5328 = vmatmul.mubr.bf16.gmra.mrb[180].mxu1 %v13950_v61  ;;  %v7066_v52 = vmax.f32 %v6554_v44, 0.0  ;;  %v7322_v53 = vmax.f32 %v6810_v45, 0.0 }
 0x1f5   : > { %10791 = vmatprep.mubr.msk.bf16.mxu0 %vm3135_vm0, %v13951_v42  ;;  %10919 = vmatprep.mubr.msk.bf16.mxu1 %vm3135_vm0, %v13953_v63 }
 0x1f6   : > { %v7067_v55 = vmax.f32 %v6555_v50, 0.0  ;;  %v7323_v56 = vmax.f32 %v6811_v51, 0.0 }
 0x1f7   : > { %v4097_v57 = vpop.f32.mrb[76].mxu0  ;;  %v5121_v58 = vpop.f32.mrb[76].mxu1 }
 0x1f8   : > { %v12127_v59 = vpack.c.bf16 %v7067_v55, %v7066_v52  ;;  %v12767_v60 = vpack.c.bf16 %v7323_v56, %v7322_v53  ;;  %v6037_v62 = vmul.f32 %v15244_v43, %v4097_v57  ;;  %v6293_v0 = vmul.f32 %v15244_v43, %v5121_v58  ;;  %v4099_v1 = vpop.f32.mrb[77].mxu0  ;;  %v5123_v2 = vpop.f32.mrb[77].mxu1  ;;  %v13967_v55 = vld [vmem:[%s14799_s30 + $0x300] ss:$8 sps:$4 sm:$0xff]  }
 0x1f9   : > { %v4100_v5 = vpop.f32.mrb[78].mxu0  ;;  %v5124_v6 = vpop.f32.mrb[78].mxu1  ;;  %v13968_v56 = vld [vmem:[%s14799_s30 + $0xb00] ss:$8 sps:$4 sm:$0xff]  }
 0x1fa   : > { %13331 = vst [vmem:[%s15008_s10 + $0x90] sm:$0xff] %v12127_v59   ;;  %13459 = vst [vmem:[%s15008_s10 + $0x490] sm:$0xff] %v12767_v60   ;;  %v6556_v9 = vadd.f32 %v15254_v54, %v6037_v62  ;;  %v6812_v10 = vadd.f32 %v15254_v54, %v6293_v0  ;;  %v6038_v11 = vmul.f32 %v15244_v43, %v4100_v5  ;;  %v4102_v13 = vpop.f32.mrb[79].mxu0  ;;  %v5126_v14 = vpop.f32.mrb[79].mxu1  ;;  %v13969_v59 = vld [vmem:[%s14799_s30 + $0x314] ss:$8 sps:$4 sm:$0xff]  }
 0x1fb   : > { %v6294_v12 = vmul.f32 %v15244_v43, %v5124_v6  ;;  %v13971_v60 = vld [vmem:[%s14799_s30 + $0xb14] ss:$8 sps:$4 sm:$0xff]  }
 0x1fc   : > { %v6557_v15 = vadd.f32 %v15254_v54, %v6038_v11  ;;  %4312 = vmatmul.mubr.bf16.gmra.mrb[184].mxu0 %v13955_v3  ;;  %5336 = vmatmul.mubr.bf16.gmra.mrb[184].mxu1 %v13956_v4  ;;  %v7068_v17 = vmax.f32 %v6556_v9, 0.0  ;;  %v7324_v18 = vmax.f32 %v6812_v10, 0.0 }
 0x1fd   : > { %v6813_v16 = vadd.f32 %v15254_v54, %v6294_v12  ;;  %10792 = vmatprep.mubr.msk.bf16.mxu0 %vm3135_vm0, %v13957_v7  ;;  %10920 = vmatprep.mubr.msk.bf16.mxu1 %vm3135_vm0, %v13959_v8 }
 0x1fe   : > { %v7069_v19 = vmax.f32 %v6557_v15, 0.0 }
 0x1ff   : > { %v7325_v20 = vmax.f32 %v6813_v16, 0.0  ;;  %v4105_v21 = vpop.f32.mrb[80].mxu0  ;;  %v5129_v22 = vpop.f32.mrb[80].mxu1 }
 0x200   : > { %v12132_v23 = vpack.c.bf16 %v7069_v19, %v7068_v17  ;;  %v6039_v25 = vmul.f32 %v15244_v43, %v4105_v21  ;;  %v6295_v26 = vmul.f32 %v15244_v43, %v5129_v22  ;;  %v4107_v27 = vpop.f32.mrb[81].mxu0  ;;  %v5131_v28 = vpop.f32.mrb[81].mxu1  ;;  %v13973_v19 = vld [vmem:[%s14799_s30 + $0x310] ss:$8 sps:$4 sm:$0xff]  }
 0x201   : > { %v12772_v24 = vpack.c.bf16 %v7325_v20, %v7324_v18  ;;  %v4108_v31 = vpop.f32.mrb[82].mxu0  ;;  %v5132_v32 = vpop.f32.mrb[82].mxu1  ;;  %v13974_v20 = vld [vmem:[%s14799_s30 + $0xb10] ss:$8 sps:$4 sm:$0xff]  }
 0x202   : > { %13332 = vst [vmem:[%s15008_s10 + $0x98] sm:$0xff] %v12132_v23   ;;  %v6558_v35 = vadd.f32 %v15254_v54, %v6039_v25  ;;  %v6814_v36 = vadd.f32 %v15254_v54, %v6295_v26  ;;  %v6040_v37 = vmul.f32 %v15244_v43, %v4108_v31  ;;  %v6296_v38 = vmul.f32 %v15244_v43, %v5132_v32  ;;  %v4110_v39 = vpop.f32.mrb[83].mxu0  ;;  %v5134_v61 = vpop.f32.mrb[83].mxu1  ;;  %v13975_v23 = vld [vmem:[%s14799_s30 + $0x324] ss:$8 sps:$4 sm:$0xff]  }
 0x203   : > { %13460 = vst [vmem:[%s15008_s10 + $0x498] sm:$0xff] %v12772_v24   ;;  %v13977_v24 = vld [vmem:[%s14799_s30 + $0xb24] ss:$8 sps:$4 sm:$0xff]  }
 0x204   : > { %v6559_v40 = vadd.f32 %v15254_v54, %v6040_v37  ;;  %v6815_v41 = vadd.f32 %v15254_v54, %v6296_v38  ;;  %4320 = vmatmul.mubr.bf16.gmra.mrb[188].mxu0 %v13961_v29  ;;  %5344 = vmatmul.mubr.bf16.gmra.mrb[188].mxu1 %v13962_v30  ;;  %v7070_v42 = vmax.f32 %v6558_v35, 0.0  ;;  %v7326_v63 = vmax.f32 %v6814_v36, 0.0 }
 0x205   : > { %10793 = vmatprep.mubr.msk.bf16.mxu0 %vm3135_vm0, %v13963_v33  ;;  %10921 = vmatprep.mubr.msk.bf16.mxu1 %vm3135_vm0, %v13965_v34 }
 0x206   : > { %v7071_v44 = vmax.f32 %v6559_v40, 0.0  ;;  %v7327_v45 = vmax.f32 %v6815_v41, 0.0 }
 0x207   : > { %v4113_v46 = vpop.f32.mrb[84].mxu0  ;;  %v5137_v47 = vpop.f32.mrb[84].mxu1 }
 0x208   : > { %v12137_v48 = vpack.c.bf16 %v7071_v44, %v7070_v42  ;;  %v12777_v49 = vpack.c.bf16 %v7327_v45, %v7326_v63  ;;  %v6041_v50 = vmul.f32 %v15244_v43, %v4113_v46  ;;  %v6297_v51 = vmul.f32 %v15244_v43, %v5137_v47  ;;  %v4115_v52 = vpop.f32.mrb[85].mxu0  ;;  %v5139_v53 = vpop.f32.mrb[85].mxu1  ;;  %v13979_v44 = vld [vmem:[%s14799_s30 + $0x320] ss:$8 sps:$4 sm:$0xff]  }
 0x209   : > { %v4116_v57 = vpop.f32.mrb[86].mxu0  ;;  %v5140_v58 = vpop.f32.mrb[86].mxu1  ;;  %v13980_v45 = vld [vmem:[%s14799_s30 + $0xb20] ss:$8 sps:$4 sm:$0xff]  }
 0x20a   : > { %13333 = vst [vmem:[%s15008_s10 + $0xa0] sm:$0xff] %v12137_v48   ;;  %13461 = vst [vmem:[%s15008_s10 + $0x4a0] sm:$0xff] %v12777_v49   ;;  %v6560_v62 = vadd.f32 %v15254_v54, %v6041_v50  ;;  %v6816_v0 = vadd.f32 %v15254_v54, %v6297_v51  ;;  %v6042_v1 = vmul.f32 %v15244_v43, %v4116_v57  ;;  %v4118_v3 = vpop.f32.mrb[87].mxu0  ;;  %v5142_v4 = vpop.f32.mrb[87].mxu1  ;;  %v13981_v48 = vld [vmem:[%s14799_s30 + $0x334] ss:$8 sps:$4 sm:$0xff]  }
 0x20b   : > { %v6298_v2 = vmul.f32 %v15244_v43, %v5140_v58  ;;  %v13983_v49 = vld [vmem:[%s14799_s30 + $0xb34] ss:$8 sps:$4 sm:$0xff]  }
 0x20c   : > { %v6561_v5 = vadd.f32 %v15254_v54, %v6042_v1  ;;  %4328 = vmatmul.mubr.bf16.gmra.mrb[192].mxu0 %v13967_v55  ;;  %5352 = vmatmul.mubr.bf16.gmra.mrb[192].mxu1 %v13968_v56  ;;  %v7072_v7 = vmax.f32 %v6560_v62, 0.0  ;;  %v7328_v8 = vmax.f32 %v6816_v0, 0.0 }
 0x20d   : > { %v6817_v6 = vadd.f32 %v15254_v54, %v6298_v2  ;;  %10794 = vmatprep.mubr.msk.bf16.mxu0 %vm3135_vm0, %v13969_v59  ;;  %10922 = vmatprep.mubr.msk.bf16.mxu1 %vm3135_vm0, %v13971_v60 }
 0x20e   : > { %v7073_v9 = vmax.f32 %v6561_v5, 0.0 }
 0x20f   : > { %v7329_v10 = vmax.f32 %v6817_v6, 0.0  ;;  %v4121_v11 = vpop.f32.mrb[88].mxu0  ;;  %v5145_v12 = vpop.f32.mrb[88].mxu1 }
 0x210   : > { %v12142_v13 = vpack.c.bf16 %v7073_v9, %v7072_v7  ;;  %v6043_v15 = vmul.f32 %v15244_v43, %v4121_v11  ;;  %v6299_v16 = vmul.f32 %v15244_v43, %v5145_v12  ;;  %v4123_v17 = vpop.f32.mrb[89].mxu0  ;;  %v5147_v18 = vpop.f32.mrb[89].mxu1  ;;  %v13985_v9 = vld [vmem:[%s14799_s30 + $0x330] ss:$8 sps:$4 sm:$0xff]  }
 0x211   : > { %v12782_v14 = vpack.c.bf16 %v7329_v10, %v7328_v8  ;;  %v4124_v21 = vpop.f32.mrb[90].mxu0  ;;  %v5148_v22 = vpop.f32.mrb[90].mxu1  ;;  %v13986_v10 = vld [vmem:[%s14799_s30 + $0xb30] ss:$8 sps:$4 sm:$0xff]  }
 0x212   : > { %13334 = vst [vmem:[%s15008_s10 + $0xa8] sm:$0xff] %v12142_v13   ;;  %v6562_v25 = vadd.f32 %v15254_v54, %v6043_v15  ;;  %v6818_v26 = vadd.f32 %v15254_v54, %v6299_v16  ;;  %v6044_v27 = vmul.f32 %v15244_v43, %v4124_v21  ;;  %v6300_v28 = vmul.f32 %v15244_v43, %v5148_v22  ;;  %v4126_v29 = vpop.f32.mrb[91].mxu0  ;;  %v5150_v30 = vpop.f32.mrb[91].mxu1  ;;  %v13987_v13 = vld [vmem:[%s14799_s30 + $0x344] ss:$8 sps:$4 sm:$0xff]  }
 0x213   : > { %13462 = vst [vmem:[%s15008_s10 + $0x4a8] sm:$0xff] %v12782_v14   ;;  %v13989_v14 = vld [vmem:[%s14799_s30 + $0xb44] ss:$8 sps:$4 sm:$0xff]  }
 0x214   : > { %v6563_v31 = vadd.f32 %v15254_v54, %v6044_v27  ;;  %v6819_v32 = vadd.f32 %v15254_v54, %v6300_v28  ;;  %4336 = vmatmul.mubr.bf16.gmra.mrb[196].mxu0 %v13973_v19  ;;  %5360 = vmatmul.mubr.bf16.gmra.mrb[196].mxu1 %v13974_v20  ;;  %v7074_v33 = vmax.f32 %v6562_v25, 0.0  ;;  %v7330_v34 = vmax.f32 %v6818_v26, 0.0 }
 0x215   : > { %10795 = vmatprep.mubr.msk.bf16.mxu0 %vm3135_vm0, %v13975_v23  ;;  %10923 = vmatprep.mubr.msk.bf16.mxu1 %vm3135_vm0, %v13977_v24 }
 0x216   : > { %v7075_v35 = vmax.f32 %v6563_v31, 0.0  ;;  %v7331_v36 = vmax.f32 %v6819_v32, 0.0 }
 0x217   : > { %v4129_v37 = vpop.f32.mrb[92].mxu0  ;;  %v5153_v38 = vpop.f32.mrb[92].mxu1 }
 0x218   : > { %v12147_v39 = vpack.c.bf16 %v7075_v35, %v7074_v33  ;;  %v12787_v61 = vpack.c.bf16 %v7331_v36, %v7330_v34  ;;  %v6045_v40 = vmul.f32 %v15244_v43, %v4129_v37  ;;  %v6301_v41 = vmul.f32 %v15244_v43, %v5153_v38  ;;  %v4131_v42 = vpop.f32.mrb[93].mxu0  ;;  %v5155_v63 = vpop.f32.mrb[93].mxu1  ;;  %v13991_v35 = vld [vmem:[%s14799_s30 + $0x340] ss:$8 sps:$4 sm:$0xff]  }
 0x219   : > { %v4132_v46 = vpop.f32.mrb[94].mxu0  ;;  %v5156_v47 = vpop.f32.mrb[94].mxu1  ;;  %v13992_v36 = vld [vmem:[%s14799_s30 + $0xb40] ss:$8 sps:$4 sm:$0xff]  }
 0x21a   : > { %13335 = vst [vmem:[%s15008_s10 + $0xb0] sm:$0xff] %v12147_v39   ;;  %13463 = vst [vmem:[%s15008_s10 + $0x4b0] sm:$0xff] %v12787_v61   ;;  %v6564_v50 = vadd.f32 %v15254_v54, %v6045_v40  ;;  %v6820_v51 = vadd.f32 %v15254_v54, %v6301_v41  ;;  %v6046_v52 = vmul.f32 %v15244_v43, %v4132_v46  ;;  %v4134_v55 = vpop.f32.mrb[95].mxu0  ;;  %v5158_v56 = vpop.f32.mrb[95].mxu1  ;;  %v13993_v39 = vld [vmem:[%s14799_s30 + $0x354] ss:$8 sps:$4 sm:$0xff]  }
 0x21b   : > { %v6302_v53 = vmul.f32 %v15244_v43, %v5156_v47  ;;  %v13995_v61 = vld [vmem:[%s14799_s30 + $0xb54] ss:$8 sps:$4 sm:$0xff]  }
 0x21c   : > { %v6565_v57 = vadd.f32 %v15254_v54, %v6046_v52  ;;  %4344 = vmatmul.mubr.bf16.gmra.mrb[200].mxu0 %v13979_v44  ;;  %5368 = vmatmul.mubr.bf16.gmra.mrb[200].mxu1 %v13980_v45  ;;  %v7076_v59 = vmax.f32 %v6564_v50, 0.0  ;;  %v7332_v60 = vmax.f32 %v6820_v51, 0.0 }
 0x21d   : > { %v6821_v58 = vadd.f32 %v15254_v54, %v6302_v53  ;;  %10796 = vmatprep.mubr.msk.bf16.mxu0 %vm3135_vm0, %v13981_v48  ;;  %10924 = vmatprep.mubr.msk.bf16.mxu1 %vm3135_vm0, %v13983_v49 }
 0x21e   : > { %v7077_v62 = vmax.f32 %v6565_v57, 0.0 }
 0x21f   : > { %v7333_v0 = vmax.f32 %v6821_v58, 0.0  ;;  %v4137_v1 = vpop.f32.mrb[96].mxu0  ;;  %v5161_v2 = vpop.f32.mrb[96].mxu1 }
 0x220   : > { %v12152_v3 = vpack.c.bf16 %v7077_v62, %v7076_v59  ;;  %v6047_v5 = vmul.f32 %v15244_v43, %v4137_v1  ;;  %v6303_v6 = vmul.f32 %v15244_v43, %v5161_v2  ;;  %v4139_v7 = vpop.f32.mrb[97].mxu0  ;;  %v5163_v8 = vpop.f32.mrb[97].mxu1  ;;  %v13997_v62 = vld [vmem:[%s14799_s30 + $0x350] ss:$8 sps:$4 sm:$0xff]  }
 0x221   : > { %v12792_v4 = vpack.c.bf16 %v7333_v0, %v7332_v60  ;;  %v4140_v11 = vpop.f32.mrb[98].mxu0  ;;  %v5164_v12 = vpop.f32.mrb[98].mxu1  ;;  %v13998_v0 = vld [vmem:[%s14799_s30 + $0xb50] ss:$8 sps:$4 sm:$0xff]  }
 0x222   : > { %13336 = vst [vmem:[%s15008_s10 + $0xb8] sm:$0xff] %v12152_v3   ;;  %v6566_v15 = vadd.f32 %v15254_v54, %v6047_v5  ;;  %v6822_v16 = vadd.f32 %v15254_v54, %v6303_v6  ;;  %v6048_v17 = vmul.f32 %v15244_v43, %v4140_v11  ;;  %v6304_v18 = vmul.f32 %v15244_v43, %v5164_v12  ;;  %v4142_v19 = vpop.f32.mrb[99].mxu0  ;;  %v5166_v20 = vpop.f32.mrb[99].mxu1  ;;  %v13999_v3 = vld [vmem:[%s14799_s30 + $0x364] ss:$8 sps:$4 sm:$0xff]  }
 0x223   : > { %13464 = vst [vmem:[%s15008_s10 + $0x4b8] sm:$0xff] %v12792_v4   ;;  %v14001_v4 = vld [vmem:[%s14799_s30 + $0xb64] ss:$8 sps:$4 sm:$0xff]  }
 0x224   : > { %v6567_v21 = vadd.f32 %v15254_v54, %v6048_v17  ;;  %v6823_v22 = vadd.f32 %v15254_v54, %v6304_v18  ;;  %4352 = vmatmul.mubr.bf16.gmra.mrb[204].mxu0 %v13985_v9  ;;  %5376 = vmatmul.mubr.bf16.gmra.mrb[204].mxu1 %v13986_v10  ;;  %v7078_v23 = vmax.f32 %v6566_v15, 0.0  ;;  %v7334_v24 = vmax.f32 %v6822_v16, 0.0 }
 0x225   : > { %10797 = vmatprep.mubr.msk.bf16.mxu0 %vm3135_vm0, %v13987_v13  ;;  %10925 = vmatprep.mubr.msk.bf16.mxu1 %vm3135_vm0, %v13989_v14 }
 0x226   : > { %v7079_v25 = vmax.f32 %v6567_v21, 0.0  ;;  %v7335_v26 = vmax.f32 %v6823_v22, 0.0 }
 0x227   : > { %v4145_v27 = vpop.f32.mrb[100].mxu0  ;;  %v5169_v28 = vpop.f32.mrb[100].mxu1 }
 0x228   : > { %v12157_v29 = vpack.c.bf16 %v7079_v25, %v7078_v23  ;;  %v12797_v30 = vpack.c.bf16 %v7335_v26, %v7334_v24  ;;  %v6049_v31 = vmul.f32 %v15244_v43, %v4145_v27  ;;  %v6305_v32 = vmul.f32 %v15244_v43, %v5169_v28  ;;  %v4147_v33 = vpop.f32.mrb[101].mxu0  ;;  %v5171_v34 = vpop.f32.mrb[101].mxu1  ;;  %v14003_v25 = vld [vmem:[%s14799_s30 + $0x360] ss:$8 sps:$4 sm:$0xff]  }
 0x229   : > { %v4148_v37 = vpop.f32.mrb[102].mxu0  ;;  %v5172_v38 = vpop.f32.mrb[102].mxu1  ;;  %v14004_v26 = vld [vmem:[%s14799_s30 + $0xb60] ss:$8 sps:$4 sm:$0xff]  }
 0x22a   : > { %13337 = vst [vmem:[%s15008_s10 + $0xc0] sm:$0xff] %v12157_v29   ;;  %13465 = vst [vmem:[%s15008_s10 + $0x4c0] sm:$0xff] %v12797_v30   ;;  %v6568_v40 = vadd.f32 %v15254_v54, %v6049_v31  ;;  %v6824_v41 = vadd.f32 %v15254_v54, %v6305_v32  ;;  %v6050_v42 = vmul.f32 %v15244_v43, %v4148_v37  ;;  %v4150_v44 = vpop.f32.mrb[103].mxu0  ;;  %v5174_v45 = vpop.f32.mrb[103].mxu1  ;;  %v14005_v29 = vld [vmem:[%s14799_s30 + $0x374] ss:$8 sps:$4 sm:$0xff]  }
 0x22b   : > { %v6306_v63 = vmul.f32 %v15244_v43, %v5172_v38  ;;  %v14007_v30 = vld [vmem:[%s14799_s30 + $0xb74] ss:$8 sps:$4 sm:$0xff]  }
 0x22c   : > { %v6569_v46 = vadd.f32 %v15254_v54, %v6050_v42  ;;  %4360 = vmatmul.mubr.bf16.gmra.mrb[208].mxu0 %v13991_v35  ;;  %5384 = vmatmul.mubr.bf16.gmra.mrb[208].mxu1 %v13992_v36  ;;  %v7080_v48 = vmax.f32 %v6568_v40, 0.0  ;;  %v7336_v49 = vmax.f32 %v6824_v41, 0.0 }
 0x22d   : > { %v6825_v47 = vadd.f32 %v15254_v54, %v6306_v63  ;;  %10798 = vmatprep.mubr.msk.bf16.mxu0 %vm3135_vm0, %v13993_v39  ;;  %10926 = vmatprep.mubr.msk.bf16.mxu1 %vm3135_vm0, %v13995_v61 }
 0x22e   : > { %v7081_v50 = vmax.f32 %v6569_v46, 0.0 }
 0x22f   : > { %v7337_v51 = vmax.f32 %v6825_v47, 0.0  ;;  %v4153_v52 = vpop.f32.mrb[104].mxu0  ;;  %v5177_v53 = vpop.f32.mrb[104].mxu1 }
 0x230   : > { %v12162_v55 = vpack.c.bf16 %v7081_v50, %v7080_v48  ;;  %v6051_v57 = vmul.f32 %v15244_v43, %v4153_v52  ;;  %v6307_v58 = vmul.f32 %v15244_v43, %v5177_v53  ;;  %v4155_v59 = vpop.f32.mrb[105].mxu0  ;;  %v5179_v60 = vpop.f32.mrb[105].mxu1  ;;  %v14009_v50 = vld [vmem:[%s14799_s30 + $0x370] ss:$8 sps:$4 sm:$0xff]  }
 0x231   : > { %v12802_v56 = vpack.c.bf16 %v7337_v51, %v7336_v49  ;;  %v4156_v1 = vpop.f32.mrb[106].mxu0  ;;  %v5180_v2 = vpop.f32.mrb[106].mxu1  ;;  %v14010_v51 = vld [vmem:[%s14799_s30 + $0xb70] ss:$8 sps:$4 sm:$0xff]  }
 0x232   : > { %13338 = vst [vmem:[%s15008_s10 + $0xc8] sm:$0xff] %v12162_v55   ;;  %v6570_v5 = vadd.f32 %v15254_v54, %v6051_v57  ;;  %v6826_v6 = vadd.f32 %v15254_v54, %v6307_v58  ;;  %v6052_v7 = vmul.f32 %v15244_v43, %v4156_v1  ;;  %v6308_v8 = vmul.f32 %v15244_v43, %v5180_v2  ;;  %v4158_v9 = vpop.f32.mrb[107].mxu0  ;;  %v5182_v10 = vpop.f32.mrb[107].mxu1  ;;  %v14011_v55 = vld [vmem:[%s14799_s30 + $0x384] ss:$8 sps:$4 sm:$0xff]  }
 0x233   : > { %13466 = vst [vmem:[%s15008_s10 + $0x4c8] sm:$0xff] %v12802_v56   ;;  %v14013_v56 = vld [vmem:[%s14799_s30 + $0xb84] ss:$8 sps:$4 sm:$0xff]  }
 0x234   : > { %v6571_v11 = vadd.f32 %v15254_v54, %v6052_v7  ;;  %v6827_v12 = vadd.f32 %v15254_v54, %v6308_v8  ;;  %4368 = vmatmul.mubr.bf16.gmra.mrb[212].mxu0 %v13997_v62  ;;  %5392 = vmatmul.mubr.bf16.gmra.mrb[212].mxu1 %v13998_v0  ;;  %v7082_v13 = vmax.f32 %v6570_v5, 0.0  ;;  %v7338_v14 = vmax.f32 %v6826_v6, 0.0 }
 0x235   : > { %10799 = vmatprep.mubr.msk.bf16.mxu0 %vm3135_vm0, %v13999_v3  ;;  %10927 = vmatprep.mubr.msk.bf16.mxu1 %vm3135_vm0, %v14001_v4 }
 0x236   : > { %v7083_v15 = vmax.f32 %v6571_v11, 0.0  ;;  %v7339_v16 = vmax.f32 %v6827_v12, 0.0 }
 0x237   : > { %v4161_v17 = vpop.f32.mrb[108].mxu0  ;;  %v5185_v18 = vpop.f32.mrb[108].mxu1 }
 0x238   : > { %v12167_v19 = vpack.c.bf16 %v7083_v15, %v7082_v13  ;;  %v12807_v20 = vpack.c.bf16 %v7339_v16, %v7338_v14  ;;  %v6053_v21 = vmul.f32 %v15244_v43, %v4161_v17  ;;  %v6309_v22 = vmul.f32 %v15244_v43, %v5185_v18  ;;  %v4163_v23 = vpop.f32.mrb[109].mxu0  ;;  %v5187_v24 = vpop.f32.mrb[109].mxu1  ;;  %v14015_v15 = vld [vmem:[%s14799_s30 + $0x380] ss:$8 sps:$4 sm:$0xff]  }
 0x239   : > { %v4164_v27 = vpop.f32.mrb[110].mxu0  ;;  %v5188_v28 = vpop.f32.mrb[110].mxu1  ;;  %v14016_v16 = vld [vmem:[%s14799_s30 + $0xb80] ss:$8 sps:$4 sm:$0xff]  }
 0x23a   : > { %13339 = vst [vmem:[%s15008_s10 + $0xd0] sm:$0xff] %v12167_v19   ;;  %13467 = vst [vmem:[%s15008_s10 + $0x4d0] sm:$0xff] %v12807_v20   ;;  %v6572_v31 = vadd.f32 %v15254_v54, %v6053_v21  ;;  %v6828_v32 = vadd.f32 %v15254_v54, %v6309_v22  ;;  %v6054_v33 = vmul.f32 %v15244_v43, %v4164_v27  ;;  %v4166_v35 = vpop.f32.mrb[111].mxu0  ;;  %v5190_v36 = vpop.f32.mrb[111].mxu1  ;;  %v14017_v19 = vld [vmem:[%s14799_s30 + $0x394] ss:$8 sps:$4 sm:$0xff]  }
 0x23b   : > { %v6310_v34 = vmul.f32 %v15244_v43, %v5188_v28  ;;  %v14019_v20 = vld [vmem:[%s14799_s30 + $0xb94] ss:$8 sps:$4 sm:$0xff]  }
 0x23c   : > { %v6573_v37 = vadd.f32 %v15254_v54, %v6054_v33  ;;  %4376 = vmatmul.mubr.bf16.gmra.mrb[216].mxu0 %v14003_v25  ;;  %5400 = vmatmul.mubr.bf16.gmra.mrb[216].mxu1 %v14004_v26  ;;  %v7084_v39 = vmax.f32 %v6572_v31, 0.0  ;;  %v7340_v61 = vmax.f32 %v6828_v32, 0.0 }
 0x23d   : > { %v6829_v38 = vadd.f32 %v15254_v54, %v6310_v34  ;;  %10800 = vmatprep.mubr.msk.bf16.mxu0 %vm3135_vm0, %v14005_v29  ;;  %10928 = vmatprep.mubr.msk.bf16.mxu1 %vm3135_vm0, %v14007_v30 }
 0x23e   : > { %v7085_v40 = vmax.f32 %v6573_v37, 0.0 }
 0x23f   : > { %v7341_v41 = vmax.f32 %v6829_v38, 0.0  ;;  %v4169_v42 = vpop.f32.mrb[112].mxu0  ;;  %v5193_v63 = vpop.f32.mrb[112].mxu1 }
 0x240   : > { %v12172_v44 = vpack.c.bf16 %v7085_v40, %v7084_v39  ;;  %v6055_v46 = vmul.f32 %v15244_v43, %v4169_v42  ;;  %v6311_v47 = vmul.f32 %v15244_v43, %v5193_v63  ;;  %v4171_v48 = vpop.f32.mrb[113].mxu0  ;;  %v5195_v49 = vpop.f32.mrb[113].mxu1  ;;  %v14021_v40 = vld [vmem:[%s14799_s30 + $0x390] ss:$8 sps:$4 sm:$0xff]  }
 0x241   : > { %v12812_v45 = vpack.c.bf16 %v7341_v41, %v7340_v61  ;;  %v4172_v52 = vpop.f32.mrb[114].mxu0  ;;  %v5196_v53 = vpop.f32.mrb[114].mxu1  ;;  %v14022_v41 = vld [vmem:[%s14799_s30 + $0xb90] ss:$8 sps:$4 sm:$0xff]  }
 0x242   : > { %13340 = vst [vmem:[%s15008_s10 + $0xd8] sm:$0xff] %v12172_v44   ;;  %v6574_v57 = vadd.f32 %v15254_v54, %v6055_v46  ;;  %v6830_v58 = vadd.f32 %v15254_v54, %v6311_v47  ;;  %v6056_v59 = vmul.f32 %v15244_v43, %v4172_v52  ;;  %v6312_v60 = vmul.f32 %v15244_v43, %v5196_v53  ;;  %v4174_v62 = vpop.f32.mrb[115].mxu0  ;;  %v5198_v0 = vpop.f32.mrb[115].mxu1  ;;  %v14023_v44 = vld [vmem:[%s14799_s30 + $0x3a4] ss:$8 sps:$4 sm:$0xff]  }
 0x243   : > { %13468 = vst [vmem:[%s15008_s10 + $0x4d8] sm:$0xff] %v12812_v45   ;;  %v14025_v45 = vld [vmem:[%s14799_s30 + $0xba4] ss:$8 sps:$4 sm:$0xff]  }
 0x244   : > { %v6575_v1 = vadd.f32 %v15254_v54, %v6056_v59  ;;  %v6831_v2 = vadd.f32 %v15254_v54, %v6312_v60  ;;  %4384 = vmatmul.mubr.bf16.gmra.mrb[220].mxu0 %v14009_v50  ;;  %5408 = vmatmul.mubr.bf16.gmra.mrb[220].mxu1 %v14010_v51  ;;  %v7086_v3 = vmax.f32 %v6574_v57, 0.0  ;;  %v7342_v4 = vmax.f32 %v6830_v58, 0.0 }
 0x245   : > { %10801 = vmatprep.mubr.msk.bf16.mxu0 %vm3135_vm0, %v14011_v55  ;;  %10929 = vmatprep.mubr.msk.bf16.mxu1 %vm3135_vm0, %v14013_v56 }
 0x246   : > { %v7087_v5 = vmax.f32 %v6575_v1, 0.0  ;;  %v7343_v6 = vmax.f32 %v6831_v2, 0.0 }
 0x247   : > { %v4177_v7 = vpop.f32.mrb[116].mxu0  ;;  %v5201_v8 = vpop.f32.mrb[116].mxu1 }
 0x248   : > { %v12177_v9 = vpack.c.bf16 %v7087_v5, %v7086_v3  ;;  %v12817_v10 = vpack.c.bf16 %v7343_v6, %v7342_v4  ;;  %v6057_v11 = vmul.f32 %v15244_v43, %v4177_v7  ;;  %v6313_v12 = vmul.f32 %v15244_v43, %v5201_v8  ;;  %v4179_v13 = vpop.f32.mrb[117].mxu0  ;;  %v5203_v14 = vpop.f32.mrb[117].mxu1  ;;  %v14027_v5 = vld [vmem:[%s14799_s30 + $0x3a0] ss:$8 sps:$4 sm:$0xff]  }
 0x249   : > { %v4180_v17 = vpop.f32.mrb[118].mxu0  ;;  %v5204_v18 = vpop.f32.mrb[118].mxu1  ;;  %v14028_v6 = vld [vmem:[%s14799_s30 + $0xba0] ss:$8 sps:$4 sm:$0xff]  }
 0x24a   : > { %13341 = vst [vmem:[%s15008_s10 + $0xe0] sm:$0xff] %v12177_v9   ;;  %13469 = vst [vmem:[%s15008_s10 + $0x4e0] sm:$0xff] %v12817_v10   ;;  %v6576_v21 = vadd.f32 %v15254_v54, %v6057_v11  ;;  %v6832_v22 = vadd.f32 %v15254_v54, %v6313_v12  ;;  %v6058_v23 = vmul.f32 %v15244_v43, %v4180_v17  ;;  %v4182_v25 = vpop.f32.mrb[119].mxu0  ;;  %v5206_v26 = vpop.f32.mrb[119].mxu1  ;;  %v14029_v9 = vld [vmem:[%s14799_s30 + $0x3b4] ss:$8 sps:$4 sm:$0xff]  }
 0x24b   : > { %v6314_v24 = vmul.f32 %v15244_v43, %v5204_v18  ;;  %v14031_v10 = vld [vmem:[%s14799_s30 + $0xbb4] ss:$8 sps:$4 sm:$0xff]   ;;  %v15504_v25 = vld [vmem:[#allocation5] ss:$0 sm:$0xff] }
 0x24c   : > { %v6577_v27 = vadd.f32 %v15254_v54, %v6058_v23  ;;  %4392 = vmatmul.mubr.bf16.gmra.mrb[224].mxu0 %v14015_v15  ;;  %5416 = vmatmul.mubr.bf16.gmra.mrb[224].mxu1 %v14016_v16  ;;  %v7088_v29 = vmax.f32 %v6576_v21, 0.0  ;;  %v7344_v30 = vmax.f32 %v6832_v22, 0.0 }
 0x24d   : > { %v6833_v28 = vadd.f32 %v15254_v54, %v6314_v24  ;;  %10802 = vmatprep.mubr.msk.bf16.mxu0 %vm3135_vm0, %v14017_v19  ;;  %10930 = vmatprep.mubr.msk.bf16.mxu1 %vm3135_vm0, %v14019_v20 }
 0x24e   : > { %v7089_v31 = vmax.f32 %v6577_v27, 0.0 }
 0x24f   : > { %v7345_v32 = vmax.f32 %v6833_v28, 0.0  ;;  %v4185_v33 = vpop.f32.mrb[120].mxu0  ;;  %v5209_v34 = vpop.f32.mrb[120].mxu1 }
 0x250   : > { %v12182_v35 = vpack.c.bf16 %v7089_v31, %v7088_v29  ;;  %v6059_v37 = vmul.f32 %v15244_v43, %v4185_v33  ;;  %v6315_v38 = vmul.f32 %v15244_v43, %v5209_v34  ;;  %v4187_v39 = vpop.f32.mrb[121].mxu0  ;;  %v5211_v61 = vpop.f32.mrb[121].mxu1  ;;  %v14034_v31 = vld [vmem:[%s14799_s30 + $0xbb0] ss:$8 sps:$4 sm:$0xff]   ;;  %v14035_v34 = vld [vmem:[%s14799_s30 + $0x3c4] ss:$8 sps:$4 sm:$0xff]  }
 0x251   : > { %v12822_v36 = vpack.c.bf16 %v7345_v32, %v7344_v30  ;;  %v4188_v42 = vpop.f32.mrb[122].mxu0  ;;  %v5212_v63 = vpop.f32.mrb[122].mxu1  ;;  %v14033_v30 = vld [vmem:[%s14799_s30 + $0x3b0] ss:$8 sps:$4 sm:$0xff]  }
 0x252   : > { %13342 = vst [vmem:[%s15008_s10 + $0xe8] sm:$0xff] %v12182_v35   ;;  %v6578_v46 = vadd.f32 %v15254_v54, %v6059_v37  ;;  %v6834_v47 = vadd.f32 %v15254_v54, %v6315_v38  ;;  %v6060_v48 = vmul.f32 %v15244_v43, %v4188_v42  ;;  %v6316_v49 = vmul.f32 %v15244_v43, %v5212_v63  ;;  %v4190_v50 = vpop.f32.mrb[123].mxu0  ;;  %v5214_v51 = vpop.f32.mrb[123].mxu1  ;;  %v14037_v35 = vld [vmem:[%s14799_s30 + $0xbc4] ss:$8 sps:$4 sm:$0xff]  }
 0x253   : > { %13470 = vst [vmem:[%s15008_s10 + $0x4e8] sm:$0xff] %v12822_v36   ;;  %v15514_v36 = vld [vmem:[#allocation7] ss:$0 sm:$0xff] }
 0x254   : > { %v6579_v52 = vadd.f32 %v15254_v54, %v6060_v48  ;;  %v6835_v53 = vadd.f32 %v15254_v54, %v6316_v49  ;;  %4400 = vmatmul.mubr.bf16.gmra.mrb[228].mxu0 %v14021_v40  ;;  %5424 = vmatmul.mubr.bf16.gmra.mrb[228].mxu1 %v14022_v41  ;;  %v7090_v55 = vmax.f32 %v6578_v46, 0.0  ;;  %v7346_v56 = vmax.f32 %v6834_v47, 0.0 }
 0x255   : > { %10803 = vmatprep.mubr.msk.bf16.mxu0 %vm3135_vm0, %v14023_v44  ;;  %10931 = vmatprep.mubr.msk.bf16.mxu1 %vm3135_vm0, %v14025_v45 }
 0x256   : > { %v7091_v57 = vmax.f32 %v6579_v52, 0.0  ;;  %v7347_v58 = vmax.f32 %v6835_v53, 0.0 }
 0x257   : > { %v4193_v59 = vpop.f32.mrb[124].mxu0  ;;  %v5217_v60 = vpop.f32.mrb[124].mxu1 }
 0x258   : > { %v12187_v62 = vpack.c.bf16 %v7091_v57, %v7090_v55  ;;  %v12827_v0 = vpack.c.bf16 %v7347_v58, %v7346_v56  ;;  %v6061_v1 = vmul.f32 %v15244_v43, %v4193_v59  ;;  %v6317_v2 = vmul.f32 %v15244_v43, %v5217_v60  ;;  %v4195_v3 = vpop.f32.mrb[125].mxu0  ;;  %v5219_v4 = vpop.f32.mrb[125].mxu1  ;;  %v14039_v57 = vld [vmem:[%s14799_s30 + $0x3c0] ss:$8 sps:$4 sm:$0xff]  }
 0x259   : > { %v4196_v7 = vpop.f32.mrb[126].mxu0  ;;  %v5220_v8 = vpop.f32.mrb[126].mxu1  ;;  %v14040_v58 = vld [vmem:[%s14799_s30 + $0xbc0] ss:$8 sps:$4 sm:$0xff]  }
 0x25a   : > { %13343 = vst [vmem:[%s15008_s10 + $0xf0] sm:$0xff] %v12187_v62   ;;  %13471 = vst [vmem:[%s15008_s10 + $0x4f0] sm:$0xff] %v12827_v0   ;;  %v6580_v11 = vadd.f32 %v15254_v54, %v6061_v1  ;;  %v6836_v12 = vadd.f32 %v15254_v54, %v6317_v2  ;;  %v6062_v13 = vmul.f32 %v15244_v43, %v4196_v7  ;;  %v4198_v15 = vpop.f32.mrb[127].mxu0  ;;  %v5222_v16 = vpop.f32.mrb[127].mxu1  ;;  %v14041_v62 = vld [vmem:[%s14799_s30 + $0x3d4] ss:$8 sps:$4 sm:$0xff]  }
 0x25b   : > { %v6318_v14 = vmul.f32 %v15244_v43, %v5220_v8  ;;  %v14043_v0 = vld [vmem:[%s14799_s30 + $0xbd4] ss:$8 sps:$4 sm:$0xff]  }
 0x25c   : > { %v6581_v17 = vadd.f32 %v15254_v54, %v6062_v13  ;;  %4408 = vmatmul.mubr.bf16.gmra.mrb[232].mxu0 %v14027_v5  ;;  %5432 = vmatmul.mubr.bf16.gmra.mrb[232].mxu1 %v14028_v6  ;;  %v7092_v19 = vmax.f32 %v6580_v11, 0.0  ;;  %v7348_v20 = vmax.f32 %v6836_v12, 0.0 }
 0x25d   : > { %v6837_v18 = vadd.f32 %v15254_v54, %v6318_v14  ;;  %10804 = vmatprep.mubr.msk.bf16.mxu0 %vm3135_vm0, %v14029_v9  ;;  %10932 = vmatprep.mubr.msk.bf16.mxu1 %vm3135_vm0, %v14031_v10 }
 0x25e   : > { %v7093_v21 = vmax.f32 %v6581_v17, 0.0 }
 0x25f   : > { %v7349_v43 = vmax.f32 %v6837_v18, 0.0  ;;  %v4201_v22 = vpop.f32.mrb[128].mxu0  ;;  %v5225_v23 = vpop.f32.mrb[128].mxu1 }
 0x260   : > { %v12192_v24 = vpack.c.bf16 %v7093_v21, %v7092_v19  ;;  %v6063_v26 = vmul.f32 %v15504_v25, %v4201_v22  ;;  %v6319_v27 = vmul.f32 %v15504_v25, %v5225_v23  ;;  %v4203_v28 = vpop.f32.mrb[129].mxu0  ;;  %v5227_v29 = vpop.f32.mrb[129].mxu1  ;;  %v14045_v21 = vld [vmem:[%s14799_s30 + $0x3d0] ss:$8 sps:$4 sm:$0xff]  }
 0x261   : > { %v12832_v54 = vpack.c.bf16 %v7349_v43, %v7348_v20  ;;  %v4204_v32 = vpop.f32.mrb[130].mxu0  ;;  %v5228_v33 = vpop.f32.mrb[130].mxu1  ;;  %v14046_v43 = vld [vmem:[%s14799_s30 + $0xbd0] ss:$8 sps:$4 sm:$0xff]  }
 0x262   : > { %13344 = vst [vmem:[%s15008_s10 + $0xf8] sm:$0xff] %v12192_v24   ;;  %v6582_v37 = vadd.f32 %v15514_v36, %v6063_v26  ;;  %v6838_v38 = vadd.f32 %v15514_v36, %v6319_v27  ;;  %v6064_v39 = vmul.f32 %v15504_v25, %v4204_v32  ;;  %v6320_v61 = vmul.f32 %v15504_v25, %v5228_v33  ;;  %v4206_v40 = vpop.f32.mrb[131].mxu0  ;;  %v5230_v41 = vpop.f32.mrb[131].mxu1  ;;  %v14047_v24 = vld [vmem:[%s14799_s30 + $0x3e4] ss:$8 sps:$4 sm:$0xff]  }
 0x263   : > { %13472 = vst [vmem:[%s15008_s10 + $0x4f8] sm:$0xff] %v12832_v54   ;;  %v14049_v54 = vld [vmem:[%s14799_s30 + $0xbe4] ss:$8 sps:$4 sm:$0xff]  }
 0x264   : > { %v6583_v42 = vadd.f32 %v15514_v36, %v6064_v39  ;;  %v6839_v63 = vadd.f32 %v15514_v36, %v6320_v61  ;;  %4416 = vmatmul.mubr.bf16.gmra.mrb[236].mxu0 %v14033_v30  ;;  %5440 = vmatmul.mubr.bf16.gmra.mrb[236].mxu1 %v14034_v31  ;;  %v7094_v44 = vmax.f32 %v6582_v37, 0.0  ;;  %v7350_v45 = vmax.f32 %v6838_v38, 0.0 }
 0x265   : > { %10805 = vmatprep.mubr.msk.bf16.mxu0 %vm3135_vm0, %v14035_v34  ;;  %10933 = vmatprep.mubr.msk.bf16.mxu1 %vm3135_vm0, %v14037_v35 }
 0x266   : > { %v7095_v46 = vmax.f32 %v6583_v42, 0.0  ;;  %v7351_v47 = vmax.f32 %v6839_v63, 0.0 }
 0x267   : > { %v4209_v48 = vpop.f32.mrb[132].mxu0  ;;  %v5233_v49 = vpop.f32.mrb[132].mxu1 }
 0x268   : > { %v12197_v50 = vpack.c.bf16 %v7095_v46, %v7094_v44  ;;  %v12837_v51 = vpack.c.bf16 %v7351_v47, %v7350_v45  ;;  %v6065_v52 = vmul.f32 %v15504_v25, %v4209_v48  ;;  %v6321_v53 = vmul.f32 %v15504_v25, %v5233_v49  ;;  %v4211_v55 = vpop.f32.mrb[133].mxu0  ;;  %v5235_v56 = vpop.f32.mrb[133].mxu1  ;;  %v14051_v46 = vld [vmem:[%s14799_s30 + $0x3e0] ss:$8 sps:$4 sm:$0xff]  }
 0x269   : > { %v4212_v59 = vpop.f32.mrb[134].mxu0  ;;  %v5236_v60 = vpop.f32.mrb[134].mxu1  ;;  %v14052_v47 = vld [vmem:[%s14799_s30 + $0xbe0] ss:$8 sps:$4 sm:$0xff]  }
 0x26a   : > { %13345 = vst [vmem:[%s15008_s10 + $0x100] sm:$0xff] %v12197_v50   ;;  %13473 = vst [vmem:[%s15008_s10 + $0x500] sm:$0xff] %v12837_v51   ;;  %v6584_v1 = vadd.f32 %v15514_v36, %v6065_v52  ;;  %v6840_v2 = vadd.f32 %v15514_v36, %v6321_v53  ;;  %v6066_v3 = vmul.f32 %v15504_v25, %v4212_v59  ;;  %v4214_v5 = vpop.f32.mrb[135].mxu0  ;;  %v5238_v6 = vpop.f32.mrb[135].mxu1  ;;  %v14053_v50 = vld [vmem:[%s14799_s30 + $0x3f4] ss:$8 sps:$4 sm:$0xff]  }
 0x26b   : > { %v6322_v4 = vmul.f32 %v15504_v25, %v5236_v60  ;;  %v14055_v51 = vld [vmem:[%s14799_s30 + $0xbf4] ss:$8 sps:$4 sm:$0xff]  }
 0x26c   : > { %v6585_v7 = vadd.f32 %v15514_v36, %v6066_v3  ;;  %4424 = vmatmul.mubr.bf16.gmra.mrb[240].mxu0 %v14039_v57  ;;  %5448 = vmatmul.mubr.bf16.gmra.mrb[240].mxu1 %v14040_v58  ;;  %v7096_v9 = vmax.f32 %v6584_v1, 0.0  ;;  %v7352_v10 = vmax.f32 %v6840_v2, 0.0 }
 0x26d   : > { %v6841_v8 = vadd.f32 %v15514_v36, %v6322_v4  ;;  %10806 = vmatprep.mubr.msk.bf16.mxu0 %vm3135_vm0, %v14041_v62  ;;  %10934 = vmatprep.mubr.msk.bf16.mxu1 %vm3135_vm0, %v14043_v0 }
 0x26e   : > { %v7097_v11 = vmax.f32 %v6585_v7, 0.0 }
 0x26f   : > { %v7353_v12 = vmax.f32 %v6841_v8, 0.0  ;;  %v4217_v13 = vpop.f32.mrb[136].mxu0  ;;  %v5241_v14 = vpop.f32.mrb[136].mxu1 }
 0x270   : > { %v12202_v15 = vpack.c.bf16 %v7097_v11, %v7096_v9  ;;  %v6067_v17 = vmul.f32 %v15504_v25, %v4217_v13  ;;  %v6323_v18 = vmul.f32 %v15504_v25, %v5241_v14  ;;  %v4219_v19 = vpop.f32.mrb[137].mxu0  ;;  %v5243_v20 = vpop.f32.mrb[137].mxu1  ;;  %v14057_v11 = vld [vmem:[%s14799_s30 + $0x3f0] ss:$8 sps:$4 sm:$0xff]  }
 0x271   : > { %v12842_v16 = vpack.c.bf16 %v7353_v12, %v7352_v10  ;;  %v4220_v22 = vpop.f32.mrb[138].mxu0  ;;  %v5244_v23 = vpop.f32.mrb[138].mxu1  ;;  %v14058_v12 = vld [vmem:[%s14799_s30 + $0xbf0] ss:$8 sps:$4 sm:$0xff]  }
 0x272   : > { %13346 = vst [vmem:[%s15008_s10 + $0x108] sm:$0xff] %v12202_v15   ;;  %v6586_v26 = vadd.f32 %v15514_v36, %v6067_v17  ;;  %v6842_v27 = vadd.f32 %v15514_v36, %v6323_v18  ;;  %v6068_v28 = vmul.f32 %v15504_v25, %v4220_v22  ;;  %v6324_v29 = vmul.f32 %v15504_v25, %v5244_v23  ;;  %v4222_v30 = vpop.f32.mrb[139].mxu0  ;;  %v5246_v31 = vpop.f32.mrb[139].mxu1  ;;  %v14061_v15 = vld [vmem:[%s14799_s30 + $0x404] ss:$8 sps:$4 sm:$0xff]  }
 0x273   : > { %13474 = vst [vmem:[%s15008_s10 + $0x508] sm:$0xff] %v12842_v16   ;;  %v14064_v16 = vld [vmem:[%s14799_s30 + $0xc04] ss:$8 sps:$4 sm:$0xff]  }
 0x274   : > { %v6587_v32 = vadd.f32 %v15514_v36, %v6068_v28  ;;  %v6843_v33 = vadd.f32 %v15514_v36, %v6324_v29  ;;  %4432 = vmatmul.mubr.bf16.gmra.mrb[244].mxu0 %v14045_v21  ;;  %5456 = vmatmul.mubr.bf16.gmra.mrb[244].mxu1 %v14046_v43  ;;  %v7098_v34 = vmax.f32 %v6586_v26, 0.0  ;;  %v7354_v35 = vmax.f32 %v6842_v27, 0.0 }
 0x275   : > { %10807 = vmatprep.mubr.msk.bf16.mxu0 %vm3135_vm0, %v14047_v24  ;;  %10935 = vmatprep.mubr.msk.bf16.mxu1 %vm3135_vm0, %v14049_v54 }
 0x276   : > { %v7099_v37 = vmax.f32 %v6587_v32, 0.0  ;;  %v7355_v38 = vmax.f32 %v6843_v33, 0.0 }
 0x277   : > { %v4225_v39 = vpop.f32.mrb[140].mxu0  ;;  %v5249_v61 = vpop.f32.mrb[140].mxu1 }
 0x278   : > { %v12207_v40 = vpack.c.bf16 %v7099_v37, %v7098_v34  ;;  %v12847_v41 = vpack.c.bf16 %v7355_v38, %v7354_v35  ;;  %v6069_v42 = vmul.f32 %v15504_v25, %v4225_v39  ;;  %v6325_v63 = vmul.f32 %v15504_v25, %v5249_v61  ;;  %v4227_v44 = vpop.f32.mrb[141].mxu0  ;;  %v5251_v45 = vpop.f32.mrb[141].mxu1  ;;  %v14059_v37 = vld [vmem:[%s14799_s30 + $0x400] ss:$8 sps:$4 sm:$0xff]  }
 0x279   : > { %v4228_v48 = vpop.f32.mrb[142].mxu0  ;;  %v5252_v49 = vpop.f32.mrb[142].mxu1  ;;  %v14062_v38 = vld [vmem:[%s14799_s30 + $0xc00] ss:$8 sps:$4 sm:$0xff]  }
 0x27a   : > { %13347 = vst [vmem:[%s15008_s10 + $0x110] sm:$0xff] %v12207_v40   ;;  %13475 = vst [vmem:[%s15008_s10 + $0x510] sm:$0xff] %v12847_v41   ;;  %v6588_v52 = vadd.f32 %v15514_v36, %v6069_v42  ;;  %v6844_v53 = vadd.f32 %v15514_v36, %v6325_v63  ;;  %v6070_v55 = vmul.f32 %v15504_v25, %v4228_v48  ;;  %v4230_v57 = vpop.f32.mrb[143].mxu0  ;;  %v5254_v58 = vpop.f32.mrb[143].mxu1  ;;  %v14067_v40 = vld [vmem:[%s14799_s30 + $0x414] ss:$8 sps:$4 sm:$0xff]  }
 0x27b   : > { %v6326_v56 = vmul.f32 %v15504_v25, %v5252_v49  ;;  %v14070_v41 = vld [vmem:[%s14799_s30 + $0xc14] ss:$8 sps:$4 sm:$0xff]  }
 0x27c   : > { %v6589_v59 = vadd.f32 %v15514_v36, %v6070_v55  ;;  %4440 = vmatmul.mubr.bf16.gmra.mrb[248].mxu0 %v14051_v46  ;;  %5464 = vmatmul.mubr.bf16.gmra.mrb[248].mxu1 %v14052_v47  ;;  %v7100_v62 = vmax.f32 %v6588_v52, 0.0  ;;  %v7356_v0 = vmax.f32 %v6844_v53, 0.0 }
 0x27d   : > { %v6845_v60 = vadd.f32 %v15514_v36, %v6326_v56  ;;  %10808 = vmatprep.mubr.msk.bf16.mxu0 %vm3135_vm0, %v14053_v50  ;;  %10936 = vmatprep.mubr.msk.bf16.mxu1 %vm3135_vm0, %v14055_v51 }
 0x27e   : > { %v7101_v1 = vmax.f32 %v6589_v59, 0.0 }
 0x27f   : > { %v7357_v2 = vmax.f32 %v6845_v60, 0.0  ;;  %v4233_v3 = vpop.f32.mrb[144].mxu0  ;;  %v5257_v4 = vpop.f32.mrb[144].mxu1 }
 0x280   : > { %v12212_v5 = vpack.c.bf16 %v7101_v1, %v7100_v62  ;;  %v6071_v7 = vmul.f32 %v15504_v25, %v4233_v3  ;;  %v6327_v8 = vmul.f32 %v15504_v25, %v5257_v4  ;;  %v4235_v9 = vpop.f32.mrb[145].mxu0  ;;  %v5259_v10 = vpop.f32.mrb[145].mxu1  ;;  %v14065_v1 = vld [vmem:[%s14799_s30 + $0x410] ss:$8 sps:$4 sm:$0xff]  }
 0x281   : > { %v12852_v6 = vpack.c.bf16 %v7357_v2, %v7356_v0  ;;  %v4236_v13 = vpop.f32.mrb[146].mxu0  ;;  %v5260_v14 = vpop.f32.mrb[146].mxu1  ;;  %v14068_v2 = vld [vmem:[%s14799_s30 + $0xc10] ss:$8 sps:$4 sm:$0xff]  }
 0x282   : > { %13348 = vst [vmem:[%s15008_s10 + $0x118] sm:$0xff] %v12212_v5   ;;  %v6590_v17 = vadd.f32 %v15514_v36, %v6071_v7  ;;  %v6846_v18 = vadd.f32 %v15514_v36, %v6327_v8  ;;  %v6072_v19 = vmul.f32 %v15504_v25, %v4236_v13  ;;  %v6328_v20 = vmul.f32 %v15504_v25, %v5260_v14  ;;  %v4238_v21 = vpop.f32.mrb[147].mxu0  ;;  %v5262_v43 = vpop.f32.mrb[147].mxu1  ;;  %v14073_v5 = vld [vmem:[%s14799_s30 + $0x424] ss:$8 sps:$4 sm:$0xff]  }
 0x283   : > { %13476 = vst [vmem:[%s15008_s10 + $0x518] sm:$0xff] %v12852_v6   ;;  %v14076_v6 = vld [vmem:[%s14799_s30 + $0xc24] ss:$8 sps:$4 sm:$0xff]  }
 0x284   : > { %v6591_v22 = vadd.f32 %v15514_v36, %v6072_v19  ;;  %v6847_v23 = vadd.f32 %v15514_v36, %v6328_v20  ;;  %4448 = vmatmul.mubr.bf16.gmra.mrb[252].mxu0 %v14057_v11  ;;  %5472 = vmatmul.mubr.bf16.gmra.mrb[252].mxu1 %v14058_v12  ;;  %v7102_v24 = vmax.f32 %v6590_v17, 0.0  ;;  %v7358_v54 = vmax.f32 %v6846_v18, 0.0 }
 0x285   : > { %10809 = vmatprep.mubr.msk.bf16.mxu0 %vm3135_vm0, %v14061_v15  ;;  %10937 = vmatprep.mubr.msk.bf16.mxu1 %vm3135_vm0, %v14064_v16 }
 0x286   : > { %v7103_v26 = vmax.f32 %v6591_v22, 0.0  ;;  %v7359_v27 = vmax.f32 %v6847_v23, 0.0 }
 0x287   : > { %v4241_v28 = vpop.f32.mrb[148].mxu0  ;;  %v5265_v29 = vpop.f32.mrb[148].mxu1 }
 0x288   : > { %v12217_v30 = vpack.c.bf16 %v7103_v26, %v7102_v24  ;;  %v12857_v31 = vpack.c.bf16 %v7359_v27, %v7358_v54  ;;  %v6073_v32 = vmul.f32 %v15504_v25, %v4241_v28  ;;  %v6329_v33 = vmul.f32 %v15504_v25, %v5265_v29  ;;  %v4243_v34 = vpop.f32.mrb[149].mxu0  ;;  %v5267_v35 = vpop.f32.mrb[149].mxu1  ;;  %v14071_v26 = vld [vmem:[%s14799_s30 + $0x420] ss:$8 sps:$4 sm:$0xff]  }
 0x289   : > { %v4244_v39 = vpop.f32.mrb[150].mxu0  ;;  %v5268_v61 = vpop.f32.mrb[150].mxu1  ;;  %v14074_v27 = vld [vmem:[%s14799_s30 + $0xc20] ss:$8 sps:$4 sm:$0xff]  }
 0x28a   : > { %13349 = vst [vmem:[%s15008_s10 + $0x120] sm:$0xff] %v12217_v30   ;;  %13477 = vst [vmem:[%s15008_s10 + $0x520] sm:$0xff] %v12857_v31   ;;  %v6592_v42 = vadd.f32 %v15514_v36, %v6073_v32  ;;  %v6848_v63 = vadd.f32 %v15514_v36, %v6329_v33  ;;  %v6074_v44 = vmul.f32 %v15504_v25, %v4244_v39  ;;  %v4246_v46 = vpop.f32.mrb[151].mxu0  ;;  %v5270_v47 = vpop.f32.mrb[151].mxu1  ;;  %v14079_v30 = vld [vmem:[%s14799_s30 + $0x434] ss:$8 sps:$4 sm:$0xff]  }
 0x28b   : > { %v6330_v45 = vmul.f32 %v15504_v25, %v5268_v61  ;;  %v14082_v31 = vld [vmem:[%s14799_s30 + $0xc34] ss:$8 sps:$4 sm:$0xff]  }
 0x28c   : > { %v6593_v48 = vadd.f32 %v15514_v36, %v6074_v44  ;;  %4456 = vmatmul.mubr.bf16.gmra.mrb[0].mxu0 %v14059_v37  ;;  %5480 = vmatmul.mubr.bf16.gmra.mrb[0].mxu1 %v14062_v38  ;;  %v7104_v50 = vmax.f32 %v6592_v42, 0.0  ;;  %v7360_v51 = vmax.f32 %v6848_v63, 0.0 }
 0x28d   : > { %v6849_v49 = vadd.f32 %v15514_v36, %v6330_v45  ;;  %10810 = vmatprep.mubr.msk.bf16.mxu0 %vm3135_vm0, %v14067_v40  ;;  %10938 = vmatprep.mubr.msk.bf16.mxu1 %vm3135_vm0, %v14070_v41 }
 0x28e   : > { %v7105_v52 = vmax.f32 %v6593_v48, 0.0 }
 0x28f   : > { %v7361_v53 = vmax.f32 %v6849_v49, 0.0  ;;  %v4249_v55 = vpop.f32.mrb[152].mxu0  ;;  %v5273_v56 = vpop.f32.mrb[152].mxu1 }
 0x290   : > { %v12222_v57 = vpack.c.bf16 %v7105_v52, %v7104_v50  ;;  %v6075_v59 = vmul.f32 %v15504_v25, %v4249_v55  ;;  %v6331_v60 = vmul.f32 %v15504_v25, %v5273_v56  ;;  %v4251_v62 = vpop.f32.mrb[153].mxu0  ;;  %v5275_v0 = vpop.f32.mrb[153].mxu1  ;;  %v14077_v52 = vld [vmem:[%s14799_s30 + $0x430] ss:$8 sps:$4 sm:$0xff]  }
 0x291   : > { %v12862_v58 = vpack.c.bf16 %v7361_v53, %v7360_v51  ;;  %v4252_v3 = vpop.f32.mrb[154].mxu0  ;;  %v5276_v4 = vpop.f32.mrb[154].mxu1  ;;  %v14080_v53 = vld [vmem:[%s14799_s30 + $0xc30] ss:$8 sps:$4 sm:$0xff]  }
 0x292   : > { %13350 = vst [vmem:[%s15008_s10 + $0x128] sm:$0xff] %v12222_v57   ;;  %v6594_v7 = vadd.f32 %v15514_v36, %v6075_v59  ;;  %v6850_v8 = vadd.f32 %v15514_v36, %v6331_v60  ;;  %v6076_v9 = vmul.f32 %v15504_v25, %v4252_v3  ;;  %v6332_v10 = vmul.f32 %v15504_v25, %v5276_v4  ;;  %v4254_v11 = vpop.f32.mrb[155].mxu0  ;;  %v5278_v12 = vpop.f32.mrb[155].mxu1  ;;  %v14085_v57 = vld [vmem:[%s14799_s30 + $0x444] ss:$8 sps:$4 sm:$0xff]  }
 0x293   : > { %13478 = vst [vmem:[%s15008_s10 + $0x528] sm:$0xff] %v12862_v58   ;;  %v14088_v58 = vld [vmem:[%s14799_s30 + $0xc44] ss:$8 sps:$4 sm:$0xff]  }
 0x294   : > { %v6595_v13 = vadd.f32 %v15514_v36, %v6076_v9  ;;  %v6851_v14 = vadd.f32 %v15514_v36, %v6332_v10  ;;  %4464 = vmatmul.mubr.bf16.gmra.mrb[4].mxu0 %v14065_v1  ;;  %5488 = vmatmul.mubr.bf16.gmra.mrb[4].mxu1 %v14068_v2  ;;  %v7106_v15 = vmax.f32 %v6594_v7, 0.0  ;;  %v7362_v16 = vmax.f32 %v6850_v8, 0.0 }
 0x295   : > { %10811 = vmatprep.mubr.msk.bf16.mxu0 %vm3135_vm0, %v14073_v5  ;;  %10939 = vmatprep.mubr.msk.bf16.mxu1 %vm3135_vm0, %v14076_v6 }
 0x296   : > { %v7107_v17 = vmax.f32 %v6595_v13, 0.0  ;;  %v7363_v18 = vmax.f32 %v6851_v14, 0.0 }
 0x297   : > { %v4257_v19 = vpop.f32.mrb[156].mxu0  ;;  %v5281_v20 = vpop.f32.mrb[156].mxu1 }
 0x298   : > { %v12227_v21 = vpack.c.bf16 %v7107_v17, %v7106_v15  ;;  %v12867_v43 = vpack.c.bf16 %v7363_v18, %v7362_v16  ;;  %v6077_v22 = vmul.f32 %v15504_v25, %v4257_v19  ;;  %v6333_v23 = vmul.f32 %v15504_v25, %v5281_v20  ;;  %v4259_v24 = vpop.f32.mrb[157].mxu0  ;;  %v5283_v54 = vpop.f32.mrb[157].mxu1  ;;  %v14083_v17 = vld [vmem:[%s14799_s30 + $0x440] ss:$8 sps:$4 sm:$0xff]  }
 0x299   : > { %v4260_v28 = vpop.f32.mrb[158].mxu0  ;;  %v5284_v29 = vpop.f32.mrb[158].mxu1  ;;  %v14086_v18 = vld [vmem:[%s14799_s30 + $0xc40] ss:$8 sps:$4 sm:$0xff]  }
 0x29a   : > { %13351 = vst [vmem:[%s15008_s10 + $0x130] sm:$0xff] %v12227_v21   ;;  %13479 = vst [vmem:[%s15008_s10 + $0x530] sm:$0xff] %v12867_v43   ;;  %v6596_v32 = vadd.f32 %v15514_v36, %v6077_v22  ;;  %v6852_v33 = vadd.f32 %v15514_v36, %v6333_v23  ;;  %v6078_v34 = vmul.f32 %v15504_v25, %v4260_v28  ;;  %v4262_v37 = vpop.f32.mrb[159].mxu0  ;;  %v5286_v38 = vpop.f32.mrb[159].mxu1  ;;  %v14091_v21 = vld [vmem:[%s14799_s30 + $0x454] ss:$8 sps:$4 sm:$0xff]  }
 0x29b   : > { %v6334_v35 = vmul.f32 %v15504_v25, %v5284_v29  ;;  %v14094_v43 = vld [vmem:[%s14799_s30 + $0xc54] ss:$8 sps:$4 sm:$0xff]  }
 0x29c   : > { %v6597_v39 = vadd.f32 %v15514_v36, %v6078_v34  ;;  %4472 = vmatmul.mubr.bf16.gmra.mrb[8].mxu0 %v14071_v26  ;;  %5496 = vmatmul.mubr.bf16.gmra.mrb[8].mxu1 %v14074_v27  ;;  %v7108_v40 = vmax.f32 %v6596_v32, 0.0  ;;  %v7364_v41 = vmax.f32 %v6852_v33, 0.0 }
 0x29d   : > { %v6853_v61 = vadd.f32 %v15514_v36, %v6334_v35  ;;  %10812 = vmatprep.mubr.msk.bf16.mxu0 %vm3135_vm0, %v14079_v30  ;;  %10940 = vmatprep.mubr.msk.bf16.mxu1 %vm3135_vm0, %v14082_v31 }
 0x29e   : > { %v7109_v42 = vmax.f32 %v6597_v39, 0.0 }
 0x29f   : > { %v7365_v63 = vmax.f32 %v6853_v61, 0.0  ;;  %v4265_v44 = vpop.f32.mrb[160].mxu0  ;;  %v5289_v45 = vpop.f32.mrb[160].mxu1 }
 0x2a0   : > { %v12232_v46 = vpack.c.bf16 %v7109_v42, %v7108_v40  ;;  %v6079_v48 = vmul.f32 %v15504_v25, %v4265_v44  ;;  %v6335_v49 = vmul.f32 %v15504_v25, %v5289_v45  ;;  %v4267_v50 = vpop.f32.mrb[161].mxu0  ;;  %v5291_v51 = vpop.f32.mrb[161].mxu1  ;;  %v14089_v42 = vld [vmem:[%s14799_s30 + $0x450] ss:$8 sps:$4 sm:$0xff]  }
 0x2a1   : > { %v12872_v47 = vpack.c.bf16 %v7365_v63, %v7364_v41  ;;  %v4268_v55 = vpop.f32.mrb[162].mxu0  ;;  %v5292_v56 = vpop.f32.mrb[162].mxu1  ;;  %v14092_v63 = vld [vmem:[%s14799_s30 + $0xc50] ss:$8 sps:$4 sm:$0xff]  }
 0x2a2   : > { %13352 = vst [vmem:[%s15008_s10 + $0x138] sm:$0xff] %v12232_v46   ;;  %v6598_v59 = vadd.f32 %v15514_v36, %v6079_v48  ;;  %v6854_v60 = vadd.f32 %v15514_v36, %v6335_v49  ;;  %v6080_v62 = vmul.f32 %v15504_v25, %v4268_v55  ;;  %v6336_v0 = vmul.f32 %v15504_v25, %v5292_v56  ;;  %v4270_v1 = vpop.f32.mrb[163].mxu0  ;;  %v5294_v2 = vpop.f32.mrb[163].mxu1  ;;  %v14097_v46 = vld [vmem:[%s14799_s30 + $0x464] ss:$8 sps:$4 sm:$0xff]  }
 0x2a3   : > { %13480 = vst [vmem:[%s15008_s10 + $0x538] sm:$0xff] %v12872_v47   ;;  %v14100_v47 = vld [vmem:[%s14799_s30 + $0xc64] ss:$8 sps:$4 sm:$0xff]  }
 0x2a4   : > { %v6599_v3 = vadd.f32 %v15514_v36, %v6080_v62  ;;  %v6855_v4 = vadd.f32 %v15514_v36, %v6336_v0  ;;  %4480 = vmatmul.mubr.bf16.gmra.mrb[12].mxu0 %v14077_v52  ;;  %5504 = vmatmul.mubr.bf16.gmra.mrb[12].mxu1 %v14080_v53  ;;  %v7110_v5 = vmax.f32 %v6598_v59, 0.0  ;;  %v7366_v6 = vmax.f32 %v6854_v60, 0.0 }
 0x2a5   : > { %10813 = vmatprep.mubr.msk.bf16.mxu0 %vm3135_vm0, %v14085_v57  ;;  %10941 = vmatprep.mubr.msk.bf16.mxu1 %vm3135_vm0, %v14088_v58 }
 0x2a6   : > { %v7111_v7 = vmax.f32 %v6599_v3, 0.0  ;;  %v7367_v8 = vmax.f32 %v6855_v4, 0.0 }
 0x2a7   : > { %v4273_v9 = vpop.f32.mrb[164].mxu0  ;;  %v5297_v10 = vpop.f32.mrb[164].mxu1 }
 0x2a8   : > { %v12237_v11 = vpack.c.bf16 %v7111_v7, %v7110_v5  ;;  %v12877_v12 = vpack.c.bf16 %v7367_v8, %v7366_v6  ;;  %v6081_v13 = vmul.f32 %v15504_v25, %v4273_v9  ;;  %v6337_v14 = vmul.f32 %v15504_v25, %v5297_v10  ;;  %v4275_v15 = vpop.f32.mrb[165].mxu0  ;;  %v5299_v16 = vpop.f32.mrb[165].mxu1  ;;  %v14095_v7 = vld [vmem:[%s14799_s30 + $0x460] ss:$8 sps:$4 sm:$0xff]  }
 0x2a9   : > { %v4276_v19 = vpop.f32.mrb[166].mxu0  ;;  %v5300_v20 = vpop.f32.mrb[166].mxu1  ;;  %v14098_v8 = vld [vmem:[%s14799_s30 + $0xc60] ss:$8 sps:$4 sm:$0xff]  }
 0x2aa   : > { %13353 = vst [vmem:[%s15008_s10 + $0x140] sm:$0xff] %v12237_v11   ;;  %13481 = vst [vmem:[%s15008_s10 + $0x540] sm:$0xff] %v12877_v12   ;;  %v6600_v22 = vadd.f32 %v15514_v36, %v6081_v13  ;;  %v6856_v23 = vadd.f32 %v15514_v36, %v6337_v14  ;;  %v6082_v24 = vmul.f32 %v15504_v25, %v4276_v19  ;;  %v4278_v26 = vpop.f32.mrb[167].mxu0  ;;  %v5302_v27 = vpop.f32.mrb[167].mxu1  ;;  %v14103_v11 = vld [vmem:[%s14799_s30 + $0x474] ss:$8 sps:$4 sm:$0xff]  }
 0x2ab   : > { %v6338_v54 = vmul.f32 %v15504_v25, %v5300_v20  ;;  %v14106_v12 = vld [vmem:[%s14799_s30 + $0xc74] ss:$8 sps:$4 sm:$0xff]  }
 0x2ac   : > { %v6601_v28 = vadd.f32 %v15514_v36, %v6082_v24  ;;  %4488 = vmatmul.mubr.bf16.gmra.mrb[16].mxu0 %v14083_v17  ;;  %5512 = vmatmul.mubr.bf16.gmra.mrb[16].mxu1 %v14086_v18  ;;  %v7112_v30 = vmax.f32 %v6600_v22, 0.0  ;;  %v7368_v31 = vmax.f32 %v6856_v23, 0.0 }
 0x2ad   : > { %v6857_v29 = vadd.f32 %v15514_v36, %v6338_v54  ;;  %10814 = vmatprep.mubr.msk.bf16.mxu0 %vm3135_vm0, %v14091_v21  ;;  %10942 = vmatprep.mubr.msk.bf16.mxu1 %vm3135_vm0, %v14094_v43 }
 0x2ae   : > { %v7113_v32 = vmax.f32 %v6601_v28, 0.0 }
 0x2af   : > { %v7369_v33 = vmax.f32 %v6857_v29, 0.0  ;;  %v4281_v34 = vpop.f32.mrb[168].mxu0  ;;  %v5305_v35 = vpop.f32.mrb[168].mxu1 }
 0x2b0   : > { %v12242_v37 = vpack.c.bf16 %v7113_v32, %v7112_v30  ;;  %v6083_v39 = vmul.f32 %v15504_v25, %v4281_v34  ;;  %v6339_v61 = vmul.f32 %v15504_v25, %v5305_v35  ;;  %v4283_v40 = vpop.f32.mrb[169].mxu0  ;;  %v5307_v41 = vpop.f32.mrb[169].mxu1  ;;  %v14101_v32 = vld [vmem:[%s14799_s30 + $0x470] ss:$8 sps:$4 sm:$0xff]  }
 0x2b1   : > { %v12882_v38 = vpack.c.bf16 %v7369_v33, %v7368_v31  ;;  %v4284_v44 = vpop.f32.mrb[170].mxu0  ;;  %v5308_v45 = vpop.f32.mrb[170].mxu1  ;;  %v14104_v33 = vld [vmem:[%s14799_s30 + $0xc70] ss:$8 sps:$4 sm:$0xff]  }
 0x2b2   : > { %13354 = vst [vmem:[%s15008_s10 + $0x148] sm:$0xff] %v12242_v37   ;;  %v6602_v48 = vadd.f32 %v15514_v36, %v6083_v39  ;;  %v6858_v49 = vadd.f32 %v15514_v36, %v6339_v61  ;;  %v6084_v50 = vmul.f32 %v15504_v25, %v4284_v44  ;;  %v6340_v51 = vmul.f32 %v15504_v25, %v5308_v45  ;;  %v4286_v52 = vpop.f32.mrb[171].mxu0  ;;  %v5310_v53 = vpop.f32.mrb[171].mxu1  ;;  %v14109_v37 = vld [vmem:[%s14799_s30 + $0x484] ss:$8 sps:$4 sm:$0xff]  }
 0x2b3   : > { %13482 = vst [vmem:[%s15008_s10 + $0x548] sm:$0xff] %v12882_v38   ;;  %v14112_v38 = vld [vmem:[%s14799_s30 + $0xc84] ss:$8 sps:$4 sm:$0xff]  }
 0x2b4   : > { %v6603_v55 = vadd.f32 %v15514_v36, %v6084_v50  ;;  %v6859_v56 = vadd.f32 %v15514_v36, %v6340_v51  ;;  %4496 = vmatmul.mubr.bf16.gmra.mrb[20].mxu0 %v14089_v42  ;;  %5520 = vmatmul.mubr.bf16.gmra.mrb[20].mxu1 %v14092_v63  ;;  %v7114_v57 = vmax.f32 %v6602_v48, 0.0  ;;  %v7370_v58 = vmax.f32 %v6858_v49, 0.0 }
 0x2b5   : > { %10815 = vmatprep.mubr.msk.bf16.mxu0 %vm3135_vm0, %v14097_v46  ;;  %10943 = vmatprep.mubr.msk.bf16.mxu1 %vm3135_vm0, %v14100_v47 }
 0x2b6   : > { %v7115_v59 = vmax.f32 %v6603_v55, 0.0  ;;  %v7371_v60 = vmax.f32 %v6859_v56, 0.0 }
 0x2b7   : > { %v4289_v62 = vpop.f32.mrb[172].mxu0  ;;  %v5313_v0 = vpop.f32.mrb[172].mxu1 }
 0x2b8   : > { %v12247_v1 = vpack.c.bf16 %v7115_v59, %v7114_v57  ;;  %v12887_v2 = vpack.c.bf16 %v7371_v60, %v7370_v58  ;;  %v6085_v3 = vmul.f32 %v15504_v25, %v4289_v62  ;;  %v6341_v4 = vmul.f32 %v15504_v25, %v5313_v0  ;;  %v4291_v5 = vpop.f32.mrb[173].mxu0  ;;  %v5315_v6 = vpop.f32.mrb[173].mxu1  ;;  %v14107_v59 = vld [vmem:[%s14799_s30 + $0x480] ss:$8 sps:$4 sm:$0xff]  }
 0x2b9   : > { %v4292_v9 = vpop.f32.mrb[174].mxu0  ;;  %v5316_v10 = vpop.f32.mrb[174].mxu1  ;;  %v14110_v60 = vld [vmem:[%s14799_s30 + $0xc80] ss:$8 sps:$4 sm:$0xff]  }
 0x2ba   : > { %13355 = vst [vmem:[%s15008_s10 + $0x150] sm:$0xff] %v12247_v1   ;;  %13483 = vst [vmem:[%s15008_s10 + $0x550] sm:$0xff] %v12887_v2   ;;  %v6604_v13 = vadd.f32 %v15514_v36, %v6085_v3  ;;  %v6860_v14 = vadd.f32 %v15514_v36, %v6341_v4  ;;  %v6086_v15 = vmul.f32 %v15504_v25, %v4292_v9  ;;  %v4294_v17 = vpop.f32.mrb[175].mxu0  ;;  %v5318_v18 = vpop.f32.mrb[175].mxu1  ;;  %v14115_v1 = vld [vmem:[%s14799_s30 + $0x494] ss:$8 sps:$4 sm:$0xff]  }
 0x2bb   : > { %v6342_v16 = vmul.f32 %v15504_v25, %v5316_v10  ;;  %v14118_v2 = vld [vmem:[%s14799_s30 + $0xc94] ss:$8 sps:$4 sm:$0xff]  }
 0x2bc   : > { %v6605_v19 = vadd.f32 %v15514_v36, %v6086_v15  ;;  %4504 = vmatmul.mubr.bf16.gmra.mrb[24].mxu0 %v14095_v7  ;;  %5528 = vmatmul.mubr.bf16.gmra.mrb[24].mxu1 %v14098_v8  ;;  %v7116_v21 = vmax.f32 %v6604_v13, 0.0  ;;  %v7372_v43 = vmax.f32 %v6860_v14, 0.0 }
 0x2bd   : > { %v6861_v20 = vadd.f32 %v15514_v36, %v6342_v16  ;;  %10816 = vmatprep.mubr.msk.bf16.mxu0 %vm3135_vm0, %v14103_v11  ;;  %10944 = vmatprep.mubr.msk.bf16.mxu1 %vm3135_vm0, %v14106_v12 }
 0x2be   : > { %v7117_v22 = vmax.f32 %v6605_v19, 0.0 }
 0x2bf   : > { %v7373_v23 = vmax.f32 %v6861_v20, 0.0  ;;  %v4297_v24 = vpop.f32.mrb[176].mxu0  ;;  %v5321_v54 = vpop.f32.mrb[176].mxu1 }
 0x2c0   : > { %v12252_v26 = vpack.c.bf16 %v7117_v22, %v7116_v21  ;;  %v6087_v28 = vmul.f32 %v15504_v25, %v4297_v24  ;;  %v6343_v29 = vmul.f32 %v15504_v25, %v5321_v54  ;;  %v4299_v30 = vpop.f32.mrb[177].mxu0  ;;  %v5323_v31 = vpop.f32.mrb[177].mxu1  ;;  %v14113_v22 = vld [vmem:[%s14799_s30 + $0x490] ss:$8 sps:$4 sm:$0xff]  }
 0x2c1   : > { %v12892_v27 = vpack.c.bf16 %v7373_v23, %v7372_v43  ;;  %v4300_v34 = vpop.f32.mrb[178].mxu0  ;;  %v5324_v35 = vpop.f32.mrb[178].mxu1  ;;  %v14116_v23 = vld [vmem:[%s14799_s30 + $0xc90] ss:$8 sps:$4 sm:$0xff]  }
 0x2c2   : > { %13356 = vst [vmem:[%s15008_s10 + $0x158] sm:$0xff] %v12252_v26   ;;  %v6606_v39 = vadd.f32 %v15514_v36, %v6087_v28  ;;  %v6862_v61 = vadd.f32 %v15514_v36, %v6343_v29  ;;  %v6088_v40 = vmul.f32 %v15504_v25, %v4300_v34  ;;  %v6344_v41 = vmul.f32 %v15504_v25, %v5324_v35  ;;  %v4302_v42 = vpop.f32.mrb[179].mxu0  ;;  %v5326_v63 = vpop.f32.mrb[179].mxu1  ;;  %v14121_v26 = vld [vmem:[%s14799_s30 + $0x4a4] ss:$8 sps:$4 sm:$0xff]  }
 0x2c3   : > { %13484 = vst [vmem:[%s15008_s10 + $0x558] sm:$0xff] %v12892_v27   ;;  %v14124_v27 = vld [vmem:[%s14799_s30 + $0xca4] ss:$8 sps:$4 sm:$0xff]  }
 0x2c4   : > { %v6607_v44 = vadd.f32 %v15514_v36, %v6088_v40  ;;  %v6863_v45 = vadd.f32 %v15514_v36, %v6344_v41  ;;  %4512 = vmatmul.mubr.bf16.gmra.mrb[28].mxu0 %v14101_v32  ;;  %5536 = vmatmul.mubr.bf16.gmra.mrb[28].mxu1 %v14104_v33  ;;  %v7118_v46 = vmax.f32 %v6606_v39, 0.0  ;;  %v7374_v47 = vmax.f32 %v6862_v61, 0.0 }
 0x2c5   : > { %10817 = vmatprep.mubr.msk.bf16.mxu0 %vm3135_vm0, %v14109_v37  ;;  %10945 = vmatprep.mubr.msk.bf16.mxu1 %vm3135_vm0, %v14112_v38 }
 0x2c6   : > { %v7119_v48 = vmax.f32 %v6607_v44, 0.0  ;;  %v7375_v49 = vmax.f32 %v6863_v45, 0.0 }
 0x2c7   : > { %v4305_v50 = vpop.f32.mrb[180].mxu0  ;;  %v5329_v51 = vpop.f32.mrb[180].mxu1 }
 0x2c8   : > { %v12257_v52 = vpack.c.bf16 %v7119_v48, %v7118_v46  ;;  %v12897_v53 = vpack.c.bf16 %v7375_v49, %v7374_v47  ;;  %v6089_v55 = vmul.f32 %v15504_v25, %v4305_v50  ;;  %v6345_v56 = vmul.f32 %v15504_v25, %v5329_v51  ;;  %v4307_v57 = vpop.f32.mrb[181].mxu0  ;;  %v5331_v58 = vpop.f32.mrb[181].mxu1  ;;  %v14119_v48 = vld [vmem:[%s14799_s30 + $0x4a0] ss:$8 sps:$4 sm:$0xff]  }
 0x2c9   : > { %v4308_v62 = vpop.f32.mrb[182].mxu0  ;;  %v5332_v0 = vpop.f32.mrb[182].mxu1  ;;  %v14122_v49 = vld [vmem:[%s14799_s30 + $0xca0] ss:$8 sps:$4 sm:$0xff]  }
 0x2ca   : > { %13357 = vst [vmem:[%s15008_s10 + $0x160] sm:$0xff] %v12257_v52   ;;  %13485 = vst [vmem:[%s15008_s10 + $0x560] sm:$0xff] %v12897_v53   ;;  %v6608_v3 = vadd.f32 %v15514_v36, %v6089_v55  ;;  %v6864_v4 = vadd.f32 %v15514_v36, %v6345_v56  ;;  %v6090_v5 = vmul.f32 %v15504_v25, %v4308_v62  ;;  %v4310_v7 = vpop.f32.mrb[183].mxu0  ;;  %v5334_v8 = vpop.f32.mrb[183].mxu1  ;;  %v14127_v52 = vld [vmem:[%s14799_s30 + $0x4b4] ss:$8 sps:$4 sm:$0xff]  }
 0x2cb   : > { %v6346_v6 = vmul.f32 %v15504_v25, %v5332_v0  ;;  %v14130_v53 = vld [vmem:[%s14799_s30 + $0xcb4] ss:$8 sps:$4 sm:$0xff]   ;;  %v15764_v7 = vld [vmem:[#allocation5] ss:$0 sm:$0xff] }
 0x2cc   : > { %v6609_v9 = vadd.f32 %v15514_v36, %v6090_v5  ;;  %4520 = vmatmul.mubr.bf16.gmra.mrb[32].mxu0 %v14107_v59  ;;  %5544 = vmatmul.mubr.bf16.gmra.mrb[32].mxu1 %v14110_v60  ;;  %v7120_v11 = vmax.f32 %v6608_v3, 0.0  ;;  %v7376_v12 = vmax.f32 %v6864_v4, 0.0 }
 0x2cd   : > { %v6865_v10 = vadd.f32 %v15514_v36, %v6346_v6  ;;  %10818 = vmatprep.mubr.msk.bf16.mxu0 %vm3135_vm0, %v14115_v1  ;;  %10946 = vmatprep.mubr.msk.bf16.mxu1 %vm3135_vm0, %v14118_v2 }
 0x2ce   : > { %v7121_v13 = vmax.f32 %v6609_v9, 0.0 }
 0x2cf   : > { %v7377_v14 = vmax.f32 %v6865_v10, 0.0  ;;  %v4313_v15 = vpop.f32.mrb[184].mxu0  ;;  %v5337_v16 = vpop.f32.mrb[184].mxu1 }
 0x2d0   : > { %v12262_v17 = vpack.c.bf16 %v7121_v13, %v7120_v11  ;;  %v6091_v19 = vmul.f32 %v15504_v25, %v4313_v15  ;;  %v6347_v20 = vmul.f32 %v15504_v25, %v5337_v16  ;;  %v4315_v21 = vpop.f32.mrb[185].mxu0  ;;  %v5339_v43 = vpop.f32.mrb[185].mxu1  ;;  %v14128_v13 = vld [vmem:[%s14799_s30 + $0xcb0] ss:$8 sps:$4 sm:$0xff]   ;;  %v14133_v16 = vld [vmem:[%s14799_s30 + $0x4c4] ss:$8 sps:$4 sm:$0xff]  }
 0x2d1   : > { %v12902_v18 = vpack.c.bf16 %v7377_v14, %v7376_v12  ;;  %v4316_v24 = vpop.f32.mrb[186].mxu0  ;;  %v5340_v54 = vpop.f32.mrb[186].mxu1  ;;  %v14125_v12 = vld [vmem:[%s14799_s30 + $0x4b0] ss:$8 sps:$4 sm:$0xff]  }
 0x2d2   : > { %13358 = vst [vmem:[%s15008_s10 + $0x168] sm:$0xff] %v12262_v17   ;;  %v6610_v28 = vadd.f32 %v15514_v36, %v6091_v19  ;;  %v6866_v29 = vadd.f32 %v15514_v36, %v6347_v20  ;;  %v6092_v30 = vmul.f32 %v15504_v25, %v4316_v24  ;;  %v6348_v31 = vmul.f32 %v15504_v25, %v5340_v54  ;;  %v4318_v32 = vpop.f32.mrb[187].mxu0  ;;  %v5342_v33 = vpop.f32.mrb[187].mxu1  ;;  %v14136_v17 = vld [vmem:[%s14799_s30 + $0xcc4] ss:$8 sps:$4 sm:$0xff]  }
 0x2d3   : > { %13486 = vst [vmem:[%s15008_s10 + $0x568] sm:$0xff] %v12902_v18   ;;  %v15774_v18 = vld [vmem:[#allocation7] ss:$0 sm:$0xff] }
 0x2d4   : > { %v6611_v34 = vadd.f32 %v15514_v36, %v6092_v30  ;;  %v6867_v35 = vadd.f32 %v15514_v36, %v6348_v31  ;;  %4528 = vmatmul.mubr.bf16.gmra.mrb[36].mxu0 %v14113_v22  ;;  %5552 = vmatmul.mubr.bf16.gmra.mrb[36].mxu1 %v14116_v23  ;;  %v7122_v37 = vmax.f32 %v6610_v28, 0.0  ;;  %v7378_v38 = vmax.f32 %v6866_v29, 0.0 }
 0x2d5   : > { %10819 = vmatprep.mubr.msk.bf16.mxu0 %vm3135_vm0, %v14121_v26  ;;  %10947 = vmatprep.mubr.msk.bf16.mxu1 %vm3135_vm0, %v14124_v27 }
 0x2d6   : > { %v7123_v39 = vmax.f32 %v6611_v34, 0.0  ;;  %v7379_v61 = vmax.f32 %v6867_v35, 0.0 }
 0x2d7   : > { %v4321_v40 = vpop.f32.mrb[188].mxu0  ;;  %v5345_v41 = vpop.f32.mrb[188].mxu1 }
 0x2d8   : > { %v12267_v42 = vpack.c.bf16 %v7123_v39, %v7122_v37  ;;  %v12907_v63 = vpack.c.bf16 %v7379_v61, %v7378_v38  ;;  %v6093_v44 = vmul.f32 %v15504_v25, %v4321_v40  ;;  %v6349_v45 = vmul.f32 %v15504_v25, %v5345_v41  ;;  %v4323_v46 = vpop.f32.mrb[189].mxu0  ;;  %v5347_v47 = vpop.f32.mrb[189].mxu1  ;;  %v14131_v39 = vld [vmem:[%s14799_s30 + $0x4c0] ss:$8 sps:$4 sm:$0xff]  }
 0x2d9   : > { %v4324_v50 = vpop.f32.mrb[190].mxu0  ;;  %v5348_v51 = vpop.f32.mrb[190].mxu1  ;;  %v14134_v61 = vld [vmem:[%s14799_s30 + $0xcc0] ss:$8 sps:$4 sm:$0xff]  }
 0x2da   : > { %13359 = vst [vmem:[%s15008_s10 + $0x170] sm:$0xff] %v12267_v42   ;;  %13487 = vst [vmem:[%s15008_s10 + $0x570] sm:$0xff] %v12907_v63   ;;  %v6612_v55 = vadd.f32 %v15514_v36, %v6093_v44  ;;  %v6868_v56 = vadd.f32 %v15514_v36, %v6349_v45  ;;  %v6094_v57 = vmul.f32 %v15504_v25, %v4324_v50  ;;  %v4326_v59 = vpop.f32.mrb[191].mxu0  ;;  %v5350_v60 = vpop.f32.mrb[191].mxu1  ;;  %v14139_v42 = vld [vmem:[%s14799_s30 + $0x4d4] ss:$8 sps:$4 sm:$0xff]  }
 0x2db   : > { %v6350_v58 = vmul.f32 %v15504_v25, %v5348_v51  ;;  %v14142_v63 = vld [vmem:[%s14799_s30 + $0xcd4] ss:$8 sps:$4 sm:$0xff]  }
 0x2dc   : > { %v6613_v62 = vadd.f32 %v15514_v36, %v6094_v57  ;;  %4536 = vmatmul.mubr.bf16.gmra.mrb[40].mxu0 %v14119_v48  ;;  %5560 = vmatmul.mubr.bf16.gmra.mrb[40].mxu1 %v14122_v49  ;;  %v7124_v1 = vmax.f32 %v6612_v55, 0.0  ;;  %v7380_v2 = vmax.f32 %v6868_v56, 0.0 }
 0x2dd   : > { %v6869_v0 = vadd.f32 %v15514_v36, %v6350_v58  ;;  %10820 = vmatprep.mubr.msk.bf16.mxu0 %vm3135_vm0, %v14127_v52  ;;  %10948 = vmatprep.mubr.msk.bf16.mxu1 %vm3135_vm0, %v14130_v53 }
 0x2de   : > { %v7125_v3 = vmax.f32 %v6613_v62, 0.0 }
 0x2df   : > { %v7381_v25 = vmax.f32 %v6869_v0, 0.0  ;;  %v4329_v4 = vpop.f32.mrb[192].mxu0  ;;  %v5353_v5 = vpop.f32.mrb[192].mxu1 }
 0x2e0   : > { %v12272_v6 = vpack.c.bf16 %v7125_v3, %v7124_v1  ;;  %v6095_v8 = vmul.f32 %v15764_v7, %v4329_v4  ;;  %v6351_v9 = vmul.f32 %v15764_v7, %v5353_v5  ;;  %v4331_v10 = vpop.f32.mrb[193].mxu0  ;;  %v5355_v11 = vpop.f32.mrb[193].mxu1  ;;  %v14137_v3 = vld [vmem:[%s14799_s30 + $0x4d0] ss:$8 sps:$4 sm:$0xff]  }
 0x2e1   : > { %v12912_v36 = vpack.c.bf16 %v7381_v25, %v7380_v2  ;;  %v4332_v14 = vpop.f32.mrb[194].mxu0  ;;  %v5356_v15 = vpop.f32.mrb[194].mxu1  ;;  %v14140_v25 = vld [vmem:[%s14799_s30 + $0xcd0] ss:$8 sps:$4 sm:$0xff]  }
 0x2e2   : > { %13360 = vst [vmem:[%s15008_s10 + $0x178] sm:$0xff] %v12272_v6   ;;  %v6614_v19 = vadd.f32 %v15774_v18, %v6095_v8  ;;  %v6870_v20 = vadd.f32 %v15774_v18, %v6351_v9  ;;  %v6096_v21 = vmul.f32 %v15764_v7, %v4332_v14  ;;  %v6352_v43 = vmul.f32 %v15764_v7, %v5356_v15  ;;  %v4334_v22 = vpop.f32.mrb[195].mxu0  ;;  %v5358_v23 = vpop.f32.mrb[195].mxu1  ;;  %v14145_v6 = vld [vmem:[%s14799_s30 + $0x4e4] ss:$8 sps:$4 sm:$0xff]  }
 0x2e3   : > { %13488 = vst [vmem:[%s15008_s10 + $0x578] sm:$0xff] %v12912_v36   ;;  %v14148_v36 = vld [vmem:[%s14799_s30 + $0xce4] ss:$8 sps:$4 sm:$0xff]  }
 0x2e4   : > { %v6615_v24 = vadd.f32 %v15774_v18, %v6096_v21  ;;  %v6871_v54 = vadd.f32 %v15774_v18, %v6352_v43  ;;  %4544 = vmatmul.mubr.bf16.gmra.mrb[44].mxu0 %v14125_v12  ;;  %5568 = vmatmul.mubr.bf16.gmra.mrb[44].mxu1 %v14128_v13  ;;  %v7126_v26 = vmax.f32 %v6614_v19, 0.0  ;;  %v7382_v27 = vmax.f32 %v6870_v20, 0.0 }
 0x2e5   : > { %10821 = vmatprep.mubr.msk.bf16.mxu0 %vm3135_vm0, %v14133_v16  ;;  %10949 = vmatprep.mubr.msk.bf16.mxu1 %vm3135_vm0, %v14136_v17 }
 0x2e6   : > { %v7127_v28 = vmax.f32 %v6615_v24, 0.0  ;;  %v7383_v29 = vmax.f32 %v6871_v54, 0.0 }
 0x2e7   : > { %v4337_v30 = vpop.f32.mrb[196].mxu0  ;;  %v5361_v31 = vpop.f32.mrb[196].mxu1 }
 0x2e8   : > { %v12277_v32 = vpack.c.bf16 %v7127_v28, %v7126_v26  ;;  %v12917_v33 = vpack.c.bf16 %v7383_v29, %v7382_v27  ;;  %v6097_v34 = vmul.f32 %v15764_v7, %v4337_v30  ;;  %v6353_v35 = vmul.f32 %v15764_v7, %v5361_v31  ;;  %v4339_v37 = vpop.f32.mrb[197].mxu0  ;;  %v5363_v38 = vpop.f32.mrb[197].mxu1  ;;  %v14143_v28 = vld [vmem:[%s14799_s30 + $0x4e0] ss:$8 sps:$4 sm:$0xff]  }
 0x2e9   : > { %v4340_v40 = vpop.f32.mrb[198].mxu0  ;;  %v5364_v41 = vpop.f32.mrb[198].mxu1  ;;  %v14146_v29 = vld [vmem:[%s14799_s30 + $0xce0] ss:$8 sps:$4 sm:$0xff]  }
 0x2ea   : > { %13361 = vst [vmem:[%s15008_s10 + $0x180] sm:$0xff] %v12277_v32   ;;  %13489 = vst [vmem:[%s15008_s10 + $0x580] sm:$0xff] %v12917_v33   ;;  %v6616_v44 = vadd.f32 %v15774_v18, %v6097_v34  ;;  %v6872_v45 = vadd.f32 %v15774_v18, %v6353_v35  ;;  %v6098_v46 = vmul.f32 %v15764_v7, %v4340_v40  ;;  %v4342_v48 = vpop.f32.mrb[199].mxu0  ;;  %v5366_v49 = vpop.f32.mrb[199].mxu1  ;;  %v14151_v32 = vld [vmem:[%s14799_s30 + $0x4f4] ss:$8 sps:$4 sm:$0xff]  }
 0x2eb   : > { %v6354_v47 = vmul.f32 %v15764_v7, %v5364_v41  ;;  %v14154_v33 = vld [vmem:[%s14799_s30 + $0xcf4] ss:$8 sps:$4 sm:$0xff]  }
 0x2ec   : > { %v6617_v50 = vadd.f32 %v15774_v18, %v6098_v46  ;;  %4552 = vmatmul.mubr.bf16.gmra.mrb[48].mxu0 %v14131_v39  ;;  %5576 = vmatmul.mubr.bf16.gmra.mrb[48].mxu1 %v14134_v61  ;;  %v7128_v52 = vmax.f32 %v6616_v44, 0.0  ;;  %v7384_v53 = vmax.f32 %v6872_v45, 0.0 }
 0x2ed   : > { %v6873_v51 = vadd.f32 %v15774_v18, %v6354_v47  ;;  %10822 = vmatprep.mubr.msk.bf16.mxu0 %vm3135_vm0, %v14139_v42  ;;  %10950 = vmatprep.mubr.msk.bf16.mxu1 %vm3135_vm0, %v14142_v63 }
 0x2ee   : > { %v7129_v55 = vmax.f32 %v6617_v50, 0.0 }
 0x2ef   : > { %v7385_v56 = vmax.f32 %v6873_v51, 0.0  ;;  %v4345_v57 = vpop.f32.mrb[200].mxu0  ;;  %v5369_v58 = vpop.f32.mrb[200].mxu1 }
 0x2f0   : > { %v12282_v59 = vpack.c.bf16 %v7129_v55, %v7128_v52  ;;  %v6099_v62 = vmul.f32 %v15764_v7, %v4345_v57  ;;  %v6355_v0 = vmul.f32 %v15764_v7, %v5369_v58  ;;  %v4347_v1 = vpop.f32.mrb[201].mxu0  ;;  %v5371_v2 = vpop.f32.mrb[201].mxu1  ;;  %v14149_v55 = vld [vmem:[%s14799_s30 + $0x4f0] ss:$8 sps:$4 sm:$0xff]  }
 0x2f1   : > { %v12922_v60 = vpack.c.bf16 %v7385_v56, %v7384_v53  ;;  %v4348_v4 = vpop.f32.mrb[202].mxu0  ;;  %v5372_v5 = vpop.f32.mrb[202].mxu1  ;;  %v14152_v56 = vld [vmem:[%s14799_s30 + $0xcf0] ss:$8 sps:$4 sm:$0xff]  }
 0x2f2   : > { %13362 = vst [vmem:[%s15008_s10 + $0x188] sm:$0xff] %v12282_v59   ;;  %v6618_v8 = vadd.f32 %v15774_v18, %v6099_v62  ;;  %v6874_v9 = vadd.f32 %v15774_v18, %v6355_v0  ;;  %v6100_v10 = vmul.f32 %v15764_v7, %v4348_v4  ;;  %v6356_v11 = vmul.f32 %v15764_v7, %v5372_v5  ;;  %v4350_v12 = vpop.f32.mrb[203].mxu0  ;;  %v5374_v13 = vpop.f32.mrb[203].mxu1  ;;  %v14157_v59 = vld [vmem:[%s14799_s30 + $0x504] ss:$8 sps:$4 sm:$0xff]  }
 0x2f3   : > { %13490 = vst [vmem:[%s15008_s10 + $0x588] sm:$0xff] %v12922_v60   ;;  %v14160_v60 = vld [vmem:[%s14799_s30 + $0xd04] ss:$8 sps:$4 sm:$0xff]  }
 0x2f4   : > { %v6619_v14 = vadd.f32 %v15774_v18, %v6100_v10  ;;  %v6875_v15 = vadd.f32 %v15774_v18, %v6356_v11  ;;  %4560 = vmatmul.mubr.bf16.gmra.mrb[52].mxu0 %v14137_v3  ;;  %5584 = vmatmul.mubr.bf16.gmra.mrb[52].mxu1 %v14140_v25  ;;  %v7130_v16 = vmax.f32 %v6618_v8, 0.0  ;;  %v7386_v17 = vmax.f32 %v6874_v9, 0.0 }
 0x2f5   : > { %10823 = vmatprep.mubr.msk.bf16.mxu0 %vm3135_vm0, %v14145_v6  ;;  %10951 = vmatprep.mubr.msk.bf16.mxu1 %vm3135_vm0, %v14148_v36 }
 0x2f6   : > { %v7131_v19 = vmax.f32 %v6619_v14, 0.0  ;;  %v7387_v20 = vmax.f32 %v6875_v15, 0.0 }
 0x2f7   : > { %v4353_v21 = vpop.f32.mrb[204].mxu0  ;;  %v5377_v43 = vpop.f32.mrb[204].mxu1 }
 0x2f8   : > { %v12287_v22 = vpack.c.bf16 %v7131_v19, %v7130_v16  ;;  %v12927_v23 = vpack.c.bf16 %v7387_v20, %v7386_v17  ;;  %v6101_v24 = vmul.f32 %v15764_v7, %v4353_v21  ;;  %v6357_v54 = vmul.f32 %v15764_v7, %v5377_v43  ;;  %v4355_v26 = vpop.f32.mrb[205].mxu0  ;;  %v5379_v27 = vpop.f32.mrb[205].mxu1  ;;  %v14155_v19 = vld [vmem:[%s14799_s30 + $0x500] ss:$8 sps:$4 sm:$0xff]  }
 0x2f9   : > { %v4356_v30 = vpop.f32.mrb[206].mxu0  ;;  %v5380_v31 = vpop.f32.mrb[206].mxu1  ;;  %v14158_v20 = vld [vmem:[%s14799_s30 + $0xd00] ss:$8 sps:$4 sm:$0xff]  }
 0x2fa   : > { %13363 = vst [vmem:[%s15008_s10 + $0x190] sm:$0xff] %v12287_v22   ;;  %13491 = vst [vmem:[%s15008_s10 + $0x590] sm:$0xff] %v12927_v23   ;;  %v6620_v34 = vadd.f32 %v15774_v18, %v6101_v24  ;;  %v6876_v35 = vadd.f32 %v15774_v18, %v6357_v54  ;;  %v6102_v37 = vmul.f32 %v15764_v7, %v4356_v30  ;;  %v4358_v39 = vpop.f32.mrb[207].mxu0  ;;  %v5382_v61 = vpop.f32.mrb[207].mxu1  ;;  %v14163_v22 = vld [vmem:[%s14799_s30 + $0x514] ss:$8 sps:$4 sm:$0xff]  }
 0x2fb   : > { %v6358_v38 = vmul.f32 %v15764_v7, %v5380_v31  ;;  %v14166_v23 = vld [vmem:[%s14799_s30 + $0xd14] ss:$8 sps:$4 sm:$0xff]  }
 0x2fc   : > { %v6621_v40 = vadd.f32 %v15774_v18, %v6102_v37  ;;  %4568 = vmatmul.mubr.bf16.gmra.mrb[56].mxu0 %v14143_v28  ;;  %5592 = vmatmul.mubr.bf16.gmra.mrb[56].mxu1 %v14146_v29  ;;  %v7132_v42 = vmax.f32 %v6620_v34, 0.0  ;;  %v7388_v63 = vmax.f32 %v6876_v35, 0.0 }
 0x2fd   : > { %v6877_v41 = vadd.f32 %v15774_v18, %v6358_v38  ;;  %10824 = vmatprep.mubr.msk.bf16.mxu0 %vm3135_vm0, %v14151_v32  ;;  %10952 = vmatprep.mubr.msk.bf16.mxu1 %vm3135_vm0, %v14154_v33 }
 0x2fe   : > { %v7133_v44 = vmax.f32 %v6621_v40, 0.0 }
 0x2ff   : > { %v7389_v45 = vmax.f32 %v6877_v41, 0.0  ;;  %v4361_v46 = vpop.f32.mrb[208].mxu0  ;;  %v5385_v47 = vpop.f32.mrb[208].mxu1 }
 0x300   : > { %v12292_v48 = vpack.c.bf16 %v7133_v44, %v7132_v42  ;;  %v6103_v50 = vmul.f32 %v15764_v7, %v4361_v46  ;;  %v6359_v51 = vmul.f32 %v15764_v7, %v5385_v47  ;;  %v4363_v52 = vpop.f32.mrb[209].mxu0  ;;  %v5387_v53 = vpop.f32.mrb[209].mxu1  ;;  %v14161_v44 = vld [vmem:[%s14799_s30 + $0x510] ss:$8 sps:$4 sm:$0xff]  }
 0x301   : > { %v12932_v49 = vpack.c.bf16 %v7389_v45, %v7388_v63  ;;  %v4364_v57 = vpop.f32.mrb[210].mxu0  ;;  %v5388_v58 = vpop.f32.mrb[210].mxu1  ;;  %v14164_v45 = vld [vmem:[%s14799_s30 + $0xd10] ss:$8 sps:$4 sm:$0xff]  }
 0x302   : > { %13364 = vst [vmem:[%s15008_s10 + $0x198] sm:$0xff] %v12292_v48   ;;  %v6622_v62 = vadd.f32 %v15774_v18, %v6103_v50  ;;  %v6878_v0 = vadd.f32 %v15774_v18, %v6359_v51  ;;  %v6104_v1 = vmul.f32 %v15764_v7, %v4364_v57  ;;  %v6360_v2 = vmul.f32 %v15764_v7, %v5388_v58  ;;  %v4366_v3 = vpop.f32.mrb[211].mxu0  ;;  %v5390_v25 = vpop.f32.mrb[211].mxu1  ;;  %v14169_v48 = vld [vmem:[%s14799_s30 + $0x524] ss:$8 sps:$4 sm:$0xff]  }
 0x303   : > { %13492 = vst [vmem:[%s15008_s10 + $0x598] sm:$0xff] %v12932_v49   ;;  %v14172_v49 = vld [vmem:[%s14799_s30 + $0xd24] ss:$8 sps:$4 sm:$0xff]  }
 0x304   : > { %v6623_v4 = vadd.f32 %v15774_v18, %v6104_v1  ;;  %v6879_v5 = vadd.f32 %v15774_v18, %v6360_v2  ;;  %4576 = vmatmul.mubr.bf16.gmra.mrb[60].mxu0 %v14149_v55  ;;  %5600 = vmatmul.mubr.bf16.gmra.mrb[60].mxu1 %v14152_v56  ;;  %v7134_v6 = vmax.f32 %v6622_v62, 0.0  ;;  %v7390_v36 = vmax.f32 %v6878_v0, 0.0 }
 0x305   : > { %10825 = vmatprep.mubr.msk.bf16.mxu0 %vm3135_vm0, %v14157_v59  ;;  %10953 = vmatprep.mubr.msk.bf16.mxu1 %vm3135_vm0, %v14160_v60 }
 0x306   : > { %v7135_v8 = vmax.f32 %v6623_v4, 0.0  ;;  %v7391_v9 = vmax.f32 %v6879_v5, 0.0 }
 0x307   : > { %v4369_v10 = vpop.f32.mrb[212].mxu0  ;;  %v5393_v11 = vpop.f32.mrb[212].mxu1 }
 0x308   : > { %v12297_v12 = vpack.c.bf16 %v7135_v8, %v7134_v6  ;;  %v12937_v13 = vpack.c.bf16 %v7391_v9, %v7390_v36  ;;  %v6105_v14 = vmul.f32 %v15764_v7, %v4369_v10  ;;  %v6361_v15 = vmul.f32 %v15764_v7, %v5393_v11  ;;  %v4371_v16 = vpop.f32.mrb[213].mxu0  ;;  %v5395_v17 = vpop.f32.mrb[213].mxu1  ;;  %v14167_v8 = vld [vmem:[%s14799_s30 + $0x520] ss:$8 sps:$4 sm:$0xff]  }
 0x309   : > { %v4372_v21 = vpop.f32.mrb[214].mxu0  ;;  %v5396_v43 = vpop.f32.mrb[214].mxu1  ;;  %v14170_v9 = vld [vmem:[%s14799_s30 + $0xd20] ss:$8 sps:$4 sm:$0xff]  }
 0x30a   : > { %13365 = vst [vmem:[%s15008_s10 + $0x1a0] sm:$0xff] %v12297_v12   ;;  %13493 = vst [vmem:[%s15008_s10 + $0x5a0] sm:$0xff] %v12937_v13   ;;  %v6624_v24 = vadd.f32 %v15774_v18, %v6105_v14  ;;  %v6880_v54 = vadd.f32 %v15774_v18, %v6361_v15  ;;  %v6106_v26 = vmul.f32 %v15764_v7, %v4372_v21  ;;  %v4374_v28 = vpop.f32.mrb[215].mxu0  ;;  %v5398_v29 = vpop.f32.mrb[215].mxu1  ;;  %v14175_v12 = vld [vmem:[%s14799_s30 + $0x534] ss:$8 sps:$4 sm:$0xff]  }
 0x30b   : > { %v6362_v27 = vmul.f32 %v15764_v7, %v5396_v43  ;;  %v14178_v13 = vld [vmem:[%s14799_s30 + $0xd34] ss:$8 sps:$4 sm:$0xff]  }
 0x30c   : > { %v6625_v30 = vadd.f32 %v15774_v18, %v6106_v26  ;;  %4584 = vmatmul.mubr.bf16.gmra.mrb[64].mxu0 %v14155_v19  ;;  %5608 = vmatmul.mubr.bf16.gmra.mrb[64].mxu1 %v14158_v20  ;;  %v7136_v32 = vmax.f32 %v6624_v24, 0.0  ;;  %v7392_v33 = vmax.f32 %v6880_v54, 0.0 }
 0x30d   : > { %v6881_v31 = vadd.f32 %v15774_v18, %v6362_v27  ;;  %10826 = vmatprep.mubr.msk.bf16.mxu0 %vm3135_vm0, %v14163_v22  ;;  %10954 = vmatprep.mubr.msk.bf16.mxu1 %vm3135_vm0, %v14166_v23 }
 0x30e   : > { %v7137_v34 = vmax.f32 %v6625_v30, 0.0 }
 0x30f   : > { %v7393_v35 = vmax.f32 %v6881_v31, 0.0  ;;  %v4377_v37 = vpop.f32.mrb[216].mxu0  ;;  %v5401_v38 = vpop.f32.mrb[216].mxu1 }
 0x310   : > { %v12302_v39 = vpack.c.bf16 %v7137_v34, %v7136_v32  ;;  %v6107_v40 = vmul.f32 %v15764_v7, %v4377_v37  ;;  %v6363_v41 = vmul.f32 %v15764_v7, %v5401_v38  ;;  %v4379_v42 = vpop.f32.mrb[217].mxu0  ;;  %v5403_v63 = vpop.f32.mrb[217].mxu1  ;;  %v14173_v34 = vld [vmem:[%s14799_s30 + $0x530] ss:$8 sps:$4 sm:$0xff]  }
 0x311   : > { %v12942_v61 = vpack.c.bf16 %v7393_v35, %v7392_v33  ;;  %v4380_v46 = vpop.f32.mrb[218].mxu0  ;;  %v5404_v47 = vpop.f32.mrb[218].mxu1  ;;  %v14176_v35 = vld [vmem:[%s14799_s30 + $0xd30] ss:$8 sps:$4 sm:$0xff]  }
 0x312   : > { %13366 = vst [vmem:[%s15008_s10 + $0x1a8] sm:$0xff] %v12302_v39   ;;  %v6626_v50 = vadd.f32 %v15774_v18, %v6107_v40  ;;  %v6882_v51 = vadd.f32 %v15774_v18, %v6363_v41  ;;  %v6108_v52 = vmul.f32 %v15764_v7, %v4380_v46  ;;  %v6364_v53 = vmul.f32 %v15764_v7, %v5404_v47  ;;  %v4382_v55 = vpop.f32.mrb[219].mxu0  ;;  %v5406_v56 = vpop.f32.mrb[219].mxu1  ;;  %v14181_v39 = vld [vmem:[%s14799_s30 + $0x544] ss:$8 sps:$4 sm:$0xff]  }
 0x313   : > { %13494 = vst [vmem:[%s15008_s10 + $0x5a8] sm:$0xff] %v12942_v61   ;;  %v14184_v61 = vld [vmem:[%s14799_s30 + $0xd44] ss:$8 sps:$4 sm:$0xff]  }
 0x314   : > { %v6627_v57 = vadd.f32 %v15774_v18, %v6108_v52  ;;  %v6883_v58 = vadd.f32 %v15774_v18, %v6364_v53  ;;  %4592 = vmatmul.mubr.bf16.gmra.mrb[68].mxu0 %v14161_v44  ;;  %5616 = vmatmul.mubr.bf16.gmra.mrb[68].mxu1 %v14164_v45  ;;  %v7138_v59 = vmax.f32 %v6626_v50, 0.0  ;;  %v7394_v60 = vmax.f32 %v6882_v51, 0.0 }
 0x315   : > { %10827 = vmatprep.mubr.msk.bf16.mxu0 %vm3135_vm0, %v14169_v48  ;;  %10955 = vmatprep.mubr.msk.bf16.mxu1 %vm3135_vm0, %v14172_v49 }
 0x316   : > { %v7139_v62 = vmax.f32 %v6627_v57, 0.0  ;;  %v7395_v0 = vmax.f32 %v6883_v58, 0.0 }
 0x317   : > { %v4385_v1 = vpop.f32.mrb[220].mxu0  ;;  %v5409_v2 = vpop.f32.mrb[220].mxu1 }
 0x318   : > { %v12307_v3 = vpack.c.bf16 %v7139_v62, %v7138_v59  ;;  %v12947_v25 = vpack.c.bf16 %v7395_v0, %v7394_v60  ;;  %v6109_v4 = vmul.f32 %v15764_v7, %v4385_v1  ;;  %v6365_v5 = vmul.f32 %v15764_v7, %v5409_v2  ;;  %v4387_v6 = vpop.f32.mrb[221].mxu0  ;;  %v5411_v36 = vpop.f32.mrb[221].mxu1  ;;  %v14179_v62 = vld [vmem:[%s14799_s30 + $0x540] ss:$8 sps:$4 sm:$0xff]  }
 0x319   : > { %v4388_v10 = vpop.f32.mrb[222].mxu0  ;;  %v5412_v11 = vpop.f32.mrb[222].mxu1  ;;  %v14182_v0 = vld [vmem:[%s14799_s30 + $0xd40] ss:$8 sps:$4 sm:$0xff]  }
 0x31a   : > { %13367 = vst [vmem:[%s15008_s10 + $0x1b0] sm:$0xff] %v12307_v3   ;;  %13495 = vst [vmem:[%s15008_s10 + $0x5b0] sm:$0xff] %v12947_v25   ;;  %v6628_v14 = vadd.f32 %v15774_v18, %v6109_v4  ;;  %v6884_v15 = vadd.f32 %v15774_v18, %v6365_v5  ;;  %v6110_v16 = vmul.f32 %v15764_v7, %v4388_v10  ;;  %v4390_v19 = vpop.f32.mrb[223].mxu0  ;;  %v5414_v20 = vpop.f32.mrb[223].mxu1  ;;  %v14187_v3 = vld [vmem:[%s14799_s30 + $0x554] ss:$8 sps:$4 sm:$0xff]  }
 0x31b   : > { %v6366_v17 = vmul.f32 %v15764_v7, %v5412_v11  ;;  %v14190_v25 = vld [vmem:[%s14799_s30 + $0xd54] ss:$8 sps:$4 sm:$0xff]  }
 0x31c   : > { %v6629_v21 = vadd.f32 %v15774_v18, %v6110_v16  ;;  %4600 = vmatmul.mubr.bf16.gmra.mrb[72].mxu0 %v14167_v8  ;;  %5624 = vmatmul.mubr.bf16.gmra.mrb[72].mxu1 %v14170_v9  ;;  %v7140_v22 = vmax.f32 %v6628_v14, 0.0  ;;  %v7396_v23 = vmax.f32 %v6884_v15, 0.0 }
 0x31d   : > { %v6885_v43 = vadd.f32 %v15774_v18, %v6366_v17  ;;  %10828 = vmatprep.mubr.msk.bf16.mxu0 %vm3135_vm0, %v14175_v12  ;;  %10956 = vmatprep.mubr.msk.bf16.mxu1 %vm3135_vm0, %v14178_v13 }
 0x31e   : > { %v7141_v24 = vmax.f32 %v6629_v21, 0.0 }
 0x31f   : > { %v7397_v54 = vmax.f32 %v6885_v43, 0.0  ;;  %v4393_v26 = vpop.f32.mrb[224].mxu0  ;;  %v5417_v27 = vpop.f32.mrb[224].mxu1 }
 0x320   : > { %v12312_v28 = vpack.c.bf16 %v7141_v24, %v7140_v22  ;;  %v6111_v30 = vmul.f32 %v15764_v7, %v4393_v26  ;;  %v6367_v31 = vmul.f32 %v15764_v7, %v5417_v27  ;;  %v4395_v32 = vpop.f32.mrb[225].mxu0  ;;  %v5419_v33 = vpop.f32.mrb[225].mxu1  ;;  %v14185_v24 = vld [vmem:[%s14799_s30 + $0x550] ss:$8 sps:$4 sm:$0xff]  }
 0x321   : > { %v12952_v29 = vpack.c.bf16 %v7397_v54, %v7396_v23  ;;  %v4396_v37 = vpop.f32.mrb[226].mxu0  ;;  %v5420_v38 = vpop.f32.mrb[226].mxu1  ;;  %v14188_v54 = vld [vmem:[%s14799_s30 + $0xd50] ss:$8 sps:$4 sm:$0xff]  }
 0x322   : > { %13368 = vst [vmem:[%s15008_s10 + $0x1b8] sm:$0xff] %v12312_v28   ;;  %v6630_v40 = vadd.f32 %v15774_v18, %v6111_v30  ;;  %v6886_v41 = vadd.f32 %v15774_v18, %v6367_v31  ;;  %v6112_v42 = vmul.f32 %v15764_v7, %v4396_v37  ;;  %v6368_v63 = vmul.f32 %v15764_v7, %v5420_v38  ;;  %v4398_v44 = vpop.f32.mrb[227].mxu0  ;;  %v5422_v45 = vpop.f32.mrb[227].mxu1  ;;  %v14193_v28 = vld [vmem:[%s14799_s30 + $0x564] ss:$8 sps:$4 sm:$0xff]  }
 0x323   : > { %13496 = vst [vmem:[%s15008_s10 + $0x5b8] sm:$0xff] %v12952_v29   ;;  %v14196_v29 = vld [vmem:[%s14799_s30 + $0xd64] ss:$8 sps:$4 sm:$0xff]  }
 0x324   : > { %v6631_v46 = vadd.f32 %v15774_v18, %v6112_v42  ;;  %v6887_v47 = vadd.f32 %v15774_v18, %v6368_v63  ;;  %4608 = vmatmul.mubr.bf16.gmra.mrb[76].mxu0 %v14173_v34  ;;  %5632 = vmatmul.mubr.bf16.gmra.mrb[76].mxu1 %v14176_v35  ;;  %v7142_v48 = vmax.f32 %v6630_v40, 0.0  ;;  %v7398_v49 = vmax.f32 %v6886_v41, 0.0 }
 0x325   : > { %10829 = vmatprep.mubr.msk.bf16.mxu0 %vm3135_vm0, %v14181_v39  ;;  %10957 = vmatprep.mubr.msk.bf16.mxu1 %vm3135_vm0, %v14184_v61 }
 0x326   : > { %v7143_v50 = vmax.f32 %v6631_v46, 0.0  ;;  %v7399_v51 = vmax.f32 %v6887_v47, 0.0 }
 0x327   : > { %v4401_v52 = vpop.f32.mrb[228].mxu0  ;;  %v5425_v53 = vpop.f32.mrb[228].mxu1 }
 0x328   : > { %v12317_v55 = vpack.c.bf16 %v7143_v50, %v7142_v48  ;;  %v12957_v56 = vpack.c.bf16 %v7399_v51, %v7398_v49  ;;  %v6113_v57 = vmul.f32 %v15764_v7, %v4401_v52  ;;  %v6369_v58 = vmul.f32 %v15764_v7, %v5425_v53  ;;  %v4403_v59 = vpop.f32.mrb[229].mxu0  ;;  %v5427_v60 = vpop.f32.mrb[229].mxu1  ;;  %v14191_v50 = vld [vmem:[%s14799_s30 + $0x560] ss:$8 sps:$4 sm:$0xff]  }
 0x329   : > { %v4404_v1 = vpop.f32.mrb[230].mxu0  ;;  %v5428_v2 = vpop.f32.mrb[230].mxu1  ;;  %v14194_v51 = vld [vmem:[%s14799_s30 + $0xd60] ss:$8 sps:$4 sm:$0xff]  }
 0x32a   : > { %13369 = vst [vmem:[%s15008_s10 + $0x1c0] sm:$0xff] %v12317_v55   ;;  %13497 = vst [vmem:[%s15008_s10 + $0x5c0] sm:$0xff] %v12957_v56   ;;  %v6632_v4 = vadd.f32 %v15774_v18, %v6113_v57  ;;  %v6888_v5 = vadd.f32 %v15774_v18, %v6369_v58  ;;  %v6114_v6 = vmul.f32 %v15764_v7, %v4404_v1  ;;  %v4406_v8 = vpop.f32.mrb[231].mxu0  ;;  %v5430_v9 = vpop.f32.mrb[231].mxu1  ;;  %v14199_v55 = vld [vmem:[%s14799_s30 + $0x574] ss:$8 sps:$4 sm:$0xff]  }
 0x32b   : > { %v6370_v36 = vmul.f32 %v15764_v7, %v5428_v2  ;;  %v14202_v56 = vld [vmem:[%s14799_s30 + $0xd74] ss:$8 sps:$4 sm:$0xff]  }
 0x32c   : > { %v6633_v10 = vadd.f32 %v15774_v18, %v6114_v6  ;;  %4616 = vmatmul.mubr.bf16.gmra.mrb[80].mxu0 %v14179_v62  ;;  %5640 = vmatmul.mubr.bf16.gmra.mrb[80].mxu1 %v14182_v0  ;;  %v7144_v12 = vmax.f32 %v6632_v4, 0.0  ;;  %v7400_v13 = vmax.f32 %v6888_v5, 0.0 }
 0x32d   : > { %v6889_v11 = vadd.f32 %v15774_v18, %v6370_v36  ;;  %10830 = vmatprep.mubr.msk.bf16.mxu0 %vm3135_vm0, %v14187_v3  ;;  %10958 = vmatprep.mubr.msk.bf16.mxu1 %vm3135_vm0, %v14190_v25 }
 0x32e   : > { %v7145_v14 = vmax.f32 %v6633_v10, 0.0 }
 0x32f   : > { %v7401_v15 = vmax.f32 %v6889_v11, 0.0  ;;  %v4409_v16 = vpop.f32.mrb[232].mxu0  ;;  %v5433_v17 = vpop.f32.mrb[232].mxu1 }
 0x330   : > { %v12322_v19 = vpack.c.bf16 %v7145_v14, %v7144_v12  ;;  %v6115_v21 = vmul.f32 %v15764_v7, %v4409_v16  ;;  %v6371_v43 = vmul.f32 %v15764_v7, %v5433_v17  ;;  %v4411_v22 = vpop.f32.mrb[233].mxu0  ;;  %v5435_v23 = vpop.f32.mrb[233].mxu1  ;;  %v14197_v14 = vld [vmem:[%s14799_s30 + $0x570] ss:$8 sps:$4 sm:$0xff]  }
 0x331   : > { %v12962_v20 = vpack.c.bf16 %v7401_v15, %v7400_v13  ;;  %v4412_v26 = vpop.f32.mrb[234].mxu0  ;;  %v5436_v27 = vpop.f32.mrb[234].mxu1  ;;  %v14200_v15 = vld [vmem:[%s14799_s30 + $0xd70] ss:$8 sps:$4 sm:$0xff]  }
 0x332   : > { %13370 = vst [vmem:[%s15008_s10 + $0x1c8] sm:$0xff] %v12322_v19   ;;  %v6634_v30 = vadd.f32 %v15774_v18, %v6115_v21  ;;  %v6890_v31 = vadd.f32 %v15774_v18, %v6371_v43  ;;  %v6116_v32 = vmul.f32 %v15764_v7, %v4412_v26  ;;  %v6372_v33 = vmul.f32 %v15764_v7, %v5436_v27  ;;  %v4414_v34 = vpop.f32.mrb[235].mxu0  ;;  %v5438_v35 = vpop.f32.mrb[235].mxu1  ;;  %v14205_v19 = vld [vmem:[%s14799_s30 + $0x584] ss:$8 sps:$4 sm:$0xff]  }
 0x333   : > { %13498 = vst [vmem:[%s15008_s10 + $0x5c8] sm:$0xff] %v12962_v20   ;;  %v14208_v20 = vld [vmem:[%s14799_s30 + $0xd84] ss:$8 sps:$4 sm:$0xff]  }
 0x334   : > { %v6635_v37 = vadd.f32 %v15774_v18, %v6116_v32  ;;  %v6891_v38 = vadd.f32 %v15774_v18, %v6372_v33  ;;  %4624 = vmatmul.mubr.bf16.gmra.mrb[84].mxu0 %v14185_v24  ;;  %5648 = vmatmul.mubr.bf16.gmra.mrb[84].mxu1 %v14188_v54  ;;  %v7146_v39 = vmax.f32 %v6634_v30, 0.0  ;;  %v7402_v61 = vmax.f32 %v6890_v31, 0.0 }
 0x335   : > { %10831 = vmatprep.mubr.msk.bf16.mxu0 %vm3135_vm0, %v14193_v28  ;;  %10959 = vmatprep.mubr.msk.bf16.mxu1 %vm3135_vm0, %v14196_v29 }
 0x336   : > { %v7147_v40 = vmax.f32 %v6635_v37, 0.0  ;;  %v7403_v41 = vmax.f32 %v6891_v38, 0.0 }
 0x337   : > { %v4417_v42 = vpop.f32.mrb[236].mxu0  ;;  %v5441_v63 = vpop.f32.mrb[236].mxu1 }
 0x338   : > { %v12327_v44 = vpack.c.bf16 %v7147_v40, %v7146_v39  ;;  %v12967_v45 = vpack.c.bf16 %v7403_v41, %v7402_v61  ;;  %v6117_v46 = vmul.f32 %v15764_v7, %v4417_v42  ;;  %v6373_v47 = vmul.f32 %v15764_v7, %v5441_v63  ;;  %v4419_v48 = vpop.f32.mrb[237].mxu0  ;;  %v5443_v49 = vpop.f32.mrb[237].mxu1  ;;  %v14203_v40 = vld [vmem:[%s14799_s30 + $0x580] ss:$8 sps:$4 sm:$0xff]  }
 0x339   : > { %v4420_v52 = vpop.f32.mrb[238].mxu0  ;;  %v5444_v53 = vpop.f32.mrb[238].mxu1  ;;  %v14206_v41 = vld [vmem:[%s14799_s30 + $0xd80] ss:$8 sps:$4 sm:$0xff]  }
 0x33a   : > { %13371 = vst [vmem:[%s15008_s10 + $0x1d0] sm:$0xff] %v12327_v44   ;;  %13499 = vst [vmem:[%s15008_s10 + $0x5d0] sm:$0xff] %v12967_v45   ;;  %v6636_v57 = vadd.f32 %v15774_v18, %v6117_v46  ;;  %v6892_v58 = vadd.f32 %v15774_v18, %v6373_v47  ;;  %v6118_v59 = vmul.f32 %v15764_v7, %v4420_v52  ;;  %v4422_v62 = vpop.f32.mrb[239].mxu0  ;;  %v5446_v0 = vpop.f32.mrb[239].mxu1  ;;  %v14211_v44 = vld [vmem:[%s14799_s30 + $0x594] ss:$8 sps:$4 sm:$0xff]  }
 0x33b   : > { %v6374_v60 = vmul.f32 %v15764_v7, %v5444_v53  ;;  %v14214_v45 = vld [vmem:[%s14799_s30 + $0xd94] ss:$8 sps:$4 sm:$0xff]  }
 0x33c   : > { %v6637_v1 = vadd.f32 %v15774_v18, %v6118_v59  ;;  %4632 = vmatmul.mubr.bf16.gmra.mrb[88].mxu0 %v14191_v50  ;;  %5656 = vmatmul.mubr.bf16.gmra.mrb[88].mxu1 %v14194_v51  ;;  %v7148_v3 = vmax.f32 %v6636_v57, 0.0  ;;  %v7404_v25 = vmax.f32 %v6892_v58, 0.0 }
 0x33d   : > { %v6893_v2 = vadd.f32 %v15774_v18, %v6374_v60  ;;  %10832 = vmatprep.mubr.msk.bf16.mxu0 %vm3135_vm0, %v14199_v55  ;;  %10960 = vmatprep.mubr.msk.bf16.mxu1 %vm3135_vm0, %v14202_v56 }
 0x33e   : > { %v7149_v4 = vmax.f32 %v6637_v1, 0.0 }
 0x33f   : > { %v7405_v5 = vmax.f32 %v6893_v2, 0.0  ;;  %v4425_v6 = vpop.f32.mrb[240].mxu0  ;;  %v5449_v36 = vpop.f32.mrb[240].mxu1 }
 0x340   : > { %v12332_v8 = vpack.c.bf16 %v7149_v4, %v7148_v3  ;;  %v6119_v10 = vmul.f32 %v15764_v7, %v4425_v6  ;;  %v6375_v11 = vmul.f32 %v15764_v7, %v5449_v36  ;;  %v4427_v12 = vpop.f32.mrb[241].mxu0  ;;  %v5451_v13 = vpop.f32.mrb[241].mxu1  ;;  %v14209_v4 = vld [vmem:[%s14799_s30 + $0x590] ss:$8 sps:$4 sm:$0xff]  }
 0x341   : > { %v12972_v9 = vpack.c.bf16 %v7405_v5, %v7404_v25  ;;  %v4428_v16 = vpop.f32.mrb[242].mxu0  ;;  %v5452_v17 = vpop.f32.mrb[242].mxu1  ;;  %v14212_v5 = vld [vmem:[%s14799_s30 + $0xd90] ss:$8 sps:$4 sm:$0xff]  }
 0x342   : > { %13372 = vst [vmem:[%s15008_s10 + $0x1d8] sm:$0xff] %v12332_v8   ;;  %v6638_v21 = vadd.f32 %v15774_v18, %v6119_v10  ;;  %v6894_v43 = vadd.f32 %v15774_v18, %v6375_v11  ;;  %v6120_v22 = vmul.f32 %v15764_v7, %v4428_v16  ;;  %v6376_v23 = vmul.f32 %v15764_v7, %v5452_v17  ;;  %v4430_v24 = vpop.f32.mrb[243].mxu0  ;;  %v5454_v54 = vpop.f32.mrb[243].mxu1  ;;  %v14217_v8 = vld [vmem:[%s14799_s30 + $0x5a4] ss:$8 sps:$4 sm:$0xff]  }
 0x343   : > { %13500 = vst [vmem:[%s15008_s10 + $0x5d8] sm:$0xff] %v12972_v9   ;;  %v14220_v9 = vld [vmem:[%s14799_s30 + $0xda4] ss:$8 sps:$4 sm:$0xff]  }
 0x344   : > { %v6639_v26 = vadd.f32 %v15774_v18, %v6120_v22  ;;  %v6895_v27 = vadd.f32 %v15774_v18, %v6376_v23  ;;  %4640 = vmatmul.mubr.bf16.gmra.mrb[92].mxu0 %v14197_v14  ;;  %5664 = vmatmul.mubr.bf16.gmra.mrb[92].mxu1 %v14200_v15  ;;  %v7150_v28 = vmax.f32 %v6638_v21, 0.0  ;;  %v7406_v29 = vmax.f32 %v6894_v43, 0.0 }
 0x345   : > { %10833 = vmatprep.mubr.msk.bf16.mxu0 %vm3135_vm0, %v14205_v19  ;;  %10961 = vmatprep.mubr.msk.bf16.mxu1 %vm3135_vm0, %v14208_v20 }
 0x346   : > { %v7151_v30 = vmax.f32 %v6639_v26, 0.0  ;;  %v7407_v31 = vmax.f32 %v6895_v27, 0.0 }
 0x347   : > { %v4433_v32 = vpop.f32.mrb[244].mxu0  ;;  %v5457_v33 = vpop.f32.mrb[244].mxu1 }
 0x348   : > { %v12337_v34 = vpack.c.bf16 %v7151_v30, %v7150_v28  ;;  %v12977_v35 = vpack.c.bf16 %v7407_v31, %v7406_v29  ;;  %v6121_v37 = vmul.f32 %v15764_v7, %v4433_v32  ;;  %v6377_v38 = vmul.f32 %v15764_v7, %v5457_v33  ;;  %v4435_v39 = vpop.f32.mrb[245].mxu0  ;;  %v5459_v61 = vpop.f32.mrb[245].mxu1  ;;  %v14215_v30 = vld [vmem:[%s14799_s30 + $0x5a0] ss:$8 sps:$4 sm:$0xff]  }
 0x349   : > { %v4436_v42 = vpop.f32.mrb[246].mxu0  ;;  %v5460_v63 = vpop.f32.mrb[246].mxu1  ;;  %v14218_v31 = vld [vmem:[%s14799_s30 + $0xda0] ss:$8 sps:$4 sm:$0xff]  }
 0x34a   : > { %13373 = vst [vmem:[%s15008_s10 + $0x1e0] sm:$0xff] %v12337_v34   ;;  %13501 = vst [vmem:[%s15008_s10 + $0x5e0] sm:$0xff] %v12977_v35   ;;  %v6640_v46 = vadd.f32 %v15774_v18, %v6121_v37  ;;  %v6896_v47 = vadd.f32 %v15774_v18, %v6377_v38  ;;  %v6122_v48 = vmul.f32 %v15764_v7, %v4436_v42  ;;  %v4438_v50 = vpop.f32.mrb[247].mxu0  ;;  %v5462_v51 = vpop.f32.mrb[247].mxu1  ;;  %v14223_v34 = vld [vmem:[%s14799_s30 + $0x5b4] ss:$8 sps:$4 sm:$0xff]  }
 0x34b   : > { %v6378_v49 = vmul.f32 %v15764_v7, %v5460_v63  ;;  %v14226_v35 = vld [vmem:[%s14799_s30 + $0xdb4] ss:$8 sps:$4 sm:$0xff]   ;;  %v16024_v50 = vld [vmem:[#allocation5] ss:$0 sm:$0xff] }
 0x34c   : > { %v6641_v52 = vadd.f32 %v15774_v18, %v6122_v48  ;;  %4648 = vmatmul.mubr.bf16.gmra.mrb[96].mxu0 %v14203_v40  ;;  %5672 = vmatmul.mubr.bf16.gmra.mrb[96].mxu1 %v14206_v41  ;;  %v7152_v55 = vmax.f32 %v6640_v46, 0.0  ;;  %v7408_v56 = vmax.f32 %v6896_v47, 0.0 }
 0x34d   : > { %v6897_v53 = vadd.f32 %v15774_v18, %v6378_v49  ;;  %10834 = vmatprep.mubr.msk.bf16.mxu0 %vm3135_vm0, %v14211_v44  ;;  %10962 = vmatprep.mubr.msk.bf16.mxu1 %vm3135_vm0, %v14214_v45 }
 0x34e   : > { %v7153_v57 = vmax.f32 %v6641_v52, 0.0 }
 0x34f   : > { %v7409_v58 = vmax.f32 %v6897_v53, 0.0  ;;  %v4441_v59 = vpop.f32.mrb[248].mxu0  ;;  %v5465_v60 = vpop.f32.mrb[248].mxu1 }
 0x350   : > { %v12342_v62 = vpack.c.bf16 %v7153_v57, %v7152_v55  ;;  %v6123_v1 = vmul.f32 %v15764_v7, %v4441_v59  ;;  %v6379_v2 = vmul.f32 %v15764_v7, %v5465_v60  ;;  %v4443_v3 = vpop.f32.mrb[249].mxu0  ;;  %v5467_v25 = vpop.f32.mrb[249].mxu1  ;;  %v14224_v57 = vld [vmem:[%s14799_s30 + $0xdb0] ss:$8 sps:$4 sm:$0xff]   ;;  %v14229_v60 = vld [vmem:[%s14799_s30 + $0x5c4] ss:$8 sps:$4 sm:$0xff]  }
 0x351   : > { %v12982_v0 = vpack.c.bf16 %v7409_v58, %v7408_v56  ;;  %v4444_v6 = vpop.f32.mrb[250].mxu0  ;;  %v5468_v36 = vpop.f32.mrb[250].mxu1  ;;  %v14221_v56 = vld [vmem:[%s14799_s30 + $0x5b0] ss:$8 sps:$4 sm:$0xff]  }
 0x352   : > { %13374 = vst [vmem:[%s15008_s10 + $0x1e8] sm:$0xff] %v12342_v62   ;;  %v6642_v10 = vadd.f32 %v15774_v18, %v6123_v1  ;;  %v6898_v11 = vadd.f32 %v15774_v18, %v6379_v2  ;;  %v6124_v12 = vmul.f32 %v15764_v7, %v4444_v6  ;;  %v6380_v13 = vmul.f32 %v15764_v7, %v5468_v36  ;;  %v4446_v14 = vpop.f32.mrb[251].mxu0  ;;  %v5470_v15 = vpop.f32.mrb[251].mxu1  ;;  %v14232_v62 = vld [vmem:[%s14799_s30 + $0xdc4] ss:$8 sps:$4 sm:$0xff]  }
 0x353   : > { %13502 = vst [vmem:[%s15008_s10 + $0x5e8] sm:$0xff] %v12982_v0   ;;  %v16034_v0 = vld [vmem:[#allocation7] ss:$0 sm:$0xff] }
 0x354   : > { %v6643_v16 = vadd.f32 %v15774_v18, %v6124_v12  ;;  %v6899_v17 = vadd.f32 %v15774_v18, %v6380_v13  ;;  %4656 = vmatmul.mubr.bf16.gmra.mrb[100].mxu0 %v14209_v4  ;;  %5680 = vmatmul.mubr.bf16.gmra.mrb[100].mxu1 %v14212_v5  ;;  %v7154_v19 = vmax.f32 %v6642_v10, 0.0  ;;  %v7410_v20 = vmax.f32 %v6898_v11, 0.0 }
 0x355   : > { %10835 = vmatprep.mubr.msk.bf16.mxu0 %vm3135_vm0, %v14217_v8  ;;  %10963 = vmatprep.mubr.msk.bf16.mxu1 %vm3135_vm0, %v14220_v9 }
 0x356   : > { %v7155_v21 = vmax.f32 %v6643_v16, 0.0  ;;  %v7411_v43 = vmax.f32 %v6899_v17, 0.0 }
 0x357   : > { %v4449_v22 = vpop.f32.mrb[252].mxu0  ;;  %v5473_v23 = vpop.f32.mrb[252].mxu1 }
 0x358   : > { %v12347_v24 = vpack.c.bf16 %v7155_v21, %v7154_v19  ;;  %v12987_v54 = vpack.c.bf16 %v7411_v43, %v7410_v20  ;;  %v6125_v26 = vmul.f32 %v15764_v7, %v4449_v22  ;;  %v6381_v27 = vmul.f32 %v15764_v7, %v5473_v23  ;;  %v4451_v28 = vpop.f32.mrb[253].mxu0  ;;  %v5475_v29 = vpop.f32.mrb[253].mxu1  ;;  %v14227_v21 = vld [vmem:[%s14799_s30 + $0x5c0] ss:$8 sps:$4 sm:$0xff]  }
 0x359   : > { %v4452_v32 = vpop.f32.mrb[254].mxu0  ;;  %v5476_v33 = vpop.f32.mrb[254].mxu1  ;;  %v14230_v43 = vld [vmem:[%s14799_s30 + $0xdc0] ss:$8 sps:$4 sm:$0xff]  }
 0x35a   : > { %13375 = vst [vmem:[%s15008_s10 + $0x1f0] sm:$0xff] %v12347_v24   ;;  %13503 = vst [vmem:[%s15008_s10 + $0x5f0] sm:$0xff] %v12987_v54   ;;  %v6644_v37 = vadd.f32 %v15774_v18, %v6125_v26  ;;  %v6900_v38 = vadd.f32 %v15774_v18, %v6381_v27  ;;  %v6126_v39 = vmul.f32 %v15764_v7, %v4452_v32  ;;  %v4454_v40 = vpop.f32.mrb[255].mxu0  ;;  %v5478_v41 = vpop.f32.mrb[255].mxu1  ;;  %v14235_v24 = vld [vmem:[%s14799_s30 + $0x5d4] ss:$8 sps:$4 sm:$0xff]  }
 0x35b   : > { %v6382_v61 = vmul.f32 %v15764_v7, %v5476_v33  ;;  %v14238_v54 = vld [vmem:[%s14799_s30 + $0xdd4] ss:$8 sps:$4 sm:$0xff]  }
 0x35c   : > { %v6645_v42 = vadd.f32 %v15774_v18, %v6126_v39  ;;  %4664 = vmatmul.mubr.bf16.gmra.mrb[104].mxu0 %v14215_v30  ;;  %5688 = vmatmul.mubr.bf16.gmra.mrb[104].mxu1 %v14218_v31  ;;  %v7156_v44 = vmax.f32 %v6644_v37, 0.0  ;;  %v7412_v45 = vmax.f32 %v6900_v38, 0.0 }
 0x35d   : > { %v6901_v63 = vadd.f32 %v15774_v18, %v6382_v61  ;;  %10836 = vmatprep.mubr.msk.bf16.mxu0 %vm3135_vm0, %v14223_v34  ;;  %10964 = vmatprep.mubr.msk.bf16.mxu1 %vm3135_vm0, %v14226_v35 }
 0x35e   : > { %v7157_v46 = vmax.f32 %v6645_v42, 0.0 }
 0x35f   : > { %v7413_v7 = vmax.f32 %v6901_v63, 0.0  ;;  %v4457_v47 = vpop.f32.mrb[0].mxu0  ;;  %v5481_v48 = vpop.f32.mrb[0].mxu1 }
 0x360   : > { %v12352_v49 = vpack.c.bf16 %v7157_v46, %v7156_v44  ;;  %v6127_v51 = vmul.f32 %v16024_v50, %v4457_v47  ;;  %v6383_v52 = vmul.f32 %v16024_v50, %v5481_v48  ;;  %v4459_v53 = vpop.f32.mrb[1].mxu0  ;;  %v5483_v55 = vpop.f32.mrb[1].mxu1  ;;  %v14233_v46 = vld [vmem:[%s14799_s30 + $0x5d0] ss:$8 sps:$4 sm:$0xff]  }
 0x361   : > { %v12992_v18 = vpack.c.bf16 %v7413_v7, %v7412_v45  ;;  %v4460_v58 = vpop.f32.mrb[2].mxu0  ;;  %v5484_v59 = vpop.f32.mrb[2].mxu1  ;;  %v14236_v7 = vld [vmem:[%s14799_s30 + $0xdd0] ss:$8 sps:$4 sm:$0xff]  }
 0x362   : > { %13376 = vst [vmem:[%s15008_s10 + $0x1f8] sm:$0xff] %v12352_v49   ;;  %v6646_v1 = vadd.f32 %v16034_v0, %v6127_v51  ;;  %v6902_v2 = vadd.f32 %v16034_v0, %v6383_v52  ;;  %v6128_v3 = vmul.f32 %v16024_v50, %v4460_v58  ;;  %v6384_v25 = vmul.f32 %v16024_v50, %v5484_v59  ;;  %v4462_v4 = vpop.f32.mrb[3].mxu0  ;;  %v5486_v5 = vpop.f32.mrb[3].mxu1  ;;  %v14241_v49 = vld [vmem:[%s14799_s30 + $0x5e4] ss:$8 sps:$4 sm:$0xff]  }
 0x363   : > { %13504 = vst [vmem:[%s15008_s10 + $0x5f8] sm:$0xff] %v12992_v18   ;;  %v14244_v18 = vld [vmem:[%s14799_s30 + $0xde4] ss:$8 sps:$4 sm:$0xff]  }
 0x364   : > { %v6647_v6 = vadd.f32 %v16034_v0, %v6128_v3  ;;  %v6903_v36 = vadd.f32 %v16034_v0, %v6384_v25  ;;  %4672 = vmatmul.mubr.bf16.gmra.mrb[108].mxu0 %v14221_v56  ;;  %5696 = vmatmul.mubr.bf16.gmra.mrb[108].mxu1 %v14224_v57  ;;  %v7158_v8 = vmax.f32 %v6646_v1, 0.0  ;;  %v7414_v9 = vmax.f32 %v6902_v2, 0.0 }
 0x365   : > { %10837 = vmatprep.mubr.msk.bf16.mxu0 %vm3135_vm0, %v14229_v60  ;;  %10965 = vmatprep.mubr.msk.bf16.mxu1 %vm3135_vm0, %v14232_v62 }
 0x366   : > { %v7159_v10 = vmax.f32 %v6647_v6, 0.0  ;;  %v7415_v11 = vmax.f32 %v6903_v36, 0.0 }
 0x367   : > { %v4465_v12 = vpop.f32.mrb[4].mxu0  ;;  %v5489_v13 = vpop.f32.mrb[4].mxu1 }
 0x368   : > { %v12357_v14 = vpack.c.bf16 %v7159_v10, %v7158_v8  ;;  %v12997_v15 = vpack.c.bf16 %v7415_v11, %v7414_v9  ;;  %v6129_v16 = vmul.f32 %v16024_v50, %v4465_v12  ;;  %v6385_v17 = vmul.f32 %v16024_v50, %v5489_v13  ;;  %v4467_v19 = vpop.f32.mrb[5].mxu0  ;;  %v5491_v20 = vpop.f32.mrb[5].mxu1  ;;  %v14239_v10 = vld [vmem:[%s14799_s30 + $0x5e0] ss:$8 sps:$4 sm:$0xff]  }
 0x369   : > { %v4468_v22 = vpop.f32.mrb[6].mxu0  ;;  %v5492_v23 = vpop.f32.mrb[6].mxu1  ;;  %v14242_v11 = vld [vmem:[%s14799_s30 + $0xde0] ss:$8 sps:$4 sm:$0xff]  }
 0x36a   : > { %13377 = vst [vmem:[%s15008_s10 + $0x200] sm:$0xff] %v12357_v14   ;;  %13505 = vst [vmem:[%s15008_s10 + $0x600] sm:$0xff] %v12997_v15   ;;  %v6648_v26 = vadd.f32 %v16034_v0, %v6129_v16  ;;  %v6904_v27 = vadd.f32 %v16034_v0, %v6385_v17  ;;  %v6130_v28 = vmul.f32 %v16024_v50, %v4468_v22  ;;  %v4470_v30 = vpop.f32.mrb[7].mxu0  ;;  %v5494_v31 = vpop.f32.mrb[7].mxu1  ;;  %v14247_v14 = vld [vmem:[%s14799_s30 + $0x5f4] ss:$8 sps:$4 sm:$0xff]  }
 0x36b   : > { %v6386_v29 = vmul.f32 %v16024_v50, %v5492_v23  ;;  %v14250_v15 = vld [vmem:[%s14799_s30 + $0xdf4] ss:$8 sps:$4 sm:$0xff]  }
 0x36c   : > { %v6649_v32 = vadd.f32 %v16034_v0, %v6130_v28  ;;  %4680 = vmatmul.mubr.bf16.gmra.mrb[112].mxu0 %v14227_v21  ;;  %5704 = vmatmul.mubr.bf16.gmra.mrb[112].mxu1 %v14230_v43  ;;  %v7160_v34 = vmax.f32 %v6648_v26, 0.0  ;;  %v7416_v35 = vmax.f32 %v6904_v27, 0.0 }
 0x36d   : > { %v6905_v33 = vadd.f32 %v16034_v0, %v6386_v29  ;;  %10838 = vmatprep.mubr.msk.bf16.mxu0 %vm3135_vm0, %v14235_v24  ;;  %10966 = vmatprep.mubr.msk.bf16.mxu1 %vm3135_vm0, %v14238_v54 }
 0x36e   : > { %v7161_v37 = vmax.f32 %v6649_v32, 0.0 }
 0x36f   : > { %v7417_v38 = vmax.f32 %v6905_v33, 0.0  ;;  %v4473_v39 = vpop.f32.mrb[8].mxu0  ;;  %v5497_v61 = vpop.f32.mrb[8].mxu1 }
 0x370   : > { %v12362_v40 = vpack.c.bf16 %v7161_v37, %v7160_v34  ;;  %v6131_v42 = vmul.f32 %v16024_v50, %v4473_v39  ;;  %v6387_v63 = vmul.f32 %v16024_v50, %v5497_v61  ;;  %v4475_v44 = vpop.f32.mrb[9].mxu0  ;;  %v5499_v45 = vpop.f32.mrb[9].mxu1  ;;  %v14245_v37 = vld [vmem:[%s14799_s30 + $0x5f0] ss:$8 sps:$4 sm:$0xff]  }
 0x371   : > { %v13002_v41 = vpack.c.bf16 %v7417_v38, %v7416_v35  ;;  %v4476_v47 = vpop.f32.mrb[10].mxu0  ;;  %v5500_v48 = vpop.f32.mrb[10].mxu1  ;;  %v14248_v38 = vld [vmem:[%s14799_s30 + $0xdf0] ss:$8 sps:$4 sm:$0xff]  }
 0x372   : > { %13378 = vst [vmem:[%s15008_s10 + $0x208] sm:$0xff] %v12362_v40   ;;  %v6650_v51 = vadd.f32 %v16034_v0, %v6131_v42  ;;  %v6906_v52 = vadd.f32 %v16034_v0, %v6387_v63  ;;  %v6132_v53 = vmul.f32 %v16024_v50, %v4476_v47  ;;  %v6388_v55 = vmul.f32 %v16024_v50, %v5500_v48  ;;  %v4478_v56 = vpop.f32.mrb[11].mxu0  ;;  %v5502_v57 = vpop.f32.mrb[11].mxu1  ;;  %v14253_v40 = vld [vmem:[%s14799_s30 + $0x604] ss:$8 sps:$4 sm:$0xff]  }
 0x373   : > { %13506 = vst [vmem:[%s15008_s10 + $0x608] sm:$0xff] %v13002_v41   ;;  %v14256_v41 = vld [vmem:[%s14799_s30 + $0xe04] ss:$8 sps:$4 sm:$0xff]  }
 0x374   : > { %v6651_v58 = vadd.f32 %v16034_v0, %v6132_v53  ;;  %v6907_v59 = vadd.f32 %v16034_v0, %v6388_v55  ;;  %4688 = vmatmul.mubr.bf16.gmra.mrb[116].mxu0 %v14233_v46  ;;  %5712 = vmatmul.mubr.bf16.gmra.mrb[116].mxu1 %v14236_v7  ;;  %v7162_v60 = vmax.f32 %v6650_v51, 0.0  ;;  %v7418_v62 = vmax.f32 %v6906_v52, 0.0 }
 0x375   : > { %10839 = vmatprep.mubr.msk.bf16.mxu0 %vm3135_vm0, %v14241_v49  ;;  %10967 = vmatprep.mubr.msk.bf16.mxu1 %vm3135_vm0, %v14244_v18 }
 0x376   : > { %v7163_v1 = vmax.f32 %v6651_v58, 0.0  ;;  %v7419_v2 = vmax.f32 %v6907_v59, 0.0 }
 0x377   : > { %v4481_v3 = vpop.f32.mrb[12].mxu0  ;;  %v5505_v25 = vpop.f32.mrb[12].mxu1 }
 0x378   : > { %v12367_v4 = vpack.c.bf16 %v7163_v1, %v7162_v60  ;;  %v13007_v5 = vpack.c.bf16 %v7419_v2, %v7418_v62  ;;  %v6133_v6 = vmul.f32 %v16024_v50, %v4481_v3  ;;  %v6389_v36 = vmul.f32 %v16024_v50, %v5505_v25  ;;  %v4483_v8 = vpop.f32.mrb[13].mxu0  ;;  %v5507_v9 = vpop.f32.mrb[13].mxu1  ;;  %v14251_v1 = vld [vmem:[%s14799_s30 + $0x600] ss:$8 sps:$4 sm:$0xff]  }
 0x379   : > { %v4484_v12 = vpop.f32.mrb[14].mxu0  ;;  %v5508_v13 = vpop.f32.mrb[14].mxu1  ;;  %v14254_v2 = vld [vmem:[%s14799_s30 + $0xe00] ss:$8 sps:$4 sm:$0xff]  }
 0x37a   : > { %13379 = vst [vmem:[%s15008_s10 + $0x210] sm:$0xff] %v12367_v4   ;;  %13507 = vst [vmem:[%s15008_s10 + $0x610] sm:$0xff] %v13007_v5   ;;  %v6652_v16 = vadd.f32 %v16034_v0, %v6133_v6  ;;  %v6908_v17 = vadd.f32 %v16034_v0, %v6389_v36  ;;  %v6134_v19 = vmul.f32 %v16024_v50, %v4484_v12  ;;  %v4486_v21 = vpop.f32.mrb[15].mxu0  ;;  %v5510_v43 = vpop.f32.mrb[15].mxu1  ;;  %v14259_v4 = vld [vmem:[%s14799_s30 + $0x614] ss:$8 sps:$4 sm:$0xff]  }
 0x37b   : > { %v6390_v20 = vmul.f32 %v16024_v50, %v5508_v13  ;;  %v14262_v5 = vld [vmem:[%s14799_s30 + $0xe14] ss:$8 sps:$4 sm:$0xff]  }
 0x37c   : > { %v6653_v22 = vadd.f32 %v16034_v0, %v6134_v19  ;;  %4696 = vmatmul.mubr.bf16.gmra.mrb[120].mxu0 %v14239_v10  ;;  %5720 = vmatmul.mubr.bf16.gmra.mrb[120].mxu1 %v14242_v11  ;;  %v7164_v24 = vmax.f32 %v6652_v16, 0.0  ;;  %v7420_v54 = vmax.f32 %v6908_v17, 0.0 }
 0x37d   : > { %v6909_v23 = vadd.f32 %v16034_v0, %v6390_v20  ;;  %10840 = vmatprep.mubr.msk.bf16.mxu0 %vm3135_vm0, %v14247_v14  ;;  %10968 = vmatprep.mubr.msk.bf16.mxu1 %vm3135_vm0, %v14250_v15 }
 0x37e   : > { %v7165_v26 = vmax.f32 %v6653_v22, 0.0 }
 0x37f   : > { %v7421_v27 = vmax.f32 %v6909_v23, 0.0  ;;  %v4489_v28 = vpop.f32.mrb[16].mxu0  ;;  %v5513_v29 = vpop.f32.mrb[16].mxu1 }
 0x380   : > { %v12372_v30 = vpack.c.bf16 %v7165_v26, %v7164_v24  ;;  %v6135_v32 = vmul.f32 %v16024_v50, %v4489_v28  ;;  %v6391_v33 = vmul.f32 %v16024_v50, %v5513_v29  ;;  %v4491_v34 = vpop.f32.mrb[17].mxu0  ;;  %v5515_v35 = vpop.f32.mrb[17].mxu1  ;;  %v14257_v26 = vld [vmem:[%s14799_s30 + $0x610] ss:$8 sps:$4 sm:$0xff]  }
 0x381   : > { %v13012_v31 = vpack.c.bf16 %v7421_v27, %v7420_v54  ;;  %v4492_v39 = vpop.f32.mrb[18].mxu0  ;;  %v5516_v61 = vpop.f32.mrb[18].mxu1  ;;  %v14260_v27 = vld [vmem:[%s14799_s30 + $0xe10] ss:$8 sps:$4 sm:$0xff]  }
 0x382   : > { %13380 = vst [vmem:[%s15008_s10 + $0x218] sm:$0xff] %v12372_v30   ;;  %v6654_v42 = vadd.f32 %v16034_v0, %v6135_v32  ;;  %v6910_v63 = vadd.f32 %v16034_v0, %v6391_v33  ;;  %v6136_v44 = vmul.f32 %v16024_v50, %v4492_v39  ;;  %v6392_v45 = vmul.f32 %v16024_v50, %v5516_v61  ;;  %v4494_v46 = vpop.f32.mrb[19].mxu0  ;;  %v5518_v7 = vpop.f32.mrb[19].mxu1  ;;  %v14265_v30 = vld [vmem:[%s14799_s30 + $0x624] ss:$8 sps:$4 sm:$0xff]  }
 0x383   : > { %13508 = vst [vmem:[%s15008_s10 + $0x618] sm:$0xff] %v13012_v31   ;;  %v14268_v31 = vld [vmem:[%s14799_s30 + $0xe24] ss:$8 sps:$4 sm:$0xff]  }
 0x384   : > { %v6655_v47 = vadd.f32 %v16034_v0, %v6136_v44  ;;  %v6911_v48 = vadd.f32 %v16034_v0, %v6392_v45  ;;  %4704 = vmatmul.mubr.bf16.gmra.mrb[124].mxu0 %v14245_v37  ;;  %5728 = vmatmul.mubr.bf16.gmra.mrb[124].mxu1 %v14248_v38  ;;  %v7166_v49 = vmax.f32 %v6654_v42, 0.0  ;;  %v7422_v18 = vmax.f32 %v6910_v63, 0.0 }
 0x385   : > { %10841 = vmatprep.mubr.msk.bf16.mxu0 %vm3135_vm0, %v14253_v40  ;;  %10969 = vmatprep.mubr.msk.bf16.mxu1 %vm3135_vm0, %v14256_v41 }
 0x386   : > { %v7167_v51 = vmax.f32 %v6655_v47, 0.0  ;;  %v7423_v52 = vmax.f32 %v6911_v48, 0.0 }
 0x387   : > { %v4497_v53 = vpop.f32.mrb[20].mxu0  ;;  %v5521_v55 = vpop.f32.mrb[20].mxu1 }
 0x388   : > { %v12377_v56 = vpack.c.bf16 %v7167_v51, %v7166_v49  ;;  %v13017_v57 = vpack.c.bf16 %v7423_v52, %v7422_v18  ;;  %v6137_v58 = vmul.f32 %v16024_v50, %v4497_v53  ;;  %v6393_v59 = vmul.f32 %v16024_v50, %v5521_v55  ;;  %v4499_v60 = vpop.f32.mrb[21].mxu0  ;;  %v5523_v62 = vpop.f32.mrb[21].mxu1  ;;  %v14263_v51 = vld [vmem:[%s14799_s30 + $0x620] ss:$8 sps:$4 sm:$0xff]  }
 0x389   : > { %v4500_v3 = vpop.f32.mrb[22].mxu0  ;;  %v5524_v25 = vpop.f32.mrb[22].mxu1  ;;  %v14266_v52 = vld [vmem:[%s14799_s30 + $0xe20] ss:$8 sps:$4 sm:$0xff]  }
 0x38a   : > { %13381 = vst [vmem:[%s15008_s10 + $0x220] sm:$0xff] %v12377_v56   ;;  %13509 = vst [vmem:[%s15008_s10 + $0x620] sm:$0xff] %v13017_v57   ;;  %v6656_v6 = vadd.f32 %v16034_v0, %v6137_v58  ;;  %v6912_v36 = vadd.f32 %v16034_v0, %v6393_v59  ;;  %v6138_v8 = vmul.f32 %v16024_v50, %v4500_v3  ;;  %v4502_v10 = vpop.f32.mrb[23].mxu0  ;;  %v5526_v11 = vpop.f32.mrb[23].mxu1  ;;  %v14271_v56 = vld [vmem:[%s14799_s30 + $0x634] ss:$8 sps:$4 sm:$0xff]  }
 0x38b   : > { %v6394_v9 = vmul.f32 %v16024_v50, %v5524_v25  ;;  %v14274_v57 = vld [vmem:[%s14799_s30 + $0xe34] ss:$8 sps:$4 sm:$0xff]  }
 0x38c   : > { %v6657_v12 = vadd.f32 %v16034_v0, %v6138_v8  ;;  %4712 = vmatmul.mubr.bf16.gmra.mrb[128].mxu0 %v14251_v1  ;;  %5736 = vmatmul.mubr.bf16.gmra.mrb[128].mxu1 %v14254_v2  ;;  %v7168_v14 = vmax.f32 %v6656_v6, 0.0  ;;  %v7424_v15 = vmax.f32 %v6912_v36, 0.0 }
 0x38d   : > { %v6913_v13 = vadd.f32 %v16034_v0, %v6394_v9  ;;  %10842 = vmatprep.mubr.msk.bf16.mxu0 %vm3135_vm0, %v14259_v4  ;;  %10970 = vmatprep.mubr.msk.bf16.mxu1 %vm3135_vm0, %v14262_v5 }
 0x38e   : > { %v7169_v16 = vmax.f32 %v6657_v12, 0.0 }
 0x38f   : > { %v7425_v17 = vmax.f32 %v6913_v13, 0.0  ;;  %v4505_v19 = vpop.f32.mrb[24].mxu0  ;;  %v5529_v20 = vpop.f32.mrb[24].mxu1 }
 0x390   : > { %v12382_v21 = vpack.c.bf16 %v7169_v16, %v7168_v14  ;;  %v6139_v22 = vmul.f32 %v16024_v50, %v4505_v19  ;;  %v6395_v23 = vmul.f32 %v16024_v50, %v5529_v20  ;;  %v4507_v24 = vpop.f32.mrb[25].mxu0  ;;  %v5531_v54 = vpop.f32.mrb[25].mxu1  ;;  %v14269_v16 = vld [vmem:[%s14799_s30 + $0x630] ss:$8 sps:$4 sm:$0xff]  }
 0x391   : > { %v13022_v43 = vpack.c.bf16 %v7425_v17, %v7424_v15  ;;  %v4508_v28 = vpop.f32.mrb[26].mxu0  ;;  %v5532_v29 = vpop.f32.mrb[26].mxu1  ;;  %v14272_v17 = vld [vmem:[%s14799_s30 + $0xe30] ss:$8 sps:$4 sm:$0xff]  }
 0x392   : > { %13382 = vst [vmem:[%s15008_s10 + $0x228] sm:$0xff] %v12382_v21   ;;  %v6658_v32 = vadd.f32 %v16034_v0, %v6139_v22  ;;  %v6914_v33 = vadd.f32 %v16034_v0, %v6395_v23  ;;  %v6140_v34 = vmul.f32 %v16024_v50, %v4508_v28  ;;  %v6396_v35 = vmul.f32 %v16024_v50, %v5532_v29  ;;  %v4510_v37 = vpop.f32.mrb[27].mxu0  ;;  %v5534_v38 = vpop.f32.mrb[27].mxu1  ;;  %v14277_v21 = vld [vmem:[%s14799_s30 + $0x644] ss:$8 sps:$4 sm:$0xff]  }
 0x393   : > { %13510 = vst [vmem:[%s15008_s10 + $0x628] sm:$0xff] %v13022_v43   ;;  %v14280_v43 = vld [vmem:[%s14799_s30 + $0xe44] ss:$8 sps:$4 sm:$0xff]  }
 0x394   : > { %v6659_v39 = vadd.f32 %v16034_v0, %v6140_v34  ;;  %v6915_v61 = vadd.f32 %v16034_v0, %v6396_v35  ;;  %4720 = vmatmul.mubr.bf16.gmra.mrb[132].mxu0 %v14257_v26  ;;  %5744 = vmatmul.mubr.bf16.gmra.mrb[132].mxu1 %v14260_v27  ;;  %v7170_v40 = vmax.f32 %v6658_v32, 0.0  ;;  %v7426_v41 = vmax.f32 %v6914_v33, 0.0 }
 0x395   : > { %10843 = vmatprep.mubr.msk.bf16.mxu0 %vm3135_vm0, %v14265_v30  ;;  %10971 = vmatprep.mubr.msk.bf16.mxu1 %vm3135_vm0, %v14268_v31 }
 0x396   : > { %v7171_v42 = vmax.f32 %v6659_v39, 0.0  ;;  %v7427_v63 = vmax.f32 %v6915_v61, 0.0 }
 0x397   : > { %v4513_v44 = vpop.f32.mrb[28].mxu0  ;;  %v5537_v45 = vpop.f32.mrb[28].mxu1 }
 0x398   : > { %v12387_v46 = vpack.c.bf16 %v7171_v42, %v7170_v40  ;;  %v13027_v7 = vpack.c.bf16 %v7427_v63, %v7426_v41  ;;  %v6141_v47 = vmul.f32 %v16024_v50, %v4513_v44  ;;  %v6397_v48 = vmul.f32 %v16024_v50, %v5537_v45  ;;  %v4515_v49 = vpop.f32.mrb[29].mxu0  ;;  %v5539_v18 = vpop.f32.mrb[29].mxu1  ;;  %v14275_v42 = vld [vmem:[%s14799_s30 + $0x640] ss:$8 sps:$4 sm:$0xff]  }
 0x399   : > { %v4516_v53 = vpop.f32.mrb[30].mxu0  ;;  %v5540_v55 = vpop.f32.mrb[30].mxu1  ;;  %v14278_v63 = vld [vmem:[%s14799_s30 + $0xe40] ss:$8 sps:$4 sm:$0xff]  }
 0x39a   : > { %13383 = vst [vmem:[%s15008_s10 + $0x230] sm:$0xff] %v12387_v46   ;;  %13511 = vst [vmem:[%s15008_s10 + $0x630] sm:$0xff] %v13027_v7   ;;  %v6660_v58 = vadd.f32 %v16034_v0, %v6141_v47  ;;  %v6916_v59 = vadd.f32 %v16034_v0, %v6397_v48  ;;  %v6142_v60 = vmul.f32 %v16024_v50, %v4516_v53  ;;  %v4518_v1 = vpop.f32.mrb[31].mxu0  ;;  %v5542_v2 = vpop.f32.mrb[31].mxu1  ;;  %v14283_v46 = vld [vmem:[%s14799_s30 + $0x654] ss:$8 sps:$4 sm:$0xff]  }
 0x39b   : > { %v6398_v62 = vmul.f32 %v16024_v50, %v5540_v55  ;;  %v14286_v7 = vld [vmem:[%s14799_s30 + $0xe54] ss:$8 sps:$4 sm:$0xff]  }
 0x39c   : > { %v6661_v3 = vadd.f32 %v16034_v0, %v6142_v60  ;;  %4728 = vmatmul.mubr.bf16.gmra.mrb[136].mxu0 %v14263_v51  ;;  %5752 = vmatmul.mubr.bf16.gmra.mrb[136].mxu1 %v14266_v52  ;;  %v7172_v4 = vmax.f32 %v6660_v58, 0.0  ;;  %v7428_v5 = vmax.f32 %v6916_v59, 0.0 }
 0x39d   : > { %v6917_v25 = vadd.f32 %v16034_v0, %v6398_v62  ;;  %10844 = vmatprep.mubr.msk.bf16.mxu0 %vm3135_vm0, %v14271_v56  ;;  %10972 = vmatprep.mubr.msk.bf16.mxu1 %vm3135_vm0, %v14274_v57 }
 0x39e   : > { %v7173_v6 = vmax.f32 %v6661_v3, 0.0 }
 0x39f   : > { %v7429_v36 = vmax.f32 %v6917_v25, 0.0  ;;  %v4521_v8 = vpop.f32.mrb[32].mxu0  ;;  %v5545_v9 = vpop.f32.mrb[32].mxu1 }
 0x3a0   : > { %v12392_v10 = vpack.c.bf16 %v7173_v6, %v7172_v4  ;;  %v6143_v12 = vmul.f32 %v16024_v50, %v4521_v8  ;;  %v6399_v13 = vmul.f32 %v16024_v50, %v5545_v9  ;;  %v4523_v14 = vpop.f32.mrb[33].mxu0  ;;  %v5547_v15 = vpop.f32.mrb[33].mxu1  ;;  %v14281_v6 = vld [vmem:[%s14799_s30 + $0x650] ss:$8 sps:$4 sm:$0xff]  }
 0x3a1   : > { %v13032_v11 = vpack.c.bf16 %v7429_v36, %v7428_v5  ;;  %v4524_v19 = vpop.f32.mrb[34].mxu0  ;;  %v5548_v20 = vpop.f32.mrb[34].mxu1  ;;  %v14284_v36 = vld [vmem:[%s14799_s30 + $0xe50] ss:$8 sps:$4 sm:$0xff]  }
 0x3a2   : > { %13384 = vst [vmem:[%s15008_s10 + $0x238] sm:$0xff] %v12392_v10   ;;  %v6662_v22 = vadd.f32 %v16034_v0, %v6143_v12  ;;  %v6918_v23 = vadd.f32 %v16034_v0, %v6399_v13  ;;  %v6144_v24 = vmul.f32 %v16024_v50, %v4524_v19  ;;  %v6400_v54 = vmul.f32 %v16024_v50, %v5548_v20  ;;  %v4526_v26 = vpop.f32.mrb[35].mxu0  ;;  %v5550_v27 = vpop.f32.mrb[35].mxu1  ;;  %v14289_v10 = vld [vmem:[%s14799_s30 + $0x664] ss:$8 sps:$4 sm:$0xff]  }
 0x3a3   : > { %13512 = vst [vmem:[%s15008_s10 + $0x638] sm:$0xff] %v13032_v11   ;;  %v14292_v11 = vld [vmem:[%s14799_s30 + $0xe64] ss:$8 sps:$4 sm:$0xff]  }
 0x3a4   : > { %v6663_v28 = vadd.f32 %v16034_v0, %v6144_v24  ;;  %v6919_v29 = vadd.f32 %v16034_v0, %v6400_v54  ;;  %4736 = vmatmul.mubr.bf16.gmra.mrb[140].mxu0 %v14269_v16  ;;  %5760 = vmatmul.mubr.bf16.gmra.mrb[140].mxu1 %v14272_v17  ;;  %v7174_v30 = vmax.f32 %v6662_v22, 0.0  ;;  %v7430_v31 = vmax.f32 %v6918_v23, 0.0 }
 0x3a5   : > { %10845 = vmatprep.mubr.msk.bf16.mxu0 %vm3135_vm0, %v14277_v21  ;;  %10973 = vmatprep.mubr.msk.bf16.mxu1 %vm3135_vm0, %v14280_v43 }
 0x3a6   : > { %v7175_v32 = vmax.f32 %v6663_v28, 0.0  ;;  %v7431_v33 = vmax.f32 %v6919_v29, 0.0 }
 0x3a7   : > { %v4529_v34 = vpop.f32.mrb[36].mxu0  ;;  %v5553_v35 = vpop.f32.mrb[36].mxu1 }
 0x3a8   : > { %v12397_v37 = vpack.c.bf16 %v7175_v32, %v7174_v30  ;;  %v13037_v38 = vpack.c.bf16 %v7431_v33, %v7430_v31  ;;  %v6145_v39 = vmul.f32 %v16024_v50, %v4529_v34  ;;  %v6401_v61 = vmul.f32 %v16024_v50, %v5553_v35  ;;  %v4531_v40 = vpop.f32.mrb[37].mxu0  ;;  %v5555_v41 = vpop.f32.mrb[37].mxu1  ;;  %v14287_v32 = vld [vmem:[%s14799_s30 + $0x660] ss:$8 sps:$4 sm:$0xff]  }
 0x3a9   : > { %v4532_v44 = vpop.f32.mrb[38].mxu0  ;;  %v5556_v45 = vpop.f32.mrb[38].mxu1  ;;  %v14290_v33 = vld [vmem:[%s14799_s30 + $0xe60] ss:$8 sps:$4 sm:$0xff]  }
 0x3aa   : > { %13385 = vst [vmem:[%s15008_s10 + $0x240] sm:$0xff] %v12397_v37   ;;  %13513 = vst [vmem:[%s15008_s10 + $0x640] sm:$0xff] %v13037_v38   ;;  %v6664_v47 = vadd.f32 %v16034_v0, %v6145_v39  ;;  %v6920_v48 = vadd.f32 %v16034_v0, %v6401_v61  ;;  %v6146_v49 = vmul.f32 %v16024_v50, %v4532_v44  ;;  %v4534_v51 = vpop.f32.mrb[39].mxu0  ;;  %v5558_v52 = vpop.f32.mrb[39].mxu1  ;;  %v14295_v37 = vld [vmem:[%s14799_s30 + $0x674] ss:$8 sps:$4 sm:$0xff]  }
 0x3ab   : > { %v6402_v18 = vmul.f32 %v16024_v50, %v5556_v45  ;;  %v14298_v38 = vld [vmem:[%s14799_s30 + $0xe74] ss:$8 sps:$4 sm:$0xff]  }
 0x3ac   : > { %v6665_v53 = vadd.f32 %v16034_v0, %v6146_v49  ;;  %4744 = vmatmul.mubr.bf16.gmra.mrb[144].mxu0 %v14275_v42  ;;  %5768 = vmatmul.mubr.bf16.gmra.mrb[144].mxu1 %v14278_v63  ;;  %v7176_v56 = vmax.f32 %v6664_v47, 0.0  ;;  %v7432_v57 = vmax.f32 %v6920_v48, 0.0 }
 0x3ad   : > { %v6921_v55 = vadd.f32 %v16034_v0, %v6402_v18  ;;  %10846 = vmatprep.mubr.msk.bf16.mxu0 %vm3135_vm0, %v14283_v46  ;;  %10974 = vmatprep.mubr.msk.bf16.mxu1 %vm3135_vm0, %v14286_v7 }
 0x3ae   : > { %v7177_v58 = vmax.f32 %v6665_v53, 0.0 }
 0x3af   : > { %v7433_v59 = vmax.f32 %v6921_v55, 0.0  ;;  %v4537_v60 = vpop.f32.mrb[40].mxu0  ;;  %v5561_v62 = vpop.f32.mrb[40].mxu1 }
 0x3b0   : > { %v12402_v1 = vpack.c.bf16 %v7177_v58, %v7176_v56  ;;  %v6147_v3 = vmul.f32 %v16024_v50, %v4537_v60  ;;  %v6403_v25 = vmul.f32 %v16024_v50, %v5561_v62  ;;  %v4539_v4 = vpop.f32.mrb[41].mxu0  ;;  %v5563_v5 = vpop.f32.mrb[41].mxu1  ;;  %v14293_v58 = vld [vmem:[%s14799_s30 + $0x670] ss:$8 sps:$4 sm:$0xff]  }
 0x3b1   : > { %v13042_v2 = vpack.c.bf16 %v7433_v59, %v7432_v57  ;;  %v4540_v8 = vpop.f32.mrb[42].mxu0  ;;  %v5564_v9 = vpop.f32.mrb[42].mxu1  ;;  %v14296_v59 = vld [vmem:[%s14799_s30 + $0xe70] ss:$8 sps:$4 sm:$0xff]  }
 0x3b2   : > { %13386 = vst [vmem:[%s15008_s10 + $0x248] sm:$0xff] %v12402_v1   ;;  %v6666_v12 = vadd.f32 %v16034_v0, %v6147_v3  ;;  %v6922_v13 = vadd.f32 %v16034_v0, %v6403_v25  ;;  %v6148_v14 = vmul.f32 %v16024_v50, %v4540_v8  ;;  %v6404_v15 = vmul.f32 %v16024_v50, %v5564_v9  ;;  %v4542_v16 = vpop.f32.mrb[43].mxu0  ;;  %v5566_v17 = vpop.f32.mrb[43].mxu1  ;;  %v14301_v1 = vld [vmem:[%s14799_s30 + $0x684] ss:$8 sps:$4 sm:$0xff]  }
 0x3b3   : > { %13514 = vst [vmem:[%s15008_s10 + $0x648] sm:$0xff] %v13042_v2   ;;  %v14304_v2 = vld [vmem:[%s14799_s30 + $0xe84] ss:$8 sps:$4 sm:$0xff]  }
 0x3b4   : > { %v6667_v19 = vadd.f32 %v16034_v0, %v6148_v14  ;;  %v6923_v20 = vadd.f32 %v16034_v0, %v6404_v15  ;;  %4752 = vmatmul.mubr.bf16.gmra.mrb[148].mxu0 %v14281_v6  ;;  %5776 = vmatmul.mubr.bf16.gmra.mrb[148].mxu1 %v14284_v36  ;;  %v7178_v21 = vmax.f32 %v6666_v12, 0.0  ;;  %v7434_v43 = vmax.f32 %v6922_v13, 0.0 }
 0x3b5   : > { %10847 = vmatprep.mubr.msk.bf16.mxu0 %vm3135_vm0, %v14289_v10  ;;  %10975 = vmatprep.mubr.msk.bf16.mxu1 %vm3135_vm0, %v14292_v11 }
 0x3b6   : > { %v7179_v22 = vmax.f32 %v6667_v19, 0.0  ;;  %v7435_v23 = vmax.f32 %v6923_v20, 0.0 }
 0x3b7   : > { %v4545_v24 = vpop.f32.mrb[44].mxu0  ;;  %v5569_v54 = vpop.f32.mrb[44].mxu1 }
 0x3b8   : > { %v12407_v26 = vpack.c.bf16 %v7179_v22, %v7178_v21  ;;  %v13047_v27 = vpack.c.bf16 %v7435_v23, %v7434_v43  ;;  %v6149_v28 = vmul.f32 %v16024_v50, %v4545_v24  ;;  %v6405_v29 = vmul.f32 %v16024_v50, %v5569_v54  ;;  %v4547_v30 = vpop.f32.mrb[45].mxu0  ;;  %v5571_v31 = vpop.f32.mrb[45].mxu1  ;;  %v14299_v22 = vld [vmem:[%s14799_s30 + $0x680] ss:$8 sps:$4 sm:$0xff]  }
 0x3b9   : > { %v4548_v34 = vpop.f32.mrb[46].mxu0  ;;  %v5572_v35 = vpop.f32.mrb[46].mxu1  ;;  %v14302_v23 = vld [vmem:[%s14799_s30 + $0xe80] ss:$8 sps:$4 sm:$0xff]  }
 0x3ba   : > { %13387 = vst [vmem:[%s15008_s10 + $0x250] sm:$0xff] %v12407_v26   ;;  %13515 = vst [vmem:[%s15008_s10 + $0x650] sm:$0xff] %v13047_v27   ;;  %v6668_v39 = vadd.f32 %v16034_v0, %v6149_v28  ;;  %v6924_v61 = vadd.f32 %v16034_v0, %v6405_v29  ;;  %v6150_v40 = vmul.f32 %v16024_v50, %v4548_v34  ;;  %v4550_v42 = vpop.f32.mrb[47].mxu0  ;;  %v5574_v63 = vpop.f32.mrb[47].mxu1  ;;  %v14307_v26 = vld [vmem:[%s14799_s30 + $0x694] ss:$8 sps:$4 sm:$0xff]  }
 0x3bb   : > { %v6406_v41 = vmul.f32 %v16024_v50, %v5572_v35  ;;  %v14310_v27 = vld [vmem:[%s14799_s30 + $0xe94] ss:$8 sps:$4 sm:$0xff]  }
 0x3bc   : > { %v6669_v44 = vadd.f32 %v16034_v0, %v6150_v40  ;;  %4760 = vmatmul.mubr.bf16.gmra.mrb[152].mxu0 %v14287_v32  ;;  %5784 = vmatmul.mubr.bf16.gmra.mrb[152].mxu1 %v14290_v33  ;;  %v7180_v46 = vmax.f32 %v6668_v39, 0.0  ;;  %v7436_v7 = vmax.f32 %v6924_v61, 0.0 }
 0x3bd   : > { %v6925_v45 = vadd.f32 %v16034_v0, %v6406_v41  ;;  %10848 = vmatprep.mubr.msk.bf16.mxu0 %vm3135_vm0, %v14295_v37  ;;  %10976 = vmatprep.mubr.msk.bf16.mxu1 %vm3135_vm0, %v14298_v38 }
 0x3be   : > { %v7181_v47 = vmax.f32 %v6669_v44, 0.0 }
 0x3bf   : > { %v7437_v48 = vmax.f32 %v6925_v45, 0.0  ;;  %v4553_v49 = vpop.f32.mrb[48].mxu0  ;;  %v5577_v18 = vpop.f32.mrb[48].mxu1 }
 0x3c0   : > { %v12412_v51 = vpack.c.bf16 %v7181_v47, %v7180_v46  ;;  %v6151_v53 = vmul.f32 %v16024_v50, %v4553_v49  ;;  %v6407_v55 = vmul.f32 %v16024_v50, %v5577_v18  ;;  %v4555_v56 = vpop.f32.mrb[49].mxu0  ;;  %v5579_v57 = vpop.f32.mrb[49].mxu1  ;;  %v14305_v47 = vld [vmem:[%s14799_s30 + $0x690] ss:$8 sps:$4 sm:$0xff]  }
 0x3c1   : > { %v13052_v52 = vpack.c.bf16 %v7437_v48, %v7436_v7  ;;  %v4556_v60 = vpop.f32.mrb[50].mxu0  ;;  %v5580_v62 = vpop.f32.mrb[50].mxu1  ;;  %v14308_v48 = vld [vmem:[%s14799_s30 + $0xe90] ss:$8 sps:$4 sm:$0xff]  }
 0x3c2   : > { %13388 = vst [vmem:[%s15008_s10 + $0x258] sm:$0xff] %v12412_v51   ;;  %v6670_v3 = vadd.f32 %v16034_v0, %v6151_v53  ;;  %v6926_v25 = vadd.f32 %v16034_v0, %v6407_v55  ;;  %v6152_v4 = vmul.f32 %v16024_v50, %v4556_v60  ;;  %v6408_v5 = vmul.f32 %v16024_v50, %v5580_v62  ;;  %v4558_v6 = vpop.f32.mrb[51].mxu0  ;;  %v5582_v36 = vpop.f32.mrb[51].mxu1  ;;  %v14313_v51 = vld [vmem:[%s14799_s30 + $0x6a4] ss:$8 sps:$4 sm:$0xff]  }
 0x3c3   : > { %13516 = vst [vmem:[%s15008_s10 + $0x658] sm:$0xff] %v13052_v52   ;;  %v14316_v52 = vld [vmem:[%s14799_s30 + $0xea4] ss:$8 sps:$4 sm:$0xff]  }
 0x3c4   : > { %v6671_v8 = vadd.f32 %v16034_v0, %v6152_v4  ;;  %v6927_v9 = vadd.f32 %v16034_v0, %v6408_v5  ;;  %4768 = vmatmul.mubr.bf16.gmra.mrb[156].mxu0 %v14293_v58  ;;  %5792 = vmatmul.mubr.bf16.gmra.mrb[156].mxu1 %v14296_v59  ;;  %v7182_v10 = vmax.f32 %v6670_v3, 0.0  ;;  %v7438_v11 = vmax.f32 %v6926_v25, 0.0 }
 0x3c5   : > { %10849 = vmatprep.mubr.msk.bf16.mxu0 %vm3135_vm0, %v14301_v1  ;;  %10977 = vmatprep.mubr.msk.bf16.mxu1 %vm3135_vm0, %v14304_v2 }
 0x3c6   : > { %v7183_v12 = vmax.f32 %v6671_v8, 0.0  ;;  %v7439_v13 = vmax.f32 %v6927_v9, 0.0 }
 0x3c7   : > { %v4561_v14 = vpop.f32.mrb[52].mxu0  ;;  %v5585_v15 = vpop.f32.mrb[52].mxu1 }
 0x3c8   : > { %v12417_v16 = vpack.c.bf16 %v7183_v12, %v7182_v10  ;;  %v13057_v17 = vpack.c.bf16 %v7439_v13, %v7438_v11  ;;  %v6153_v19 = vmul.f32 %v16024_v50, %v4561_v14  ;;  %v6409_v20 = vmul.f32 %v16024_v50, %v5585_v15  ;;  %v4563_v21 = vpop.f32.mrb[53].mxu0  ;;  %v5587_v43 = vpop.f32.mrb[53].mxu1  ;;  %v14311_v12 = vld [vmem:[%s14799_s30 + $0x6a0] ss:$8 sps:$4 sm:$0xff]  }
 0x3c9   : > { %v4564_v24 = vpop.f32.mrb[54].mxu0  ;;  %v5588_v54 = vpop.f32.mrb[54].mxu1  ;;  %v14314_v13 = vld [vmem:[%s14799_s30 + $0xea0] ss:$8 sps:$4 sm:$0xff]  }
 0x3ca   : > { %13389 = vst [vmem:[%s15008_s10 + $0x260] sm:$0xff] %v12417_v16   ;;  %13517 = vst [vmem:[%s15008_s10 + $0x660] sm:$0xff] %v13057_v17   ;;  %v6672_v28 = vadd.f32 %v16034_v0, %v6153_v19  ;;  %v6928_v29 = vadd.f32 %v16034_v0, %v6409_v20  ;;  %v6154_v30 = vmul.f32 %v16024_v50, %v4564_v24  ;;  %v4566_v32 = vpop.f32.mrb[55].mxu0  ;;  %v5590_v33 = vpop.f32.mrb[55].mxu1  ;;  %v14319_v16 = vld [vmem:[%s14799_s30 + $0x6b4] ss:$8 sps:$4 sm:$0xff]  }
 0x3cb   : > { %v6410_v31 = vmul.f32 %v16024_v50, %v5588_v54  ;;  %v14322_v17 = vld [vmem:[%s14799_s30 + $0xeb4] ss:$8 sps:$4 sm:$0xff]   ;;  %v16284_v32 = vld [vmem:[#allocation5] ss:$0 sm:$0xff] }
 0x3cc   : > { %v6673_v34 = vadd.f32 %v16034_v0, %v6154_v30  ;;  %4776 = vmatmul.mubr.bf16.gmra.mrb[160].mxu0 %v14299_v22  ;;  %5800 = vmatmul.mubr.bf16.gmra.mrb[160].mxu1 %v14302_v23  ;;  %v7184_v37 = vmax.f32 %v6672_v28, 0.0  ;;  %v7440_v38 = vmax.f32 %v6928_v29, 0.0 }
 0x3cd   : > { %v6929_v35 = vadd.f32 %v16034_v0, %v6410_v31  ;;  %10850 = vmatprep.mubr.msk.bf16.mxu0 %vm3135_vm0, %v14307_v26  ;;  %10978 = vmatprep.mubr.msk.bf16.mxu1 %vm3135_vm0, %v14310_v27 }
 0x3ce   : > { %v7185_v39 = vmax.f32 %v6673_v34, 0.0 }
 0x3cf   : > { %v7441_v61 = vmax.f32 %v6929_v35, 0.0  ;;  %v4569_v40 = vpop.f32.mrb[56].mxu0  ;;  %v5593_v41 = vpop.f32.mrb[56].mxu1 }
 0x3d0   : > { %v12422_v42 = vpack.c.bf16 %v7185_v39, %v7184_v37  ;;  %v6155_v44 = vmul.f32 %v16024_v50, %v4569_v40  ;;  %v6411_v45 = vmul.f32 %v16024_v50, %v5593_v41  ;;  %v4571_v46 = vpop.f32.mrb[57].mxu0  ;;  %v5595_v7 = vpop.f32.mrb[57].mxu1  ;;  %v14320_v39 = vld [vmem:[%s14799_s30 + $0xeb0] ss:$8 sps:$4 sm:$0xff]   ;;  %v14325_v41 = vld [vmem:[%s14799_s30 + $0x6c4] ss:$8 sps:$4 sm:$0xff]  }
 0x3d1   : > { %v13062_v63 = vpack.c.bf16 %v7441_v61, %v7440_v38  ;;  %v4572_v49 = vpop.f32.mrb[58].mxu0  ;;  %v5596_v18 = vpop.f32.mrb[58].mxu1  ;;  %v14317_v38 = vld [vmem:[%s14799_s30 + $0x6b0] ss:$8 sps:$4 sm:$0xff]  }
 0x3d2   : > { %13390 = vst [vmem:[%s15008_s10 + $0x268] sm:$0xff] %v12422_v42   ;;  %v6674_v53 = vadd.f32 %v16034_v0, %v6155_v44  ;;  %v6930_v55 = vadd.f32 %v16034_v0, %v6411_v45  ;;  %v6156_v56 = vmul.f32 %v16024_v50, %v4572_v49  ;;  %v6412_v57 = vmul.f32 %v16024_v50, %v5596_v18  ;;  %v4574_v58 = vpop.f32.mrb[59].mxu0  ;;  %v5598_v59 = vpop.f32.mrb[59].mxu1  ;;  %v14328_v42 = vld [vmem:[%s14799_s30 + $0xec4] ss:$8 sps:$4 sm:$0xff]  }
 0x3d3   : > { %13518 = vst [vmem:[%s15008_s10 + $0x668] sm:$0xff] %v13062_v63   ;;  %v16294_v63 = vld [vmem:[#allocation7] ss:$0 sm:$0xff] }
 0x3d4   : > { %v6675_v60 = vadd.f32 %v16034_v0, %v6156_v56  ;;  %v6931_v62 = vadd.f32 %v16034_v0, %v6412_v57  ;;  %4784 = vmatmul.mubr.bf16.gmra.mrb[164].mxu0 %v14305_v47  ;;  %5808 = vmatmul.mubr.bf16.gmra.mrb[164].mxu1 %v14308_v48  ;;  %v7186_v1 = vmax.f32 %v6674_v53, 0.0  ;;  %v7442_v2 = vmax.f32 %v6930_v55, 0.0 }
 0x3d5   : > { %10851 = vmatprep.mubr.msk.bf16.mxu0 %vm3135_vm0, %v14313_v51  ;;  %10979 = vmatprep.mubr.msk.bf16.mxu1 %vm3135_vm0, %v14316_v52 }
 0x3d6   : > { %v7187_v3 = vmax.f32 %v6675_v60, 0.0  ;;  %v7443_v25 = vmax.f32 %v6931_v62, 0.0 }
 0x3d7   : > { %v4577_v4 = vpop.f32.mrb[60].mxu0  ;;  %v5601_v5 = vpop.f32.mrb[60].mxu1 }
 0x3d8   : > { %v12427_v6 = vpack.c.bf16 %v7187_v3, %v7186_v1  ;;  %v13067_v36 = vpack.c.bf16 %v7443_v25, %v7442_v2  ;;  %v6157_v8 = vmul.f32 %v16024_v50, %v4577_v4  ;;  %v6413_v9 = vmul.f32 %v16024_v50, %v5601_v5  ;;  %v4579_v10 = vpop.f32.mrb[61].mxu0  ;;  %v5603_v11 = vpop.f32.mrb[61].mxu1  ;;  %v14323_v3 = vld [vmem:[%s14799_s30 + $0x6c0] ss:$8 sps:$4 sm:$0xff]  }
 0x3d9   : > { %v4580_v14 = vpop.f32.mrb[62].mxu0  ;;  %v5604_v15 = vpop.f32.mrb[62].mxu1  ;;  %v14326_v25 = vld [vmem:[%s14799_s30 + $0xec0] ss:$8 sps:$4 sm:$0xff]  }
 0x3da   : > { %13391 = vst [vmem:[%s15008_s10 + $0x270] sm:$0xff] %v12427_v6   ;;  %13519 = vst [vmem:[%s15008_s10 + $0x670] sm:$0xff] %v13067_v36   ;;  %v6676_v19 = vadd.f32 %v16034_v0, %v6157_v8  ;;  %v6932_v20 = vadd.f32 %v16034_v0, %v6413_v9  ;;  %v6158_v21 = vmul.f32 %v16024_v50, %v4580_v14  ;;  %v4582_v22 = vpop.f32.mrb[63].mxu0  ;;  %v5606_v23 = vpop.f32.mrb[63].mxu1  ;;  %v14331_v6 = vld [vmem:[%s14799_s30 + $0x6d4] ss:$8 sps:$4 sm:$0xff]  }
 0x3db   : > { %v6414_v43 = vmul.f32 %v16024_v50, %v5604_v15  ;;  %v14334_v36 = vld [vmem:[%s14799_s30 + $0xed4] ss:$8 sps:$4 sm:$0xff]  }
 0x3dc   : > { %v6677_v24 = vadd.f32 %v16034_v0, %v6158_v21  ;;  %4792 = vmatmul.mubr.bf16.gmra.mrb[168].mxu0 %v14311_v12  ;;  %5816 = vmatmul.mubr.bf16.gmra.mrb[168].mxu1 %v14314_v13  ;;  %v7188_v26 = vmax.f32 %v6676_v19, 0.0  ;;  %v7444_v27 = vmax.f32 %v6932_v20, 0.0 }
 0x3dd   : > { %v6933_v54 = vadd.f32 %v16034_v0, %v6414_v43  ;;  %10852 = vmatprep.mubr.msk.bf16.mxu0 %vm3135_vm0, %v14319_v16  ;;  %10980 = vmatprep.mubr.msk.bf16.mxu1 %vm3135_vm0, %v14322_v17 }
 0x3de   : > { %v7189_v28 = vmax.f32 %v6677_v24, 0.0 }
 0x3df   : > { %v7445_v50 = vmax.f32 %v6933_v54, 0.0  ;;  %v4585_v29 = vpop.f32.mrb[64].mxu0  ;;  %v5609_v30 = vpop.f32.mrb[64].mxu1 }
 0x3e0   : > { %v12432_v31 = vpack.c.bf16 %v7189_v28, %v7188_v26  ;;  %v6159_v33 = vmul.f32 %v16284_v32, %v4585_v29  ;;  %v6415_v34 = vmul.f32 %v16284_v32, %v5609_v30  ;;  %v4587_v35 = vpop.f32.mrb[65].mxu0  ;;  %v5611_v37 = vpop.f32.mrb[65].mxu1  ;;  %v14329_v28 = vld [vmem:[%s14799_s30 + $0x6d0] ss:$8 sps:$4 sm:$0xff]  }
 0x3e1   : > { %v13072_v0 = vpack.c.bf16 %v7445_v50, %v7444_v27  ;;  %v4588_v61 = vpop.f32.mrb[66].mxu0  ;;  %v5612_v40 = vpop.f32.mrb[66].mxu1  ;;  %v14332_v50 = vld [vmem:[%s14799_s30 + $0xed0] ss:$8 sps:$4 sm:$0xff]  }
 0x3e2   : > { %13392 = vst [vmem:[%s15008_s10 + $0x278] sm:$0xff] %v12432_v31   ;;  %v6678_v44 = vadd.f32 %v16294_v63, %v6159_v33  ;;  %v6934_v45 = vadd.f32 %v16294_v63, %v6415_v34  ;;  %v6160_v46 = vmul.f32 %v16284_v32, %v4588_v61  ;;  %v6416_v7 = vmul.f32 %v16284_v32, %v5612_v40  ;;  %v4590_v47 = vpop.f32.mrb[67].mxu0  ;;  %v5614_v48 = vpop.f32.mrb[67].mxu1  ;;  %v14337_v31 = vld [vmem:[%s14799_s30 + $0x6e4] ss:$8 sps:$4 sm:$0xff]  }
 0x3e3   : > { %13520 = vst [vmem:[%s15008_s10 + $0x678] sm:$0xff] %v13072_v0   ;;  %v14340_v0 = vld [vmem:[%s14799_s30 + $0xee4] ss:$8 sps:$4 sm:$0xff]  }
 0x3e4   : > { %v6679_v49 = vadd.f32 %v16294_v63, %v6160_v46  ;;  %v6935_v18 = vadd.f32 %v16294_v63, %v6416_v7  ;;  %4800 = vmatmul.mubr.bf16.gmra.mrb[172].mxu0 %v14317_v38  ;;  %5824 = vmatmul.mubr.bf16.gmra.mrb[172].mxu1 %v14320_v39  ;;  %v7190_v51 = vmax.f32 %v6678_v44, 0.0  ;;  %v7446_v52 = vmax.f32 %v6934_v45, 0.0 }
 0x3e5   : > { %10853 = vmatprep.mubr.msk.bf16.mxu0 %vm3135_vm0, %v14325_v41  ;;  %10981 = vmatprep.mubr.msk.bf16.mxu1 %vm3135_vm0, %v14328_v42 }
 0x3e6   : > { %v7191_v53 = vmax.f32 %v6679_v49, 0.0  ;;  %v7447_v55 = vmax.f32 %v6935_v18, 0.0 }
 0x3e7   : > { %v4593_v56 = vpop.f32.mrb[68].mxu0  ;;  %v5617_v57 = vpop.f32.mrb[68].mxu1 }
 0x3e8   : > { %v12437_v58 = vpack.c.bf16 %v7191_v53, %v7190_v51  ;;  %v13077_v59 = vpack.c.bf16 %v7447_v55, %v7446_v52  ;;  %v6161_v60 = vmul.f32 %v16284_v32, %v4593_v56  ;;  %v6417_v62 = vmul.f32 %v16284_v32, %v5617_v57  ;;  %v4595_v1 = vpop.f32.mrb[69].mxu0  ;;  %v5619_v2 = vpop.f32.mrb[69].mxu1  ;;  %v14335_v53 = vld [vmem:[%s14799_s30 + $0x6e0] ss:$8 sps:$4 sm:$0xff]  }
 0x3e9   : > { %v4596_v4 = vpop.f32.mrb[70].mxu0  ;;  %v5620_v5 = vpop.f32.mrb[70].mxu1  ;;  %v14338_v55 = vld [vmem:[%s14799_s30 + $0xee0] ss:$8 sps:$4 sm:$0xff]  }
 0x3ea   : > { %13393 = vst [vmem:[%s15008_s10 + $0x280] sm:$0xff] %v12437_v58   ;;  %13521 = vst [vmem:[%s15008_s10 + $0x680] sm:$0xff] %v13077_v59   ;;  %v6680_v8 = vadd.f32 %v16294_v63, %v6161_v60  ;;  %v6936_v9 = vadd.f32 %v16294_v63, %v6417_v62  ;;  %v6162_v10 = vmul.f32 %v16284_v32, %v4596_v4  ;;  %v4598_v12 = vpop.f32.mrb[71].mxu0  ;;  %v5622_v13 = vpop.f32.mrb[71].mxu1  ;;  %v14343_v58 = vld [vmem:[%s14799_s30 + $0x6f4] ss:$8 sps:$4 sm:$0xff]  }
 0x3eb   : > { %v6418_v11 = vmul.f32 %v16284_v32, %v5620_v5  ;;  %v14346_v59 = vld [vmem:[%s14799_s30 + $0xef4] ss:$8 sps:$4 sm:$0xff]  }
 0x3ec   : > { %v6681_v14 = vadd.f32 %v16294_v63, %v6162_v10  ;;  %4808 = vmatmul.mubr.bf16.gmra.mrb[176].mxu0 %v14323_v3  ;;  %5832 = vmatmul.mubr.bf16.gmra.mrb[176].mxu1 %v14326_v25  ;;  %v7192_v16 = vmax.f32 %v6680_v8, 0.0  ;;  %v7448_v17 = vmax.f32 %v6936_v9, 0.0 }
 0x3ed   : > { %v6937_v15 = vadd.f32 %v16294_v63, %v6418_v11  ;;  %10854 = vmatprep.mubr.msk.bf16.mxu0 %vm3135_vm0, %v14331_v6  ;;  %10982 = vmatprep.mubr.msk.bf16.mxu1 %vm3135_vm0, %v14334_v36 }
 0x3ee   : > { %v7193_v19 = vmax.f32 %v6681_v14, 0.0 }
 0x3ef   : > { %v7449_v20 = vmax.f32 %v6937_v15, 0.0  ;;  %v4601_v21 = vpop.f32.mrb[72].mxu0  ;;  %v5625_v43 = vpop.f32.mrb[72].mxu1 }
 0x3f0   : > { %v12442_v22 = vpack.c.bf16 %v7193_v19, %v7192_v16  ;;  %v6163_v24 = vmul.f32 %v16284_v32, %v4601_v21  ;;  %v6419_v54 = vmul.f32 %v16284_v32, %v5625_v43  ;;  %v4603_v26 = vpop.f32.mrb[73].mxu0  ;;  %v5627_v27 = vpop.f32.mrb[73].mxu1  ;;  %v14341_v19 = vld [vmem:[%s14799_s30 + $0x6f0] ss:$8 sps:$4 sm:$0xff]  }
 0x3f1   : > { %v13082_v23 = vpack.c.bf16 %v7449_v20, %v7448_v17  ;;  %v4604_v29 = vpop.f32.mrb[74].mxu0  ;;  %v5628_v30 = vpop.f32.mrb[74].mxu1  ;;  %v14344_v20 = vld [vmem:[%s14799_s30 + $0xef0] ss:$8 sps:$4 sm:$0xff]  }
 0x3f2   : > { %13394 = vst [vmem:[%s15008_s10 + $0x288] sm:$0xff] %v12442_v22   ;;  %v6682_v33 = vadd.f32 %v16294_v63, %v6163_v24  ;;  %v6938_v34 = vadd.f32 %v16294_v63, %v6419_v54  ;;  %v6164_v35 = vmul.f32 %v16284_v32, %v4604_v29  ;;  %v6420_v37 = vmul.f32 %v16284_v32, %v5628_v30  ;;  %v4606_v38 = vpop.f32.mrb[75].mxu0  ;;  %v5630_v39 = vpop.f32.mrb[75].mxu1  ;;  %v14349_v22 = vld [vmem:[%s14799_s30 + $0x704] ss:$8 sps:$4 sm:$0xff]  }
 0x3f3   : > { %13522 = vst [vmem:[%s15008_s10 + $0x688] sm:$0xff] %v13082_v23   ;;  %v14352_v23 = vld [vmem:[%s14799_s30 + $0xf04] ss:$8 sps:$4 sm:$0xff]  }
 0x3f4   : > { %v6683_v61 = vadd.f32 %v16294_v63, %v6164_v35  ;;  %v6939_v40 = vadd.f32 %v16294_v63, %v6420_v37  ;;  %4816 = vmatmul.mubr.bf16.gmra.mrb[180].mxu0 %v14329_v28  ;;  %5840 = vmatmul.mubr.bf16.gmra.mrb[180].mxu1 %v14332_v50  ;;  %v7194_v41 = vmax.f32 %v6682_v33, 0.0  ;;  %v7450_v42 = vmax.f32 %v6938_v34, 0.0 }
 0x3f5   : > { %10855 = vmatprep.mubr.msk.bf16.mxu0 %vm3135_vm0, %v14337_v31  ;;  %10983 = vmatprep.mubr.msk.bf16.mxu1 %vm3135_vm0, %v14340_v0 }
 0x3f6   : > { %v7195_v44 = vmax.f32 %v6683_v61, 0.0  ;;  %v7451_v45 = vmax.f32 %v6939_v40, 0.0 }
 0x3f7   : > { %v4609_v46 = vpop.f32.mrb[76].mxu0  ;;  %v5633_v7 = vpop.f32.mrb[76].mxu1 }
 0x3f8   : > { %v12447_v47 = vpack.c.bf16 %v7195_v44, %v7194_v41  ;;  %v13087_v48 = vpack.c.bf16 %v7451_v45, %v7450_v42  ;;  %v6165_v49 = vmul.f32 %v16284_v32, %v4609_v46  ;;  %v6421_v18 = vmul.f32 %v16284_v32, %v5633_v7  ;;  %v4611_v51 = vpop.f32.mrb[77].mxu0  ;;  %v5635_v52 = vpop.f32.mrb[77].mxu1  ;;  %v14347_v44 = vld [vmem:[%s14799_s30 + $0x700] ss:$8 sps:$4 sm:$0xff]  }
 0x3f9   : > { %v4612_v56 = vpop.f32.mrb[78].mxu0  ;;  %v5636_v57 = vpop.f32.mrb[78].mxu1  ;;  %v14350_v45 = vld [vmem:[%s14799_s30 + $0xf00] ss:$8 sps:$4 sm:$0xff]  }
 0x3fa   : > { %13395 = vst [vmem:[%s15008_s10 + $0x290] sm:$0xff] %v12447_v47   ;;  %13523 = vst [vmem:[%s15008_s10 + $0x690] sm:$0xff] %v13087_v48   ;;  %v6684_v60 = vadd.f32 %v16294_v63, %v6165_v49  ;;  %v6940_v62 = vadd.f32 %v16294_v63, %v6421_v18  ;;  %v6166_v1 = vmul.f32 %v16284_v32, %v4612_v56  ;;  %v4614_v3 = vpop.f32.mrb[79].mxu0  ;;  %v5638_v25 = vpop.f32.mrb[79].mxu1  ;;  %v14355_v47 = vld [vmem:[%s14799_s30 + $0x714] ss:$8 sps:$4 sm:$0xff]  }
 0x3fb   : > { %v6422_v2 = vmul.f32 %v16284_v32, %v5636_v57  ;;  %v14358_v48 = vld [vmem:[%s14799_s30 + $0xf14] ss:$8 sps:$4 sm:$0xff]  }
 0x3fc   : > { %v6685_v4 = vadd.f32 %v16294_v63, %v6166_v1  ;;  %4824 = vmatmul.mubr.bf16.gmra.mrb[184].mxu0 %v14335_v53  ;;  %5848 = vmatmul.mubr.bf16.gmra.mrb[184].mxu1 %v14338_v55  ;;  %v7196_v6 = vmax.f32 %v6684_v60, 0.0  ;;  %v7452_v36 = vmax.f32 %v6940_v62, 0.0 }
 0x3fd   : > { %v6941_v5 = vadd.f32 %v16294_v63, %v6422_v2  ;;  %10856 = vmatprep.mubr.msk.bf16.mxu0 %vm3135_vm0, %v14343_v58  ;;  %10984 = vmatprep.mubr.msk.bf16.mxu1 %vm3135_vm0, %v14346_v59 }
 0x3fe   : > { %v7197_v8 = vmax.f32 %v6685_v4, 0.0 }
 0x3ff   : > { %v7453_v9 = vmax.f32 %v6941_v5, 0.0  ;;  %v4617_v10 = vpop.f32.mrb[80].mxu0  ;;  %v5641_v11 = vpop.f32.mrb[80].mxu1 }
 0x400   : > { %v12452_v12 = vpack.c.bf16 %v7197_v8, %v7196_v6  ;;  %v6167_v14 = vmul.f32 %v16284_v32, %v4617_v10  ;;  %v6423_v15 = vmul.f32 %v16284_v32, %v5641_v11  ;;  %v4619_v16 = vpop.f32.mrb[81].mxu0  ;;  %v5643_v17 = vpop.f32.mrb[81].mxu1  ;;  %v14353_v8 = vld [vmem:[%s14799_s30 + $0x710] ss:$8 sps:$4 sm:$0xff]  }
 0x401   : > { %v13092_v13 = vpack.c.bf16 %v7453_v9, %v7452_v36  ;;  %v4620_v21 = vpop.f32.mrb[82].mxu0  ;;  %v5644_v43 = vpop.f32.mrb[82].mxu1  ;;  %v14356_v9 = vld [vmem:[%s14799_s30 + $0xf10] ss:$8 sps:$4 sm:$0xff]  }
 0x402   : > { %13396 = vst [vmem:[%s15008_s10 + $0x298] sm:$0xff] %v12452_v12   ;;  %v6686_v24 = vadd.f32 %v16294_v63, %v6167_v14  ;;  %v6942_v54 = vadd.f32 %v16294_v63, %v6423_v15  ;;  %v6168_v26 = vmul.f32 %v16284_v32, %v4620_v21  ;;  %v6424_v27 = vmul.f32 %v16284_v32, %v5644_v43  ;;  %v4622_v28 = vpop.f32.mrb[83].mxu0  ;;  %v5646_v50 = vpop.f32.mrb[83].mxu1  ;;  %v14361_v12 = vld [vmem:[%s14799_s30 + $0x724] ss:$8 sps:$4 sm:$0xff]  }
 0x403   : > { %13524 = vst [vmem:[%s15008_s10 + $0x698] sm:$0xff] %v13092_v13   ;;  %v14364_v13 = vld [vmem:[%s14799_s30 + $0xf24] ss:$8 sps:$4 sm:$0xff]  }
 0x404   : > { %v6687_v29 = vadd.f32 %v16294_v63, %v6168_v26  ;;  %v6943_v30 = vadd.f32 %v16294_v63, %v6424_v27  ;;  %4832 = vmatmul.mubr.bf16.gmra.mrb[188].mxu0 %v14341_v19  ;;  %5856 = vmatmul.mubr.bf16.gmra.mrb[188].mxu1 %v14344_v20  ;;  %v7198_v31 = vmax.f32 %v6686_v24, 0.0  ;;  %v7454_v0 = vmax.f32 %v6942_v54, 0.0 }
 0x405   : > { %10857 = vmatprep.mubr.msk.bf16.mxu0 %vm3135_vm0, %v14349_v22  ;;  %10985 = vmatprep.mubr.msk.bf16.mxu1 %vm3135_vm0, %v14352_v23 }
 0x406   : > { %v7199_v33 = vmax.f32 %v6687_v29, 0.0  ;;  %v7455_v34 = vmax.f32 %v6943_v30, 0.0 }
 0x407   : > { %v4625_v35 = vpop.f32.mrb[84].mxu0  ;;  %v5649_v37 = vpop.f32.mrb[84].mxu1 }
 0x408   : > { %v12457_v38 = vpack.c.bf16 %v7199_v33, %v7198_v31  ;;  %v13097_v39 = vpack.c.bf16 %v7455_v34, %v7454_v0  ;;  %v6169_v61 = vmul.f32 %v16284_v32, %v4625_v35  ;;  %v6425_v40 = vmul.f32 %v16284_v32, %v5649_v37  ;;  %v4627_v41 = vpop.f32.mrb[85].mxu0  ;;  %v5651_v42 = vpop.f32.mrb[85].mxu1  ;;  %v14359_v33 = vld [vmem:[%s14799_s30 + $0x720] ss:$8 sps:$4 sm:$0xff]  }
 0x409   : > { %v4628_v46 = vpop.f32.mrb[86].mxu0  ;;  %v5652_v7 = vpop.f32.mrb[86].mxu1  ;;  %v14362_v34 = vld [vmem:[%s14799_s30 + $0xf20] ss:$8 sps:$4 sm:$0xff]  }
 0x40a   : > { %13397 = vst [vmem:[%s15008_s10 + $0x2a0] sm:$0xff] %v12457_v38   ;;  %13525 = vst [vmem:[%s15008_s10 + $0x6a0] sm:$0xff] %v13097_v39   ;;  %v6688_v49 = vadd.f32 %v16294_v63, %v6169_v61  ;;  %v6944_v18 = vadd.f32 %v16294_v63, %v6425_v40  ;;  %v6170_v51 = vmul.f32 %v16284_v32, %v4628_v46  ;;  %v4630_v53 = vpop.f32.mrb[87].mxu0  ;;  %v5654_v55 = vpop.f32.mrb[87].mxu1  ;;  %v14367_v38 = vld [vmem:[%s14799_s30 + $0x734] ss:$8 sps:$4 sm:$0xff]  }
 0x40b   : > { %v6426_v52 = vmul.f32 %v16284_v32, %v5652_v7  ;;  %v14370_v39 = vld [vmem:[%s14799_s30 + $0xf34] ss:$8 sps:$4 sm:$0xff]  }
 0x40c   : > { %v6689_v56 = vadd.f32 %v16294_v63, %v6170_v51  ;;  %4840 = vmatmul.mubr.bf16.gmra.mrb[192].mxu0 %v14347_v44  ;;  %5864 = vmatmul.mubr.bf16.gmra.mrb[192].mxu1 %v14350_v45  ;;  %v7200_v58 = vmax.f32 %v6688_v49, 0.0  ;;  %v7456_v59 = vmax.f32 %v6944_v18, 0.0 }
 0x40d   : > { %v6945_v57 = vadd.f32 %v16294_v63, %v6426_v52  ;;  %10858 = vmatprep.mubr.msk.bf16.mxu0 %vm3135_vm0, %v14355_v47  ;;  %10986 = vmatprep.mubr.msk.bf16.mxu1 %vm3135_vm0, %v14358_v48 }
 0x40e   : > { %v7201_v60 = vmax.f32 %v6689_v56, 0.0 }
 0x40f   : > { %v7457_v62 = vmax.f32 %v6945_v57, 0.0  ;;  %v4633_v1 = vpop.f32.mrb[88].mxu0  ;;  %v5657_v2 = vpop.f32.mrb[88].mxu1 }
 0x410   : > { %v12462_v3 = vpack.c.bf16 %v7201_v60, %v7200_v58  ;;  %v6171_v4 = vmul.f32 %v16284_v32, %v4633_v1  ;;  %v6427_v5 = vmul.f32 %v16284_v32, %v5657_v2  ;;  %v4635_v6 = vpop.f32.mrb[89].mxu0  ;;  %v5659_v36 = vpop.f32.mrb[89].mxu1  ;;  %v14365_v60 = vld [vmem:[%s14799_s30 + $0x730] ss:$8 sps:$4 sm:$0xff]  }
 0x411   : > { %v13102_v25 = vpack.c.bf16 %v7457_v62, %v7456_v59  ;;  %v4636_v10 = vpop.f32.mrb[90].mxu0  ;;  %v5660_v11 = vpop.f32.mrb[90].mxu1  ;;  %v14368_v62 = vld [vmem:[%s14799_s30 + $0xf30] ss:$8 sps:$4 sm:$0xff]  }
 0x412   : > { %13398 = vst [vmem:[%s15008_s10 + $0x2a8] sm:$0xff] %v12462_v3   ;;  %v6690_v14 = vadd.f32 %v16294_v63, %v6171_v4  ;;  %v6946_v15 = vadd.f32 %v16294_v63, %v6427_v5  ;;  %v6172_v16 = vmul.f32 %v16284_v32, %v4636_v10  ;;  %v6428_v17 = vmul.f32 %v16284_v32, %v5660_v11  ;;  %v4638_v19 = vpop.f32.mrb[91].mxu0  ;;  %v5662_v20 = vpop.f32.mrb[91].mxu1  ;;  %v14373_v3 = vld [vmem:[%s14799_s30 + $0x744] ss:$8 sps:$4 sm:$0xff]  }
 0x413   : > { %13526 = vst [vmem:[%s15008_s10 + $0x6a8] sm:$0xff] %v13102_v25   ;;  %v14376_v25 = vld [vmem:[%s14799_s30 + $0xf44] ss:$8 sps:$4 sm:$0xff]  }
 0x414   : > { %v6691_v21 = vadd.f32 %v16294_v63, %v6172_v16  ;;  %v6947_v43 = vadd.f32 %v16294_v63, %v6428_v17  ;;  %4848 = vmatmul.mubr.bf16.gmra.mrb[196].mxu0 %v14353_v8  ;;  %5872 = vmatmul.mubr.bf16.gmra.mrb[196].mxu1 %v14356_v9  ;;  %v7202_v22 = vmax.f32 %v6690_v14, 0.0  ;;  %v7458_v23 = vmax.f32 %v6946_v15, 0.0 }
 0x415   : > { %10859 = vmatprep.mubr.msk.bf16.mxu0 %vm3135_vm0, %v14361_v12  ;;  %10987 = vmatprep.mubr.msk.bf16.mxu1 %vm3135_vm0, %v14364_v13 }
 0x416   : > { %v7203_v24 = vmax.f32 %v6691_v21, 0.0  ;;  %v7459_v54 = vmax.f32 %v6947_v43, 0.0 }
 0x417   : > { %v4641_v26 = vpop.f32.mrb[92].mxu0  ;;  %v5665_v27 = vpop.f32.mrb[92].mxu1 }
 0x418   : > { %v12467_v28 = vpack.c.bf16 %v7203_v24, %v7202_v22  ;;  %v13107_v50 = vpack.c.bf16 %v7459_v54, %v7458_v23  ;;  %v6173_v29 = vmul.f32 %v16284_v32, %v4641_v26  ;;  %v6429_v30 = vmul.f32 %v16284_v32, %v5665_v27  ;;  %v4643_v31 = vpop.f32.mrb[93].mxu0  ;;  %v5667_v0 = vpop.f32.mrb[93].mxu1  ;;  %v14371_v24 = vld [vmem:[%s14799_s30 + $0x740] ss:$8 sps:$4 sm:$0xff]  }
 0x419   : > { %v4644_v35 = vpop.f32.mrb[94].mxu0  ;;  %v5668_v37 = vpop.f32.mrb[94].mxu1  ;;  %v14374_v54 = vld [vmem:[%s14799_s30 + $0xf40] ss:$8 sps:$4 sm:$0xff]  }
 0x41a   : > { %13399 = vst [vmem:[%s15008_s10 + $0x2b0] sm:$0xff] %v12467_v28   ;;  %13527 = vst [vmem:[%s15008_s10 + $0x6b0] sm:$0xff] %v13107_v50   ;;  %v6692_v61 = vadd.f32 %v16294_v63, %v6173_v29  ;;  %v6948_v40 = vadd.f32 %v16294_v63, %v6429_v30  ;;  %v6174_v41 = vmul.f32 %v16284_v32, %v4644_v35  ;;  %v4646_v44 = vpop.f32.mrb[95].mxu0  ;;  %v5670_v45 = vpop.f32.mrb[95].mxu1  ;;  %v14379_v28 = vld [vmem:[%s14799_s30 + $0x754] ss:$8 sps:$4 sm:$0xff]  }
 0x41b   : > { %v6430_v42 = vmul.f32 %v16284_v32, %v5668_v37  ;;  %v14382_v50 = vld [vmem:[%s14799_s30 + $0xf54] ss:$8 sps:$4 sm:$0xff]  }
 0x41c   : > { %v6693_v46 = vadd.f32 %v16294_v63, %v6174_v41  ;;  %4856 = vmatmul.mubr.bf16.gmra.mrb[200].mxu0 %v14359_v33  ;;  %5880 = vmatmul.mubr.bf16.gmra.mrb[200].mxu1 %v14362_v34  ;;  %v7204_v47 = vmax.f32 %v6692_v61, 0.0  ;;  %v7460_v48 = vmax.f32 %v6948_v40, 0.0 }
 0x41d   : > { %v6949_v7 = vadd.f32 %v16294_v63, %v6430_v42  ;;  %10860 = vmatprep.mubr.msk.bf16.mxu0 %vm3135_vm0, %v14367_v38  ;;  %10988 = vmatprep.mubr.msk.bf16.mxu1 %vm3135_vm0, %v14370_v39 }
 0x41e   : > { %v7205_v49 = vmax.f32 %v6693_v46, 0.0 }
 0x41f   : > { %v7461_v18 = vmax.f32 %v6949_v7, 0.0  ;;  %v4649_v51 = vpop.f32.mrb[96].mxu0  ;;  %v5673_v52 = vpop.f32.mrb[96].mxu1 }
 0x420   : > { %v12472_v53 = vpack.c.bf16 %v7205_v49, %v7204_v47  ;;  %v6175_v56 = vmul.f32 %v16284_v32, %v4649_v51  ;;  %v6431_v57 = vmul.f32 %v16284_v32, %v5673_v52  ;;  %v4651_v58 = vpop.f32.mrb[97].mxu0  ;;  %v5675_v59 = vpop.f32.mrb[97].mxu1  ;;  %v14377_v49 = vld [vmem:[%s14799_s30 + $0x750] ss:$8 sps:$4 sm:$0xff]  }
 0x421   : > { %v13112_v55 = vpack.c.bf16 %v7461_v18, %v7460_v48  ;;  %v4652_v1 = vpop.f32.mrb[98].mxu0  ;;  %v5676_v2 = vpop.f32.mrb[98].mxu1  ;;  %v14380_v18 = vld [vmem:[%s14799_s30 + $0xf50] ss:$8 sps:$4 sm:$0xff]  }
 0x422   : > { %13400 = vst [vmem:[%s15008_s10 + $0x2b8] sm:$0xff] %v12472_v53   ;;  %v6694_v4 = vadd.f32 %v16294_v63, %v6175_v56  ;;  %v6950_v5 = vadd.f32 %v16294_v63, %v6431_v57  ;;  %v6176_v6 = vmul.f32 %v16284_v32, %v4652_v1  ;;  %v6432_v36 = vmul.f32 %v16284_v32, %v5676_v2  ;;  %v4654_v8 = vpop.f32.mrb[99].mxu0  ;;  %v5678_v9 = vpop.f32.mrb[99].mxu1  ;;  %v14385_v53 = vld [vmem:[%s14799_s30 + $0x764] ss:$8 sps:$4 sm:$0xff]  }
 0x423   : > { %13528 = vst [vmem:[%s15008_s10 + $0x6b8] sm:$0xff] %v13112_v55   ;;  %v14388_v55 = vld [vmem:[%s14799_s30 + $0xf64] ss:$8 sps:$4 sm:$0xff]  }
 0x424   : > { %v6695_v10 = vadd.f32 %v16294_v63, %v6176_v6  ;;  %v6951_v11 = vadd.f32 %v16294_v63, %v6432_v36  ;;  %4864 = vmatmul.mubr.bf16.gmra.mrb[204].mxu0 %v14365_v60  ;;  %5888 = vmatmul.mubr.bf16.gmra.mrb[204].mxu1 %v14368_v62  ;;  %v7206_v12 = vmax.f32 %v6694_v4, 0.0  ;;  %v7462_v13 = vmax.f32 %v6950_v5, 0.0 }
 0x425   : > { %10861 = vmatprep.mubr.msk.bf16.mxu0 %vm3135_vm0, %v14373_v3  ;;  %10989 = vmatprep.mubr.msk.bf16.mxu1 %vm3135_vm0, %v14376_v25 }
 0x426   : > { %v7207_v14 = vmax.f32 %v6695_v10, 0.0  ;;  %v7463_v15 = vmax.f32 %v6951_v11, 0.0 }
 0x427   : > { %v4657_v16 = vpop.f32.mrb[100].mxu0  ;;  %v5681_v17 = vpop.f32.mrb[100].mxu1 }
 0x428   : > { %v12477_v19 = vpack.c.bf16 %v7207_v14, %v7206_v12  ;;  %v13117_v20 = vpack.c.bf16 %v7463_v15, %v7462_v13  ;;  %v6177_v21 = vmul.f32 %v16284_v32, %v4657_v16  ;;  %v6433_v43 = vmul.f32 %v16284_v32, %v5681_v17  ;;  %v4659_v22 = vpop.f32.mrb[101].mxu0  ;;  %v5683_v23 = vpop.f32.mrb[101].mxu1  ;;  %v14383_v14 = vld [vmem:[%s14799_s30 + $0x760] ss:$8 sps:$4 sm:$0xff]  }
 0x429   : > { %v4660_v26 = vpop.f32.mrb[102].mxu0  ;;  %v5684_v27 = vpop.f32.mrb[102].mxu1  ;;  %v14386_v15 = vld [vmem:[%s14799_s30 + $0xf60] ss:$8 sps:$4 sm:$0xff]  }
 0x42a   : > { %13401 = vst [vmem:[%s15008_s10 + $0x2c0] sm:$0xff] %v12477_v19   ;;  %13529 = vst [vmem:[%s15008_s10 + $0x6c0] sm:$0xff] %v13117_v20   ;;  %v6696_v29 = vadd.f32 %v16294_v63, %v6177_v21  ;;  %v6952_v30 = vadd.f32 %v16294_v63, %v6433_v43  ;;  %v6178_v31 = vmul.f32 %v16284_v32, %v4660_v26  ;;  %v4662_v33 = vpop.f32.mrb[103].mxu0  ;;  %v5686_v34 = vpop.f32.mrb[103].mxu1  ;;  %v14391_v19 = vld [vmem:[%s14799_s30 + $0x774] ss:$8 sps:$4 sm:$0xff]  }
 0x42b   : > { %v6434_v0 = vmul.f32 %v16284_v32, %v5684_v27  ;;  %v14394_v20 = vld [vmem:[%s14799_s30 + $0xf74] ss:$8 sps:$4 sm:$0xff]  }
 0x42c   : > { %v6697_v35 = vadd.f32 %v16294_v63, %v6178_v31  ;;  %4872 = vmatmul.mubr.bf16.gmra.mrb[208].mxu0 %v14371_v24  ;;  %5896 = vmatmul.mubr.bf16.gmra.mrb[208].mxu1 %v14374_v54  ;;  %v7208_v38 = vmax.f32 %v6696_v29, 0.0  ;;  %v7464_v39 = vmax.f32 %v6952_v30, 0.0 }
 0x42d   : > { %v6953_v37 = vadd.f32 %v16294_v63, %v6434_v0  ;;  %10862 = vmatprep.mubr.msk.bf16.mxu0 %vm3135_vm0, %v14379_v28  ;;  %10990 = vmatprep.mubr.msk.bf16.mxu1 %vm3135_vm0, %v14382_v50 }
 0x42e   : > { %v7209_v61 = vmax.f32 %v6697_v35, 0.0 }
 0x42f   : > { %v7465_v40 = vmax.f32 %v6953_v37, 0.0  ;;  %v4665_v41 = vpop.f32.mrb[104].mxu0  ;;  %v5689_v42 = vpop.f32.mrb[104].mxu1 }
 0x430   : > { %v12482_v44 = vpack.c.bf16 %v7209_v61, %v7208_v38  ;;  %v6179_v46 = vmul.f32 %v16284_v32, %v4665_v41  ;;  %v6435_v7 = vmul.f32 %v16284_v32, %v5689_v42  ;;  %v4667_v47 = vpop.f32.mrb[105].mxu0  ;;  %v5691_v48 = vpop.f32.mrb[105].mxu1  ;;  %v14389_v61 = vld [vmem:[%s14799_s30 + $0x770] ss:$8 sps:$4 sm:$0xff]  }
 0x431   : > { %v13122_v45 = vpack.c.bf16 %v7465_v40, %v7464_v39  ;;  %v4668_v51 = vpop.f32.mrb[106].mxu0  ;;  %v5692_v52 = vpop.f32.mrb[106].mxu1  ;;  %v14392_v40 = vld [vmem:[%s14799_s30 + $0xf70] ss:$8 sps:$4 sm:$0xff]  }
 0x432   : > { %13402 = vst [vmem:[%s15008_s10 + $0x2c8] sm:$0xff] %v12482_v44   ;;  %v6698_v56 = vadd.f32 %v16294_v63, %v6179_v46  ;;  %v6954_v57 = vadd.f32 %v16294_v63, %v6435_v7  ;;  %v6180_v58 = vmul.f32 %v16284_v32, %v4668_v51  ;;  %v6436_v59 = vmul.f32 %v16284_v32, %v5692_v52  ;;  %v4670_v60 = vpop.f32.mrb[107].mxu0  ;;  %v5694_v62 = vpop.f32.mrb[107].mxu1  ;;  %v14397_v44 = vld [vmem:[%s14799_s30 + $0x784] ss:$8 sps:$4 sm:$0xff]  }
 0x433   : > { %13530 = vst [vmem:[%s15008_s10 + $0x6c8] sm:$0xff] %v13122_v45   ;;  %v14400_v45 = vld [vmem:[%s14799_s30 + $0xf84] ss:$8 sps:$4 sm:$0xff]  }
 0x434   : > { %v6699_v1 = vadd.f32 %v16294_v63, %v6180_v58  ;;  %v6955_v2 = vadd.f32 %v16294_v63, %v6436_v59  ;;  %4880 = vmatmul.mubr.bf16.gmra.mrb[212].mxu0 %v14377_v49  ;;  %5904 = vmatmul.mubr.bf16.gmra.mrb[212].mxu1 %v14380_v18  ;;  %v7210_v3 = vmax.f32 %v6698_v56, 0.0  ;;  %v7466_v25 = vmax.f32 %v6954_v57, 0.0 }
 0x435   : > { %10863 = vmatprep.mubr.msk.bf16.mxu0 %vm3135_vm0, %v14385_v53  ;;  %10991 = vmatprep.mubr.msk.bf16.mxu1 %vm3135_vm0, %v14388_v55 }
 0x436   : > { %v7211_v4 = vmax.f32 %v6699_v1, 0.0  ;;  %v7467_v5 = vmax.f32 %v6955_v2, 0.0 }
 0x437   : > { %v4673_v6 = vpop.f32.mrb[108].mxu0  ;;  %v5697_v36 = vpop.f32.mrb[108].mxu1 }
 0x438   : > { %v12487_v8 = vpack.c.bf16 %v7211_v4, %v7210_v3  ;;  %v13127_v9 = vpack.c.bf16 %v7467_v5, %v7466_v25  ;;  %v6181_v10 = vmul.f32 %v16284_v32, %v4673_v6  ;;  %v6437_v11 = vmul.f32 %v16284_v32, %v5697_v36  ;;  %v4675_v12 = vpop.f32.mrb[109].mxu0  ;;  %v5699_v13 = vpop.f32.mrb[109].mxu1  ;;  %v14395_v4 = vld [vmem:[%s14799_s30 + $0x780] ss:$8 sps:$4 sm:$0xff]  }
 0x439   : > { %v4676_v16 = vpop.f32.mrb[110].mxu0  ;;  %v5700_v17 = vpop.f32.mrb[110].mxu1  ;;  %v14398_v5 = vld [vmem:[%s14799_s30 + $0xf80] ss:$8 sps:$4 sm:$0xff]  }
 0x43a   : > { %13403 = vst [vmem:[%s15008_s10 + $0x2d0] sm:$0xff] %v12487_v8   ;;  %13531 = vst [vmem:[%s15008_s10 + $0x6d0] sm:$0xff] %v13127_v9   ;;  %v6700_v21 = vadd.f32 %v16294_v63, %v6181_v10  ;;  %v6956_v43 = vadd.f32 %v16294_v63, %v6437_v11  ;;  %v6182_v22 = vmul.f32 %v16284_v32, %v4676_v16  ;;  %v4678_v24 = vpop.f32.mrb[111].mxu0  ;;  %v5702_v54 = vpop.f32.mrb[111].mxu1  ;;  %v14403_v8 = vld [vmem:[%s14799_s30 + $0x794] ss:$8 sps:$4 sm:$0xff]  }
 0x43b   : > { %v6438_v23 = vmul.f32 %v16284_v32, %v5700_v17  ;;  %v14406_v9 = vld [vmem:[%s14799_s30 + $0xf94] ss:$8 sps:$4 sm:$0xff]  }
 0x43c   : > { %v6701_v26 = vadd.f32 %v16294_v63, %v6182_v22  ;;  %4888 = vmatmul.mubr.bf16.gmra.mrb[216].mxu0 %v14383_v14  ;;  %5912 = vmatmul.mubr.bf16.gmra.mrb[216].mxu1 %v14386_v15  ;;  %v7212_v28 = vmax.f32 %v6700_v21, 0.0  ;;  %v7468_v50 = vmax.f32 %v6956_v43, 0.0 }
 0x43d   : > { %v6957_v27 = vadd.f32 %v16294_v63, %v6438_v23  ;;  %10864 = vmatprep.mubr.msk.bf16.mxu0 %vm3135_vm0, %v14391_v19  ;;  %10992 = vmatprep.mubr.msk.bf16.mxu1 %vm3135_vm0, %v14394_v20 }
 0x43e   : > { %v7213_v29 = vmax.f32 %v6701_v26, 0.0 }
 0x43f   : > { %v7469_v30 = vmax.f32 %v6957_v27, 0.0  ;;  %v4681_v31 = vpop.f32.mrb[112].mxu0  ;;  %v5705_v0 = vpop.f32.mrb[112].mxu1 }
 0x440   : > { %v12492_v33 = vpack.c.bf16 %v7213_v29, %v7212_v28  ;;  %v6183_v35 = vmul.f32 %v16284_v32, %v4681_v31  ;;  %v6439_v37 = vmul.f32 %v16284_v32, %v5705_v0  ;;  %v4683_v38 = vpop.f32.mrb[113].mxu0  ;;  %v5707_v39 = vpop.f32.mrb[113].mxu1  ;;  %v14401_v29 = vld [vmem:[%s14799_s30 + $0x790] ss:$8 sps:$4 sm:$0xff]  }
 0x441   : > { %v13132_v34 = vpack.c.bf16 %v7469_v30, %v7468_v50  ;;  %v4684_v41 = vpop.f32.mrb[114].mxu0  ;;  %v5708_v42 = vpop.f32.mrb[114].mxu1  ;;  %v14404_v30 = vld [vmem:[%s14799_s30 + $0xf90] ss:$8 sps:$4 sm:$0xff]  }
 0x442   : > { %13404 = vst [vmem:[%s15008_s10 + $0x2d8] sm:$0xff] %v12492_v33   ;;  %v6702_v46 = vadd.f32 %v16294_v63, %v6183_v35  ;;  %v6958_v7 = vadd.f32 %v16294_v63, %v6439_v37  ;;  %v6184_v47 = vmul.f32 %v16284_v32, %v4684_v41  ;;  %v6440_v48 = vmul.f32 %v16284_v32, %v5708_v42  ;;  %v4686_v49 = vpop.f32.mrb[115].mxu0  ;;  %v5710_v18 = vpop.f32.mrb[115].mxu1  ;;  %v14409_v33 = vld [vmem:[%s14799_s30 + $0x7a4] ss:$8 sps:$4 sm:$0xff]  }
 0x443   : > { %13532 = vst [vmem:[%s15008_s10 + $0x6d8] sm:$0xff] %v13132_v34   ;;  %v14412_v34 = vld [vmem:[%s14799_s30 + $0xfa4] ss:$8 sps:$4 sm:$0xff]  }
 0x444   : > { %v6703_v51 = vadd.f32 %v16294_v63, %v6184_v47  ;;  %v6959_v52 = vadd.f32 %v16294_v63, %v6440_v48  ;;  %4896 = vmatmul.mubr.bf16.gmra.mrb[220].mxu0 %v14389_v61  ;;  %5920 = vmatmul.mubr.bf16.gmra.mrb[220].mxu1 %v14392_v40  ;;  %v7214_v53 = vmax.f32 %v6702_v46, 0.0  ;;  %v7470_v55 = vmax.f32 %v6958_v7, 0.0 }
 0x445   : > { %10865 = vmatprep.mubr.msk.bf16.mxu0 %vm3135_vm0, %v14397_v44  ;;  %10993 = vmatprep.mubr.msk.bf16.mxu1 %vm3135_vm0, %v14400_v45 }
 0x446   : > { %v7215_v56 = vmax.f32 %v6703_v51, 0.0  ;;  %v7471_v57 = vmax.f32 %v6959_v52, 0.0 }
 0x447   : > { %v4689_v58 = vpop.f32.mrb[116].mxu0  ;;  %v5713_v59 = vpop.f32.mrb[116].mxu1 }
 0x448   : > { %v12497_v60 = vpack.c.bf16 %v7215_v56, %v7214_v53  ;;  %v13137_v62 = vpack.c.bf16 %v7471_v57, %v7470_v55  ;;  %v6185_v1 = vmul.f32 %v16284_v32, %v4689_v58  ;;  %v6441_v2 = vmul.f32 %v16284_v32, %v5713_v59  ;;  %v4691_v3 = vpop.f32.mrb[117].mxu0  ;;  %v5715_v25 = vpop.f32.mrb[117].mxu1  ;;  %v14407_v56 = vld [vmem:[%s14799_s30 + $0x7a0] ss:$8 sps:$4 sm:$0xff]  }
 0x449   : > { %v4692_v6 = vpop.f32.mrb[118].mxu0  ;;  %v5716_v36 = vpop.f32.mrb[118].mxu1  ;;  %v14410_v57 = vld [vmem:[%s14799_s30 + $0xfa0] ss:$8 sps:$4 sm:$0xff]  }
 0x44a   : > { %13405 = vst [vmem:[%s15008_s10 + $0x2e0] sm:$0xff] %v12497_v60   ;;  %13533 = vst [vmem:[%s15008_s10 + $0x6e0] sm:$0xff] %v13137_v62   ;;  %v6704_v10 = vadd.f32 %v16294_v63, %v6185_v1  ;;  %v6960_v11 = vadd.f32 %v16294_v63, %v6441_v2  ;;  %v6186_v12 = vmul.f32 %v16284_v32, %v4692_v6  ;;  %v4694_v14 = vpop.f32.mrb[119].mxu0  ;;  %v5718_v15 = vpop.f32.mrb[119].mxu1  ;;  %v14415_v60 = vld [vmem:[%s14799_s30 + $0x7b4] ss:$8 sps:$4 sm:$0xff]  }
 0x44b   : > { %v6442_v13 = vmul.f32 %v16284_v32, %v5716_v36  ;;  %v14418_v62 = vld [vmem:[%s14799_s30 + $0xfb4] ss:$8 sps:$4 sm:$0xff]   ;;  %v16544_v14 = vld [vmem:[#allocation5] ss:$0 sm:$0xff] }
 0x44c   : > { %v6705_v16 = vadd.f32 %v16294_v63, %v6186_v12  ;;  %4904 = vmatmul.mubr.bf16.gmra.mrb[224].mxu0 %v14395_v4  ;;  %5928 = vmatmul.mubr.bf16.gmra.mrb[224].mxu1 %v14398_v5  ;;  %v7216_v19 = vmax.f32 %v6704_v10, 0.0  ;;  %v7472_v20 = vmax.f32 %v6960_v11, 0.0 }
 0x44d   : > { %v6961_v17 = vadd.f32 %v16294_v63, %v6442_v13  ;;  %10866 = vmatprep.mubr.msk.bf16.mxu0 %vm3135_vm0, %v14403_v8  ;;  %10994 = vmatprep.mubr.msk.bf16.mxu1 %vm3135_vm0, %v14406_v9 }
 0x44e   : > { %v7217_v21 = vmax.f32 %v6705_v16, 0.0 }
 0x44f   : > { %v7473_v43 = vmax.f32 %v6961_v17, 0.0  ;;  %v4697_v22 = vpop.f32.mrb[120].mxu0  ;;  %v5721_v23 = vpop.f32.mrb[120].mxu1 }
 0x450   : > { %v12502_v24 = vpack.c.bf16 %v7217_v21, %v7216_v19  ;;  %v6187_v26 = vmul.f32 %v16284_v32, %v4697_v22  ;;  %v6443_v27 = vmul.f32 %v16284_v32, %v5721_v23  ;;  %v4699_v28 = vpop.f32.mrb[121].mxu0  ;;  %v5723_v50 = vpop.f32.mrb[121].mxu1  ;;  %v14416_v21 = vld [vmem:[%s14799_s30 + $0xfb0] ss:$8 sps:$4 sm:$0xff]   ;;  %v14421_v23 = vld [vmem:[%s14799_s30 + $0x7c4] ss:$8 sps:$4 sm:$0xff]  }
 0x451   : > { %v13142_v54 = vpack.c.bf16 %v7473_v43, %v7472_v20  ;;  %v4700_v31 = vpop.f32.mrb[122].mxu0  ;;  %v5724_v0 = vpop.f32.mrb[122].mxu1  ;;  %v14413_v20 = vld [vmem:[%s14799_s30 + $0x7b0] ss:$8 sps:$4 sm:$0xff]  }
 0x452   : > { %13406 = vst [vmem:[%s15008_s10 + $0x2e8] sm:$0xff] %v12502_v24   ;;  %v6706_v35 = vadd.f32 %v16294_v63, %v6187_v26  ;;  %v6962_v37 = vadd.f32 %v16294_v63, %v6443_v27  ;;  %v6188_v38 = vmul.f32 %v16284_v32, %v4700_v31  ;;  %v6444_v39 = vmul.f32 %v16284_v32, %v5724_v0  ;;  %v4702_v61 = vpop.f32.mrb[123].mxu0  ;;  %v5726_v40 = vpop.f32.mrb[123].mxu1  ;;  %v14424_v24 = vld [vmem:[%s14799_s30 + $0xfc4] ss:$8 sps:$4 sm:$0xff]  }
 0x453   : > { %13534 = vst [vmem:[%s15008_s10 + $0x6e8] sm:$0xff] %v13142_v54   ;;  %v16554_v54 = vld [vmem:[#allocation7] ss:$0 sm:$0xff] }
 0x454   : > { %v6707_v41 = vadd.f32 %v16294_v63, %v6188_v38  ;;  %v6963_v42 = vadd.f32 %v16294_v63, %v6444_v39  ;;  %4912 = vmatmul.mubr.bf16.gmra.mrb[228].mxu0 %v14401_v29  ;;  %5936 = vmatmul.mubr.bf16.gmra.mrb[228].mxu1 %v14404_v30  ;;  %v7218_v44 = vmax.f32 %v6706_v35, 0.0  ;;  %v7474_v45 = vmax.f32 %v6962_v37, 0.0 }
 0x455   : > { %10867 = vmatprep.mubr.msk.bf16.mxu0 %vm3135_vm0, %v14409_v33  ;;  %10995 = vmatprep.mubr.msk.bf16.mxu1 %vm3135_vm0, %v14412_v34 }
 0x456   : > { %v7219_v46 = vmax.f32 %v6707_v41, 0.0  ;;  %v7475_v7 = vmax.f32 %v6963_v42, 0.0 }
 0x457   : > { %v4705_v47 = vpop.f32.mrb[124].mxu0  ;;  %v5729_v48 = vpop.f32.mrb[124].mxu1 }
 0x458   : > { %v12507_v49 = vpack.c.bf16 %v7219_v46, %v7218_v44  ;;  %v13147_v18 = vpack.c.bf16 %v7475_v7, %v7474_v45  ;;  %v6189_v51 = vmul.f32 %v16284_v32, %v4705_v47  ;;  %v6445_v52 = vmul.f32 %v16284_v32, %v5729_v48  ;;  %v4707_v53 = vpop.f32.mrb[125].mxu0  ;;  %v5731_v55 = vpop.f32.mrb[125].mxu1  ;;  %v14419_v46 = vld [vmem:[%s14799_s30 + $0x7c0] ss:$8 sps:$4 sm:$0xff]  }
 0x459   : > { %v4708_v58 = vpop.f32.mrb[126].mxu0  ;;  %v5732_v59 = vpop.f32.mrb[126].mxu1  ;;  %v14422_v7 = vld [vmem:[%s14799_s30 + $0xfc0] ss:$8 sps:$4 sm:$0xff]  }
 0x45a   : > { %13407 = vst [vmem:[%s15008_s10 + $0x2f0] sm:$0xff] %v12507_v49   ;;  %13535 = vst [vmem:[%s15008_s10 + $0x6f0] sm:$0xff] %v13147_v18   ;;  %v6708_v1 = vadd.f32 %v16294_v63, %v6189_v51  ;;  %v6964_v2 = vadd.f32 %v16294_v63, %v6445_v52  ;;  %v6190_v3 = vmul.f32 %v16284_v32, %v4708_v58  ;;  %v4710_v4 = vpop.f32.mrb[127].mxu0  ;;  %v5734_v5 = vpop.f32.mrb[127].mxu1  ;;  %v14427_v49 = vld [vmem:[%s14799_s30 + $0x7d4] ss:$8 sps:$4 sm:$0xff]  }
 0x45b   : > { %v6446_v25 = vmul.f32 %v16284_v32, %v5732_v59  ;;  %v14430_v18 = vld [vmem:[%s14799_s30 + $0xfd4] ss:$8 sps:$4 sm:$0xff]  }
 0x45c   : > { %v6709_v6 = vadd.f32 %v16294_v63, %v6190_v3  ;;  %4920 = vmatmul.mubr.bf16.gmra.mrb[232].mxu0 %v14407_v56  ;;  %5944 = vmatmul.mubr.bf16.gmra.mrb[232].mxu1 %v14410_v57  ;;  %v7220_v8 = vmax.f32 %v6708_v1, 0.0  ;;  %v7476_v9 = vmax.f32 %v6964_v2, 0.0 }
 0x45d   : > { %v6965_v36 = vadd.f32 %v16294_v63, %v6446_v25  ;;  %10868 = vmatprep.mubr.msk.bf16.mxu0 %vm3135_vm0, %v14415_v60  ;;  %10996 = vmatprep.mubr.msk.bf16.mxu1 %vm3135_vm0, %v14418_v62 }
 0x45e   : > { %v7221_v10 = vmax.f32 %v6709_v6, 0.0 }
 0x45f   : > { %v7477_v32 = vmax.f32 %v6965_v36, 0.0  ;;  %v4713_v11 = vpop.f32.mrb[128].mxu0  ;;  %v5737_v12 = vpop.f32.mrb[128].mxu1 }
 0x460   : > { %v12512_v13 = vpack.c.bf16 %v7221_v10, %v7220_v8  ;;  %v6191_v15 = vmul.f32 %v16544_v14, %v4713_v11  ;;  %v6447_v16 = vmul.f32 %v16544_v14, %v5737_v12  ;;  %v4715_v17 = vpop.f32.mrb[129].mxu0  ;;  %v5739_v19 = vpop.f32.mrb[129].mxu1  ;;  %v14425_v10 = vld [vmem:[%s14799_s30 + $0x7d0] ss:$8 sps:$4 sm:$0xff]  }
 0x461   : > { %v13152_v63 = vpack.c.bf16 %v7477_v32, %v7476_v9  ;;  %v4716_v43 = vpop.f32.mrb[130].mxu0  ;;  %v5740_v22 = vpop.f32.mrb[130].mxu1  ;;  %v14428_v32 = vld [vmem:[%s14799_s30 + $0xfd0] ss:$8 sps:$4 sm:$0xff]  }
 0x462   : > { %13408 = vst [vmem:[%s15008_s10 + $0x2f8] sm:$0xff] %v12512_v13   ;;  %v6710_v26 = vadd.f32 %v16554_v54, %v6191_v15  ;;  %v6966_v27 = vadd.f32 %v16554_v54, %v6447_v16  ;;  %v6192_v28 = vmul.f32 %v16544_v14, %v4716_v43  ;;  %v6448_v50 = vmul.f32 %v16544_v14, %v5740_v22  ;;  %v4718_v29 = vpop.f32.mrb[131].mxu0  ;;  %v5742_v30 = vpop.f32.mrb[131].mxu1  ;;  %v14433_v13 = vld [vmem:[%s14799_s30 + $0x7e4] ss:$8 sps:$4 sm:$0xff]  }
 0x463   : > { %13536 = vst [vmem:[%s15008_s10 + $0x6f8] sm:$0xff] %v13152_v63   ;;  %v14436_v63 = vld [vmem:[%s14799_s30 + $0xfe4] ss:$8 sps:$4 sm:$0xff]  }
 0x464   : > { %v6711_v31 = vadd.f32 %v16554_v54, %v6192_v28  ;;  %v6967_v0 = vadd.f32 %v16554_v54, %v6448_v50  ;;  %4928 = vmatmul.mubr.bf16.gmra.mrb[236].mxu0 %v14413_v20  ;;  %5952 = vmatmul.mubr.bf16.gmra.mrb[236].mxu1 %v14416_v21  ;;  %v7222_v33 = vmax.f32 %v6710_v26, 0.0  ;;  %v7478_v34 = vmax.f32 %v6966_v27, 0.0 }
 0x465   : > { %10869 = vmatprep.mubr.msk.bf16.mxu0 %vm3135_vm0, %v14421_v23  ;;  %10997 = vmatprep.mubr.msk.bf16.mxu1 %vm3135_vm0, %v14424_v24 }
 0x466   : > { %v7223_v35 = vmax.f32 %v6711_v31, 0.0  ;;  %v7479_v37 = vmax.f32 %v6967_v0, 0.0 }
 0x467   : > { %v4721_v38 = vpop.f32.mrb[132].mxu0  ;;  %v5745_v39 = vpop.f32.mrb[132].mxu1 }
 0x468   : > { %v12517_v61 = vpack.c.bf16 %v7223_v35, %v7222_v33  ;;  %v13157_v40 = vpack.c.bf16 %v7479_v37, %v7478_v34  ;;  %v6193_v41 = vmul.f32 %v16544_v14, %v4721_v38  ;;  %v6449_v42 = vmul.f32 %v16544_v14, %v5745_v39  ;;  %v4723_v44 = vpop.f32.mrb[133].mxu0  ;;  %v5747_v45 = vpop.f32.mrb[133].mxu1  ;;  %v14431_v35 = vld [vmem:[%s14799_s30 + $0x7e0] ss:$8 sps:$4 sm:$0xff]  }
 0x469   : > { %v4724_v47 = vpop.f32.mrb[134].mxu0  ;;  %v5748_v48 = vpop.f32.mrb[134].mxu1  ;;  %v14434_v37 = vld [vmem:[%s14799_s30 + $0xfe0] ss:$8 sps:$4 sm:$0xff]  }
 0x46a   : > { %13409 = vst [vmem:[%s15008_s10 + $0x300] sm:$0xff] %v12517_v61   ;;  %13537 = vst [vmem:[%s15008_s10 + $0x700] sm:$0xff] %v13157_v40   ;;  %v6712_v51 = vadd.f32 %v16554_v54, %v6193_v41  ;;  %v6968_v52 = vadd.f32 %v16554_v54, %v6449_v42  ;;  %v6194_v53 = vmul.f32 %v16544_v14, %v4724_v47  ;;  %v4726_v56 = vpop.f32.mrb[135].mxu0  ;;  %v5750_v57 = vpop.f32.mrb[135].mxu1  ;;  %v14439_v61 = vld [vmem:[%s14799_s30 + $0x7f4] ss:$8 sps:$4 sm:$0xff]  }
 0x46b   : > { %v6450_v55 = vmul.f32 %v16544_v14, %v5748_v48  ;;  %v14442_v40 = vld [vmem:[%s14799_s30 + $0xff4] ss:$8 sps:$4 sm:$0xff]  }
 0x46c   : > { %v6713_v58 = vadd.f32 %v16554_v54, %v6194_v53  ;;  %4936 = vmatmul.mubr.bf16.gmra.mrb[240].mxu0 %v14419_v46  ;;  %5960 = vmatmul.mubr.bf16.gmra.mrb[240].mxu1 %v14422_v7  ;;  %v7224_v60 = vmax.f32 %v6712_v51, 0.0  ;;  %v7480_v62 = vmax.f32 %v6968_v52, 0.0 }
 0x46d   : > { %v6969_v59 = vadd.f32 %v16554_v54, %v6450_v55  ;;  %10870 = vmatprep.mubr.msk.bf16.mxu0 %vm3135_vm0, %v14427_v49  ;;  %10998 = vmatprep.mubr.msk.bf16.mxu1 %vm3135_vm0, %v14430_v18 }
 0x46e   : > { %v7225_v1 = vmax.f32 %v6713_v58, 0.0 }
 0x46f   : > { %v7481_v2 = vmax.f32 %v6969_v59, 0.0  ;;  %v4729_v3 = vpop.f32.mrb[136].mxu0  ;;  %v5753_v25 = vpop.f32.mrb[136].mxu1 }
 0x470   : > { %v12522_v4 = vpack.c.bf16 %v7225_v1, %v7224_v60  ;;  %v6195_v6 = vmul.f32 %v16544_v14, %v4729_v3  ;;  %v6451_v36 = vmul.f32 %v16544_v14, %v5753_v25  ;;  %v4731_v8 = vpop.f32.mrb[137].mxu0  ;;  %v5755_v9 = vpop.f32.mrb[137].mxu1  ;;  %v14437_v1 = vld [vmem:[%s14799_s30 + $0x7f0] ss:$8 sps:$4 sm:$0xff]  }
 0x471   : > { %v13162_v5 = vpack.c.bf16 %v7481_v2, %v7480_v62  ;;  %v4732_v11 = vpop.f32.mrb[138].mxu0  ;;  %v5756_v12 = vpop.f32.mrb[138].mxu1  ;;  %v14440_v2 = vld [vmem:[%s14799_s30 + $0xff0] ss:$8 sps:$4 sm:$0xff]  }
 0x472   : > { %13410 = vst [vmem:[%s15008_s10 + $0x308] sm:$0xff] %v12522_v4   ;;  %v6714_v15 = vadd.f32 %v16554_v54, %v6195_v6  ;;  %v6970_v16 = vadd.f32 %v16554_v54, %v6451_v36  ;;  %v6196_v17 = vmul.f32 %v16544_v14, %v4732_v11  ;;  %v6452_v19 = vmul.f32 %v16544_v14, %v5756_v12  ;;  %v4734_v20 = vpop.f32.mrb[139].mxu0  ;;  %v5758_v21 = vpop.f32.mrb[139].mxu1 }
 0x473   : > { %13538 = vst [vmem:[%s15008_s10 + $0x708] sm:$0xff] %v13162_v5  }
 0x474   : > { %v6715_v43 = vadd.f32 %v16554_v54, %v6196_v17  ;;  %v6971_v22 = vadd.f32 %v16554_v54, %v6452_v19  ;;  %4944 = vmatmul.mubr.bf16.gmra.mrb[244].mxu0 %v14425_v10  ;;  %5968 = vmatmul.mubr.bf16.gmra.mrb[244].mxu1 %v14428_v32  ;;  %v7226_v23 = vmax.f32 %v6714_v15, 0.0  ;;  %v7482_v24 = vmax.f32 %v6970_v16, 0.0 }
 0x475   : > { %10871 = vmatprep.mubr.msk.bf16.mxu0 %vm3135_vm0, %v14433_v13  ;;  %10999 = vmatprep.mubr.msk.bf16.mxu1 %vm3135_vm0, %v14436_v63 }
 0x476   : > { %v7227_v26 = vmax.f32 %v6715_v43, 0.0  ;;  %v7483_v27 = vmax.f32 %v6971_v22, 0.0 }
 0x477   : > { %v4737_v28 = vpop.f32.mrb[140].mxu0  ;;  %v5761_v50 = vpop.f32.mrb[140].mxu1 }
 0x478   : > { %v12527_v29 = vpack.c.bf16 %v7227_v26, %v7226_v23  ;;  %v13167_v30 = vpack.c.bf16 %v7483_v27, %v7482_v24  ;;  %v6197_v31 = vmul.f32 %v16544_v14, %v4737_v28  ;;  %v6453_v0 = vmul.f32 %v16544_v14, %v5761_v50  ;;  %v4739_v33 = vpop.f32.mrb[141].mxu0  ;;  %v5763_v34 = vpop.f32.mrb[141].mxu1 }
 0x479   : > { %v4740_v38 = vpop.f32.mrb[142].mxu0  ;;  %v5764_v39 = vpop.f32.mrb[142].mxu1 }
 0x47a   : > { %13411 = vst [vmem:[%s15008_s10 + $0x310] sm:$0xff] %v12527_v29   ;;  %13539 = vst [vmem:[%s15008_s10 + $0x710] sm:$0xff] %v13167_v30   ;;  %v6716_v41 = vadd.f32 %v16554_v54, %v6197_v31  ;;  %v6972_v42 = vadd.f32 %v16554_v54, %v6453_v0  ;;  %v6198_v44 = vmul.f32 %v16544_v14, %v4740_v38  ;;  %v4742_v46 = vpop.f32.mrb[143].mxu0  ;;  %v5766_v7 = vpop.f32.mrb[143].mxu1 }
 0x47b   : > { %v6454_v45 = vmul.f32 %v16544_v14, %v5764_v39 }
 0x47c   : > { %v6717_v47 = vadd.f32 %v16554_v54, %v6198_v44  ;;  %4952 = vmatmul.mubr.bf16.gmra.mrb[248].mxu0 %v14431_v35  ;;  %5976 = vmatmul.mubr.bf16.gmra.mrb[248].mxu1 %v14434_v37  ;;  %v7228_v49 = vmax.f32 %v6716_v41, 0.0  ;;  %v7484_v18 = vmax.f32 %v6972_v42, 0.0 }
 0x47d   : > { %v6973_v48 = vadd.f32 %v16554_v54, %v6454_v45  ;;  %10872 = vmatprep.mubr.msk.bf16.mxu0 %vm3135_vm0, %v14439_v61  ;;  %11000 = vmatprep.mubr.msk.bf16.mxu1 %vm3135_vm0, %v14442_v40 }
 0x47e   : > { %v7229_v51 = vmax.f32 %v6717_v47, 0.0 }
 0x47f   : > { %v7485_v52 = vmax.f32 %v6973_v48, 0.0  ;;  %v4745_v53 = vpop.f32.mrb[144].mxu0  ;;  %v5769_v55 = vpop.f32.mrb[144].mxu1 }
 0x480   : > { %v12532_v56 = vpack.c.bf16 %v7229_v51, %v7228_v49  ;;  %v6199_v58 = vmul.f32 %v16544_v14, %v4745_v53  ;;  %v6455_v59 = vmul.f32 %v16544_v14, %v5769_v55  ;;  %v4747_v60 = vpop.f32.mrb[145].mxu0  ;;  %v5771_v62 = vpop.f32.mrb[145].mxu1 }
 0x481   : > { %v13172_v57 = vpack.c.bf16 %v7485_v52, %v7484_v18  ;;  %v4748_v3 = vpop.f32.mrb[146].mxu0  ;;  %v5772_v25 = vpop.f32.mrb[146].mxu1 }
 0x482   : > { %13412 = vst [vmem:[%s15008_s10 + $0x318] sm:$0xff] %v12532_v56   ;;  %v6718_v4 = vadd.f32 %v16554_v54, %v6199_v58  ;;  %v6974_v5 = vadd.f32 %v16554_v54, %v6455_v59  ;;  %v6200_v6 = vmul.f32 %v16544_v14, %v4748_v3  ;;  %v6456_v36 = vmul.f32 %v16544_v14, %v5772_v25  ;;  %v4750_v8 = vpop.f32.mrb[147].mxu0  ;;  %v5774_v9 = vpop.f32.mrb[147].mxu1 }
 0x483   : > { %13540 = vst [vmem:[%s15008_s10 + $0x718] sm:$0xff] %v13172_v57  }
 0x484   : > { %v6719_v10 = vadd.f32 %v16554_v54, %v6200_v6  ;;  %v6975_v32 = vadd.f32 %v16554_v54, %v6456_v36  ;;  %4960 = vmatmul.mubr.bf16.gmra.mrb[252].mxu0 %v14437_v1  ;;  %5984 = vmatmul.mubr.bf16.gmra.mrb[252].mxu1 %v14440_v2  ;;  %v7230_v11 = vmax.f32 %v6718_v4, 0.0  ;;  %v7486_v12 = vmax.f32 %v6974_v5, 0.0 }
 0x486   : > { %v7231_v13 = vmax.f32 %v6719_v10, 0.0  ;;  %v7487_v63 = vmax.f32 %v6975_v32, 0.0 }
 0x487   : > { %v4753_v15 = vpop.f32.mrb[148].mxu0  ;;  %v5777_v16 = vpop.f32.mrb[148].mxu1 }
 0x488   : > { %v12537_v17 = vpack.c.bf16 %v7231_v13, %v7230_v11  ;;  %v13177_v19 = vpack.c.bf16 %v7487_v63, %v7486_v12  ;;  %v6201_v20 = vmul.f32 %v16544_v14, %v4753_v15  ;;  %v6457_v21 = vmul.f32 %v16544_v14, %v5777_v16  ;;  %v4755_v43 = vpop.f32.mrb[149].mxu0  ;;  %v5779_v22 = vpop.f32.mrb[149].mxu1 }
 0x489   : > { %v4756_v23 = vpop.f32.mrb[150].mxu0  ;;  %v5780_v24 = vpop.f32.mrb[150].mxu1 }
 0x48a   : > { %13413 = vst [vmem:[%s15008_s10 + $0x320] sm:$0xff] %v12537_v17   ;;  %13541 = vst [vmem:[%s15008_s10 + $0x720] sm:$0xff] %v13177_v19   ;;  %v6720_v26 = vadd.f32 %v16554_v54, %v6201_v20  ;;  %v6976_v27 = vadd.f32 %v16554_v54, %v6457_v21  ;;  %v6202_v28 = vmul.f32 %v16544_v14, %v4756_v23  ;;  %v4758_v29 = vpop.f32.mrb[151].mxu0  ;;  %v5782_v30 = vpop.f32.mrb[151].mxu1 }
 0x48b   : > { %v6458_v50 = vmul.f32 %v16544_v14, %v5780_v24 }
 0x48c   : > { %v6721_v31 = vadd.f32 %v16554_v54, %v6202_v28  ;;  %v7232_v33 = vmax.f32 %v6720_v26, 0.0  ;;  %v7488_v34 = vmax.f32 %v6976_v27, 0.0 }
 0x48d   : > { %v6977_v0 = vadd.f32 %v16554_v54, %v6458_v50 }
 0x48e   : > { %v7233_v35 = vmax.f32 %v6721_v31, 0.0 }
 0x48f   : > { %v7489_v37 = vmax.f32 %v6977_v0, 0.0  ;;  %v4761_v38 = vpop.f32.mrb[152].mxu0  ;;  %v5785_v39 = vpop.f32.mrb[152].mxu1 }
 0x490   : > { %v12542_v61 = vpack.c.bf16 %v7233_v35, %v7232_v33  ;;  %v6203_v41 = vmul.f32 %v16544_v14, %v4761_v38  ;;  %v6459_v42 = vmul.f32 %v16544_v14, %v5785_v39  ;;  %v4763_v44 = vpop.f32.mrb[153].mxu0  ;;  %v5787_v45 = vpop.f32.mrb[153].mxu1 }
 0x491   : > { %v13182_v40 = vpack.c.bf16 %v7489_v37, %v7488_v34  ;;  %v4764_v46 = vpop.f32.mrb[154].mxu0  ;;  %v5788_v7 = vpop.f32.mrb[154].mxu1 }
 0x492   : > { %13414 = vst [vmem:[%s15008_s10 + $0x328] sm:$0xff] %v12542_v61   ;;  %v6722_v47 = vadd.f32 %v16554_v54, %v6203_v41  ;;  %v6978_v48 = vadd.f32 %v16554_v54, %v6459_v42  ;;  %v6204_v49 = vmul.f32 %v16544_v14, %v4764_v46  ;;  %v6460_v18 = vmul.f32 %v16544_v14, %v5788_v7  ;;  %v4766_v51 = vpop.f32.mrb[155].mxu0  ;;  %v5790_v52 = vpop.f32.mrb[155].mxu1 }
 0x493   : > { %13542 = vst [vmem:[%s15008_s10 + $0x728] sm:$0xff] %v13182_v40  }
 0x494   : > { %v6723_v53 = vadd.f32 %v16554_v54, %v6204_v49  ;;  %v6979_v55 = vadd.f32 %v16554_v54, %v6460_v18  ;;  %v7234_v56 = vmax.f32 %v6722_v47, 0.0  ;;  %v7490_v57 = vmax.f32 %v6978_v48, 0.0 }
 0x496   : > { %v7235_v58 = vmax.f32 %v6723_v53, 0.0  ;;  %v7491_v59 = vmax.f32 %v6979_v55, 0.0 }
 0x497   : > { %v4769_v60 = vpop.f32.mrb[156].mxu0  ;;  %v5793_v62 = vpop.f32.mrb[156].mxu1 }
 0x498   : > { %v12547_v1 = vpack.c.bf16 %v7235_v58, %v7234_v56  ;;  %v13187_v2 = vpack.c.bf16 %v7491_v59, %v7490_v57  ;;  %v6205_v3 = vmul.f32 %v16544_v14, %v4769_v60  ;;  %v6461_v25 = vmul.f32 %v16544_v14, %v5793_v62  ;;  %v4771_v4 = vpop.f32.mrb[157].mxu0  ;;  %v5795_v5 = vpop.f32.mrb[157].mxu1 }
 0x499   : > { %v4772_v6 = vpop.f32.mrb[158].mxu0  ;;  %v5796_v36 = vpop.f32.mrb[158].mxu1 }
 0x49a   : > { %13415 = vst [vmem:[%s15008_s10 + $0x330] sm:$0xff] %v12547_v1   ;;  %13543 = vst [vmem:[%s15008_s10 + $0x730] sm:$0xff] %v13187_v2   ;;  %v6724_v8 = vadd.f32 %v16554_v54, %v6205_v3  ;;  %v6980_v9 = vadd.f32 %v16554_v54, %v6461_v25  ;;  %v6206_v10 = vmul.f32 %v16544_v14, %v4772_v6  ;;  %v4774_v11 = vpop.f32.mrb[159].mxu0  ;;  %v5798_v12 = vpop.f32.mrb[159].mxu1 }
 0x49b   : > { %v6462_v32 = vmul.f32 %v16544_v14, %v5796_v36 }
 0x49c   : > { %v6725_v13 = vadd.f32 %v16554_v54, %v6206_v10  ;;  %v7236_v15 = vmax.f32 %v6724_v8, 0.0  ;;  %v7492_v16 = vmax.f32 %v6980_v9, 0.0 }
 0x49d   : > { %v6981_v63 = vadd.f32 %v16554_v54, %v6462_v32 }
 0x49e   : > { %v7237_v17 = vmax.f32 %v6725_v13, 0.0 }
 0x49f   : > { %v7493_v19 = vmax.f32 %v6981_v63, 0.0  ;;  %v4777_v20 = vpop.f32.mrb[160].mxu0  ;;  %v5801_v21 = vpop.f32.mrb[160].mxu1 }
 0x4a0   : > { %v12552_v43 = vpack.c.bf16 %v7237_v17, %v7236_v15  ;;  %v6207_v23 = vmul.f32 %v16544_v14, %v4777_v20  ;;  %v6463_v24 = vmul.f32 %v16544_v14, %v5801_v21  ;;  %v4779_v26 = vpop.f32.mrb[161].mxu0  ;;  %v5803_v27 = vpop.f32.mrb[161].mxu1 }
 0x4a1   : > { %v13192_v22 = vpack.c.bf16 %v7493_v19, %v7492_v16  ;;  %v4780_v28 = vpop.f32.mrb[162].mxu0  ;;  %v5804_v50 = vpop.f32.mrb[162].mxu1 }
 0x4a2   : > { %13416 = vst [vmem:[%s15008_s10 + $0x338] sm:$0xff] %v12552_v43   ;;  %v6726_v29 = vadd.f32 %v16554_v54, %v6207_v23  ;;  %v6982_v30 = vadd.f32 %v16554_v54, %v6463_v24  ;;  %v6208_v31 = vmul.f32 %v16544_v14, %v4780_v28  ;;  %v6464_v0 = vmul.f32 %v16544_v14, %v5804_v50  ;;  %v4782_v33 = vpop.f32.mrb[163].mxu0  ;;  %v5806_v34 = vpop.f32.mrb[163].mxu1 }
 0x4a3   : > { %13544 = vst [vmem:[%s15008_s10 + $0x738] sm:$0xff] %v13192_v22  }
 0x4a4   : > { %v6727_v35 = vadd.f32 %v16554_v54, %v6208_v31  ;;  %v6983_v37 = vadd.f32 %v16554_v54, %v6464_v0  ;;  %v7238_v38 = vmax.f32 %v6726_v29, 0.0  ;;  %v7494_v39 = vmax.f32 %v6982_v30, 0.0 }
 0x4a6   : > { %v7239_v61 = vmax.f32 %v6727_v35, 0.0  ;;  %v7495_v40 = vmax.f32 %v6983_v37, 0.0 }
 0x4a7   : > { %v4785_v41 = vpop.f32.mrb[164].mxu0  ;;  %v5809_v42 = vpop.f32.mrb[164].mxu1 }
 0x4a8   : > { %v12557_v44 = vpack.c.bf16 %v7239_v61, %v7238_v38  ;;  %v13197_v45 = vpack.c.bf16 %v7495_v40, %v7494_v39  ;;  %v6209_v46 = vmul.f32 %v16544_v14, %v4785_v41  ;;  %v6465_v7 = vmul.f32 %v16544_v14, %v5809_v42  ;;  %v4787_v47 = vpop.f32.mrb[165].mxu0  ;;  %v5811_v48 = vpop.f32.mrb[165].mxu1 }
 0x4a9   : > { %v4788_v49 = vpop.f32.mrb[166].mxu0  ;;  %v5812_v18 = vpop.f32.mrb[166].mxu1 }
 0x4aa   : > { %13417 = vst [vmem:[%s15008_s10 + $0x340] sm:$0xff] %v12557_v44   ;;  %13545 = vst [vmem:[%s15008_s10 + $0x740] sm:$0xff] %v13197_v45   ;;  %v6728_v51 = vadd.f32 %v16554_v54, %v6209_v46  ;;  %v6984_v52 = vadd.f32 %v16554_v54, %v6465_v7  ;;  %v6210_v53 = vmul.f32 %v16544_v14, %v4788_v49  ;;  %v4790_v56 = vpop.f32.mrb[167].mxu0  ;;  %v5814_v57 = vpop.f32.mrb[167].mxu1 }
 0x4ab   : > { %v6466_v55 = vmul.f32 %v16544_v14, %v5812_v18 }
 0x4ac   : > { %v6729_v58 = vadd.f32 %v16554_v54, %v6210_v53  ;;  %v7240_v60 = vmax.f32 %v6728_v51, 0.0  ;;  %v7496_v62 = vmax.f32 %v6984_v52, 0.0 }
 0x4ad   : > { %v6985_v59 = vadd.f32 %v16554_v54, %v6466_v55 }
 0x4ae   : > { %v7241_v1 = vmax.f32 %v6729_v58, 0.0 }
 0x4af   : > { %v7497_v2 = vmax.f32 %v6985_v59, 0.0  ;;  %v4793_v3 = vpop.f32.mrb[168].mxu0  ;;  %v5817_v25 = vpop.f32.mrb[168].mxu1 }
 0x4b0   : > { %v12562_v4 = vpack.c.bf16 %v7241_v1, %v7240_v60  ;;  %v6211_v6 = vmul.f32 %v16544_v14, %v4793_v3  ;;  %v6467_v36 = vmul.f32 %v16544_v14, %v5817_v25  ;;  %v4795_v8 = vpop.f32.mrb[169].mxu0  ;;  %v5819_v9 = vpop.f32.mrb[169].mxu1 }
 0x4b1   : > { %v13202_v5 = vpack.c.bf16 %v7497_v2, %v7496_v62  ;;  %v4796_v10 = vpop.f32.mrb[170].mxu0  ;;  %v5820_v32 = vpop.f32.mrb[170].mxu1 }
 0x4b2   : > { %13418 = vst [vmem:[%s15008_s10 + $0x348] sm:$0xff] %v12562_v4   ;;  %v6730_v11 = vadd.f32 %v16554_v54, %v6211_v6  ;;  %v6986_v12 = vadd.f32 %v16554_v54, %v6467_v36  ;;  %v6212_v13 = vmul.f32 %v16544_v14, %v4796_v10  ;;  %v6468_v63 = vmul.f32 %v16544_v14, %v5820_v32  ;;  %v4798_v15 = vpop.f32.mrb[171].mxu0  ;;  %v5822_v16 = vpop.f32.mrb[171].mxu1 }
 0x4b3   : > { %13546 = vst [vmem:[%s15008_s10 + $0x748] sm:$0xff] %v13202_v5  }
 0x4b4   : > { %v6731_v17 = vadd.f32 %v16554_v54, %v6212_v13  ;;  %v6987_v19 = vadd.f32 %v16554_v54, %v6468_v63  ;;  %v7242_v20 = vmax.f32 %v6730_v11, 0.0  ;;  %v7498_v21 = vmax.f32 %v6986_v12, 0.0 }
 0x4b6   : > { %v7243_v43 = vmax.f32 %v6731_v17, 0.0  ;;  %v7499_v22 = vmax.f32 %v6987_v19, 0.0 }
 0x4b7   : > { %v4801_v23 = vpop.f32.mrb[172].mxu0  ;;  %v5825_v24 = vpop.f32.mrb[172].mxu1 }
 0x4b8   : > { %v12567_v26 = vpack.c.bf16 %v7243_v43, %v7242_v20  ;;  %v13207_v27 = vpack.c.bf16 %v7499_v22, %v7498_v21  ;;  %v6213_v28 = vmul.f32 %v16544_v14, %v4801_v23  ;;  %v6469_v50 = vmul.f32 %v16544_v14, %v5825_v24  ;;  %v4803_v29 = vpop.f32.mrb[173].mxu0  ;;  %v5827_v30 = vpop.f32.mrb[173].mxu1 }
 0x4b9   : > { %v4804_v31 = vpop.f32.mrb[174].mxu0  ;;  %v5828_v0 = vpop.f32.mrb[174].mxu1 }
 0x4ba   : > { %13419 = vst [vmem:[%s15008_s10 + $0x350] sm:$0xff] %v12567_v26   ;;  %13547 = vst [vmem:[%s15008_s10 + $0x750] sm:$0xff] %v13207_v27   ;;  %v6732_v33 = vadd.f32 %v16554_v54, %v6213_v28  ;;  %v6988_v34 = vadd.f32 %v16554_v54, %v6469_v50  ;;  %v6214_v35 = vmul.f32 %v16544_v14, %v4804_v31  ;;  %v4806_v38 = vpop.f32.mrb[175].mxu0  ;;  %v5830_v39 = vpop.f32.mrb[175].mxu1 }
 0x4bb   : > { %v6470_v37 = vmul.f32 %v16544_v14, %v5828_v0 }
 0x4bc   : > { %v6733_v61 = vadd.f32 %v16554_v54, %v6214_v35  ;;  %v7244_v41 = vmax.f32 %v6732_v33, 0.0  ;;  %v7500_v42 = vmax.f32 %v6988_v34, 0.0 }
 0x4bd   : > { %v6989_v40 = vadd.f32 %v16554_v54, %v6470_v37 }
 0x4be   : > { %v7245_v44 = vmax.f32 %v6733_v61, 0.0 }
 0x4bf   : > { %v7501_v45 = vmax.f32 %v6989_v40, 0.0  ;;  %v4809_v46 = vpop.f32.mrb[176].mxu0  ;;  %v5833_v7 = vpop.f32.mrb[176].mxu1 }
 0x4c0   : > { %v12572_v47 = vpack.c.bf16 %v7245_v44, %v7244_v41  ;;  %v6215_v49 = vmul.f32 %v16544_v14, %v4809_v46  ;;  %v6471_v18 = vmul.f32 %v16544_v14, %v5833_v7  ;;  %v4811_v51 = vpop.f32.mrb[177].mxu0  ;;  %v5835_v52 = vpop.f32.mrb[177].mxu1 }
 0x4c1   : > { %v13212_v48 = vpack.c.bf16 %v7501_v45, %v7500_v42  ;;  %v4812_v53 = vpop.f32.mrb[178].mxu0  ;;  %v5836_v55 = vpop.f32.mrb[178].mxu1 }
 0x4c2   : > { %13420 = vst [vmem:[%s15008_s10 + $0x358] sm:$0xff] %v12572_v47   ;;  %v6734_v56 = vadd.f32 %v16554_v54, %v6215_v49  ;;  %v6990_v57 = vadd.f32 %v16554_v54, %v6471_v18  ;;  %v6216_v58 = vmul.f32 %v16544_v14, %v4812_v53  ;;  %v6472_v59 = vmul.f32 %v16544_v14, %v5836_v55  ;;  %v4814_v60 = vpop.f32.mrb[179].mxu0  ;;  %v5838_v62 = vpop.f32.mrb[179].mxu1 }
 0x4c3   : > { %13548 = vst [vmem:[%s15008_s10 + $0x758] sm:$0xff] %v13212_v48  }
 0x4c4   : > { %v6735_v1 = vadd.f32 %v16554_v54, %v6216_v58  ;;  %v6991_v2 = vadd.f32 %v16554_v54, %v6472_v59  ;;  %v7246_v3 = vmax.f32 %v6734_v56, 0.0  ;;  %v7502_v25 = vmax.f32 %v6990_v57, 0.0 }
 0x4c6   : > { %v7247_v4 = vmax.f32 %v6735_v1, 0.0  ;;  %v7503_v5 = vmax.f32 %v6991_v2, 0.0 }
 0x4c7   : > { %v4817_v6 = vpop.f32.mrb[180].mxu0  ;;  %v5841_v36 = vpop.f32.mrb[180].mxu1 }
 0x4c8   : > { %v12577_v8 = vpack.c.bf16 %v7247_v4, %v7246_v3  ;;  %v13217_v9 = vpack.c.bf16 %v7503_v5, %v7502_v25  ;;  %v6217_v10 = vmul.f32 %v16544_v14, %v4817_v6  ;;  %v6473_v32 = vmul.f32 %v16544_v14, %v5841_v36  ;;  %v4819_v11 = vpop.f32.mrb[181].mxu0  ;;  %v5843_v12 = vpop.f32.mrb[181].mxu1 }
 0x4c9   : > { %v4820_v13 = vpop.f32.mrb[182].mxu0  ;;  %v5844_v63 = vpop.f32.mrb[182].mxu1 }
 0x4ca   : > { %13421 = vst [vmem:[%s15008_s10 + $0x360] sm:$0xff] %v12577_v8   ;;  %13549 = vst [vmem:[%s15008_s10 + $0x760] sm:$0xff] %v13217_v9   ;;  %v6736_v15 = vadd.f32 %v16554_v54, %v6217_v10  ;;  %v6992_v16 = vadd.f32 %v16554_v54, %v6473_v32  ;;  %v6218_v17 = vmul.f32 %v16544_v14, %v4820_v13  ;;  %v4822_v20 = vpop.f32.mrb[183].mxu0  ;;  %v5846_v21 = vpop.f32.mrb[183].mxu1 }
 0x4cb   : > { %v6474_v19 = vmul.f32 %v16544_v14, %v5844_v63 }
 0x4cc   : > { %v6737_v43 = vadd.f32 %v16554_v54, %v6218_v17  ;;  %v7248_v23 = vmax.f32 %v6736_v15, 0.0  ;;  %v7504_v24 = vmax.f32 %v6992_v16, 0.0 }
 0x4cd   : > { %v6993_v22 = vadd.f32 %v16554_v54, %v6474_v19 }
 0x4ce   : > { %v7249_v26 = vmax.f32 %v6737_v43, 0.0 }
 0x4cf   : > { %v7505_v27 = vmax.f32 %v6993_v22, 0.0  ;;  %v4825_v28 = vpop.f32.mrb[184].mxu0  ;;  %v5849_v50 = vpop.f32.mrb[184].mxu1 }
 0x4d0   : > { %v12582_v29 = vpack.c.bf16 %v7249_v26, %v7248_v23  ;;  %v6219_v31 = vmul.f32 %v16544_v14, %v4825_v28  ;;  %v6475_v0 = vmul.f32 %v16544_v14, %v5849_v50  ;;  %v4827_v33 = vpop.f32.mrb[185].mxu0  ;;  %v5851_v34 = vpop.f32.mrb[185].mxu1 }
 0x4d1   : > { %v13222_v30 = vpack.c.bf16 %v7505_v27, %v7504_v24  ;;  %v4828_v35 = vpop.f32.mrb[186].mxu0  ;;  %v5852_v37 = vpop.f32.mrb[186].mxu1 }
 0x4d2   : > { %13422 = vst [vmem:[%s15008_s10 + $0x368] sm:$0xff] %v12582_v29   ;;  %v6738_v38 = vadd.f32 %v16554_v54, %v6219_v31  ;;  %v6994_v39 = vadd.f32 %v16554_v54, %v6475_v0  ;;  %v6220_v61 = vmul.f32 %v16544_v14, %v4828_v35  ;;  %v6476_v40 = vmul.f32 %v16544_v14, %v5852_v37  ;;  %v4830_v41 = vpop.f32.mrb[187].mxu0  ;;  %v5854_v42 = vpop.f32.mrb[187].mxu1 }
 0x4d3   : > { %13550 = vst [vmem:[%s15008_s10 + $0x768] sm:$0xff] %v13222_v30  }
 0x4d4   : > { %v6739_v44 = vadd.f32 %v16554_v54, %v6220_v61  ;;  %v6995_v45 = vadd.f32 %v16554_v54, %v6476_v40  ;;  %v7250_v46 = vmax.f32 %v6738_v38, 0.0  ;;  %v7506_v7 = vmax.f32 %v6994_v39, 0.0 }
 0x4d6   : > { %v7251_v47 = vmax.f32 %v6739_v44, 0.0  ;;  %v7507_v48 = vmax.f32 %v6995_v45, 0.0 }
 0x4d7   : > { %v4833_v49 = vpop.f32.mrb[188].mxu0  ;;  %v5857_v18 = vpop.f32.mrb[188].mxu1 }
 0x4d8   : > { %v12587_v51 = vpack.c.bf16 %v7251_v47, %v7250_v46  ;;  %v13227_v52 = vpack.c.bf16 %v7507_v48, %v7506_v7  ;;  %v6221_v53 = vmul.f32 %v16544_v14, %v4833_v49  ;;  %v6477_v55 = vmul.f32 %v16544_v14, %v5857_v18  ;;  %v4835_v56 = vpop.f32.mrb[189].mxu0  ;;  %v5859_v57 = vpop.f32.mrb[189].mxu1 }
 0x4d9   : > { %v4836_v58 = vpop.f32.mrb[190].mxu0  ;;  %v5860_v59 = vpop.f32.mrb[190].mxu1 }
 0x4da   : > { %13423 = vst [vmem:[%s15008_s10 + $0x370] sm:$0xff] %v12587_v51   ;;  %13551 = vst [vmem:[%s15008_s10 + $0x770] sm:$0xff] %v13227_v52   ;;  %v6740_v60 = vadd.f32 %v16554_v54, %v6221_v53  ;;  %v6996_v62 = vadd.f32 %v16554_v54, %v6477_v55  ;;  %v6222_v1 = vmul.f32 %v16544_v14, %v4836_v58  ;;  %v4838_v3 = vpop.f32.mrb[191].mxu0  ;;  %v5862_v25 = vpop.f32.mrb[191].mxu1 }
 0x4db   : > { %v6478_v2 = vmul.f32 %v16544_v14, %v5860_v59 }
 0x4dc   : > { %v6741_v4 = vadd.f32 %v16554_v54, %v6222_v1  ;;  %v7252_v6 = vmax.f32 %v6740_v60, 0.0  ;;  %v7508_v36 = vmax.f32 %v6996_v62, 0.0 }
 0x4dd   : > { %v6997_v5 = vadd.f32 %v16554_v54, %v6478_v2 }
 0x4de   : > { %v7253_v8 = vmax.f32 %v6741_v4, 0.0 }
 0x4df   : > { %v7509_v9 = vmax.f32 %v6997_v5, 0.0  ;;  %v4841_v10 = vpop.f32.mrb[192].mxu0  ;;  %v5865_v32 = vpop.f32.mrb[192].mxu1 }
 0x4e0   : > { %v12592_v11 = vpack.c.bf16 %v7253_v8, %v7252_v6  ;;  %v6223_v13 = vmul.f32 %v16544_v14, %v4841_v10  ;;  %v6479_v63 = vmul.f32 %v16544_v14, %v5865_v32  ;;  %v4843_v15 = vpop.f32.mrb[193].mxu0  ;;  %v5867_v16 = vpop.f32.mrb[193].mxu1 }
 0x4e1   : > { %v13232_v12 = vpack.c.bf16 %v7509_v9, %v7508_v36  ;;  %v4844_v17 = vpop.f32.mrb[194].mxu0  ;;  %v5868_v19 = vpop.f32.mrb[194].mxu1 }
 0x4e2   : > { %13424 = vst [vmem:[%s15008_s10 + $0x378] sm:$0xff] %v12592_v11   ;;  %v6742_v20 = vadd.f32 %v16554_v54, %v6223_v13  ;;  %v6998_v21 = vadd.f32 %v16554_v54, %v6479_v63  ;;  %v6224_v43 = vmul.f32 %v16544_v14, %v4844_v17  ;;  %v6480_v22 = vmul.f32 %v16544_v14, %v5868_v19  ;;  %v4846_v23 = vpop.f32.mrb[195].mxu0  ;;  %v5870_v24 = vpop.f32.mrb[195].mxu1 }
 0x4e3   : > { %13552 = vst [vmem:[%s15008_s10 + $0x778] sm:$0xff] %v13232_v12  }
 0x4e4   : > { %v6743_v26 = vadd.f32 %v16554_v54, %v6224_v43  ;;  %v6999_v27 = vadd.f32 %v16554_v54, %v6480_v22  ;;  %v7254_v28 = vmax.f32 %v6742_v20, 0.0  ;;  %v7510_v50 = vmax.f32 %v6998_v21, 0.0 }
 0x4e6   : > { %v7255_v29 = vmax.f32 %v6743_v26, 0.0  ;;  %v7511_v30 = vmax.f32 %v6999_v27, 0.0 }
 0x4e7   : > { %v4849_v31 = vpop.f32.mrb[196].mxu0  ;;  %v5873_v0 = vpop.f32.mrb[196].mxu1 }
 0x4e8   : > { %v12597_v33 = vpack.c.bf16 %v7255_v29, %v7254_v28  ;;  %v13237_v34 = vpack.c.bf16 %v7511_v30, %v7510_v50  ;;  %v6225_v35 = vmul.f32 %v16544_v14, %v4849_v31  ;;  %v6481_v37 = vmul.f32 %v16544_v14, %v5873_v0  ;;  %v4851_v38 = vpop.f32.mrb[197].mxu0  ;;  %v5875_v39 = vpop.f32.mrb[197].mxu1 }
 0x4e9   : > { %v4852_v61 = vpop.f32.mrb[198].mxu0  ;;  %v5876_v40 = vpop.f32.mrb[198].mxu1 }
 0x4ea   : > { %13425 = vst [vmem:[%s15008_s10 + $0x380] sm:$0xff] %v12597_v33   ;;  %13553 = vst [vmem:[%s15008_s10 + $0x780] sm:$0xff] %v13237_v34   ;;  %v6744_v41 = vadd.f32 %v16554_v54, %v6225_v35  ;;  %v7000_v42 = vadd.f32 %v16554_v54, %v6481_v37  ;;  %v6226_v44 = vmul.f32 %v16544_v14, %v4852_v61  ;;  %v4854_v46 = vpop.f32.mrb[199].mxu0  ;;  %v5878_v7 = vpop.f32.mrb[199].mxu1  ;;  %v16774_v61 = vld [vmem:[#allocation5] ss:$0 sm:$0xff] }
 0x4eb   : > { %v6482_v45 = vmul.f32 %v16544_v14, %v5876_v40 }
 0x4ec   : > { %v6745_v47 = vadd.f32 %v16554_v54, %v6226_v44  ;;  %v7256_v49 = vmax.f32 %v6744_v41, 0.0  ;;  %v7512_v18 = vmax.f32 %v7000_v42, 0.0 }
 0x4ed   : > { %v7001_v48 = vadd.f32 %v16554_v54, %v6482_v45  ;;  %v16780_v45 = vld [vmem:[#allocation7] ss:$0 sm:$0xff] }
 0x4ee   : > { %v7257_v51 = vmax.f32 %v6745_v47, 0.0 }
 0x4ef   : > { %v7513_v52 = vmax.f32 %v7001_v48, 0.0  ;;  %v4857_v53 = vpop.f32.mrb[200].mxu0  ;;  %v5881_v55 = vpop.f32.mrb[200].mxu1 }
 0x4f0   : > { %v12602_v56 = vpack.c.bf16 %v7257_v51, %v7256_v49  ;;  %v6227_v58 = vmul.f32 %v16544_v14, %v4857_v53  ;;  %v6483_v59 = vmul.f32 %v16544_v14, %v5881_v55  ;;  %v4859_v60 = vpop.f32.mrb[201].mxu0  ;;  %v5883_v62 = vpop.f32.mrb[201].mxu1 }
 0x4f1   : > { %v13242_v57 = vpack.c.bf16 %v7513_v52, %v7512_v18  ;;  %v4860_v1 = vpop.f32.mrb[202].mxu0  ;;  %v5884_v2 = vpop.f32.mrb[202].mxu1 }
 0x4f2   : > { %13426 = vst [vmem:[%s15008_s10 + $0x388] sm:$0xff] %v12602_v56   ;;  %v6746_v3 = vadd.f32 %v16554_v54, %v6227_v58  ;;  %v7002_v25 = vadd.f32 %v16554_v54, %v6483_v59  ;;  %v6228_v4 = vmul.f32 %v16544_v14, %v4860_v1  ;;  %v6484_v5 = vmul.f32 %v16544_v14, %v5884_v2  ;;  %v4862_v6 = vpop.f32.mrb[203].mxu0  ;;  %v5886_v36 = vpop.f32.mrb[203].mxu1 }
 0x4f3   : > { %13554 = vst [vmem:[%s15008_s10 + $0x788] sm:$0xff] %v13242_v57  }
 0x4f4   : > { %v6747_v8 = vadd.f32 %v16554_v54, %v6228_v4  ;;  %v7003_v9 = vadd.f32 %v16554_v54, %v6484_v5  ;;  %v7258_v10 = vmax.f32 %v6746_v3, 0.0  ;;  %v7514_v32 = vmax.f32 %v7002_v25, 0.0 }
 0x4f6   : > { %v7259_v11 = vmax.f32 %v6747_v8, 0.0  ;;  %v7515_v12 = vmax.f32 %v7003_v9, 0.0 }
 0x4f7   : > { %v4865_v13 = vpop.f32.mrb[204].mxu0  ;;  %v5889_v63 = vpop.f32.mrb[204].mxu1 }
 0x4f8   : > { %v12607_v15 = vpack.c.bf16 %v7259_v11, %v7258_v10  ;;  %v13247_v16 = vpack.c.bf16 %v7515_v12, %v7514_v32  ;;  %v6229_v17 = vmul.f32 %v16544_v14, %v4865_v13  ;;  %v6485_v19 = vmul.f32 %v16544_v14, %v5889_v63  ;;  %v4867_v20 = vpop.f32.mrb[205].mxu0  ;;  %v5891_v21 = vpop.f32.mrb[205].mxu1 }
 0x4f9   : > { %v4868_v43 = vpop.f32.mrb[206].mxu0  ;;  %v5892_v22 = vpop.f32.mrb[206].mxu1 }
 0x4fa   : > { %13427 = vst [vmem:[%s15008_s10 + $0x390] sm:$0xff] %v12607_v15   ;;  %13555 = vst [vmem:[%s15008_s10 + $0x790] sm:$0xff] %v13247_v16   ;;  %v6748_v23 = vadd.f32 %v16554_v54, %v6229_v17  ;;  %v7004_v24 = vadd.f32 %v16554_v54, %v6485_v19  ;;  %v6230_v26 = vmul.f32 %v16544_v14, %v4868_v43  ;;  %v4870_v28 = vpop.f32.mrb[207].mxu0  ;;  %v5894_v50 = vpop.f32.mrb[207].mxu1 }
 0x4fb   : > { %v6486_v27 = vmul.f32 %v16544_v14, %v5892_v22 }
 0x4fc   : > { %v6749_v29 = vadd.f32 %v16554_v54, %v6230_v26  ;;  %v7260_v31 = vmax.f32 %v6748_v23, 0.0  ;;  %v7516_v0 = vmax.f32 %v7004_v24, 0.0 }
 0x4fd   : > { %v7005_v30 = vadd.f32 %v16554_v54, %v6486_v27 }
 0x4fe   : > { %v7261_v33 = vmax.f32 %v6749_v29, 0.0 }
 0x4ff   : > { %v7517_v34 = vmax.f32 %v7005_v30, 0.0  ;;  %v4873_v35 = vpop.f32.mrb[208].mxu0  ;;  %v5897_v37 = vpop.f32.mrb[208].mxu1 }
 0x500   : > { %v12612_v38 = vpack.c.bf16 %v7261_v33, %v7260_v31  ;;  %v6231_v14 = vmul.f32 %v16774_v61, %v4873_v35  ;;  %v6487_v40 = vmul.f32 %v16774_v61, %v5897_v37  ;;  %v4875_v41 = vpop.f32.mrb[209].mxu0  ;;  %v5899_v42 = vpop.f32.mrb[209].mxu1 }
 0x501   : > { %v13252_v39 = vpack.c.bf16 %v7517_v34, %v7516_v0  ;;  %v4876_v44 = vpop.f32.mrb[210].mxu0  ;;  %v5900_v54 = vpop.f32.mrb[210].mxu1 }
 0x502   : > { %13428 = vst [vmem:[%s15008_s10 + $0x398] sm:$0xff] %v12612_v38   ;;  %v6750_v46 = vadd.f32 %v16780_v45, %v6231_v14  ;;  %v7006_v7 = vadd.f32 %v16780_v45, %v6487_v40  ;;  %v6232_v47 = vmul.f32 %v16774_v61, %v4876_v44  ;;  %v6488_v48 = vmul.f32 %v16774_v61, %v5900_v54  ;;  %v4878_v49 = vpop.f32.mrb[211].mxu0  ;;  %v5902_v18 = vpop.f32.mrb[211].mxu1 }
 0x503   : > { %13556 = vst [vmem:[%s15008_s10 + $0x798] sm:$0xff] %v13252_v39  }
 0x504   : > { %v6751_v51 = vadd.f32 %v16780_v45, %v6232_v47  ;;  %v7007_v52 = vadd.f32 %v16780_v45, %v6488_v48  ;;  %v7262_v53 = vmax.f32 %v6750_v46, 0.0  ;;  %v7518_v55 = vmax.f32 %v7006_v7, 0.0 }
 0x506   : > { %v7263_v56 = vmax.f32 %v6751_v51, 0.0  ;;  %v7519_v57 = vmax.f32 %v7007_v52, 0.0 }
 0x507   : > { %v4881_v58 = vpop.f32.mrb[212].mxu0  ;;  %v5905_v59 = vpop.f32.mrb[212].mxu1 }
 0x508   : > { %v12617_v60 = vpack.c.bf16 %v7263_v56, %v7262_v53  ;;  %v13257_v62 = vpack.c.bf16 %v7519_v57, %v7518_v55  ;;  %v6233_v1 = vmul.f32 %v16774_v61, %v4881_v58  ;;  %v6489_v2 = vmul.f32 %v16774_v61, %v5905_v59  ;;  %v4883_v3 = vpop.f32.mrb[213].mxu0  ;;  %v5907_v25 = vpop.f32.mrb[213].mxu1 }
 0x509   : > { %v4884_v4 = vpop.f32.mrb[214].mxu0  ;;  %v5908_v5 = vpop.f32.mrb[214].mxu1 }
 0x50a   : > { %13429 = vst [vmem:[%s15008_s10 + $0x3a0] sm:$0xff] %v12617_v60   ;;  %13557 = vst [vmem:[%s15008_s10 + $0x7a0] sm:$0xff] %v13257_v62   ;;  %v6752_v6 = vadd.f32 %v16780_v45, %v6233_v1  ;;  %v7008_v36 = vadd.f32 %v16780_v45, %v6489_v2  ;;  %v6234_v8 = vmul.f32 %v16774_v61, %v4884_v4  ;;  %v4886_v10 = vpop.f32.mrb[215].mxu0  ;;  %v5910_v32 = vpop.f32.mrb[215].mxu1 }
 0x50b   : > { %v6490_v9 = vmul.f32 %v16774_v61, %v5908_v5 }
 0x50c   : > { %v6753_v11 = vadd.f32 %v16780_v45, %v6234_v8  ;;  %v7264_v13 = vmax.f32 %v6752_v6, 0.0  ;;  %v7520_v63 = vmax.f32 %v7008_v36, 0.0 }
 0x50d   : > { %v7009_v12 = vadd.f32 %v16780_v45, %v6490_v9 }
 0x50e   : > { %v7265_v15 = vmax.f32 %v6753_v11, 0.0 }
 0x50f   : > { %v7521_v16 = vmax.f32 %v7009_v12, 0.0  ;;  %v4889_v17 = vpop.f32.mrb[216].mxu0  ;;  %v5913_v19 = vpop.f32.mrb[216].mxu1 }
 0x510   : > { %v12622_v20 = vpack.c.bf16 %v7265_v15, %v7264_v13  ;;  %v6235_v43 = vmul.f32 %v16774_v61, %v4889_v17  ;;  %v6491_v22 = vmul.f32 %v16774_v61, %v5913_v19  ;;  %v4891_v23 = vpop.f32.mrb[217].mxu0  ;;  %v5915_v24 = vpop.f32.mrb[217].mxu1 }
 0x511   : > { %v13262_v21 = vpack.c.bf16 %v7521_v16, %v7520_v63  ;;  %v4892_v26 = vpop.f32.mrb[218].mxu0  ;;  %v5916_v27 = vpop.f32.mrb[218].mxu1 }
 0x512   : > { %13430 = vst [vmem:[%s15008_s10 + $0x3a8] sm:$0xff] %v12622_v20   ;;  %v6754_v28 = vadd.f32 %v16780_v45, %v6235_v43  ;;  %v7010_v50 = vadd.f32 %v16780_v45, %v6491_v22  ;;  %v6236_v29 = vmul.f32 %v16774_v61, %v4892_v26  ;;  %v6492_v30 = vmul.f32 %v16774_v61, %v5916_v27  ;;  %v4894_v31 = vpop.f32.mrb[219].mxu0  ;;  %v5918_v0 = vpop.f32.mrb[219].mxu1 }
 0x513   : > { %13558 = vst [vmem:[%s15008_s10 + $0x7a8] sm:$0xff] %v13262_v21  }
 0x514   : > { %v6755_v33 = vadd.f32 %v16780_v45, %v6236_v29  ;;  %v7011_v34 = vadd.f32 %v16780_v45, %v6492_v30  ;;  %v7266_v35 = vmax.f32 %v6754_v28, 0.0  ;;  %v7522_v37 = vmax.f32 %v7010_v50, 0.0 }
 0x516   : > { %v7267_v38 = vmax.f32 %v6755_v33, 0.0  ;;  %v7523_v39 = vmax.f32 %v7011_v34, 0.0 }
 0x517   : > { %v4897_v14 = vpop.f32.mrb[220].mxu0  ;;  %v5921_v40 = vpop.f32.mrb[220].mxu1 }
 0x518   : > { %v12627_v41 = vpack.c.bf16 %v7267_v38, %v7266_v35  ;;  %v13267_v42 = vpack.c.bf16 %v7523_v39, %v7522_v37  ;;  %v6237_v44 = vmul.f32 %v16774_v61, %v4897_v14  ;;  %v6493_v54 = vmul.f32 %v16774_v61, %v5921_v40  ;;  %v4899_v46 = vpop.f32.mrb[221].mxu0  ;;  %v5923_v7 = vpop.f32.mrb[221].mxu1 }
 0x519   : > { %v4900_v47 = vpop.f32.mrb[222].mxu0  ;;  %v5924_v48 = vpop.f32.mrb[222].mxu1 }
 0x51a   : > { %13431 = vst [vmem:[%s15008_s10 + $0x3b0] sm:$0xff] %v12627_v41   ;;  %13559 = vst [vmem:[%s15008_s10 + $0x7b0] sm:$0xff] %v13267_v42   ;;  %v6756_v49 = vadd.f32 %v16780_v45, %v6237_v44  ;;  %v7012_v18 = vadd.f32 %v16780_v45, %v6493_v54  ;;  %v6238_v51 = vmul.f32 %v16774_v61, %v4900_v47  ;;  %v4902_v53 = vpop.f32.mrb[223].mxu0  ;;  %v5926_v55 = vpop.f32.mrb[223].mxu1 }
 0x51b   : > { %v6494_v52 = vmul.f32 %v16774_v61, %v5924_v48 }
 0x51c   : > { %v6757_v56 = vadd.f32 %v16780_v45, %v6238_v51  ;;  %v7268_v58 = vmax.f32 %v6756_v49, 0.0  ;;  %v7524_v59 = vmax.f32 %v7012_v18, 0.0 }
 0x51d   : > { %v7013_v57 = vadd.f32 %v16780_v45, %v6494_v52 }
 0x51e   : > { %v7269_v60 = vmax.f32 %v6757_v56, 0.0 }
 0x51f   : > { %v7525_v62 = vmax.f32 %v7013_v57, 0.0  ;;  %v4905_v1 = vpop.f32.mrb[224].mxu0  ;;  %v5929_v2 = vpop.f32.mrb[224].mxu1 }
 0x520   : > { %v12632_v3 = vpack.c.bf16 %v7269_v60, %v7268_v58  ;;  %v6239_v4 = vmul.f32 %v16774_v61, %v4905_v1  ;;  %v6495_v5 = vmul.f32 %v16774_v61, %v5929_v2  ;;  %v4907_v6 = vpop.f32.mrb[225].mxu0  ;;  %v5931_v36 = vpop.f32.mrb[225].mxu1 }
 0x521   : > { %v13272_v25 = vpack.c.bf16 %v7525_v62, %v7524_v59  ;;  %v4908_v8 = vpop.f32.mrb[226].mxu0  ;;  %v5932_v9 = vpop.f32.mrb[226].mxu1 }
 0x522   : > { %13432 = vst [vmem:[%s15008_s10 + $0x3b8] sm:$0xff] %v12632_v3   ;;  %v6758_v10 = vadd.f32 %v16780_v45, %v6239_v4  ;;  %v7014_v32 = vadd.f32 %v16780_v45, %v6495_v5  ;;  %v6240_v11 = vmul.f32 %v16774_v61, %v4908_v8  ;;  %v6496_v12 = vmul.f32 %v16774_v61, %v5932_v9  ;;  %v4910_v13 = vpop.f32.mrb[227].mxu0  ;;  %v5934_v63 = vpop.f32.mrb[227].mxu1 }
 0x523   : > { %13560 = vst [vmem:[%s15008_s10 + $0x7b8] sm:$0xff] %v13272_v25  }
 0x524   : > { %v6759_v15 = vadd.f32 %v16780_v45, %v6240_v11  ;;  %v7015_v16 = vadd.f32 %v16780_v45, %v6496_v12  ;;  %v7270_v17 = vmax.f32 %v6758_v10, 0.0  ;;  %v7526_v19 = vmax.f32 %v7014_v32, 0.0 }
 0x526   : > { %v7271_v20 = vmax.f32 %v6759_v15, 0.0  ;;  %v7527_v21 = vmax.f32 %v7015_v16, 0.0 }
 0x527   : > { %v4913_v43 = vpop.f32.mrb[228].mxu0  ;;  %v5937_v22 = vpop.f32.mrb[228].mxu1 }
 0x528   : > { %v12637_v23 = vpack.c.bf16 %v7271_v20, %v7270_v17  ;;  %v13277_v24 = vpack.c.bf16 %v7527_v21, %v7526_v19  ;;  %v6241_v26 = vmul.f32 %v16774_v61, %v4913_v43  ;;  %v6497_v27 = vmul.f32 %v16774_v61, %v5937_v22  ;;  %v4915_v28 = vpop.f32.mrb[229].mxu0  ;;  %v5939_v50 = vpop.f32.mrb[229].mxu1 }
 0x529   : > { %v4916_v29 = vpop.f32.mrb[230].mxu0  ;;  %v5940_v30 = vpop.f32.mrb[230].mxu1 }
 0x52a   : > { %13433 = vst [vmem:[%s15008_s10 + $0x3c0] sm:$0xff] %v12637_v23   ;;  %13561 = vst [vmem:[%s15008_s10 + $0x7c0] sm:$0xff] %v13277_v24   ;;  %v6760_v31 = vadd.f32 %v16780_v45, %v6241_v26  ;;  %v7016_v0 = vadd.f32 %v16780_v45, %v6497_v27  ;;  %v6242_v33 = vmul.f32 %v16774_v61, %v4916_v29  ;;  %v4918_v35 = vpop.f32.mrb[231].mxu0  ;;  %v5942_v37 = vpop.f32.mrb[231].mxu1 }
 0x52b   : > { %v6498_v34 = vmul.f32 %v16774_v61, %v5940_v30 }
 0x52c   : > { %v6761_v38 = vadd.f32 %v16780_v45, %v6242_v33  ;;  %v7272_v14 = vmax.f32 %v6760_v31, 0.0  ;;  %v7528_v40 = vmax.f32 %v7016_v0, 0.0 }
 0x52d   : > { %v7017_v39 = vadd.f32 %v16780_v45, %v6498_v34 }
 0x52e   : > { %v7273_v41 = vmax.f32 %v6761_v38, 0.0 }
 0x52f   : > { %v7529_v42 = vmax.f32 %v7017_v39, 0.0  ;;  %v4921_v44 = vpop.f32.mrb[232].mxu0  ;;  %v5945_v54 = vpop.f32.mrb[232].mxu1 }
 0x530   : > { %v12642_v46 = vpack.c.bf16 %v7273_v41, %v7272_v14  ;;  %v6243_v47 = vmul.f32 %v16774_v61, %v4921_v44  ;;  %v6499_v48 = vmul.f32 %v16774_v61, %v5945_v54  ;;  %v4923_v49 = vpop.f32.mrb[233].mxu0  ;;  %v5947_v18 = vpop.f32.mrb[233].mxu1 }
 0x531   : > { %v13282_v7 = vpack.c.bf16 %v7529_v42, %v7528_v40  ;;  %v4924_v51 = vpop.f32.mrb[234].mxu0  ;;  %v5948_v52 = vpop.f32.mrb[234].mxu1 }
 0x532   : > { %13434 = vst [vmem:[%s15008_s10 + $0x3c8] sm:$0xff] %v12642_v46   ;;  %v6762_v53 = vadd.f32 %v16780_v45, %v6243_v47  ;;  %v7018_v55 = vadd.f32 %v16780_v45, %v6499_v48  ;;  %v6244_v56 = vmul.f32 %v16774_v61, %v4924_v51  ;;  %v6500_v57 = vmul.f32 %v16774_v61, %v5948_v52  ;;  %v4926_v58 = vpop.f32.mrb[235].mxu0  ;;  %v5950_v59 = vpop.f32.mrb[235].mxu1 }
 0x533   : > { %13562 = vst [vmem:[%s15008_s10 + $0x7c8] sm:$0xff] %v13282_v7  }
 0x534   : > { %v6763_v60 = vadd.f32 %v16780_v45, %v6244_v56  ;;  %v7019_v62 = vadd.f32 %v16780_v45, %v6500_v57  ;;  %v7274_v1 = vmax.f32 %v6762_v53, 0.0  ;;  %v7530_v2 = vmax.f32 %v7018_v55, 0.0 }
 0x536   : > { %v7275_v3 = vmax.f32 %v6763_v60, 0.0  ;;  %v7531_v25 = vmax.f32 %v7019_v62, 0.0 }
 0x537   : > { %v4929_v4 = vpop.f32.mrb[236].mxu0  ;;  %v5953_v5 = vpop.f32.mrb[236].mxu1 }
 0x538   : > { %v12647_v6 = vpack.c.bf16 %v7275_v3, %v7274_v1  ;;  %v13287_v36 = vpack.c.bf16 %v7531_v25, %v7530_v2  ;;  %v6245_v8 = vmul.f32 %v16774_v61, %v4929_v4  ;;  %v6501_v9 = vmul.f32 %v16774_v61, %v5953_v5  ;;  %v4931_v10 = vpop.f32.mrb[237].mxu0  ;;  %v5955_v32 = vpop.f32.mrb[237].mxu1 }
 0x539   : > { %v4932_v11 = vpop.f32.mrb[238].mxu0  ;;  %v5956_v12 = vpop.f32.mrb[238].mxu1 }
 0x53a   : > { %13435 = vst [vmem:[%s15008_s10 + $0x3d0] sm:$0xff] %v12647_v6   ;;  %13563 = vst [vmem:[%s15008_s10 + $0x7d0] sm:$0xff] %v13287_v36   ;;  %v6764_v13 = vadd.f32 %v16780_v45, %v6245_v8  ;;  %v7020_v63 = vadd.f32 %v16780_v45, %v6501_v9  ;;  %v6246_v15 = vmul.f32 %v16774_v61, %v4932_v11  ;;  %v4934_v17 = vpop.f32.mrb[239].mxu0  ;;  %v5958_v19 = vpop.f32.mrb[239].mxu1 }
 0x53b   : > { %v6502_v16 = vmul.f32 %v16774_v61, %v5956_v12 }
 0x53c   : > { %v6765_v20 = vadd.f32 %v16780_v45, %v6246_v15  ;;  %v7276_v43 = vmax.f32 %v6764_v13, 0.0  ;;  %v7532_v22 = vmax.f32 %v7020_v63, 0.0 }
 0x53d   : > { %v7021_v21 = vadd.f32 %v16780_v45, %v6502_v16 }
 0x53e   : > { %v7277_v23 = vmax.f32 %v6765_v20, 0.0 }
 0x53f   : > { %v7533_v24 = vmax.f32 %v7021_v21, 0.0  ;;  %v4937_v26 = vpop.f32.mrb[240].mxu0  ;;  %v5961_v27 = vpop.f32.mrb[240].mxu1 }
 0x540   : > { %v12652_v28 = vpack.c.bf16 %v7277_v23, %v7276_v43  ;;  %v6247_v29 = vmul.f32 %v16774_v61, %v4937_v26  ;;  %v6503_v30 = vmul.f32 %v16774_v61, %v5961_v27  ;;  %v4939_v31 = vpop.f32.mrb[241].mxu0  ;;  %v5963_v0 = vpop.f32.mrb[241].mxu1 }
 0x541   : > { %v13292_v50 = vpack.c.bf16 %v7533_v24, %v7532_v22  ;;  %v4940_v33 = vpop.f32.mrb[242].mxu0  ;;  %v5964_v34 = vpop.f32.mrb[242].mxu1 }
 0x542   : > { %13436 = vst [vmem:[%s15008_s10 + $0x3d8] sm:$0xff] %v12652_v28   ;;  %v6766_v35 = vadd.f32 %v16780_v45, %v6247_v29  ;;  %v7022_v37 = vadd.f32 %v16780_v45, %v6503_v30  ;;  %v6248_v38 = vmul.f32 %v16774_v61, %v4940_v33  ;;  %v6504_v39 = vmul.f32 %v16774_v61, %v5964_v34  ;;  %v4942_v14 = vpop.f32.mrb[243].mxu0  ;;  %v5966_v40 = vpop.f32.mrb[243].mxu1 }
 0x543   : > { %13564 = vst [vmem:[%s15008_s10 + $0x7d8] sm:$0xff] %v13292_v50  }
 0x544   : > { %v6767_v41 = vadd.f32 %v16780_v45, %v6248_v38  ;;  %v7023_v42 = vadd.f32 %v16780_v45, %v6504_v39  ;;  %v7278_v44 = vmax.f32 %v6766_v35, 0.0  ;;  %v7534_v54 = vmax.f32 %v7022_v37, 0.0 }
 0x546   : > { %v7279_v46 = vmax.f32 %v6767_v41, 0.0  ;;  %v7535_v7 = vmax.f32 %v7023_v42, 0.0 }
 0x547   : > { %v4945_v47 = vpop.f32.mrb[244].mxu0  ;;  %v5969_v48 = vpop.f32.mrb[244].mxu1 }
 0x548   : > { %v12657_v49 = vpack.c.bf16 %v7279_v46, %v7278_v44  ;;  %v13297_v18 = vpack.c.bf16 %v7535_v7, %v7534_v54  ;;  %v6249_v51 = vmul.f32 %v16774_v61, %v4945_v47  ;;  %v6505_v52 = vmul.f32 %v16774_v61, %v5969_v48  ;;  %v4947_v53 = vpop.f32.mrb[245].mxu0  ;;  %v5971_v55 = vpop.f32.mrb[245].mxu1 }
 0x549   : > { %v4948_v56 = vpop.f32.mrb[246].mxu0  ;;  %v5972_v57 = vpop.f32.mrb[246].mxu1 }
 0x54a   : > { %13437 = vst [vmem:[%s15008_s10 + $0x3e0] sm:$0xff] %v12657_v49   ;;  %13565 = vst [vmem:[%s15008_s10 + $0x7e0] sm:$0xff] %v13297_v18   ;;  %v6768_v58 = vadd.f32 %v16780_v45, %v6249_v51  ;;  %v7024_v59 = vadd.f32 %v16780_v45, %v6505_v52  ;;  %v6250_v60 = vmul.f32 %v16774_v61, %v4948_v56  ;;  %v4950_v1 = vpop.f32.mrb[247].mxu0  ;;  %v5974_v2 = vpop.f32.mrb[247].mxu1 }
 0x54b   : > { %v6506_v62 = vmul.f32 %v16774_v61, %v5972_v57 }
 0x54c   : > { %v6769_v3 = vadd.f32 %v16780_v45, %v6250_v60  ;;  %v7280_v4 = vmax.f32 %v6768_v58, 0.0  ;;  %v7536_v5 = vmax.f32 %v7024_v59, 0.0 }
 0x54d   : > { %v7025_v25 = vadd.f32 %v16780_v45, %v6506_v62 }
 0x54e   : > { %v7281_v6 = vmax.f32 %v6769_v3, 0.0 }
 0x54f   : > { %v7537_v36 = vmax.f32 %v7025_v25, 0.0  ;;  %v4953_v8 = vpop.f32.mrb[248].mxu0  ;;  %v5977_v9 = vpop.f32.mrb[248].mxu1 }
 0x550   : > { %v12662_v10 = vpack.c.bf16 %v7281_v6, %v7280_v4  ;;  %v6251_v11 = vmul.f32 %v16774_v61, %v4953_v8  ;;  %v6507_v12 = vmul.f32 %v16774_v61, %v5977_v9  ;;  %v4955_v13 = vpop.f32.mrb[249].mxu0  ;;  %v5979_v63 = vpop.f32.mrb[249].mxu1 }
 0x551   : > { %v13302_v32 = vpack.c.bf16 %v7537_v36, %v7536_v5  ;;  %v4956_v15 = vpop.f32.mrb[250].mxu0  ;;  %v5980_v16 = vpop.f32.mrb[250].mxu1 }
 0x552   : > { %13438 = vst [vmem:[%s15008_s10 + $0x3e8] sm:$0xff] %v12662_v10   ;;  %v6770_v17 = vadd.f32 %v16780_v45, %v6251_v11  ;;  %v7026_v19 = vadd.f32 %v16780_v45, %v6507_v12  ;;  %v6252_v20 = vmul.f32 %v16774_v61, %v4956_v15  ;;  %v6508_v21 = vmul.f32 %v16774_v61, %v5980_v16  ;;  %v4958_v43 = vpop.f32.mrb[251].mxu0  ;;  %v5982_v22 = vpop.f32.mrb[251].mxu1 }
 0x553   : > { %13566 = vst [vmem:[%s15008_s10 + $0x7e8] sm:$0xff] %v13302_v32  }
 0x554   : > { %v6771_v23 = vadd.f32 %v16780_v45, %v6252_v20  ;;  %v7027_v24 = vadd.f32 %v16780_v45, %v6508_v21  ;;  %v7282_v26 = vmax.f32 %v6770_v17, 0.0  ;;  %v7538_v27 = vmax.f32 %v7026_v19, 0.0 }
 0x556   : > { %v7283_v28 = vmax.f32 %v6771_v23, 0.0  ;;  %v7539_v50 = vmax.f32 %v7027_v24, 0.0 }
 0x557   : > { %v4961_v29 = vpop.f32.mrb[252].mxu0  ;;  %v5985_v30 = vpop.f32.mrb[252].mxu1 }
 0x558   : > { %v12667_v31 = vpack.c.bf16 %v7283_v28, %v7282_v26  ;;  %v13307_v0 = vpack.c.bf16 %v7539_v50, %v7538_v27  ;;  %v6253_v33 = vmul.f32 %v16774_v61, %v4961_v29  ;;  %v6509_v34 = vmul.f32 %v16774_v61, %v5985_v30  ;;  %v4963_v35 = vpop.f32.mrb[253].mxu0  ;;  %v5987_v37 = vpop.f32.mrb[253].mxu1 }
 0x559   : > { %v4964_v38 = vpop.f32.mrb[254].mxu0  ;;  %v5988_v39 = vpop.f32.mrb[254].mxu1 }
 0x55a   : > { %13439 = vst [vmem:[%s15008_s10 + $0x3f0] sm:$0xff] %v12667_v31   ;;  %13567 = vst [vmem:[%s15008_s10 + $0x7f0] sm:$0xff] %v13307_v0   ;;  %v6772_v14 = vadd.f32 %v16780_v45, %v6253_v33  ;;  %v7028_v40 = vadd.f32 %v16780_v45, %v6509_v34  ;;  %v6254_v41 = vmul.f32 %v16774_v61, %v4964_v38  ;;  %v4966_v44 = vpop.f32.mrb[255].mxu0  ;;  %v5990_v54 = vpop.f32.mrb[255].mxu1 }
 0x55b   : > { %v6510_v42 = vmul.f32 %v16774_v61, %v5988_v39 }
 0x55c   : > { %v6773_v46 = vadd.f32 %v16780_v45, %v6254_v41  ;;  %v7284_v47 = vmax.f32 %v6772_v14, 0.0  ;;  %v7540_v48 = vmax.f32 %v7028_v40, 0.0 }
 0x55d   : > { %v7029_v7 = vadd.f32 %v16780_v45, %v6510_v42 }
 0x55e   : > { %v7285_v49 = vmax.f32 %v6773_v46, 0.0 }
 0x55f   : > { %v7541_v18 = vmax.f32 %v7029_v7, 0.0 }
 0x560   : > { %v12672_v61 = vpack.c.bf16 %v7285_v49, %v7284_v47 }
 0x561   : > { %v13312_v51 = vpack.c.bf16 %v7541_v18, %v7540_v48 }
 0x562   : > { %13440 = vst [vmem:[%s15008_s10 + $0x3f8] sm:$0xff] %v12672_v61  }
 0x563   : > { %13568 = vst [vmem:[%s15008_s10 + $0x7f8] sm:$0xff] %v13312_v51  }
 0x564   : > { %14554 = shalt.err (!%p14551_p11)
}
 0x565   : > { %s14555_s27 = scalar_lea.hbm %s16903_s22, 32768  ;;  %s14559_s14 = scalar_lea.hbm %s16956_s4, 262144 }
 0x566   : > { %p14556_p13 = scmp.ne.s32.totalorder %s16903_s22, %s14555_s27  ;;  %p14560_p6 = scmp.lt.u32.totalorder %s16903_s22, %s16956_s4 }
 0x567   : > { %p14561_p5 = scmp.lt.u32.totalorder %s14559_s14, %s14555_s27  ;;  %p14563_p9 = scmp.lt.u32.totalorder %s14555_s27, %s16903_s22 }
 0x568   : > { %p14557_p1 = pnand %p14556_p13, %p16970_p10 }
 0x569   : > { %p14562_p12 = por %p14561_p5, %p14560_p6 }
 0x56a   : > { %p14558_p0 = pneg %p14557_p1 }
 0x56b   : > { %p14564_p2 = por %p14563_p9, %p14562_p12 }
 0x56d   : > { %p14565_p3 = pnand %p14564_p2, %p14558_p0 }
 0x56f   : > { %14568 = shalt.err (!%p14565_p3)
}
 0x570   : > { %s14621_s9 = smov 64   ;;  %s14622_s10 = smov 4  }
 0x571   : > { %13601 = dma.vmem_to_hbm [thread:$0]  (%p16970_p10), %s16905_s12, 32768, %s16903_s22, %s16911_s19, %s14621_s9, %s14621_s9, %s14622_s10  }
 0x572 PF: > { %p13623_p4 = scmp.ge.s32.totalorder %s14611_s18, 2  ;;  %s10131_s11 = sand.u32 1, %s14599_s15  }
 0x573   : > { %p16971_p7 = scmp.ne.s32.totalorder %s16961_s26, 0  ;;  %s10132_s13 = scalar_lea.sflag [#allocation4], %s10131_s11 }
 0x575   : > { %p13614_p8 = pnand %p13623_p4, %p16971_p7 }
 0x577   : > { %14594 = dma.done.wait (!%p13614_p8), %s10132_s13, 32768  }
 0x578   : > { %14596 = vsyncadd (!%p13614_p8), %s10132_s13, 4294934528  ;;  %p16_p11 = scmp.ge.s32.totalorder %s14673_s21, 10   ;;  %s16972_s15 = smov %s14603_s16 }
 0x579   : > { %s16973_s16 = smov %s14607_s17  ;;  %s16974_s17 = smov %s14684_s24 }
 0x57a   : > { %s16975_s18 = smov %s14673_s21  ;;  %18 = sbr.rel (!%p16_p11) target bundleno = 5 (0x5), region = 84 }
 0x581   :  { %10137 = vsyncpa [#allocation3], 1 }
 0x582   :  { %10139 = vsyncpa [#allocation3 + $0x1], 1 }
 0x583   :  { %10140 = vsyncpa [#allocation6], 1 }
 0x584   :  { %10141 = vsyncpa [#allocation4], 1 }
 0x585   :  { %10143 = vsyncpa [#allocation4 + $0x1], 1 }

</bundles_post_ra>
